<compile_context>
chip_gen: v7x
topology: tpu7x:2x2x1
jax: 0.10.0
libtpu: 0.0.40
codegen_flags: <defaults>
</compile_context>

<pallas_src>
import jax
import jax.numpy as jnp
from jax.experimental import pallas as pl
from jax.experimental.pallas import tpu as pltpu

# ----------------------------- model dims ----------------------------------
IMG_FEAT_DIM = 1664   # densenet169.features.norm5.num_features
TXT_FEAT_DIM = 128    # prajjwal1/bert-tiny hidden_size
FC_DIM = 512
NUM_CLASSES = 4
CONV_CH = 64          # stub conv output channels
KSIZE = 3             # stub conv kernel size
KPAD = 128            # im2col feature dim padded to a full lane width
VOCAB = 100

_COMPILER_PARAMS = pltpu.CompilerParams(
    dimension_semantics=("arbitrary",),
    vmem_limit_bytes=48 << 20,   # < 64 MiB physical VMEM on v7x
)


# ---------------------------------------------------------------------------
# Fused kernel: image backbone stub + cross-attention(+mean) + FC heads +
#               concat + classifier, whole batch in one block (grid=(1,)).
# ---------------------------------------------------------------------------
def _censity_kernel(patches_ref, txt_ref, pimg_ref, ptxt_ref,
                    wc_ref, bc_ref, wp_ref, bp_ref,
                    wv_ref, bv_ref,
                    wi_ref, bi_ref, wt_ref, bt_ref,
                    wcls_ref, bcls_ref, o_ref):
    bf16 = jnp.bfloat16

    def mm(a, b):
        # bf16 MXU inputs, f32 accumulation.
        return jnp.dot(a.astype(bf16), b.astype(bf16),
                       preferred_element_type=jnp.float32)

    # ---- image backbone stub (DenseNet169 stand-in):
    #      conv3x3 + ReLU -> global average pool -> linear + ReLU -> (B, 1664)
    h = jnp.maximum(mm(patches_ref[...], wc_ref[...]) + bc_ref[...], 0.0)  # (B*P, Cf)
    pooled = mm(pimg_ref[...], h)                                          # (B, Cf)
    img_feat = jnp.maximum(mm(pooled, wp_ref[...]) + bp_ref[...], 0.0)     # (B, 1664)

    # ---- CrossAttention(text_features, image_features.view(B, 1, 1664)),
    #      then mean(dim=1).  The key/value sequence has length 1, so the
    #      softmax over keys is exactly 1.0 at every text position; the output
    #      at every query equals the value projection of the single image
    #      token, and its mean over queries is that same vector.  Exact.
    attn_mean = mm(img_feat, wv_ref[...]) + bv_ref[...]                    # (B, 1664)

    # ---- per-modality FC heads
    img_fc = mm(attn_mean, wi_ref[...]) + bi_ref[...]                      # (B, 512)
    txt_mean = mm(ptxt_ref[...], txt_ref[...])                             # (B, 128)
    txt_fc = mm(txt_mean, wt_ref[...]) + bt_ref[...]                       # (B, 512)

    # ---- concat + classifier
    combined = jnp.concatenate([img_fc, txt_fc], axis=-1)                  # (B, 1024)
    o_ref[...] = mm(combined, wcls_ref[...]) + bcls_ref[...]               # (B, C)


def censity_fused(patches, txt, pool_img, pool_txt, p):
    B = pool_img.shape[0]

    def full(arr):
        n = arr.ndim
        return pl.BlockSpec(arr.shape, lambda i, n=n: (0,) * n)

    args = (patches, txt, pool_img, pool_txt,
            p["w_conv"], p["b_conv"], p["w_proj"], p["b_proj"],
            p["attn_wv"], p["attn_bv"],
            p["w_img_fc"], p["b_img_fc"], p["w_txt_fc"], p["b_txt_fc"],
            p["w_cls"], p["b_cls"])

    return pl.pallas_call(
        _censity_kernel,
        out_shape=jax.ShapeDtypeStruct((B, NUM_CLASSES), jnp.float32),
        grid=(1,),
        in_specs=[full(a) for a in args],
        out_specs=pl.BlockSpec((B, NUM_CLASSES), lambda i: (0, 0)),
        compiler_params=_COMPILER_PARAMS,
    )(*args)


# ---------------------------------------------------------------------------
# Glue: im2col in NHWC ('same' padding, stride 1) -> (B*H*W, C*k*k), lane-dense
# ---------------------------------------------------------------------------
def _im2col_nhwc(images_nchw, k=KSIZE):
    B, C, H, W = images_nchw.shape
    x = jnp.transpose(images_nchw, (0, 2, 3, 1))              # (B, H, W, C)
    pad = k // 2
    xp = jnp.pad(x, ((0, 0), (pad, pad), (pad, pad), (0, 0)))
    cols = [xp[:, i:i + H, j:j + W, :] for i in range(k) for j in range(k)]
    patches = jnp.concatenate(cols, axis=-1)                  # (B, H, W, C*k*k)
    return patches.reshape(B * H * W, C * k * k)


# ---------------------------------------------------------------------------
# Parameter construction (deterministic, synthetic; weights in bf16)
# ---------------------------------------------------------------------------
def init_params(key):
    ks = jax.random.split(key, 12)

    def nrm(k, shape, scale=0.02, dtype=jnp.bfloat16):
        return (scale * jax.random.normal(k, shape, dtype=jnp.float32)).astype(dtype)

    def zeros(shape):
        return jnp.zeros(shape, jnp.float32)

    p = {}
    # image backbone stub
    p["w_conv"] = nrm(ks[0], (KPAD, CONV_CH))          # rows >= C*k*k meet zero-padded lanes
    p["b_conv"] = zeros((1, CONV_CH))
    p["w_proj"] = nrm(ks[1], (CONV_CH, IMG_FEAT_DIM))
    p["b_proj"] = zeros((1, IMG_FEAT_DIM))
    # text backbone stub (embedding table, f32, gathered on host)
    p["emb"] = nrm(ks[2], (VOCAB, TXT_FEAT_DIM), dtype=jnp.float32)
    # CrossAttention(text_dim=128, img_dim=1664): only the value projection is
    # live when the image key/value sequence length is 1 (see kernel comment).
    # q/k weights kept only for parameter parity with the PyTorch module.
    p["attn_wq"] = nrm(ks[3], (TXT_FEAT_DIM, IMG_FEAT_DIM))   # dead at L_kv == 1
    p["attn_wk"] = nrm(ks[4], (IMG_FEAT_DIM, IMG_FEAT_DIM))   # dead at L_kv == 1
    p["attn_wv"] = nrm(ks[5], (IMG_FEAT_DIM, IMG_FEAT_DIM))
    p["attn_bv"] = zeros((1, IMG_FEAT_DIM))
    # FC heads + classifier
    p["w_img_fc"] = nrm(ks[6], (IMG_FEAT_DIM, FC_DIM)); p["b_img_fc"] = zeros((1, FC_DIM))
    p["w_txt_fc"] = nrm(ks[7], (TXT_FEAT_DIM, FC_DIM)); p["b_txt_fc"] = zeros((1, FC_DIM))
    p["w_cls"] = nrm(ks[8], (2 * FC_DIM, NUM_CLASSES)); p["b_cls"] = zeros((1, NUM_CLASSES))
    return p


# ---------------------------------------------------------------------------
# Forward pass (mirrors Censity.forward)
# ---------------------------------------------------------------------------
def censity_forward(params, images, input_ids, attention_mask):
    B, C, H, W = images.shape
    S = input_ids.shape[1]

    # image_features = self.img_featrs(images)  -> stub fed by im2col patches
    patches = _im2col_nhwc(images, KSIZE)                      # (B*H*W, C*k*k)
    patches = jnp.pad(patches, ((0, 0), (0, KPAD - patches.shape[1])))

    # text_features = self.txt_featrs(input_ids, attention_mask)[0]
    # TODO(synk): real bert-tiny encoder; attention_mask unused by the stub.
    txt = jnp.take(params["emb"], input_ids.reshape(-1), axis=0)   # (B*S, 128)
    del attention_mask

    # averaging matrices: global-avg-pool over spatial / mean over sequence,
    # expressed as tiny matmuls so the fused kernel needs no reshapes.
    pool_img = jnp.repeat(jnp.eye(B, dtype=jnp.float32), H * W, axis=1) / float(H * W)
    pool_txt = jnp.repeat(jnp.eye(B, dtype=jnp.float32), S, axis=1) / float(S)

    return censity_fused(patches, txt, pool_img, pool_txt, params)


if __name__ == "__main__":
    key = jax.random.PRNGKey(0)
    k_par, k_img, k_ids = jax.random.split(key, 3)

    B, C, H, W = 2, 3, 16, 16
    S = 8

    params = init_params(k_par)
    images = jax.random.normal(k_img, (B, C, H, W), dtype=jnp.float32)   # NCHW
    input_ids = jax.random.randint(k_ids, (B, S), 0, VOCAB, dtype=jnp.int32)
    attention_mask = jnp.ones((B, S), dtype=jnp.int32)

    forward = jax.jit(censity_forward)
    logits = forward(params, images, input_ids, attention_mask)
    logits = jax.block_until_ready(logits)

    assert logits.shape == (B, NUM_CLASSES)
    assert bool(jnp.all(jnp.isfinite(logits)))
    print("KERNEL_OK")
</pallas_src>

<mosaic_0001>
module attributes {stable_mosaic.version = 11 : i64} {
  func.func @_censity_kernel(%arg0: i32, %arg1: memref<512x128xf32, #tpu.memory_space<vmem>>, %arg2: memref<16x128xf32, #tpu.memory_space<vmem>>, %arg3: memref<2x512xf32, #tpu.memory_space<vmem>>, %arg4: memref<2x16xf32, #tpu.memory_space<vmem>>, %arg5: memref<128x64xbf16, #tpu.memory_space<vmem>>, %arg6: memref<1x64xf32, #tpu.memory_space<vmem>>, %arg7: memref<64x1664xbf16, #tpu.memory_space<vmem>>, %arg8: memref<1x1664xf32, #tpu.memory_space<vmem>>, %arg9: memref<1664x1664xbf16, #tpu.memory_space<vmem>>, %arg10: memref<1x1664xf32, #tpu.memory_space<vmem>>, %arg11: memref<1664x512xbf16, #tpu.memory_space<vmem>>, %arg12: memref<1x512xf32, #tpu.memory_space<vmem>>, %arg13: memref<128x512xbf16, #tpu.memory_space<vmem>>, %arg14: memref<1x512xf32, #tpu.memory_space<vmem>>, %arg15: memref<1024x4xbf16, #tpu.memory_space<vmem>>, %arg16: memref<1x4xf32, #tpu.memory_space<vmem>>, %arg17: memref<2x4xf32, #tpu.memory_space<vmem>>) attributes {dimension_semantics = [#tpu.dimension_semantics<arbitrary>], iteration_bounds = array<i64: 1>, scalar_prefetch = 0 : i64, scratch_operands = 0 : i64, tpu.core_type = #tpu.core_type<tc>, window_params = [{pipeline_mode = #tpu.pipeline_mode<synchronous>, transform_indices = @transform_0, window_bounds = array<i64: 512, 128>}, {pipeline_mode = #tpu.pipeline_mode<synchronous>, transform_indices = @transform_1, window_bounds = array<i64: 16, 128>}, {pipeline_mode = #tpu.pipeline_mode<synchronous>, transform_indices = @transform_2, window_bounds = array<i64: 2, 512>}, {pipeline_mode = #tpu.pipeline_mode<synchronous>, transform_indices = @transform_3, window_bounds = array<i64: 2, 16>}, {pipeline_mode = #tpu.pipeline_mode<synchronous>, transform_indices = @transform_4, window_bounds = array<i64: 128, 64>}, {pipeline_mode = #tpu.pipeline_mode<synchronous>, transform_indices = @transform_5, window_bounds = array<i64: 1, 64>}, {pipeline_mode = #tpu.pipeline_mode<synchronous>, transform_indices = @transform_6, window_bounds = array<i64: 64, 1664>}, {pipeline_mode = #tpu.pipeline_mode<synchronous>, transform_indices = @transform_7, window_bounds = array<i64: 1, 1664>}, {pipeline_mode = #tpu.pipeline_mode<synchronous>, transform_indices = @transform_8, window_bounds = array<i64: 1664, 1664>}, {pipeline_mode = #tpu.pipeline_mode<synchronous>, transform_indices = @transform_9, window_bounds = array<i64: 1, 1664>}, {pipeline_mode = #tpu.pipeline_mode<synchronous>, transform_indices = @transform_10, window_bounds = array<i64: 1664, 512>}, {pipeline_mode = #tpu.pipeline_mode<synchronous>, transform_indices = @transform_11, window_bounds = array<i64: 1, 512>}, {pipeline_mode = #tpu.pipeline_mode<synchronous>, transform_indices = @transform_12, window_bounds = array<i64: 128, 512>}, {pipeline_mode = #tpu.pipeline_mode<synchronous>, transform_indices = @transform_13, window_bounds = array<i64: 1, 512>}, {pipeline_mode = #tpu.pipeline_mode<synchronous>, transform_indices = @transform_14, window_bounds = array<i64: 1024, 4>}, {pipeline_mode = #tpu.pipeline_mode<synchronous>, transform_indices = @transform_15, window_bounds = array<i64: 1, 4>}, {pipeline_mode = #tpu.pipeline_mode<synchronous>, transform_indices = @transform_16, window_bounds = array<i64: 2, 4>}]} {
    %c0 = arith.constant 0 : index
    %c0_0 = arith.constant 0 : index
    %0 = vector.load %arg1[%c0, %c0_0] : memref<512x128xf32, #tpu.memory_space<vmem>>, vector<512x128xf32>
    %c0_1 = arith.constant 0 : index
    %c0_2 = arith.constant 0 : index
    %1 = vector.load %arg5[%c0_1, %c0_2] : memref<128x64xbf16, #tpu.memory_space<vmem>>, vector<128x64xbf16>
    %2 = arith.truncf %0 : vector<512x128xf32> to vector<512x128xbf16>
    %cst = arith.constant dense<0.000000e+00> : vector<512x64xf32>
    %3 = tpu.matmul %2, %1, %cst {dimension_numbers = #tpu.dot_dimension_numbers<[1], [0], [0], [1], [0, 0, 1, 1], [], []>} : vector<512x128xbf16>, vector<128x64xbf16>, vector<512x64xf32> -> vector<512x64xf32>
    %c0_3 = arith.constant 0 : index
    %c0_4 = arith.constant 0 : index
    %4 = vector.load %arg6[%c0_3, %c0_4] : memref<1x64xf32, #tpu.memory_space<vmem>>, vector<1x64xf32>
    %5 = vector.broadcast %4 : vector<1x64xf32> to vector<512x64xf32>
    %6 = arith.addf %3, %5 : vector<512x64xf32>
    %cst_5 = arith.constant 0.000000e+00 : f32
    %7 = vector.broadcast %cst_5 : f32 to vector<512x64xf32>
    %8 = arith.maximumf %6, %7 : vector<512x64xf32>
    %c0_6 = arith.constant 0 : index
    %c0_7 = arith.constant 0 : index
    %9 = vector.load %arg3[%c0_6, %c0_7] : memref<2x512xf32, #tpu.memory_space<vmem>>, vector<2x512xf32>
    %10 = arith.truncf %9 : vector<2x512xf32> to vector<2x512xbf16>
    %11 = arith.truncf %8 : vector<512x64xf32> to vector<512x64xbf16>
    %cst_8 = arith.constant dense<0.000000e+00> : vector<2x64xf32>
    %12 = tpu.matmul %10, %11, %cst_8 {dimension_numbers = #tpu.dot_dimension_numbers<[1], [0], [0], [1], [0, 0, 1, 1], [], []>} : vector<2x512xbf16>, vector<512x64xbf16>, vector<2x64xf32> -> vector<2x64xf32>
    %c0_9 = arith.constant 0 : index
    %c0_10 = arith.constant 0 : index
    %13 = vector.load %arg7[%c0_9, %c0_10] : memref<64x1664xbf16, #tpu.memory_space<vmem>>, vector<64x1664xbf16>
    %14 = arith.truncf %12 : vector<2x64xf32> to vector<2x64xbf16>
    %cst_11 = arith.constant dense<0.000000e+00> : vector<2x1664xf32>
    %15 = tpu.matmul %14, %13, %cst_11 {dimension_numbers = #tpu.dot_dimension_numbers<[1], [0], [0], [1], [0, 0, 1, 1], [], []>} : vector<2x64xbf16>, vector<64x1664xbf16>, vector<2x1664xf32> -> vector<2x1664xf32>
    %c0_12 = arith.constant 0 : index
    %c0_13 = arith.constant 0 : index
    %16 = vector.load %arg8[%c0_12, %c0_13] : memref<1x1664xf32, #tpu.memory_space<vmem>>, vector<1x1664xf32>
    %17 = vector.broadcast %16 : vector<1x1664xf32> to vector<2x1664xf32>
    %18 = arith.addf %15, %17 : vector<2x1664xf32>
    %cst_14 = arith.constant 0.000000e+00 : f32
    %19 = vector.broadcast %cst_14 : f32 to vector<2x1664xf32>
    %20 = arith.maximumf %18, %19 : vector<2x1664xf32>
    %c0_15 = arith.constant 0 : index
    %c0_16 = arith.constant 0 : index
    %21 = vector.load %arg9[%c0_15, %c0_16] : memref<1664x1664xbf16, #tpu.memory_space<vmem>>, vector<1664x1664xbf16>
    %22 = arith.truncf %20 : vector<2x1664xf32> to vector<2x1664xbf16>
    %cst_17 = arith.constant dense<0.000000e+00> : vector<2x1664xf32>
    %23 = tpu.matmul %22, %21, %cst_17 {dimension_numbers = #tpu.dot_dimension_numbers<[1], [0], [0], [1], [0, 0, 1, 1], [], []>} : vector<2x1664xbf16>, vector<1664x1664xbf16>, vector<2x1664xf32> -> vector<2x1664xf32>
    %c0_18 = arith.constant 0 : index
    %c0_19 = arith.constant 0 : index
    %24 = vector.load %arg10[%c0_18, %c0_19] : memref<1x1664xf32, #tpu.memory_space<vmem>>, vector<1x1664xf32>
    %25 = vector.broadcast %24 : vector<1x1664xf32> to vector<2x1664xf32>
    %26 = arith.addf %23, %25 : vector<2x1664xf32>
    %c0_20 = arith.constant 0 : index
    %c0_21 = arith.constant 0 : index
    %27 = vector.load %arg11[%c0_20, %c0_21] : memref<1664x512xbf16, #tpu.memory_space<vmem>>, vector<1664x512xbf16>
    %28 = arith.truncf %26 : vector<2x1664xf32> to vector<2x1664xbf16>
    %cst_22 = arith.constant dense<0.000000e+00> : vector<2x512xf32>
    %29 = tpu.matmul %28, %27, %cst_22 {dimension_numbers = #tpu.dot_dimension_numbers<[1], [0], [0], [1], [0, 0, 1, 1], [], []>} : vector<2x1664xbf16>, vector<1664x512xbf16>, vector<2x512xf32> -> vector<2x512xf32>
    %c0_23 = arith.constant 0 : index
    %c0_24 = arith.constant 0 : index
    %30 = vector.load %arg12[%c0_23, %c0_24] : memref<1x512xf32, #tpu.memory_space<vmem>>, vector<1x512xf32>
    %31 = vector.broadcast %30 : vector<1x512xf32> to vector<2x512xf32>
    %32 = arith.addf %29, %31 : vector<2x512xf32>
    %c0_25 = arith.constant 0 : index
    %c0_26 = arith.constant 0 : index
    %33 = vector.load %arg4[%c0_25, %c0_26] : memref<2x16xf32, #tpu.memory_space<vmem>>, vector<2x16xf32>
    %c0_27 = arith.constant 0 : index
    %c0_28 = arith.constant 0 : index
    %34 = vector.load %arg2[%c0_27, %c0_28] : memref<16x128xf32, #tpu.memory_space<vmem>>, vector<16x128xf32>
    %35 = arith.truncf %33 : vector<2x16xf32> to vector<2x16xbf16>
    %36 = arith.truncf %34 : vector<16x128xf32> to vector<16x128xbf16>
    %cst_29 = arith.constant dense<0.000000e+00> : vector<2x128xf32>
    %37 = tpu.matmul %35, %36, %cst_29 {dimension_numbers = #tpu.dot_dimension_numbers<[1], [0], [0], [1], [0, 0, 1, 1], [], []>} : vector<2x16xbf16>, vector<16x128xbf16>, vector<2x128xf32> -> vector<2x128xf32>
    %c0_30 = arith.constant 0 : index
    %c0_31 = arith.constant 0 : index
    %38 = vector.load %arg13[%c0_30, %c0_31] : memref<128x512xbf16, #tpu.memory_space<vmem>>, vector<128x512xbf16>
    %39 = arith.truncf %37 : vector<2x128xf32> to vector<2x128xbf16>
    %cst_32 = arith.constant dense<0.000000e+00> : vector<2x512xf32>
    %40 = tpu.matmul %39, %38, %cst_32 {dimension_numbers = #tpu.dot_dimension_numbers<[1], [0], [0], [1], [0, 0, 1, 1], [], []>} : vector<2x128xbf16>, vector<128x512xbf16>, vector<2x512xf32> -> vector<2x512xf32>
    %c0_33 = arith.constant 0 : index
    %c0_34 = arith.constant 0 : index
    %41 = vector.load %arg14[%c0_33, %c0_34] : memref<1x512xf32, #tpu.memory_space<vmem>>, vector<1x512xf32>
    %42 = vector.broadcast %41 : vector<1x512xf32> to vector<2x512xf32>
    %43 = arith.addf %40, %42 : vector<2x512xf32>
    %44 = tpu.concatenate %32, %43 in 1 : vector<2x512xf32>, vector<2x512xf32> -> vector<2x1024xf32>
    %c0_35 = arith.constant 0 : index
    %c0_36 = arith.constant 0 : index
    %45 = vector.load %arg15[%c0_35, %c0_36] : memref<1024x4xbf16, #tpu.memory_space<vmem>>, vector<1024x4xbf16>
    %46 = arith.truncf %44 : vector<2x1024xf32> to vector<2x1024xbf16>
    %cst_37 = arith.constant dense<0.000000e+00> : vector<2x4xf32>
    %47 = tpu.matmul %46, %45, %cst_37 {dimension_numbers = #tpu.dot_dimension_numbers<[1], [0], [0], [1], [0, 0, 1, 1], [], []>} : vector<2x1024xbf16>, vector<1024x4xbf16>, vector<2x4xf32> -> vector<2x4xf32>
    %c0_38 = arith.constant 0 : index
    %c0_39 = arith.constant 0 : index
    %48 = vector.load %arg16[%c0_38, %c0_39] : memref<1x4xf32, #tpu.memory_space<vmem>>, vector<1x4xf32>
    %49 = vector.broadcast %48 : vector<1x4xf32> to vector<2x4xf32>
    %50 = arith.addf %47, %49 : vector<2x4xf32>
    %c0_40 = arith.constant 0 : index
    %c0_41 = arith.constant 0 : index
    %51 = vector.load %arg17[%c0_40, %c0_41] : memref<2x4xf32, #tpu.memory_space<vmem>>, vector<2x4xf32>
    tpu.vector_store %arg17[%c0_40, %c0_41], %50 {strides = array<i32>} : memref<2x4xf32, #tpu.memory_space<vmem>>, vector<2x4xf32>,
    return
  }
  func.func @transform_0(%arg0: i32) -> (i32, i32) {
    %c0_i32 = arith.constant 0 : i32
    %c0_i32_0 = arith.constant 0 : i32
    %c0_i32_1 = arith.constant 0 : i32
    return %c0_i32, %c0_i32_0 : i32, i32
  }
  func.func @transform_1(%arg0: i32) -> (i32, i32) {
    %c0_i32 = arith.constant 0 : i32
    %c0_i32_0 = arith.constant 0 : i32
    %c0_i32_1 = arith.constant 0 : i32
    return %c0_i32, %c0_i32_0 : i32, i32
  }
  func.func @transform_2(%arg0: i32) -> (i32, i32) {
    %c0_i32 = arith.constant 0 : i32
    %c0_i32_0 = arith.constant 0 : i32
    %c0_i32_1 = arith.constant 0 : i32
    return %c0_i32, %c0_i32_0 : i32, i32
  }
  func.func @transform_3(%arg0: i32) -> (i32, i32) {
    %c0_i32 = arith.constant 0 : i32
    %c0_i32_0 = arith.constant 0 : i32
    %c0_i32_1 = arith.constant 0 : i32
    return %c0_i32, %c0_i32_0 : i32, i32
  }
  func.func @transform_4(%arg0: i32) -> (i32, i32) {
    %c0_i32 = arith.constant 0 : i32
    %c0_i32_0 = arith.constant 0 : i32
    %c0_i32_1 = arith.constant 0 : i32
    return %c0_i32, %c0_i32_0 : i32, i32
  }
  func.func @transform_5(%arg0: i32) -> (i32, i32) {
    %c0_i32 = arith.constant 0 : i32
    %c0_i32_0 = arith.constant 0 : i32
    %c0_i32_1 = arith.constant 0 : i32
    return %c0_i32, %c0_i32_0 : i32, i32
  }
  func.func @transform_6(%arg0: i32) -> (i32, i32) {
    %c0_i32 = arith.constant 0 : i32
    %c0_i32_0 = arith.constant 0 : i32
    %c0_i32_1 = arith.constant 0 : i32
    return %c0_i32, %c0_i32_0 : i32, i32
  }
  func.func @transform_7(%arg0: i32) -> (i32, i32) {
    %c0_i32 = arith.constant 0 : i32
    %c0_i32_0 = arith.constant 0 : i32
    %c0_i32_1 = arith.constant 0 : i32
    return %c0_i32, %c0_i32_0 : i32, i32
  }
  func.func @transform_8(%arg0: i32) -> (i32, i32) {
    %c0_i32 = arith.constant 0 : i32
    %c0_i32_0 = arith.constant 0 : i32
    %c0_i32_1 = arith.constant 0 : i32
    return %c0_i32, %c0_i32_0 : i32, i32
  }
  func.func @transform_9(%arg0: i32) -> (i32, i32) {
    %c0_i32 = arith.constant 0 : i32
    %c0_i32_0 = arith.constant 0 : i32
    %c0_i32_1 = arith.constant 0 : i32
    return %c0_i32, %c0_i32_0 : i32, i32
  }
  func.func @transform_10(%arg0: i32) -> (i32, i32) {
    %c0_i32 = arith.constant 0 : i32
    %c0_i32_0 = arith.constant 0 : i32
    %c0_i32_1 = arith.constant 0 : i32
    return %c0_i32, %c0_i32_0 : i32, i32
  }
  func.func @transform_11(%arg0: i32) -> (i32, i32) {
    %c0_i32 = arith.constant 0 : i32
    %c0_i32_0 = arith.constant 0 : i32
    %c0_i32_1 = arith.constant 0 : i32
    return %c0_i32, %c0_i32_0 : i32, i32
  }
  func.func @transform_12(%arg0: i32) -> (i32, i32) {
    %c0_i32 = arith.constant 0 : i32
    %c0_i32_0 = arith.constant 0 : i32
    %c0_i32_1 = arith.constant 0 : i32
    return %c0_i32, %c0_i32_0 : i32, i32
  }
  func.func @transform_13(%arg0: i32) -> (i32, i32) {
    %c0_i32 = arith.constant 0 : i32
    %c0_i32_0 = arith.constant 0 : i32
    %c0_i32_1 = arith.constant 0 : i32
    return %c0_i32, %c0_i32_0 : i32, i32
  }
  func.func @transform_14(%arg0: i32) -> (i32, i32) {
    %c0_i32 = arith.constant 0 : i32
    %c0_i32_0 = arith.constant 0 : i32
    %c0_i32_1 = arith.constant 0 : i32
    return %c0_i32, %c0_i32_0 : i32, i32
  }
  func.func @transform_15(%arg0: i32) -> (i32, i32) {
    %c0_i32 = arith.constant 0 : i32
    %c0_i32_0 = arith.constant 0 : i32
    %c0_i32_1 = arith.constant 0 : i32
    return %c0_i32, %c0_i32_0 : i32, i32
  }
  func.func @transform_16(%arg0: i32) -> (i32, i32) {
    %c0_i32 = arith.constant 0 : i32
    %c0_i32_0 = arith.constant 0 : i32
    %c0_i32_1 = arith.constant 0 : i32
    return %c0_i32, %c0_i32_0 : i32, i32
  }
}

</mosaic_0001>

<bundles_post_ra>
// kernel: censity_forward.1
= control target key start
LH: loop header
LB: loop body
LE: loop exit
PB: predicated region body
PF: predicated region fallthrough
CT: control target
= control target key end

     0   :  { %s22932_s0 = inlined_call_operand.vmem [shape: f32[512,128], index: 0, kind: input, shape index: {}]   ;;  %s22933_s1 = inlined_call_operand.vmem [shape: f32[16,128], index: 1, kind: input, shape index: {}]   ;;  %s22934_s2 = inlined_call_operand.vmem [shape: f32[2,512], index: 2, kind: input, shape index: {}]   ;;  %s22935_s3 = inlined_call_operand.vmem [shape: f32[2,16], index: 3, kind: input, shape index: {}]   ;;  %s22936_s4 = inlined_call_operand.vmem [shape: bf16[128,64], index: 4, kind: input, shape index: {}]   ;;  %s22937_s5 = inlined_call_operand.hbm [shape: f32[1,64], index: 5, kind: input, shape index: {}]   ;;  %s22938_s6 = inlined_call_operand.hbm [shape: bf16[64,1664], index: 6, kind: input, shape index: {}]   ;;  %s22939_s7 = inlined_call_operand.hbm [shape: f32[1,1664], index: 7, kind: input, shape index: {}]   ;;  %s22940_s8 = inlined_call_operand.hbm [shape: bf16[1664,1664], index: 8, kind: input, shape index: {}]   ;;  %s22941_s9 = inlined_call_operand.hbm [shape: f32[1,1664], index: 9, kind: input, shape index: {}]   ;;  %s22942_s10 = inlined_call_operand.hbm [shape: bf16[1664,512], index: 10, kind: input, shape index: {}]   ;;  %s22943_s11 = inlined_call_operand.hbm [shape: f32[1,512], index: 11, kind: input, shape index: {}]   ;;  %s22944_s12 = inlined_call_operand.hbm [shape: bf16[128,512], index: 12, kind: input, shape index: {}]   ;;  %s22945_s13 = inlined_call_operand.hbm [shape: f32[1,512], index: 13, kind: input, shape index: {}]   ;;  %s22946_s14 = inlined_call_operand.vmem [shape: bf16[1024,4], index: 14, kind: input, shape index: {}]   ;;  %s22947_s15 = inlined_call_operand.hbm [shape: f32[1,4], index: 15, kind: input, shape index: {}]   ;;  %s22948_s16 = inlined_call_operand.hbm [shape: f32[2,4], index: 16, kind: output, shape index: {}]  }
   0x1   :  { %22951 = sst [smem:[#allocation27_spill]] %s22932_s0 }
   0x2   :  { %22952 = sst [smem:[#allocation28_spill]] %s22948_s16 }
   0x3   :  { %21 = vsyncpa [#allocation3], 0 }
   0x4   :  { %22 = vsyncpa [#allocation6], 0 }
   0x5   :  { %23 = vsyncpa [#allocation9], 0 }
   0x6   :  { %24 = vsyncpa [#allocation12], 0 }
   0x7   :  { %25 = vsyncpa [#allocation15], 0 }
   0x8   :  { %26 = vsyncpa [#allocation18], 0 }
   0x9   :  { %27 = vsyncpa [#allocation4], 0  ;;  %s21748_s21 = smov [#allocation5]   ;;  %s21492_s25 = scalar_lea.hbm %s22938_s6, 6656 }
   0xa   :  { %s53_s22 = sshll.u32 %s21748_s21, 4  ;;  %p21493_p0 = scmp.ne.s32.totalorder %s22938_s6, %s21492_s25  ;;  %s54_s22 = int_to_ptr.vmem [resolvable:$true] %s53_s22 }
   0xb   :  { %p21496_p1 = scmp.lt.u32.totalorder %s21492_s25, %s22938_s6 }
   0xd   :  { %p21498_p2 = pnand %p21496_p1, %p21493_p0 }
   0xf   :  { %21501 = shalt.err (!%p21498_p2)
}
  0x10   :  { %s21502_s30 = scalar_lea.vmem %s54_s22, 6656  ;;  %p21507_p4 = scmp.lt.s32.totalorder %s54_s22, %s54_s22 }
  0x11   :  { %p21503_p3 = scmp.ne.s32.totalorder %s54_s22, %s21502_s30  ;;  %p21508_p5 = scmp.lt.s32.totalorder %s21502_s30, %s21502_s30 }
  0x13   :  { %p21509_p6 = por %p21508_p5, %p21507_p4 }
  0x15   :  { %p21510_p7 = pnand %p21509_p6, %p21503_p3 }
  0x17   :  { %21513 = shalt.err (!%p21510_p7)
}
  0x18   :  { %s21749_s0 = smov 832   ;;  %s21750_s17 = smov 52  }
  0x19   :  { %59 = dma.hbm_to_vmem [thread:$0]  %s22938_s6, 6656, %s54_s22, [#allocation6], %s21749_s0, %s21749_s0, %s21750_s17  }
  0x1a   :  { %s21751_s20 = smov [#allocation8]   ;;  %s21752_s23 = smov [#allocation11]  }
  0x1b   :  { %s75_s21 = sshll.u32 %s21751_s20, 4  ;;  %s97_s24 = sshll.u32 %s21752_s23, 4  ;;  %s76_s21 = int_to_ptr.vmem [resolvable:$true] %s75_s21  ;;  %s98_s24 = int_to_ptr.vmem [resolvable:$true] %s97_s24 }
  0x1c   :  { %s21514_s27 = scalar_lea.hbm %s22940_s8, 173056 }
  0x1d   :  { %p21515_p8 = scmp.ne.s32.totalorder %s22940_s8, %s21514_s27  ;;  %p21518_p9 = scmp.lt.u32.totalorder %s21514_s27, %s22940_s8 }
  0x1f   :  { %p21520_p10 = pnand %p21518_p9, %p21515_p8 }
  0x21   :  { %21523 = shalt.err (!%p21520_p10)
}
  0x22   :  { %s21524_s6 = scalar_lea.vmem %s76_s21, 173056  ;;  %p21529_p12 = scmp.lt.s32.totalorder %s76_s21, %s76_s21 }
  0x23   :  { %p21525_p11 = scmp.ne.s32.totalorder %s76_s21, %s21524_s6  ;;  %p21530_p13 = scmp.lt.s32.totalorder %s21524_s6, %s21524_s6 }
  0x25   :  { %p21531_p0 = por %p21530_p13, %p21529_p12 }
  0x27   :  { %p21532_p1 = pnand %p21531_p0, %p21525_p11 }
  0x29   :  { %21535 = shalt.err (!%p21532_p1)
}
  0x2a   :  { %81 = dma.hbm_to_vmem [thread:$0]  %s22940_s8, 173056, %s76_s21, [#allocation9], %s21749_s0, %s21749_s0, %s21750_s17  }
  0x2b   :  { %s21536_s23 = scalar_lea.hbm %s22942_s10, 53248 }
  0x2c   :  { %p21537_p2 = scmp.ne.s32.totalorder %s22942_s10, %s21536_s23  ;;  %p21540_p3 = scmp.lt.u32.totalorder %s21536_s23, %s22942_s10 }
  0x2e   :  { %p21542_p4 = pnand %p21540_p3, %p21537_p2 }
  0x30   :  { %21545 = shalt.err (!%p21542_p4)
}
  0x31   :  { %s21546_s28 = scalar_lea.vmem %s98_s24, 53248  ;;  %p21551_p6 = scmp.lt.s32.totalorder %s98_s24, %s98_s24 }
  0x32   :  { %p21547_p5 = scmp.ne.s32.totalorder %s98_s24, %s21546_s28  ;;  %p21552_p7 = scmp.lt.s32.totalorder %s21546_s28, %s21546_s28 }
  0x34   :  { %p21553_p8 = por %p21552_p7, %p21551_p6 }
  0x36   :  { %p21554_p9 = pnand %p21553_p8, %p21547_p5 }
  0x38   :  { %21557 = shalt.err (!%p21554_p9)
}
  0x39   :  { %s21753_s8 = smov 256   ;;  %s21754_s0 = smov 16  }
  0x3a   :  { %103 = dma.hbm_to_vmem [thread:$0]  %s22942_s10, 53248, %s98_s24, [#allocation12], %s21753_s8, %s21753_s8, %s21754_s0  }
  0x3b   :  { %s21755_s29 = smov [#allocation14]   ;;  %s21756_s6 = smov [#allocation2]  }
  0x3c   :  { %s119_s30 = sshll.u32 %s21755_s29, 4  ;;  %s44_s22 = sshll.u32 %s21756_s6, 4  ;;  %s120_s30 = int_to_ptr.vmem [resolvable:$true] %s119_s30  ;;  %s45_s22 = int_to_ptr.vmem [resolvable:$true] %s44_s22 }
  0x3d   :  { %s21558_s20 = scalar_lea.hbm %s22944_s12, 4096 }
  0x3e   :  { %p21559_p10 = scmp.ne.s32.totalorder %s22944_s12, %s21558_s20  ;;  %p21562_p11 = scmp.lt.u32.totalorder %s21558_s20, %s22944_s12 }
  0x40   :  { %p21564_p12 = pnand %p21562_p11, %p21559_p10 }
  0x42   :  { %21567 = shalt.err (!%p21564_p12)
}
  0x43   :  { %s21568_s10 = scalar_lea.vmem %s120_s30, 4096  ;;  %p21573_p0 = scmp.lt.s32.totalorder %s120_s30, %s120_s30 }
  0x44   :  { %p21569_p13 = scmp.ne.s32.totalorder %s120_s30, %s21568_s10  ;;  %p21574_p1 = scmp.lt.s32.totalorder %s21568_s10, %s21568_s10 }
  0x46   :  { %p21575_p2 = por %p21574_p1, %p21573_p0 }
  0x48   :  { %p21576_p3 = pnand %p21575_p2, %p21569_p13 }
  0x4a   :  { %21579 = shalt.err (!%p21576_p3)
}
  0x4b   :  { %125 = dma.hbm_to_vmem [thread:$0]  %s22944_s12, 4096, %s120_s30, [#allocation15], %s21753_s8, %s21753_s8, %s21754_s0  }
  0x4c   :  { %s21580_s21 = scalar_lea.hbm %s22937_s5, 16 }
  0x4d   :  { %p21581_p4 = scmp.ne.s32.totalorder %s22937_s5, %s21580_s21  ;;  %p21584_p5 = scmp.lt.u32.totalorder %s21580_s21, %s22937_s5 }
  0x4f   :  { %p21586_p6 = pnand %p21584_p5, %p21581_p4 }
  0x51   :  { %21589 = shalt.err (!%p21586_p6)
}
  0x52   :  { %s21590_s20 = scalar_lea.vmem %s45_s22, 16  ;;  %s21594_s23 = scalar_lea.vmem %s45_s22, 32 }
  0x53   :  { %p21591_p7 = scmp.ne.s32.totalorder %s45_s22, %s21590_s20  ;;  %p21595_p8 = scmp.lt.s32.totalorder %s45_s22, %s45_s22 }
  0x54   :  { %p21596_p9 = scmp.lt.s32.totalorder %s21594_s23, %s21590_s20 }
  0x56   :  { %p21597_p10 = por %p21596_p9, %p21595_p8 }
  0x58   :  { %p21598_p11 = pnand %p21597_p10, %p21591_p7 }
  0x5a   :  { %21601 = shalt.err (!%p21598_p11)
}
  0x5b   :  { %47 = dma.hbm_to_vmem [thread:$0]  %s22937_s5, 16, %s45_s22, [#allocation3]  }
  0x5c   :  { %s21757_s0 = smov [#allocation7]   ;;  %s21758_s16 = smov [#allocation10]  }
  0x5d   :  { %s66_s30 = sshll.u32 %s21757_s0, 4  ;;  %s88_s25 = sshll.u32 %s21758_s16, 4  ;;  %s67_s30 = int_to_ptr.vmem [resolvable:$true] %s66_s30  ;;  %s89_s25 = int_to_ptr.vmem [resolvable:$true] %s88_s25 }
  0x5e   :  { %s21602_s24 = scalar_lea.hbm %s22939_s7, 208 }
  0x5f   :  { %p21603_p12 = scmp.ne.s32.totalorder %s22939_s7, %s21602_s24  ;;  %p21606_p13 = scmp.lt.u32.totalorder %s21602_s24, %s22939_s7 }
  0x61   :  { %p21608_p0 = pnand %p21606_p13, %p21603_p12 }
  0x63   :  { %21611 = shalt.err (!%p21608_p0)
}
  0x64   :  { %s21612_s5 = scalar_lea.vmem %s67_s30, 208  ;;  %s21616_s22 = scalar_lea.vmem %s67_s30, 224 }
  0x65   :  { %p21613_p1 = scmp.ne.s32.totalorder %s67_s30, %s21612_s5  ;;  %p21617_p2 = scmp.lt.s32.totalorder %s67_s30, %s67_s30 }
  0x66   :  { %p21618_p3 = scmp.lt.s32.totalorder %s21616_s22, %s21612_s5 }
  0x68   :  { %p21619_p4 = por %p21618_p3, %p21617_p2 }
  0x6a   :  { %p21620_p5 = pnand %p21619_p4, %p21613_p1 }
  0x6c   :  { %21623 = shalt.err (!%p21620_p5)
}
  0x6d   :  { %69 = dma.hbm_to_vmem [thread:$0]  %s22939_s7, 208, %s67_s30, [#allocation6]  }
  0x6e   :  { %s21624_s20 = scalar_lea.hbm %s22941_s9, 208 }
  0x6f   :  { %p21625_p6 = scmp.ne.s32.totalorder %s22941_s9, %s21624_s20  ;;  %p21628_p7 = scmp.lt.u32.totalorder %s21624_s20, %s22941_s9 }
  0x71   :  { %p21630_p8 = pnand %p21628_p7, %p21625_p6 }
  0x73   :  { %21633 = shalt.err (!%p21630_p8)
}
  0x74   :  { %s21634_s16 = scalar_lea.vmem %s89_s25, 208  ;;  %s21638_s26 = scalar_lea.vmem %s89_s25, 224 }
  0x75   :  { %p21635_p9 = scmp.ne.s32.totalorder %s89_s25, %s21634_s16  ;;  %p21639_p10 = scmp.lt.s32.totalorder %s89_s25, %s89_s25 }
  0x76   :  { %p21640_p11 = scmp.lt.s32.totalorder %s21638_s26, %s21634_s16 }
  0x78   :  { %p21641_p12 = por %p21640_p11, %p21639_p10 }
  0x7a   :  { %p21642_p13 = pnand %p21641_p12, %p21635_p9 }
  0x7c   :  { %21645 = shalt.err (!%p21642_p13)
}
  0x7d   :  { %91 = dma.hbm_to_vmem [thread:$0]  %s22941_s9, 208, %s89_s25, [#allocation9]  }
  0x7e   :  { %s21759_s10 = smov [#allocation13]   ;;  %s21760_s27 = smov [#allocation16]  }
  0x7f   :  { %s110_s24 = sshll.u32 %s21759_s10, 4  ;;  %s132_s28 = sshll.u32 %s21760_s27, 4  ;;  %s111_s24 = int_to_ptr.vmem [resolvable:$true] %s110_s24  ;;  %s133_s28 = int_to_ptr.vmem [resolvable:$true] %s132_s28 }
  0x80   :  { %s21646_s5 = scalar_lea.hbm %s22943_s11, 64 }
  0x81   :  { %p21647_p0 = scmp.ne.s32.totalorder %s22943_s11, %s21646_s5  ;;  %p21650_p1 = scmp.lt.u32.totalorder %s21646_s5, %s22943_s11 }
  0x83   :  { %p21652_p2 = pnand %p21650_p1, %p21647_p0 }
  0x85   :  { %21655 = shalt.err (!%p21652_p2)
}
  0x86   :  { %s21656_s9 = scalar_lea.vmem %s111_s24, 64  ;;  %p21661_p4 = scmp.lt.s32.totalorder %s111_s24, %s111_s24 }
  0x87   :  { %p21657_p3 = scmp.ne.s32.totalorder %s111_s24, %s21656_s9  ;;  %p21662_p5 = scmp.lt.s32.totalorder %s21656_s9, %s21656_s9 }
  0x89   :  { %p21663_p6 = por %p21662_p5, %p21661_p4 }
  0x8b   :  { %p21664_p7 = pnand %p21663_p6, %p21657_p3 }
  0x8d   :  { %21667 = shalt.err (!%p21664_p7)
}
  0x8e   :  { %113 = dma.hbm_to_vmem [thread:$0]  %s22943_s11, 64, %s111_s24, [#allocation12]  }
  0x8f   :  { %s21668_s12 = scalar_lea.hbm %s22945_s13, 64 }
  0x90   :  { %p21669_p8 = scmp.ne.s32.totalorder %s22945_s13, %s21668_s12  ;;  %p21672_p9 = scmp.lt.u32.totalorder %s21668_s12, %s22945_s13 }
  0x92   :  { %p21674_p10 = pnand %p21672_p9, %p21669_p8 }
  0x94   :  { %21677 = shalt.err (!%p21674_p10)
}
  0x95   :  { %s21678_s7 = scalar_lea.vmem %s133_s28, 64  ;;  %p21683_p12 = scmp.lt.s32.totalorder %s133_s28, %s133_s28 }
  0x96   :  { %p21679_p11 = scmp.ne.s32.totalorder %s133_s28, %s21678_s7  ;;  %p21684_p13 = scmp.lt.s32.totalorder %s21678_s7, %s21678_s7 }
  0x98   :  { %p21685_p0 = por %p21684_p13, %p21683_p12 }
  0x9a   :  { %p21686_p1 = pnand %p21685_p0, %p21679_p11 }
  0x9c   :  { %21689 = shalt.err (!%p21686_p1)
}
  0x9d   :  { %135 = dma.hbm_to_vmem [thread:$0]  %s22945_s13, 64, %s133_s28, [#allocation15]  }
  0x9e   :  { %s21761_s10 = smov [#allocation17]   ;;  %s21690_s21 = scalar_lea.hbm %s22947_s15, 16 }
  0x9f   :  { %s144_s24 = sshll.u32 %s21761_s10, 4  ;;  %p21691_p2 = scmp.ne.s32.totalorder %s22947_s15, %s21690_s21  ;;  %s145_s24 = int_to_ptr.vmem [resolvable:$true] %s144_s24 }
  0xa0   :  { %p21694_p3 = scmp.lt.u32.totalorder %s21690_s21, %s22947_s15 }
  0xa2   :  { %p21696_p4 = pnand %p21694_p3, %p21691_p2 }
  0xa4   :  { %21699 = shalt.err (!%p21696_p4)
}
  0xa5   :  { %s21700_s18 = scalar_lea.vmem %s145_s24, 16  ;;  %s21704_s13 = scalar_lea.vmem %s145_s24, 32 }
  0xa6   :  { %p21701_p5 = scmp.ne.s32.totalorder %s145_s24, %s21700_s18  ;;  %p21705_p6 = scmp.lt.s32.totalorder %s145_s24, %s145_s24 }
  0xa7   :  { %p21706_p7 = scmp.lt.s32.totalorder %s21704_s13, %s21700_s18 }
  0xa9   :  { %p21707_p8 = por %p21706_p7, %p21705_p6 }
  0xab   :  { %p21708_p9 = pnand %p21707_p8, %p21701_p5 }
  0xad   :  { %21711 = shalt.err (!%p21708_p9)
}
  0xae   :  { %147 = dma.hbm_to_vmem [thread:$0]  %s22947_s15, 16, %s145_s24, [#allocation18]  }
  0xaf   :  { %21734 = dma.done.wait [#allocation3], 16  }
  0xb0   :  { %21735 = vsyncadd [#allocation3], 4294967280 }
  0xb1   :  { %21736 = dma.done.wait [#allocation6], 6864  }
  0xb2   :  { %21737 = vsyncadd [#allocation6], 4294960432 }
  0xb3   :  { %21738 = dma.done.wait [#allocation9], 173264  }
  0xb4   :  { %21739 = vsyncadd [#allocation9], 4294794032 }
  0xb5   :  { %21740 = dma.done.wait [#allocation12], 53312  }
  0xb6   :  { %21741 = vsyncadd [#allocation12], 4294913984 }
  0xb7   :  { %21742 = dma.done.wait [#allocation15], 4160  }
  0xb8   :  { %21743 = vsyncadd [#allocation15], 4294963136 }
  0xb9   :  { %21744 = dma.done.wait [#allocation18], 16  }
  0xba   :  { %21745 = vsyncadd [#allocation18], 4294967280  ;;  %v18692_v0 = vld [vmem:[%s22936_s4] sm:$0xff]   ;;  %v18693_v1 = vld [vmem:[%s22936_s4 + $0x8] sm:$0xff]   ;;  %s22953_s7 = sld [smem:[#allocation27_spill]]  ;;  %vm1228_vm0 = vcmask 523264  }
  0xbb   :  { %18349 = vmatprep.subr.bf16.mxu0 %v18692_v0  ;;  %v18694_v2 = vld [vmem:[%s22936_s4 + $0x10] sm:$0xff]   ;;  %v18695_v3 = vld [vmem:[%s22936_s4 + $0x18] sm:$0xff]   ;;  %v18696_v7 = vld [vmem:[%s22936_s4 + $0x20] sm:$0xff]   ;;  %vm21765_vm1 = vmmov 0   ;;  %vm15045_vm2 = vcmask 130048   ;;  %vm16073_vm3 = vcmask 25600  }
  0xbc   :  { %18350 = vmatpush3.bf16.msra.mxu0 %v18692_v0  ;;  %v18697_v8 = vld [vmem:[%s22936_s4 + $0x28] sm:$0xff]   ;;  %v18698_v9 = vld [vmem:[%s22936_s4 + $0x30] sm:$0xff]   ;;  %v18699_v10 = vld [vmem:[%s22936_s4 + $0x38] sm:$0xff]  }
  0xbd   :  { %18351 = vmatprep.subr.bf16.mxu0 %v18693_v1 }
  0xc0   :  { %18352 = vmatpush3.bf16.msra.mxu0 %v18693_v1  ;;  %v179_v4 = vld [vmem:[%s22953_s7] sm:$0xff]  ;;  %v180_v5 = vld [vmem:[%s22953_s7 + $0x8] sm:$0xff]  ;;  %v181_v11 = vld [vmem:[%s22953_s7 + $0x10] sm:$0xff] }
  0xc1   :  { %18353 = vmatprep.subr.bf16.mxu0 %v18694_v2  ;;  %v259_v6 = vpack.c.bf16 %v180_v5, %v179_v4  ;;  %v182_v12 = vld [vmem:[%s22953_s7 + $0x18] sm:$0xff]  ;;  %v183_v13 = vld [vmem:[%s22953_s7 + $0x20] sm:$0xff]  ;;  %v184_v14 = vld [vmem:[%s22953_s7 + $0x28] sm:$0xff] }
  0xc2   :  { %v260_v15 = vpack.c.bf16 %v182_v12, %v181_v11  ;;  %v261_v16 = vpack.c.bf16 %v184_v14, %v183_v13  ;;  %v185_v17 = vld [vmem:[%s22953_s7 + $0x30] sm:$0xff]  ;;  %v186_v18 = vld [vmem:[%s22953_s7 + $0x38] sm:$0xff]  ;;  %v187_v19 = vld [vmem:[%s22953_s7 + $0x40] sm:$0xff] }
  0xc3   :  { %18365 = vmatprep.mubr.bf16.mxu0 %v259_v6  ;;  %v188_v20 = vld [vmem:[%s22953_s7 + $0x48] sm:$0xff]  ;;  %v262_v21 = vpack.c.bf16 %v186_v18, %v185_v17  ;;  %v189_v23 = vld [vmem:[%s22953_s7 + $0x50] sm:$0xff]  ;;  %v190_v24 = vld [vmem:[%s22953_s7 + $0x58] sm:$0xff] }
  0xc4   :  { %18354 = vmatpush3.bf16.msra.mxu0 %v18694_v2  ;;  %v263_v22 = vpack.c.bf16 %v188_v20, %v187_v19  ;;  %v191_v25 = vld [vmem:[%s22953_s7 + $0x60] sm:$0xff]  ;;  %v192_v26 = vld [vmem:[%s22953_s7 + $0x68] sm:$0xff]  ;;  %v264_v27 = vpack.c.bf16 %v190_v24, %v189_v23  ;;  %v193_v29 = vld [vmem:[%s22953_s7 + $0x70] sm:$0xff] }
  0xc5   :  { %18355 = vmatprep.subr.bf16.mxu0 %v18695_v3  ;;  %v265_v28 = vpack.c.bf16 %v192_v26, %v191_v25  ;;  %v194_v30 = vld [vmem:[%s22953_s7 + $0x78] sm:$0xff]  ;;  %v195_v31 = vld [vmem:[%s22953_s7 + $0x80] sm:$0xff]  ;;  %v196_v32 = vld [vmem:[%s22953_s7 + $0x88] sm:$0xff] }
  0xc6   :  { %v266_v33 = vpack.c.bf16 %v194_v30, %v193_v29  ;;  %v267_v34 = vpack.c.bf16 %v196_v32, %v195_v31  ;;  %v197_v35 = vld [vmem:[%s22953_s7 + $0x90] sm:$0xff]  ;;  %v198_v36 = vld [vmem:[%s22953_s7 + $0x98] sm:$0xff]  ;;  %v199_v37 = vld [vmem:[%s22953_s7 + $0xa0] sm:$0xff] }
  0xc7   :  { %v200_v38 = vld [vmem:[%s22953_s7 + $0xa8] sm:$0xff]  ;;  %v268_v39 = vpack.c.bf16 %v198_v36, %v197_v35  ;;  %v201_v41 = vld [vmem:[%s22953_s7 + $0xb0] sm:$0xff]  ;;  %v202_v42 = vld [vmem:[%s22953_s7 + $0xb8] sm:$0xff] }
  0xc8   :  { %18356 = vmatpush3.bf16.msra.mxu0 %v18695_v3  ;;  %v269_v40 = vpack.c.bf16 %v200_v38, %v199_v37  ;;  %v203_v43 = vld [vmem:[%s22953_s7 + $0xc0] sm:$0xff]  ;;  %v204_v44 = vld [vmem:[%s22953_s7 + $0xc8] sm:$0xff]  ;;  %v270_v45 = vpack.c.bf16 %v202_v42, %v201_v41  ;;  %v205_v47 = vld [vmem:[%s22953_s7 + $0xd0] sm:$0xff]  ;;  %v705_v42 = vlaneseq }
  0xc9   :  { %18357 = vmatprep.subr.bf16.mxu0 %v18696_v7  ;;  %v271_v46 = vpack.c.bf16 %v204_v44, %v203_v43  ;;  %v206_v48 = vld [vmem:[%s22953_s7 + $0xd8] sm:$0xff]  ;;  %v207_v49 = vld [vmem:[%s22953_s7 + $0xe0] sm:$0xff]  ;;  %v208_v50 = vld [vmem:[%s22953_s7 + $0xe8] sm:$0xff] }
  0xca   :  { %v272_v51 = vpack.c.bf16 %v206_v48, %v205_v47  ;;  %v273_v52 = vpack.c.bf16 %v208_v50, %v207_v49  ;;  %v209_v53 = vld [vmem:[%s22953_s7 + $0xf0] sm:$0xff]  ;;  %v210_v54 = vld [vmem:[%s22953_s7 + $0xf8] sm:$0xff]  ;;  %v211_v55 = vld [vmem:[%s22953_s7 + $0x100] sm:$0xff]  ;;  %v22188_v44 = vshrl.u32 %v705_v42, 7 }
  0xcb   :  { %v212_v56 = vld [vmem:[%s22953_s7 + $0x108] sm:$0xff]  ;;  %v274_v57 = vpack.c.bf16 %v210_v54, %v209_v53  ;;  %v213_v59 = vld [vmem:[%s22953_s7 + $0x110] sm:$0xff]  ;;  %v214_v60 = vld [vmem:[%s22953_s7 + $0x118] sm:$0xff] }
  0xcc   :  { %18358 = vmatpush3.bf16.msra.mxu0 %v18696_v7  ;;  %v275_v58 = vpack.c.bf16 %v212_v56, %v211_v55  ;;  %v215_v61 = vld [vmem:[%s22953_s7 + $0x120] sm:$0xff]  ;;  %v216_v62 = vld [vmem:[%s22953_s7 + $0x128] sm:$0xff]  ;;  %v276_v63 = vpack.c.bf16 %v214_v60, %v213_v59  ;;  %v217_v1 = vld [vmem:[%s22953_s7 + $0x130] sm:$0xff] }
  0xcd   :  { %18359 = vmatprep.subr.bf16.mxu0 %v18697_v8  ;;  %v277_v0 = vpack.c.bf16 %v216_v62, %v215_v61  ;;  %v218_v2 = vld [vmem:[%s22953_s7 + $0x138] sm:$0xff]  ;;  %v219_v3 = vld [vmem:[%s22953_s7 + $0x140] sm:$0xff]  ;;  %v220_v4 = vld [vmem:[%s22953_s7 + $0x148] sm:$0xff] }
  0xce   :  { %v278_v5 = vpack.c.bf16 %v218_v2, %v217_v1  ;;  %v279_v6 = vpack.c.bf16 %v220_v4, %v219_v3  ;;  %v221_v7 = vld [vmem:[%s22953_s7 + $0x150] sm:$0xff]  ;;  %v226_v14 = vld [vmem:[%s22953_s7 + $0x178] sm:$0xff]  ;;  %v22198_v50 = vld [vmem:[#allocation2] ss:$0 sm:$0xff] }
  0xcf   :  { %v225_v13 = vld [vmem:[%s22953_s7 + $0x170] sm:$0xff]  ;;  %v230_v20 = vld [vmem:[%s22953_s7 + $0x198] sm:$0xff] }
  0xd0   :  { %18360 = vmatpush3.bf16.msra.mxu0 %v18697_v8  ;;  %v222_v8 = vld [vmem:[%s22953_s7 + $0x158] sm:$0xff]  ;;  %v282_v17 = vpack.c.bf16 %v226_v14, %v225_v13  ;;  %v229_v19 = vld [vmem:[%s22953_s7 + $0x190] sm:$0xff] }
  0xd1   :  { %18361 = vmatprep.subr.bf16.mxu0 %v18698_v9  ;;  %v280_v11 = vpack.c.bf16 %v222_v8, %v221_v7  ;;  %v284_v23 = vpack.c.bf16 %v230_v20, %v229_v19  ;;  %v233_v25 = vld [vmem:[%s22953_s7 + $0x1b0] sm:$0xff]  ;;  %v234_v26 = vld [vmem:[%s22953_s7 + $0x1b8] sm:$0xff] }
  0xd2   :  { %v286_v29 = vpack.c.bf16 %v234_v26, %v233_v25  ;;  %v237_v31 = vld [vmem:[%s22953_s7 + $0x1d0] sm:$0xff]  ;;  %v238_v32 = vld [vmem:[%s22953_s7 + $0x1d8] sm:$0xff] }
  0xd3   :  { %v288_v35 = vpack.c.bf16 %v238_v32, %v237_v31  ;;  %v241_v37 = vld [vmem:[%s22953_s7 + $0x1f0] sm:$0xff]  ;;  %v242_v38 = vld [vmem:[%s22953_s7 + $0x1f8] sm:$0xff] }
  0xd4   :  { %18362 = vmatpush3.bf16.msra.mxu0 %v18698_v9  ;;  %v223_v9 = vld [vmem:[%s22953_s7 + $0x160] sm:$0xff] }
  0xd5   :  { %18363 = vmatprep.subr.bf16.mxu0 %v18699_v10 }
  0xd8   :  { %18364 = vmatpush3.bf16.msra.mxu0 %v18699_v10  ;;  %v224_v10 = vld [vmem:[%s22953_s7 + $0x168] sm:$0xff] }
  0xd9   :  { %v281_v12 = vpack.c.bf16 %v224_v10, %v223_v9 }
  0xdb   :  { %18366 = vmatmul.mubr.bf16.vlgmr.msra.gmra.mrb[0].mxu0 %v260_v15  ;;  %v227_v15 = vld [vmem:[%s22953_s7 + $0x180] sm:$0xff] }
  0xdc   :  { %18369 = vmatprep.mubr.bf16.mxu0 %v261_v16  ;;  %v228_v16 = vld [vmem:[%s22953_s7 + $0x188] sm:$0xff] }
  0xdd   :  { %v283_v18 = vpack.c.bf16 %v228_v16, %v227_v15 }
  0xe3   :  { %18370 = vmatmul.mubr.bf16.gmra.mrb[4].mxu0 %v262_v21  ;;  %v231_v21 = vld [vmem:[%s22953_s7 + $0x1a0] sm:$0xff] }
  0xe4   :  { %18373 = vmatprep.mubr.bf16.mxu0 %v263_v22  ;;  %v232_v22 = vld [vmem:[%s22953_s7 + $0x1a8] sm:$0xff] }
  0xe5   :  { %v285_v24 = vpack.c.bf16 %v232_v22, %v231_v21 }
  0xeb   :  { %18374 = vmatmul.mubr.bf16.gmra.mrb[8].mxu0 %v264_v27  ;;  %v235_v27 = vld [vmem:[%s22953_s7 + $0x1c0] sm:$0xff] }
  0xec   :  { %18377 = vmatprep.mubr.bf16.mxu0 %v265_v28  ;;  %v236_v28 = vld [vmem:[%s22953_s7 + $0x1c8] sm:$0xff] }
  0xed   :  { %v287_v30 = vpack.c.bf16 %v236_v28, %v235_v27 }
  0xf3   :  { %18378 = vmatmul.mubr.bf16.gmra.mrb[12].mxu0 %v266_v33  ;;  %v239_v33 = vld [vmem:[%s22953_s7 + $0x1e0] sm:$0xff] }
  0xf4   :  { %18381 = vmatprep.mubr.bf16.mxu0 %v267_v34  ;;  %v240_v34 = vld [vmem:[%s22953_s7 + $0x1e8] sm:$0xff] }
  0xf5   :  { %v289_v36 = vpack.c.bf16 %v240_v34, %v239_v33 }
  0xfb   :  { %18382 = vmatmul.mubr.bf16.gmra.mrb[16].mxu0 %v268_v39  ;;  %v290_v39 = vpack.c.bf16 %v242_v38, %v241_v37 }
  0xfc   :  { %18385 = vmatprep.mubr.bf16.mxu0 %v269_v40  ;;  %v21762_v40 = vmov 1983009808  }
  0xfd   :  { %v703_v41 = vunpack.c.l.s4 %v21762_v40 }
  0xff   :  { %v704_v43 = vunpack.c.0.s8 %v703_v41 }
 0x103   :  { %18386 = vmatmul.mubr.bf16.gmra.mrb[20].mxu0 %v270_v45  ;;  %v707_v45 = vsub.s32 %v704_v43, %v22188_v44 }
 0x104   :  { %18389 = vmatprep.mubr.bf16.mxu0 %v271_v46  ;;  %v699_v46 = vld [vmem:[%s22934_s2] sm:$0xff] }
 0x105   :  { %v22194_v47 = vrot.slane %v699_v46, %v707_v45 }
 0x107   :  { %v716_v48 = vcombine.high %v22194_v47, %v22194_v47 }
 0x109   :  { %v723_v49 = vpack.c.bf16 %v716_v48, %v716_v48 }
 0x10b   :  { %18390 = vmatmul.mubr.bf16.gmra.mrb[24].mxu0 %v272_v51  ;;  %790 = vmatprep.mubr.bf16.mxu1 %v723_v49  ;;  %v701_v51 = vcombine.high %v699_v46, %v699_v46 }
 0x10c   :  { %18393 = vmatprep.mubr.bf16.mxu0 %v273_v52 }
 0x10d   :  { %v22203_v59 = vrot.slane %v701_v51, %v707_v45 }
 0x113   :  { %18394 = vmatmul.mubr.bf16.gmra.mrb[28].mxu0 %v274_v57 }
 0x114   :  { %18397 = vmatprep.mubr.bf16.mxu0 %v275_v58 }
 0x11b   :  { %18398 = vmatmul.mubr.bf16.gmra.mrb[32].mxu0 %v276_v63 }
 0x11c   :  { %18401 = vmatprep.mubr.bf16.mxu0 %v277_v0 }
 0x123   :  { %18402 = vmatmul.mubr.bf16.gmra.mrb[36].mxu0 %v278_v5 }
 0x124   :  { %18405 = vmatprep.mubr.bf16.mxu0 %v279_v6 }
 0x12b   :  { %18406 = vmatmul.mubr.bf16.gmra.mrb[40].mxu0 %v280_v11 }
 0x12c   :  { %18409 = vmatprep.mubr.bf16.mxu0 %v281_v12 }
 0x133   :  { %18410 = vmatmul.mubr.bf16.gmra.mrb[44].mxu0 %v282_v17 }
 0x134   :  { %18413 = vmatprep.mubr.bf16.mxu0 %v283_v18 }
 0x13b   :  { %18414 = vmatmul.mubr.bf16.gmra.mrb[48].mxu0 %v284_v23 }
 0x13c   :  { %18417 = vmatprep.mubr.bf16.mxu0 %v285_v24 }
 0x143   :  { %18418 = vmatmul.mubr.bf16.gmra.mrb[52].mxu0 %v286_v29 }
 0x144   :  { %18421 = vmatprep.mubr.bf16.mxu0 %v287_v30 }
 0x14b   :  { %18422 = vmatmul.mubr.bf16.gmra.mrb[56].mxu0 %v288_v35 }
 0x14c   :  { %18425 = vmatprep.mubr.bf16.mxu0 %v289_v36 }
 0x153   :  { %18426 = vmatmul.mubr.bf16.gmra.mrb[60].mxu0 %v290_v39 }
 0x1ae   :  { %v18367_v52 = vpop.f32.mrb[0].mxu0 }
 0x1af   :  { %v389_v53 = vadd.f32 %v18367_v52, %v22198_v50  ;;  %v380_v54 = vpop.f32.mrb[1].mxu0 }
 0x1b0   :  { %v381_v55 = vadd.f32 %v22198_v50, %v380_v54  ;;  %v18368_v56 = vpop.f32.mrb[2].mxu0 }
 0x1b1   :  { %v392_v57 = vadd.f32 %v18368_v56, %v22198_v50  ;;  %v383_v58 = vpop.f32.mrb[3].mxu0  ;;  %v637_v61 = vmax.f32 %v389_v53, 0.0 }
 0x1b2   :  { %v384_v60 = vadd.f32 %v22198_v50, %v383_v58  ;;  %v635_v63 = vmax.f32 %v381_v55, 0.0 }
 0x1b3   :  { %v638_v62 = vmax.f32 %v392_v57, 0.0 }
 0x1b4   :  { %v636_v0 = vmax.f32 %v384_v60, 0.0 }
 0x1b5   :  { %v22206_v1 = vpack.c.bf16 %v638_v62, %v637_v61 }
 0x1b6   :  { %v18371_v2 = vpop.f32.mrb[4].mxu0  ;;  %v22208_v3 = vpack.c.bf16 %v636_v0, %v635_v63 }
 0x1b7   :  { %v405_v4 = vadd.f32 %v18371_v2, %v22198_v50  ;;  %v396_v5 = vpop.f32.mrb[5].mxu0 }
 0x1b8   :  { %v397_v6 = vadd.f32 %v22198_v50, %v396_v5  ;;  %v18372_v7 = vpop.f32.mrb[6].mxu0 }
 0x1b9   :  { %v408_v8 = vadd.f32 %v18372_v7, %v22198_v50  ;;  %v399_v9 = vpop.f32.mrb[7].mxu0  ;;  %v641_v11 = vmax.f32 %v405_v4, 0.0 }
 0x1ba   :  { %v400_v10 = vadd.f32 %v22198_v50, %v399_v9  ;;  %v639_v13 = vmax.f32 %v397_v6, 0.0 }
 0x1bb   :  { %v642_v12 = vmax.f32 %v408_v8, 0.0 }
 0x1bc   :  { %v640_v14 = vmax.f32 %v400_v10, 0.0 }
 0x1bd   :  { %v22214_v15 = vpack.c.bf16 %v642_v12, %v641_v11 }
 0x1be   :  { %v22216_v16 = vpack.c.bf16 %v640_v14, %v639_v13  ;;  %v18375_v17 = vpop.f32.mrb[8].mxu0 }
 0x1bf   :  { %v421_v18 = vadd.f32 %v18375_v17, %v22198_v50  ;;  %v412_v19 = vpop.f32.mrb[9].mxu0 }
 0x1c0   :  { %v413_v20 = vadd.f32 %v22198_v50, %v412_v19  ;;  %v18376_v21 = vpop.f32.mrb[10].mxu0 }
 0x1c1   :  { %v424_v22 = vadd.f32 %v18376_v21, %v22198_v50  ;;  %v415_v23 = vpop.f32.mrb[11].mxu0  ;;  %v645_v25 = vmax.f32 %v421_v18, 0.0 }
 0x1c2   :  { %v416_v24 = vadd.f32 %v22198_v50, %v415_v23  ;;  %v643_v27 = vmax.f32 %v413_v20, 0.0 }
 0x1c3   :  { %v646_v26 = vmax.f32 %v424_v22, 0.0 }
 0x1c4   :  { %v644_v28 = vmax.f32 %v416_v24, 0.0 }
 0x1c5   :  { %v22222_v29 = vpack.c.bf16 %v646_v26, %v645_v25 }
 0x1c6   :  { %v22224_v30 = vpack.c.bf16 %v644_v28, %v643_v27  ;;  %v18379_v31 = vpop.f32.mrb[12].mxu0 }
 0x1c7   :  { %v437_v32 = vadd.f32 %v18379_v31, %v22198_v50  ;;  %v428_v33 = vpop.f32.mrb[13].mxu0 }
 0x1c8   :  { %v429_v34 = vadd.f32 %v22198_v50, %v428_v33  ;;  %v18380_v35 = vpop.f32.mrb[14].mxu0 }
 0x1c9   :  { %v440_v36 = vadd.f32 %v18380_v35, %v22198_v50  ;;  %v431_v37 = vpop.f32.mrb[15].mxu0  ;;  %v649_v39 = vmax.f32 %v437_v32, 0.0 }
 0x1ca   :  { %v432_v38 = vadd.f32 %v22198_v50, %v431_v37  ;;  %v647_v41 = vmax.f32 %v429_v34, 0.0 }
 0x1cb   :  { %v650_v40 = vmax.f32 %v440_v36, 0.0 }
 0x1cc   :  { %v648_v42 = vmax.f32 %v432_v38, 0.0 }
 0x1cd   :  { %v22230_v43 = vpack.c.bf16 %v650_v40, %v649_v39 }
 0x1ce   :  { %v22232_v45 = vpack.c.bf16 %v648_v42, %v647_v41  ;;  %v18383_v46 = vpop.f32.mrb[16].mxu0 }
 0x1cf   :  { %v453_v48 = vadd.f32 %v18383_v46, %v22198_v50  ;;  %v444_v49 = vpop.f32.mrb[17].mxu0 }
 0x1d0   :  { %v445_v51 = vadd.f32 %v22198_v50, %v444_v49  ;;  %v18384_v52 = vpop.f32.mrb[18].mxu0 }
 0x1d1   :  { %v456_v53 = vadd.f32 %v18384_v52, %v22198_v50  ;;  %v447_v54 = vpop.f32.mrb[19].mxu0  ;;  %v653_v56 = vmax.f32 %v453_v48, 0.0 }
 0x1d2   :  { %v448_v55 = vadd.f32 %v22198_v50, %v447_v54  ;;  %v651_v58 = vmax.f32 %v445_v51, 0.0  ;;  %v717_v54 = vcombine.high %v22203_v59, %v22203_v59 }
 0x1d3   :  { %v654_v57 = vmax.f32 %v456_v53, 0.0 }
 0x1d4   :  { %v652_v60 = vmax.f32 %v448_v55, 0.0 }
 0x1d5   :  { %v735_v61 = vpack.c.bf16 %v654_v57, %v653_v56 }
 0x1d6   :  { %v18387_v62 = vpop.f32.mrb[20].mxu0  ;;  %v734_v63 = vpack.c.bf16 %v652_v60, %v651_v58  ;;  %v722_v60 = vpack.c.bf16 %v22194_v47, %v22194_v47 }
 0x1d7   :  { %v469_v0 = vadd.f32 %v18387_v62, %v22198_v50  ;;  %v460_v2 = vpop.f32.mrb[21].mxu0  ;;  %v725_v62 = vpack.c.bf16 %v717_v54, %v717_v54 }
 0x1d8   :  { %v461_v4 = vadd.f32 %v22198_v50, %v460_v2  ;;  %v18388_v5 = vpop.f32.mrb[22].mxu0  ;;  %18069 = vmatprep.subr.bf16.mxu1 %v734_v63 }
 0x1d9   :  { %v472_v6 = vadd.f32 %v18388_v5, %v22198_v50  ;;  %v463_v7 = vpop.f32.mrb[23].mxu0  ;;  %18070 = vmatpush3.bf16.msra.mxu1 %v22208_v3  ;;  %v657_v9 = vmax.f32 %v469_v0, 0.0 }
 0x1da   :  { %v464_v8 = vadd.f32 %v22198_v50, %v463_v7  ;;  %18071 = vmatprep.subr.bf16.mxu1 %v735_v61  ;;  %v655_v11 = vmax.f32 %v461_v4, 0.0 }
 0x1db   :  { %v658_v10 = vmax.f32 %v472_v6, 0.0 }
 0x1dc   :  { %v656_v12 = vmax.f32 %v464_v8, 0.0 }
 0x1dd   :  { %v737_v13 = vpack.c.bf16 %v658_v10, %v657_v9  ;;  %18072 = vmatpush3.bf16.msra.mxu1 %v22206_v1 }
 0x1de   :  { %v736_v14 = vpack.c.bf16 %v656_v12, %v655_v11  ;;  %v18391_v17 = vpop.f32.mrb[24].mxu0 }
 0x1df   :  { %v485_v18 = vadd.f32 %v18391_v17, %v22198_v50  ;;  %v476_v19 = vpop.f32.mrb[25].mxu0 }
 0x1e0   :  { %v477_v20 = vadd.f32 %v22198_v50, %v476_v19  ;;  %v18392_v21 = vpop.f32.mrb[26].mxu0  ;;  %18073 = vmatprep.subr.bf16.mxu1 %v736_v14 }
 0x1e1   :  { %v488_v3 = vadd.f32 %v18392_v21, %v22198_v50  ;;  %v479_v22 = vpop.f32.mrb[27].mxu0  ;;  %18074 = vmatpush3.bf16.msra.mxu1 %v22216_v16  ;;  %v661_v24 = vmax.f32 %v485_v18, 0.0 }
 0x1e2   :  { %v480_v23 = vadd.f32 %v22198_v50, %v479_v22  ;;  %18075 = vmatprep.subr.bf16.mxu1 %v737_v13  ;;  %v659_v1 = vmax.f32 %v477_v20, 0.0 }
 0x1e3   :  { %v662_v25 = vmax.f32 %v488_v3, 0.0 }
 0x1e4   :  { %v660_v26 = vmax.f32 %v480_v23, 0.0 }
 0x1e5   :  { %v739_v27 = vpack.c.bf16 %v662_v25, %v661_v24  ;;  %18076 = vmatpush3.bf16.msra.mxu1 %v22214_v15 }
 0x1e6   :  { %v738_v28 = vpack.c.bf16 %v660_v26, %v659_v1  ;;  %v18395_v31 = vpop.f32.mrb[28].mxu0 }
 0x1e7   :  { %v501_v32 = vadd.f32 %v18395_v31, %v22198_v50  ;;  %v492_v33 = vpop.f32.mrb[29].mxu0 }
 0x1e8   :  { %v493_v34 = vadd.f32 %v22198_v50, %v492_v33  ;;  %v18396_v35 = vpop.f32.mrb[30].mxu0  ;;  %18077 = vmatprep.subr.bf16.mxu1 %v738_v28 }
 0x1e9   :  { %v504_v16 = vadd.f32 %v18396_v35, %v22198_v50  ;;  %v495_v36 = vpop.f32.mrb[31].mxu0  ;;  %18078 = vmatpush3.bf16.msra.mxu1 %v22224_v30  ;;  %v665_v38 = vmax.f32 %v501_v32, 0.0 }
 0x1ea   :  { %v496_v37 = vadd.f32 %v22198_v50, %v495_v36  ;;  %18079 = vmatprep.subr.bf16.mxu1 %v739_v27  ;;  %v663_v15 = vmax.f32 %v493_v34, 0.0 }
 0x1eb   :  { %v666_v39 = vmax.f32 %v504_v16, 0.0 }
 0x1ec   :  { %v664_v40 = vmax.f32 %v496_v37, 0.0 }
 0x1ed   :  { %v741_v41 = vpack.c.bf16 %v666_v39, %v665_v38  ;;  %18080 = vmatpush3.bf16.msra.mxu1 %v22222_v29 }
 0x1ee   :  { %v740_v42 = vpack.c.bf16 %v664_v40, %v663_v15  ;;  %v18399_v46 = vpop.f32.mrb[32].mxu0 }
 0x1ef   :  { %v517_v48 = vadd.f32 %v18399_v46, %v22198_v50  ;;  %v508_v49 = vpop.f32.mrb[33].mxu0 }
 0x1f0   :  { %v509_v51 = vadd.f32 %v22198_v50, %v508_v49  ;;  %v18400_v52 = vpop.f32.mrb[34].mxu0  ;;  %18081 = vmatprep.subr.bf16.mxu1 %v740_v42 }
 0x1f1   :  { %v520_v30 = vadd.f32 %v18400_v52, %v22198_v50  ;;  %v511_v53 = vpop.f32.mrb[35].mxu0  ;;  %18082 = vmatpush3.bf16.msra.mxu1 %v22232_v45  ;;  %v669_v29 = vmax.f32 %v517_v48, 0.0 }
 0x1f2   :  { %v512_v55 = vadd.f32 %v22198_v50, %v511_v53  ;;  %18083 = vmatprep.subr.bf16.mxu1 %v741_v41  ;;  %v667_v57 = vmax.f32 %v509_v51, 0.0 }
 0x1f3   :  { %v670_v56 = vmax.f32 %v520_v30, 0.0 }
 0x1f4   :  { %v668_v58 = vmax.f32 %v512_v55, 0.0 }
 0x1f5   :  { %v22265_v61 = vpack.c.bf16 %v670_v56, %v669_v29  ;;  %18084 = vmatpush3.bf16.msra.mxu1 %v22230_v43 }
 0x1f6   :  { %v22268_v63 = vpack.c.bf16 %v668_v58, %v667_v57  ;;  %v18403_v45 = vpop.f32.mrb[36].mxu0 }
 0x1f7   :  { %v533_v0 = vadd.f32 %v18403_v45, %v22198_v50  ;;  %v524_v2 = vpop.f32.mrb[37].mxu0 }
 0x1f8   :  { %v525_v4 = vadd.f32 %v22198_v50, %v524_v2  ;;  %v18404_v5 = vpop.f32.mrb[38].mxu0  ;;  %791 = vmatmul.mubr.bf16.vlgmr.msra.gmra.mrb[0].mxu1 %v722_v60  ;;  %v21489_v60 = vld [vmem:[#allocation2] ss:$0 sm:$0xff] }
 0x1f9   :  { %v536_v6 = vadd.f32 %v18404_v5, %v22198_v50  ;;  %v527_v7 = vpop.f32.mrb[39].mxu0  ;;  %830 = vmatprep.mubr.bf16.mxu1 %v725_v62  ;;  %v673_v8 = vmax.f32 %v533_v0, 0.0 }
 0x1fa   :  { %v528_v47 = vadd.f32 %v22198_v50, %v527_v7  ;;  %v671_v43 = vmax.f32 %v525_v4, 0.0 }
 0x1fb   :  { %v674_v9 = vmax.f32 %v536_v6, 0.0 }
 0x1fc   :  { %v672_v10 = vmax.f32 %v528_v47, 0.0 }
 0x1fd   :  { %v22274_v11 = vpack.c.bf16 %v674_v9, %v673_v8 }
 0x1fe   :  { %v22276_v12 = vpack.c.bf16 %v672_v10, %v671_v43  ;;  %v18407_v13 = vpop.f32.mrb[40].mxu0 }
 0x1ff   :  { %v549_v14 = vadd.f32 %v18407_v13, %v22198_v50  ;;  %v540_v17 = vpop.f32.mrb[41].mxu0 }
 0x200   :  { %v541_v18 = vadd.f32 %v22198_v50, %v540_v17  ;;  %v18408_v19 = vpop.f32.mrb[42].mxu0 }
 0x201   :  { %v552_v20 = vadd.f32 %v18408_v19, %v22198_v50  ;;  %v543_v21 = vpop.f32.mrb[43].mxu0  ;;  %v677_v22 = vmax.f32 %v549_v14, 0.0 }
 0x202   :  { %v544_v3 = vadd.f32 %v22198_v50, %v543_v21  ;;  %v675_v24 = vmax.f32 %v541_v18, 0.0 }
 0x203   :  { %v678_v23 = vmax.f32 %v552_v20, 0.0 }
 0x204   :  { %v676_v25 = vmax.f32 %v544_v3, 0.0 }
 0x205   :  { %v22282_v1 = vpack.c.bf16 %v678_v23, %v677_v22 }
 0x206   :  { %v22284_v26 = vpack.c.bf16 %v676_v25, %v675_v24  ;;  %v18411_v27 = vpop.f32.mrb[44].mxu0 }
 0x207   :  { %v565_v28 = vadd.f32 %v18411_v27, %v22198_v50  ;;  %v556_v31 = vpop.f32.mrb[45].mxu0 }
 0x208   :  { %v557_v32 = vadd.f32 %v22198_v50, %v556_v31  ;;  %v18412_v33 = vpop.f32.mrb[46].mxu0 }
 0x209   :  { %v568_v34 = vadd.f32 %v18412_v33, %v22198_v50  ;;  %v559_v35 = vpop.f32.mrb[47].mxu0  ;;  %v681_v36 = vmax.f32 %v565_v28, 0.0 }
 0x20a   :  { %v560_v16 = vadd.f32 %v22198_v50, %v559_v35  ;;  %v679_v38 = vmax.f32 %v557_v32, 0.0 }
 0x20b   :  { %v682_v37 = vmax.f32 %v568_v34, 0.0 }
 0x20c   :  { %v680_v39 = vmax.f32 %v560_v16, 0.0 }
 0x20d   :  { %v22290_v15 = vpack.c.bf16 %v682_v37, %v681_v36 }
 0x20e   :  { %v22292_v40 = vpack.c.bf16 %v680_v39, %v679_v38  ;;  %v18415_v41 = vpop.f32.mrb[48].mxu0  ;;  %v724_v39 = vpack.c.bf16 %v22203_v59, %v22203_v59  ;;  %v18715_v59 = vld [vmem:[#allocation5 + $0xc] ss:$52 sps:$4 sm:$0xff]  }
 0x20f   :  { %v581_v42 = vadd.f32 %v18415_v41, %v22198_v50  ;;  %v572_v46 = vpop.f32.mrb[49].mxu0  ;;  %v18703_v41 = vld [vmem:[#allocation5 + $0x4] ss:$52 sps:$4 sm:$0xff]  }
 0x210   :  { %v573_v48 = vadd.f32 %v22198_v50, %v572_v46  ;;  %v18416_v49 = vpop.f32.mrb[50].mxu0  ;;  %v18706_v46 = vld [vmem:[#allocation5 + $0x6c] ss:$52 sps:$4 sm:$0xff]  }
 0x211   :  { %v584_v51 = vadd.f32 %v18416_v49, %v22198_v50  ;;  %v575_v52 = vpop.f32.mrb[51].mxu0  ;;  %v685_v53 = vmax.f32 %v581_v42, 0.0  ;;  %v18704_v42 = vld [vmem:[#allocation5 + $0x68] ss:$52 sps:$4 sm:$0xff]   ;;  %v18710_v49 = vld [vmem:[#allocation5 + $0x138] ss:$52 sps:$4 sm:$0xff]  }
 0x212   :  { %v576_v30 = vadd.f32 %v22198_v50, %v575_v52  ;;  %v683_v55 = vmax.f32 %v573_v48, 0.0  ;;  %v18709_v48 = vld [vmem:[#allocation5 + $0xd4] ss:$52 sps:$4 sm:$0xff]  }
 0x213   :  { %v686_v54 = vmax.f32 %v584_v51, 0.0  ;;  %v21763_v51 = vmov 0  }
 0x214   :  { %v684_v29 = vmax.f32 %v576_v30, 0.0 }
 0x215   :  { %v751_v56 = vpack.c.bf16 %v686_v54, %v685_v53 }
 0x216   :  { %v750_v57 = vpack.c.bf16 %v684_v29, %v683_v55  ;;  %v18419_v58 = vpop.f32.mrb[52].mxu0  ;;  %v18777_v55 = vld [vmem:[#allocation8] ss:$52 sps:$4 sm:$0xff]   ;;  %v18779_v29 = vld [vmem:[#allocation8 + $0x4] ss:$52 sps:$4 sm:$0xff]  }
 0x217   :  { %v597_v62 = vadd.f32 %v21489_v60, %v18419_v58  ;;  %v588_v45 = vpop.f32.mrb[53].mxu0  ;;  %9933 = vmatprep.subr.bf16.mxu0 %v18779_v29  ;;  %v18791_v58 = vld [vmem:[#allocation8 + $0xd4] ss:$52 sps:$4 sm:$0xff]  }
 0x218   :  { %v589_v0 = vadd.f32 %v21489_v60, %v588_v45  ;;  %v18420_v2 = vpop.f32.mrb[54].mxu0  ;;  %18091 = vmatprep.subr.bf16.mxu1 %v750_v57  ;;  %v18783_v57 = vld [vmem:[#allocation8 + $0x68] ss:$52 sps:$4 sm:$0xff]   ;;  %9934 = vmatpush1.bf16.msra.mxu0 %v18777_v55  ;;  %v18795_v45 = vld [vmem:[#allocation8 + $0x138] ss:$52 sps:$4 sm:$0xff]  }
 0x219   :  { %v600_v4 = vadd.f32 %v21489_v60, %v18420_v2  ;;  %v591_v5 = vpop.f32.mrb[55].mxu0  ;;  %18092 = vmatpush3.bf16.msra.mxu1 %v22268_v63  ;;  %v689_v50 = vmax.f32 %v597_v62, 0.0  ;;  %v18797_v62 = vld [vmem:[#allocation8 + $0x13c] ss:$52 sps:$4 sm:$0xff]   ;;  %v18801_v2 = vld [vmem:[#allocation8 + $0x1a0] ss:$52 sps:$4 sm:$0xff]  }
 0x21a   :  { %v592_v6 = vadd.f32 %v21489_v60, %v591_v5  ;;  %18093 = vmatprep.subr.bf16.mxu1 %v751_v56  ;;  %v687_v47 = vmax.f32 %v589_v0, 0.0  ;;  %v18785_v56 = vld [vmem:[#allocation8 + $0x6c] ss:$52 sps:$4 sm:$0xff]   ;;  %v18803_v0 = vld [vmem:[#allocation8 + $0x1a4] ss:$52 sps:$4 sm:$0xff]  }
 0x21b   :  { %v690_v7 = vmax.f32 %v600_v4, 0.0  ;;  %9935 = vmatprep.subr.bf16.mxu0 %v18785_v56  ;;  %v18809_v4 = vld [vmem:[#allocation8 + $0x20c] ss:$52 sps:$4 sm:$0xff]   ;;  %v18807_v5 = vld [vmem:[#allocation8 + $0x208] ss:$52 sps:$4 sm:$0xff]  }
 0x21c   :  { %v688_v8 = vmax.f32 %v592_v6, 0.0  ;;  %9936 = vmatpush1.bf16.msra.mxu0 %v18783_v57  ;;  %v18815_v6 = vld [vmem:[#allocation8 + $0x274] ss:$52 sps:$4 sm:$0xff]   ;;  %v18760_v56 = vld [vmem:[#allocation5 + $0x15c] ss:$52 sps:$4 sm:$0xff]  }
 0x21d   :  { %v753_v9 = vpack.c.bf16 %v690_v7, %v689_v50  ;;  %18094 = vmatpush3.bf16.msra.mxu1 %v22265_v61  ;;  %9937 = vmatprep.subr.bf16.mxu0 %v18791_v58  ;;  %v18813_v50 = vld [vmem:[#allocation8 + $0x270] ss:$52 sps:$4 sm:$0xff]   ;;  %v18758_v57 = vld [vmem:[#allocation5 + $0x158] ss:$52 sps:$4 sm:$0xff]  }
 0x21e   :  { %v752_v43 = vpack.c.bf16 %v688_v8, %v687_v47  ;;  %v18423_v10 = vpop.f32.mrb[56].mxu0  ;;  %v18821_v8 = vld [vmem:[#allocation8 + $0x2dc] ss:$52 sps:$4 sm:$0xff]   ;;  %v18755_v29 = vld [vmem:[#allocation5 + $0xf0] ss:$52 sps:$4 sm:$0xff]  }
 0x21f   :  { %v613_v13 = vadd.f32 %v21489_v60, %v18423_v10  ;;  %v604_v14 = vpop.f32.mrb[57].mxu0  ;;  %v18819_v10 = vld [vmem:[#allocation8 + $0x2d8] ss:$52 sps:$4 sm:$0xff]   ;;  %v18763_v58 = vld [vmem:[#allocation5 + $0x2c] ss:$52 sps:$4 sm:$0xff]  }
 0x220   :  { %v605_v17 = vadd.f32 %v21489_v60, %v604_v14  ;;  %v18424_v18 = vpop.f32.mrb[58].mxu0  ;;  %18095 = vmatprep.subr.bf16.mxu1 %v752_v43  ;;  %v18713_v14 = vld [vmem:[#allocation5 + $0x8] ss:$52 sps:$4 sm:$0xff]  }
 0x221   :  { %v616_v19 = vadd.f32 %v21489_v60, %v18424_v18  ;;  %v607_v20 = vpop.f32.mrb[59].mxu0  ;;  %18096 = vmatpush3.bf16.msra.mxu1 %v22276_v12  ;;  %v693_v21 = vmax.f32 %v613_v13, 0.0  ;;  %v18718_v18 = vld [vmem:[#allocation5 + $0x74] ss:$52 sps:$4 sm:$0xff]  }
 0x222   :  { %v608_v63 = vadd.f32 %v21489_v60, %v607_v20  ;;  %18097 = vmatprep.subr.bf16.mxu1 %v753_v9  ;;  %v691_v22 = vmax.f32 %v605_v17, 0.0  ;;  %v18757_v55 = vld [vmem:[#allocation5 + $0xf4] ss:$52 sps:$4 sm:$0xff]  }
 0x223   :  { %v694_v3 = vmax.f32 %v616_v19, 0.0  ;;  %v18827_v19 = vld [vmem:[#allocation8 + $0x344] ss:$52 sps:$4 sm:$0xff]  }
 0x224   :  { %v692_v23 = vmax.f32 %v608_v63, 0.0  ;;  %v18825_v63 = vld [vmem:[#allocation8 + $0x340] ss:$52 sps:$4 sm:$0xff]  }
 0x225   :  { %v755_v24 = vpack.c.bf16 %v694_v3, %v693_v21  ;;  %18098 = vmatpush3.bf16.msra.mxu1 %v22274_v11  ;;  %v18716_v21 = vld [vmem:[#allocation5 + $0x70] ss:$52 sps:$4 sm:$0xff]  }
 0x226   :  { %v754_v61 = vpack.c.bf16 %v692_v23, %v691_v22  ;;  %v18427_v25 = vpop.f32.mrb[60].mxu0  ;;  %v18721_v3 = vld [vmem:[#allocation5 + $0xdc] ss:$52 sps:$4 sm:$0xff]   ;;  %v18831_v23 = vld [vmem:[#allocation8 + $0x3a8] ss:$52 sps:$4 sm:$0xff]  }
 0x227   :  { %v629_v27 = vadd.f32 %v21489_v60, %v18427_v25  ;;  %v620_v28 = vpop.f32.mrb[61].mxu0  ;;  %v18833_v22 = vld [vmem:[#allocation8 + $0x3ac] ss:$52 sps:$4 sm:$0xff]   ;;  %v18839_v25 = vld [vmem:[#allocation8 + $0x414] ss:$52 sps:$4 sm:$0xff]  }
 0x228   :  { %v621_v31 = vadd.f32 %v21489_v60, %v620_v28  ;;  %v18428_v32 = vpop.f32.mrb[62].mxu0  ;;  %18099 = vmatprep.subr.bf16.mxu1 %v754_v61  ;;  %v18724_v61 = vld [vmem:[#allocation5 + $0x144] ss:$52 sps:$4 sm:$0xff]   ;;  %v18722_v28 = vld [vmem:[#allocation5 + $0x140] ss:$52 sps:$4 sm:$0xff]  }
 0x229   :  { %v632_v33 = vadd.f32 %v21489_v60, %v18428_v32  ;;  %v623_v34 = vpop.f32.mrb[63].mxu0  ;;  %18100 = vmatpush3.bf16.msra.mxu1 %v22284_v26  ;;  %v697_v35 = vmax.f32 %v629_v27, 0.0  ;;  %v18701_v26 = vld [vmem:[#allocation5] ss:$52 sps:$4 sm:$0xff]  }
 0x22a   :  { %v624_v12 = vadd.f32 %v21489_v60, %v623_v34  ;;  %18101 = vmatprep.subr.bf16.mxu1 %v755_v24  ;;  %v695_v36 = vmax.f32 %v621_v31, 0.0  ;;  %v18789_v60 = vld [vmem:[#allocation8 + $0xd0] ss:$52 sps:$4 sm:$0xff]   ;;  %v18719_v24 = vld [vmem:[#allocation5 + $0xd8] ss:$52 sps:$4 sm:$0xff]  }
 0x22b   :  { %v698_v16 = vmax.f32 %v632_v33, 0.0  ;;  %9938 = vmatpush1.bf16.msra.mxu0 %v18789_v60  ;;  %v18837_v27 = vld [vmem:[#allocation8 + $0x410] ss:$52 sps:$4 sm:$0xff]   ;;  %v18843_v33 = vld [vmem:[#allocation8 + $0x478] ss:$52 sps:$4 sm:$0xff]  }
 0x22c   :  { %v696_v37 = vmax.f32 %v624_v12, 0.0  ;;  %9939 = vmatprep.subr.bf16.mxu0 %v18797_v62  ;;  %v18727_v31 = vld [vmem:[#allocation5 + $0x14] ss:$52 sps:$4 sm:$0xff]   ;;  %v18725_v34 = vld [vmem:[#allocation5 + $0x10] ss:$52 sps:$4 sm:$0xff]  }
 0x22d   :  { %v757_v38 = vpack.c.bf16 %v698_v16, %v697_v35  ;;  %18102 = vmatpush3.bf16.msra.mxu1 %v22282_v1  ;;  %v18707_v1 = vld [vmem:[#allocation5 + $0xd0] ss:$52 sps:$4 sm:$0xff]   ;;  %v18845_v32 = vld [vmem:[#allocation8 + $0x47c] ss:$52 sps:$4 sm:$0xff]  }
 0x22e   :  { %v756_v11 = vpack.c.bf16 %v696_v37, %v695_v36  ;;  %v18730_v12 = vld [vmem:[#allocation5 + $0x7c] ss:$52 sps:$4 sm:$0xff]   ;;  %v18728_v36 = vld [vmem:[#allocation5 + $0x78] ss:$52 sps:$4 sm:$0xff]   ;;  %v18766_v62 = vld [vmem:[#allocation5 + $0x94] ss:$52 sps:$4 sm:$0xff]  }
 0x22f   :  { %9940 = vmatpush1.bf16.msra.mxu0 %v18795_v45  ;;  %v18851_v35 = vld [vmem:[#allocation8 + $0x4e4] ss:$52 sps:$4 sm:$0xff]   ;;  %v18849_v16 = vld [vmem:[#allocation8 + $0x4e0] ss:$52 sps:$4 sm:$0xff]  }
 0x230   :  { %18103 = vmatprep.subr.bf16.mxu1 %v756_v11  ;;  %9941 = vmatprep.subr.bf16.mxu0 %v18803_v0  ;;  %v18733_v37 = vld [vmem:[#allocation5 + $0xe4] ss:$52 sps:$4 sm:$0xff]   ;;  %v18761_v60 = vld [vmem:[#allocation5 + $0x28] ss:$52 sps:$4 sm:$0xff]  }
 0x231   :  { %18104 = vmatpush3.bf16.msra.mxu1 %v22292_v40  ;;  %v18712_v40 = vld [vmem:[#allocation5 + $0x13c] ss:$52 sps:$4 sm:$0xff]   ;;  %v18855_v11 = vld [vmem:[#allocation8 + $0x548] ss:$52 sps:$4 sm:$0xff]  }
 0x232   :  { %18105 = vmatprep.subr.bf16.mxu1 %v757_v38  ;;  %v18857_v38 = vld [vmem:[#allocation8 + $0x54c] ss:$52 sps:$4 sm:$0xff]  }
 0x233   :  { %9942 = vmatpush1.bf16.msra.mxu0 %v18801_v2  ;;  %v18764_v45 = vld [vmem:[#allocation5 + $0x90] ss:$52 sps:$4 sm:$0xff]   ;;  %v18767_v2 = vld [vmem:[#allocation5 + $0xf8] ss:$52 sps:$4 sm:$0xff]  }
 0x234   :  { %9943 = vmatprep.subr.bf16.mxu0 %v18809_v4  ;;  %v18769_v0 = vld [vmem:[#allocation5 + $0xfc] ss:$52 sps:$4 sm:$0xff]   ;;  %v18772_v4 = vld [vmem:[#allocation5 + $0x164] ss:$52 sps:$4 sm:$0xff]  }
 0x235   :  { %18106 = vmatpush3.bf16.msra.mxu1 %v22290_v15 }
 0x236   :  { %1232 = vmatprep.subr.bf16.mxu1 %v18703_v41  ;;  %v18734_v41 = vld [vmem:[#allocation5 + $0x148] ss:$52 sps:$4 sm:$0xff]  }
 0x237   :  { %9944 = vmatpush1.bf16.msra.mxu0 %v18807_v5  ;;  %v18770_v5 = vld [vmem:[#allocation5 + $0x160] ss:$52 sps:$4 sm:$0xff]  }
 0x238   :  { %831 = vmatmul.mubr.bf16.vlgmr.msra.gmra.mrb[4].mxu1 %v724_v39  ;;  %9945 = vmatprep.subr.bf16.mxu0 %v18815_v6  ;;  %v18731_v39 = vld [vmem:[#allocation5 + $0xe0] ss:$52 sps:$4 sm:$0xff]   ;;  %v18773_v6 = vld [vmem:[#allocation5 + $0x30] ss:$52 sps:$4 sm:$0xff]  }
 0x239   :  { %1233 = vmatpush1.bf16.msra.mxu1 %v18701_v26  ;;  %1264 = vmatprep.mubr.bf16.mxu1 %v21763_v51  ;;  %v18736_v26 = vld [vmem:[#allocation5 + $0x14c] ss:$52 sps:$4 sm:$0xff]  }
 0x23a   :  { %1234 = vmatprep.subr.bf16.mxu1 %v18706_v46  ;;  %v18737_v46 = vld [vmem:[#allocation5 + $0x18] ss:$52 sps:$4 sm:$0xff]  }
 0x23b   :  { %9946 = vmatpush1.bf16.msra.mxu0 %v18813_v50  ;;  %v21764_v50 = vmov 0.0  }
 0x23c   :  { %9947 = vmatprep.subr.bf16.mxu0 %v18821_v8  ;;  %v18775_v8 = vld [vmem:[#allocation5 + $0x100] ss:$52 sps:$4 sm:$0xff]  }
 0x23d   :  { %1235 = vmatpush1.bf16.msra.mxu1 %v18704_v42  ;;  %v18739_v42 = vld [vmem:[#allocation5 + $0x1c] ss:$52 sps:$4 sm:$0xff]  }
 0x23e   :  { %1236 = vmatprep.subr.bf16.mxu1 %v18709_v48  ;;  %v18742_v48 = vld [vmem:[#allocation5 + $0x84] ss:$52 sps:$4 sm:$0xff]  }
 0x23f   :  { %9948 = vmatpush1.bf16.msra.mxu0 %v18819_v10  ;;  %v18776_v10 = vld [vmem:[#allocation5 + $0x168] ss:$52 sps:$4 sm:$0xff]  }
 0x240   :  { %9949 = vmatprep.subr.bf16.mxu0 %v18827_v19  ;;  %v18788_v19 = vld [vmem:[#allocation8 + $0x74] ss:$52 sps:$4 sm:$0xff]  }
 0x241   :  { %1237 = vmatpush1.bf16.msra.mxu1 %v18707_v1  ;;  %v18740_v1 = vld [vmem:[#allocation5 + $0x80] ss:$52 sps:$4 sm:$0xff]  }
 0x242   :  { %1238 = vmatprep.subr.bf16.mxu1 %v18712_v40  ;;  %v18745_v40 = vld [vmem:[#allocation5 + $0xec] ss:$52 sps:$4 sm:$0xff]  }
 0x243   :  { %9950 = vmatpush1.bf16.msra.mxu0 %v18825_v63  ;;  %v18786_v63 = vld [vmem:[#allocation8 + $0x70] ss:$52 sps:$4 sm:$0xff]  }
 0x244   :  { %9951 = vmatprep.subr.bf16.mxu0 %v18833_v22  ;;  %v18800_v22 = vld [vmem:[#allocation8 + $0x144] ss:$52 sps:$4 sm:$0xff]  }
 0x245   :  { %1239 = vmatpush1.bf16.msra.mxu1 %v18710_v49  ;;  %v18743_v49 = vld [vmem:[#allocation5 + $0xe8] ss:$52 sps:$4 sm:$0xff]  }
 0x246   :  { %1273 = vmatprep.subr.bf16.mxu1 %v18715_v59  ;;  %v18748_v59 = vld [vmem:[#allocation5 + $0x154] ss:$52 sps:$4 sm:$0xff]  }
 0x247   :  { %9952 = vmatpush1.bf16.msra.mxu0 %v18831_v23  ;;  %v18798_v23 = vld [vmem:[#allocation8 + $0x140] ss:$52 sps:$4 sm:$0xff]  }
 0x248   :  { %9953 = vmatprep.subr.bf16.mxu0 %v18839_v25  ;;  %v18812_v25 = vld [vmem:[#allocation8 + $0x214] ss:$52 sps:$4 sm:$0xff]  }
 0x24b   :  { %9954 = vmatpush1.bf16.msra.mxu0 %v18837_v27  ;;  %v18810_v27 = vld [vmem:[#allocation8 + $0x210] ss:$52 sps:$4 sm:$0xff]  }
 0x24c   :  { %9955 = vmatprep.subr.bf16.mxu0 %v18845_v32  ;;  %v18822_v32 = vld [vmem:[#allocation8 + $0x2e0] ss:$52 sps:$4 sm:$0xff]  }
 0x24f   :  { %9956 = vmatpush1.bf16.msra.mxu0 %v18843_v33  ;;  %v18830_v33 = vld [vmem:[#allocation8 + $0x34c] ss:$52 sps:$4 sm:$0xff]  }
 0x250   :  { %9957 = vmatprep.subr.bf16.mxu0 %v18851_v35  ;;  %v18834_v35 = vld [vmem:[#allocation8 + $0x3b0] ss:$52 sps:$4 sm:$0xff]  }
 0x253   :  { %9958 = vmatpush1.bf16.msra.mxu0 %v18849_v16  ;;  %v18842_v16 = vld [vmem:[#allocation8 + $0x41c] ss:$52 sps:$4 sm:$0xff]  }
 0x254   :  { %9959 = vmatprep.subr.bf16.mxu0 %v18857_v38  ;;  %v18846_v38 = vld [vmem:[#allocation8 + $0x480] ss:$52 sps:$4 sm:$0xff]  }
 0x257   :  { %9960 = vmatpush1.bf16.msra.mxu0 %v18855_v11  ;;  %v18854_v11 = vld [vmem:[#allocation8 + $0x4ec] ss:$52 sps:$4 sm:$0xff]  }
 0x2cb   :  { %v18085_v15 = vpop.f32.mrb[0].mxu1 }
 0x2cc   :  { %v18086_v52 = vpop.f32.mrb[1].mxu1 }
 0x2cd   :  { %v18087_v30 = vadd.f32 %v18086_v52, %v18085_v15  ;;  %v18088_v53 = vpop.f32.mrb[2].mxu1  ;;  %v18746_v15 = vld [vmem:[#allocation5 + $0x150] ss:$52 sps:$4 sm:$0xff]  }
 0x2ce   :  { %v18089_v54 = vpop.f32.mrb[3].mxu1  ;;  %v18751_v52 = vld [vmem:[#allocation5 + $0x24] ss:$52 sps:$4 sm:$0xff]   ;;  %v18754_v53 = vld [vmem:[#allocation5 + $0x8c] ss:$52 sps:$4 sm:$0xff]  }
 0x2cf   :  { %v18752_v54 = vld [vmem:[#allocation5 + $0x88] ss:$52 sps:$4 sm:$0xff]  }
 0x30b   :  { %v18107_v7 = vpop.f32.mrb[4].mxu1 }
 0x30c   :  { %v18108_v47 = vpop.f32.mrb[5].mxu1 }
 0x30d   :  { %v18109_v9 = vadd.f32 %v18108_v47, %v18107_v7  ;;  %v18110_v43 = vpop.f32.mrb[6].mxu1  ;;  %v18774_v7 = vld [vmem:[#allocation5 + $0x98] ss:$52 sps:$4 sm:$0xff]  }
 0x30e   :  { %v18111_v13 = vpop.f32.mrb[7].mxu1  ;;  %v18863_v47 = vld [vmem:[#allocation8 + $0x5b4] ss:$52 sps:$4 sm:$0xff]   ;;  %v18869_v43 = vld [vmem:[#allocation8 + $0x61c] ss:$52 sps:$4 sm:$0xff]  }
 0x30f   :  { %v833_v17 = vadd.f32 %v18109_v9, %v18087_v30  ;;  %v18749_v30 = vld [vmem:[#allocation5 + $0x20] ss:$52 sps:$4 sm:$0xff]   ;;  %9961 = vmatprep.subr.bf16.mxu0 %v18863_v47  ;;  %v18867_v13 = vld [vmem:[#allocation8 + $0x618] ss:$52 sps:$4 sm:$0xff]   ;;  %v22357_v47 = vsub.s32 3, %v22188_v44 }
 0x310   :  { %v18861_v9 = vld [vmem:[#allocation8 + $0x5b0] ss:$52 sps:$4 sm:$0xff]  }
 0x311   :  { %v22309_v20 = vpack.c.bf16 %v833_v17, %v833_v17  ;;  %9962 = vmatpush1.bf16.msra.mxu0 %v18861_v9  ;;  %v18875_v17 = vld [vmem:[#allocation8 + $0x684] ss:$52 sps:$4 sm:$0xff]   ;;  %v18890_v9 = vld [vmem:[#allocation8 + $0x75c] ss:$52 sps:$4 sm:$0xff]  }
 0x312   :  { %9963 = vmatprep.subr.bf16.mxu0 %v18869_v43 }
 0x313   :  { %16156 = vmatmul.mubr.msk.bf16.vlgmr.msra.gmra.mrb[8].mxu1 %vm1228_vm0, %v22309_v20 }
 0x314   :  { %1274 = vmatpush1.bf16.msra.mxu1 %v18713_v14  ;;  %1305 = vmatprep.mubr.bf16.mxu1 %v21763_v51  ;;  %v18782_v14 = vld [vmem:[#allocation8 + $0xc] ss:$52 sps:$4 sm:$0xff]  }
 0x315   :  { %1275 = vmatprep.subr.bf16.mxu1 %v18718_v18  ;;  %9964 = vmatpush1.bf16.msra.mxu0 %v18867_v13  ;;  %v18780_v18 = vld [vmem:[#allocation8 + $0x8] ss:$52 sps:$4 sm:$0xff]   ;;  %v18888_v13 = vld [vmem:[#allocation8 + $0x758] ss:$52 sps:$4 sm:$0xff]  }
 0x316   :  { %9974 = vmatprep.subr.bf16.mxu0 %v18875_v17  ;;  %v18896_v17 = vld [vmem:[#allocation8 + $0x7c4] ss:$52 sps:$4 sm:$0xff]  }
 0x318   :  { %1276 = vmatpush1.bf16.msra.mxu1 %v18716_v21  ;;  %v18794_v21 = vld [vmem:[#allocation8 + $0xdc] ss:$52 sps:$4 sm:$0xff]  }
 0x319   :  { %1277 = vmatprep.subr.bf16.mxu1 %v18721_v3  ;;  %v18792_v3 = vld [vmem:[#allocation8 + $0xd8] ss:$52 sps:$4 sm:$0xff]  }
 0x31c   :  { %1278 = vmatpush1.bf16.msra.mxu1 %v18719_v24  ;;  %v18806_v24 = vld [vmem:[#allocation8 + $0x1ac] ss:$52 sps:$4 sm:$0xff]  }
 0x31d   :  { %1279 = vmatprep.subr.bf16.mxu1 %v18724_v61  ;;  %v18804_v61 = vld [vmem:[#allocation8 + $0x1a8] ss:$52 sps:$4 sm:$0xff]  }
 0x320   :  { %1280 = vmatpush1.bf16.msra.mxu1 %v18722_v28  ;;  %v18818_v28 = vld [vmem:[#allocation8 + $0x27c] ss:$52 sps:$4 sm:$0xff]  }
 0x321   :  { %1314 = vmatprep.subr.bf16.mxu1 %v18727_v31  ;;  %v18824_v31 = vld [vmem:[#allocation8 + $0x2e4] ss:$52 sps:$4 sm:$0xff]  }
 0x323   :  { %16157 = vmatmul.mubr.msk.bf16.vlgmr.msra.gmra.mrb[12].mxu1 %vm1228_vm0, %v22309_v20 }
 0x324   :  { %1315 = vmatpush1.bf16.msra.mxu1 %v18725_v34  ;;  %1346 = vmatprep.mubr.bf16.mxu1 %v21763_v51  ;;  %v18828_v34 = vld [vmem:[#allocation8 + $0x348] ss:$52 sps:$4 sm:$0xff]  }
 0x325   :  { %1316 = vmatprep.subr.bf16.mxu1 %v18730_v12  ;;  %v18836_v12 = vld [vmem:[#allocation8 + $0x3b4] ss:$52 sps:$4 sm:$0xff]  }
 0x328   :  { %1317 = vmatpush1.bf16.msra.mxu1 %v18728_v36  ;;  %v18840_v36 = vld [vmem:[#allocation8 + $0x418] ss:$52 sps:$4 sm:$0xff]  }
 0x329   :  { %1318 = vmatprep.subr.bf16.mxu1 %v18733_v37  ;;  %v18848_v37 = vld [vmem:[#allocation8 + $0x484] ss:$52 sps:$4 sm:$0xff]  }
 0x32c   :  { %1319 = vmatpush1.bf16.msra.mxu1 %v18731_v39  ;;  %v18852_v39 = vld [vmem:[#allocation8 + $0x4e8] ss:$52 sps:$4 sm:$0xff]  }
 0x32d   :  { %1320 = vmatprep.subr.bf16.mxu1 %v18736_v26  ;;  %v18860_v26 = vld [vmem:[#allocation8 + $0x554] ss:$52 sps:$4 sm:$0xff]  }
 0x330   :  { %1321 = vmatpush1.bf16.msra.mxu1 %v18734_v41  ;;  %v18858_v41 = vld [vmem:[#allocation8 + $0x550] ss:$52 sps:$4 sm:$0xff]  }
 0x331   :  { %1355 = vmatprep.subr.bf16.mxu1 %v18739_v42  ;;  %v18866_v42 = vld [vmem:[#allocation8 + $0x5bc] ss:$52 sps:$4 sm:$0xff]  }
 0x333   :  { %16158 = vmatmul.mubr.msk.bf16.vlgmr.msra.gmra.mrb[16].mxu1 %vm1228_vm0, %v22309_v20 }
 0x334   :  { %1356 = vmatpush1.bf16.msra.mxu1 %v18737_v46  ;;  %1387 = vmatprep.mubr.bf16.mxu1 %v21763_v51  ;;  %v18864_v46 = vld [vmem:[#allocation8 + $0x5b8] ss:$52 sps:$4 sm:$0xff]  }
 0x335   :  { %1357 = vmatprep.subr.bf16.mxu1 %v18742_v48  ;;  %v18872_v48 = vld [vmem:[#allocation8 + $0x624] ss:$52 sps:$4 sm:$0xff]  }
 0x338   :  { %1358 = vmatpush1.bf16.msra.mxu1 %v18740_v1  ;;  %v18870_v1 = vld [vmem:[#allocation8 + $0x620] ss:$52 sps:$4 sm:$0xff]  }
 0x339   :  { %1359 = vmatprep.subr.bf16.mxu1 %v18745_v40  ;;  %v18878_v40 = vld [vmem:[#allocation8 + $0x68c] ss:$52 sps:$4 sm:$0xff]  }
 0x33c   :  { %1360 = vmatpush1.bf16.msra.mxu1 %v18743_v49  ;;  %v22337_v49 = vsub.s32 0, %v22188_v44 }
 0x33d   :  { %1361 = vmatprep.subr.bf16.mxu1 %v18748_v59  ;;  %v22339_v59 = vld [vmem:[#allocation7] sm:$0xff] }
 0x33e   :  { %v914_v43 = vrot.slane %v22339_v59, %v22357_v47 }
 0x340   :  { %1362 = vmatpush1.bf16.msra.mxu1 %v18746_v15  ;;  %v22342_v15 = vsub.s32 1, %v22188_v44 }
 0x341   :  { %1396 = vmatprep.subr.bf16.mxu1 %v18751_v52  ;;  %v902_v52 = vrot.slane %v22339_v59, %v22337_v49 }
 0x343   :  { %16159 = vmatmul.mubr.msk.bf16.vlgmr.msra.gmra.mrb[20].mxu1 %vm1228_vm0, %v22309_v20 }
 0x344   :  { %1397 = vmatpush1.bf16.msra.mxu1 %v18749_v30  ;;  %1428 = vmatprep.mubr.bf16.mxu1 %v21763_v51  ;;  %v906_v30 = vrot.slane %v22339_v59, %v22342_v15 }
 0x345   :  { %1398 = vmatprep.subr.bf16.mxu1 %v18754_v53 }
 0x348   :  { %1399 = vmatpush1.bf16.msra.mxu1 %v18752_v54 }
 0x349   :  { %1400 = vmatprep.subr.bf16.mxu1 %v18757_v55 }
 0x34c   :  { %1401 = vmatpush1.bf16.msra.mxu1 %v18755_v29 }
 0x34d   :  { %1402 = vmatprep.subr.bf16.mxu1 %v18760_v56 }
 0x350   :  { %1403 = vmatpush1.bf16.msra.mxu1 %v18758_v57 }
 0x351   :  { %1437 = vmatprep.subr.bf16.mxu1 %v18763_v58 }
 0x353   :  { %16160 = vmatmul.mubr.msk.bf16.vlgmr.msra.gmra.mrb[24].mxu1 %vm1228_vm0, %v22309_v20 }
 0x354   :  { %1438 = vmatpush1.bf16.msra.mxu1 %v18761_v60  ;;  %1469 = vmatprep.mubr.bf16.mxu1 %v21763_v51 }
 0x355   :  { %1439 = vmatprep.subr.bf16.mxu1 %v18766_v62 }
 0x358   :  { %1440 = vmatpush1.bf16.msra.mxu1 %v18764_v45  ;;  %v18873_v45 = vld [vmem:[#allocation8 + $0x680] ss:$52 sps:$4 sm:$0xff]  }
 0x359   :  { %1441 = vmatprep.subr.bf16.mxu1 %v18769_v0  ;;  %v18876_v0 = vld [vmem:[#allocation8 + $0x688] ss:$52 sps:$4 sm:$0xff]  }
 0x35c   :  { %1442 = vmatpush1.bf16.msra.mxu1 %v18767_v2 }
 0x35d   :  { %1443 = vmatprep.subr.bf16.mxu1 %v18772_v4  ;;  %v18881_v4 = vld [vmem:[#allocation8 + $0x6ec] ss:$52 sps:$4 sm:$0xff]  }
 0x360   :  { %1444 = vmatpush1.bf16.msra.mxu1 %v18770_v5  ;;  %v18884_v5 = vld [vmem:[#allocation8 + $0x6f4] ss:$52 sps:$4 sm:$0xff]  }
 0x361   :  { %18429 = vmatprep.subr.bf16.mxu1 %v21764_v50 }
 0x363   :  { %16161 = vmatmul.mubr.msk.bf16.vlgmr.msra.gmra.mrb[28].mxu1 %vm1228_vm0, %v22309_v20 }
 0x364   :  { %18430 = vmatpush3.bf16.msra.mxu1 %v18773_v6  ;;  %18437 = vmatprep.mubr.msk.bf16.mxu1 %vm21765_vm1, %v21764_v50  ;;  %v18879_v6 = vld [vmem:[#allocation8 + $0x6e8] ss:$52 sps:$4 sm:$0xff]  }
 0x365   :  { %18431 = vmatprep.subr.bf16.mxu1 %v21764_v50 }
 0x368   :  { %18432 = vmatpush3.bf16.msra.mxu1 %v18774_v7  ;;  %v18882_v7 = vld [vmem:[#allocation8 + $0x6f0] ss:$52 sps:$4 sm:$0xff]  }
 0x369   :  { %18433 = vmatprep.subr.bf16.mxu1 %v21764_v50 }
 0x36c   :  { %18434 = vmatpush3.bf16.msra.mxu1 %v18775_v8  ;;  %v18887_v8 = vld [vmem:[#allocation8 + $0x754] ss:$52 sps:$4 sm:$0xff]  }
 0x36d   :  { %18435 = vmatprep.subr.bf16.mxu1 %v21764_v50 }
 0x370   :  { %18436 = vmatpush3.bf16.msra.mxu1 %v18776_v10  ;;  %v18885_v10 = vld [vmem:[#allocation8 + $0x750] ss:$52 sps:$4 sm:$0xff]  }
 0x371   :  { %10220 = vmatprep.subr.bf16.mxu1 %v18782_v14  ;;  %v18893_v14 = vld [vmem:[#allocation8 + $0x7bc] ss:$52 sps:$4 sm:$0xff]  }
 0x373   :  { %18438 = vmatmul.mubr.msk.bf16.vlgmr.msra.gmra.mrb[32].mxu1 %vm1228_vm0, %v22309_v20  ;;  %v18816_v20 = vld [vmem:[#allocation8 + $0x278] ss:$52 sps:$4 sm:$0xff]  }
 0x374   :  { %10221 = vmatpush1.bf16.msra.mxu1 %v18780_v18 }
 0x375   :  { %10222 = vmatprep.subr.bf16.mxu1 %v18788_v19 }
 0x378   :  { %10223 = vmatpush1.bf16.msra.mxu1 %v18786_v63 }
 0x379   :  { %10224 = vmatprep.subr.bf16.mxu1 %v18794_v21 }
 0x37c   :  { %10225 = vmatpush1.bf16.msra.mxu1 %v18792_v3  ;;  %v18891_v3 = vld [vmem:[#allocation8 + $0x7b8] ss:$52 sps:$4 sm:$0xff]  }
 0x37d   :  { %10226 = vmatprep.subr.bf16.mxu1 %v18800_v22  ;;  %v18894_v22 = vld [vmem:[#allocation8 + $0x7c0] ss:$52 sps:$4 sm:$0xff]  }
 0x380   :  { %10227 = vmatpush1.bf16.msra.mxu1 %v18798_v23 }
 0x381   :  { %10228 = vmatprep.subr.bf16.mxu1 %v18806_v24  ;;  %v18899_v24 = vld [vmem:[#allocation8 + $0x824] ss:$52 sps:$4 sm:$0xff]  }
 0x384   :  { %10229 = vmatpush1.bf16.msra.mxu1 %v18804_v61  ;;  %v18902_v61 = vld [vmem:[#allocation8 + $0x82c] ss:$52 sps:$4 sm:$0xff]  }
 0x385   :  { %10230 = vmatprep.subr.bf16.mxu1 %v18812_v25 }
 0x388   :  { %10231 = vmatpush1.bf16.msra.mxu1 %v18810_v27 }
 0x389   :  { %10232 = vmatprep.subr.bf16.mxu1 %v18818_v28  ;;  %v18897_v28 = vld [vmem:[#allocation8 + $0x820] ss:$52 sps:$4 sm:$0xff]  }
 0x38c   :  { %10233 = vmatpush1.bf16.msra.mxu1 %v18816_v20  ;;  %v18900_v20 = vld [vmem:[#allocation8 + $0x828] ss:$52 sps:$4 sm:$0xff]  }
 0x38d   :  { %10234 = vmatprep.subr.bf16.mxu1 %v18824_v31  ;;  %v18905_v31 = vld [vmem:[#allocation8 + $0x88c] ss:$52 sps:$4 sm:$0xff]  }
 0x390   :  { %10235 = vmatpush1.bf16.msra.mxu1 %v18822_v32  ;;  %v18908_v32 = vld [vmem:[#allocation8 + $0x894] ss:$52 sps:$4 sm:$0xff]  }
 0x391   :  { %10236 = vmatprep.subr.bf16.mxu1 %v18830_v33  ;;  %v18903_v33 = vld [vmem:[#allocation8 + $0x888] ss:$52 sps:$4 sm:$0xff]  }
 0x394   :  { %10237 = vmatpush1.bf16.msra.mxu1 %v18828_v34  ;;  %v18906_v34 = vld [vmem:[#allocation8 + $0x890] ss:$52 sps:$4 sm:$0xff]  }
 0x395   :  { %10238 = vmatprep.subr.bf16.mxu1 %v18836_v12  ;;  %v18911_v12 = vld [vmem:[#allocation8 + $0x8f4] ss:$52 sps:$4 sm:$0xff]  }
 0x398   :  { %10239 = vmatpush1.bf16.msra.mxu1 %v18834_v35  ;;  %v18914_v35 = vld [vmem:[#allocation8 + $0x8fc] ss:$52 sps:$4 sm:$0xff]  }
 0x399   :  { %10240 = vmatprep.subr.bf16.mxu1 %v18842_v16  ;;  %v18909_v16 = vld [vmem:[#allocation8 + $0x8f0] ss:$52 sps:$4 sm:$0xff]  }
 0x39c   :  { %10241 = vmatpush1.bf16.msra.mxu1 %v18840_v36  ;;  %v18912_v36 = vld [vmem:[#allocation8 + $0x8f8] ss:$52 sps:$4 sm:$0xff]  }
 0x39d   :  { %10242 = vmatprep.subr.bf16.mxu1 %v18848_v37  ;;  %v18917_v37 = vld [vmem:[#allocation8 + $0x95c] ss:$52 sps:$4 sm:$0xff]  }
 0x3a0   :  { %10243 = vmatpush1.bf16.msra.mxu1 %v18846_v38  ;;  %v18920_v38 = vld [vmem:[#allocation8 + $0x964] ss:$52 sps:$4 sm:$0xff]  }
 0x3a1   :  { %10244 = vmatprep.subr.bf16.mxu1 %v18854_v11 }
 0x3a4   :  { %10245 = vmatpush1.bf16.msra.mxu1 %v18852_v39 }
 0x3a5   :  { %10246 = vmatprep.subr.bf16.mxu1 %v18860_v26 }
 0x3a8   :  { %10247 = vmatpush1.bf16.msra.mxu1 %v18858_v41  ;;  %v18915_v41 = vld [vmem:[#allocation8 + $0x958] ss:$52 sps:$4 sm:$0xff]  }
 0x3a9   :  { %10248 = vmatprep.subr.bf16.mxu1 %v18866_v42  ;;  %v18918_v42 = vld [vmem:[#allocation8 + $0x960] ss:$52 sps:$4 sm:$0xff]  }
 0x3ac   :  { %10249 = vmatpush1.bf16.msra.mxu1 %v18864_v46 }
 0x3ad   :  { %10250 = vmatprep.subr.bf16.mxu1 %v18872_v48  ;;  %v18923_v48 = vld [vmem:[#allocation8 + $0x9c4] ss:$52 sps:$4 sm:$0xff]  }
 0x3b0   :  { %10251 = vmatpush1.bf16.msra.mxu1 %v18870_v1  ;;  %v18926_v1 = vld [vmem:[#allocation8 + $0x9cc] ss:$52 sps:$4 sm:$0xff]  }
 0x3b1   :  { %10261 = vmatprep.subr.bf16.mxu1 %v18878_v40  ;;  %v18921_v40 = vld [vmem:[#allocation8 + $0x9c0] ss:$52 sps:$4 sm:$0xff]  }
 0x3e6   :  { %v1266_v53 = vpop.f32.mrb[8].mxu1 }
 0x3e7   :  { %v1267_v54 = vadd.f32 %v1266_v53, %v902_v52  ;;  %v1268_v55 = vpop.f32.mrb[9].mxu1  ;;  %v18924_v52 = vld [vmem:[#allocation8 + $0x9c8] ss:$52 sps:$4 sm:$0xff]  }
 0x3e8   :  { %v1269_v29 = vadd.f32 %v1268_v55, %v906_v30  ;;  %v1270_v56 = vpop.f32.mrb[10].mxu1  ;;  %v18929_v30 = vld [vmem:[#allocation8 + $0xa2c] ss:$52 sps:$4 sm:$0xff]   ;;  %v18932_v53 = vld [vmem:[#allocation8 + $0xa34] ss:$52 sps:$4 sm:$0xff]  }
 0x3e9   :  { %v1518_v57 = vmax.f32 %v1267_v54, 0.0  ;;  %v1271_v58 = vpop.f32.mrb[11].mxu1  ;;  %v18927_v54 = vld [vmem:[#allocation8 + $0xa28] ss:$52 sps:$4 sm:$0xff]   ;;  %v18930_v55 = vld [vmem:[#allocation8 + $0xa30] ss:$52 sps:$4 sm:$0xff]  }
 0x3ea   :  { %v1519_v60 = vmax.f32 %v1269_v29, 0.0  ;;  %v18935_v29 = vld [vmem:[#allocation8 + $0xa94] ss:$52 sps:$4 sm:$0xff]   ;;  %v18938_v56 = vld [vmem:[#allocation8 + $0xa9c] ss:$52 sps:$4 sm:$0xff]  }
 0x3eb   :  { %v22350_v2 = vpack.c.bf16 %v1518_v57, %v1518_v57  ;;  %v18933_v57 = vld [vmem:[#allocation8 + $0xa90] ss:$52 sps:$4 sm:$0xff]   ;;  %v18936_v58 = vld [vmem:[#allocation8 + $0xa98] ss:$52 sps:$4 sm:$0xff]  }
 0x3ec   :  { %v22348_v62 = vpack.c.bf16 %v1519_v60, %v1519_v60  ;;  %v18941_v60 = vld [vmem:[#allocation8 + $0xafc] ss:$52 sps:$4 sm:$0xff]  }
 0x3ee   :  { %9965 = vmatprep.mubr.bf16.mxu0 %v22348_v62  ;;  %10252 = vmatprep.mubr.bf16.mxu1 %v22348_v62 }
 0x3ef   :  { %9966 = vmatmul.mubr.bf16.vlgmr.msra.gmra.mrb[64].mxu0 %v22350_v2  ;;  %10253 = vmatmul.mubr.bf16.vlgmr.msra.gmra.mrb[36].mxu1 %v22350_v2 }
 0x3f0   :  { %9975 = vmatpush1.bf16.msra.mxu0 %v18873_v45  ;;  %10262 = vmatpush1.bf16.msra.mxu1 %v18876_v0  ;;  %v18944_v45 = vld [vmem:[#allocation8 + $0xb04] ss:$52 sps:$4 sm:$0xff]  }
 0x3f1   :  { %9976 = vmatprep.subr.bf16.mxu0 %v18881_v4  ;;  %10263 = vmatprep.subr.bf16.mxu1 %v18884_v5 }
 0x3f4   :  { %9977 = vmatpush1.bf16.msra.mxu0 %v18879_v6  ;;  %10264 = vmatpush1.bf16.msra.mxu1 %v18882_v7  ;;  %v18939_v6 = vld [vmem:[#allocation8 + $0xaf8] ss:$52 sps:$4 sm:$0xff]   ;;  %v18942_v7 = vld [vmem:[#allocation8 + $0xb00] ss:$52 sps:$4 sm:$0xff]  }
 0x3f5   :  { %9978 = vmatprep.subr.bf16.mxu0 %v18887_v8  ;;  %10265 = vmatprep.subr.bf16.mxu1 %v18890_v9  ;;  %v18947_v9 = vld [vmem:[#allocation8 + $0xb64] ss:$52 sps:$4 sm:$0xff]  }
 0x3f6   :  { %v22361_v18 = vpop.f32.mrb[12].mxu1 }
 0x3f7   :  { %v1309_v19 = vpop.f32.mrb[13].mxu1 }
 0x3f8   :  { %v1310_v63 = vadd.f32 %v1309_v19, %v914_v43  ;;  %v1311_v21 = vpop.f32.mrb[14].mxu1  ;;  %9979 = vmatpush1.bf16.msra.mxu0 %v18885_v10  ;;  %10266 = vmatpush1.bf16.msra.mxu1 %v18888_v13  ;;  %v18950_v43 = vld [vmem:[#allocation8 + $0xb6c] ss:$52 sps:$4 sm:$0xff]   ;;  %v18948_v13 = vld [vmem:[#allocation8 + $0xb68] ss:$52 sps:$4 sm:$0xff]  }
 0x3f9   :  { %v1312_v23 = vpop.f32.mrb[15].mxu1  ;;  %9980 = vmatprep.subr.bf16.mxu0 %v18893_v14  ;;  %10267 = vmatprep.subr.bf16.mxu1 %v18896_v17  ;;  %v18945_v10 = vld [vmem:[#allocation8 + $0xb60] ss:$52 sps:$4 sm:$0xff]   ;;  %v22376_v14 = vsub.s32 2, %v22188_v44  ;;  %v18951_v21 = vld [vmem:[#allocation8 + $0xbc8] ss:$52 sps:$4 sm:$0xff]  }
 0x3fa   :  { %v1521_v25 = vmax.f32 %v1310_v63, 0.0  ;;  %v18953_v17 = vld [vmem:[#allocation8 + $0xbcc] ss:$52 sps:$4 sm:$0xff]   ;;  %v18956_v19 = vld [vmem:[#allocation8 + $0xbd4] ss:$52 sps:$4 sm:$0xff]   ;;  %v921_v63 = vsub.s32 5, %v22188_v44 }
 0x3fb   :  { %v18959_v23 = vld [vmem:[#allocation8 + $0xc34] ss:$52 sps:$4 sm:$0xff]  }
 0x3fc   :  { %v22363_v27 = vpack.c.bf16 %v1521_v25, %v1521_v25  ;;  %9981 = vmatpush1.bf16.msra.mxu0 %v18891_v3  ;;  %10268 = vmatpush1.bf16.msra.mxu1 %v18894_v22  ;;  %v18954_v3 = vld [vmem:[#allocation8 + $0xbd0] ss:$52 sps:$4 sm:$0xff]   ;;  %v910_v22 = vrot.slane %v22339_v59, %v22376_v14 }
 0x3fd   :  { %9982 = vmatprep.subr.bf16.mxu0 %v18899_v24  ;;  %10269 = vmatprep.subr.bf16.mxu1 %v18902_v61  ;;  %v18962_v24 = vld [vmem:[#allocation8 + $0xc3c] ss:$52 sps:$4 sm:$0xff]   ;;  %v922_v61 = vrot.slane %v22339_v59, %v921_v63 }
 0x3fe   :  { %10006 = vmatprep.mubr.bf16.mxu0 %v22363_v27  ;;  %10293 = vmatprep.mubr.bf16.mxu1 %v22363_v27  ;;  %v18957_v25 = vld [vmem:[#allocation8 + $0xc30] ss:$52 sps:$4 sm:$0xff]  }
 0x400   :  { %9983 = vmatpush1.bf16.msra.mxu0 %v18897_v28  ;;  %10270 = vmatpush1.bf16.msra.mxu1 %v18900_v20  ;;  %v18960_v28 = vld [vmem:[#allocation8 + $0xc38] ss:$52 sps:$4 sm:$0xff]   ;;  %v1308_v20 = vadd.f32 %v22361_v18, %v910_v22 }
 0x401   :  { %9984 = vmatprep.subr.bf16.mxu0 %v18905_v31  ;;  %10271 = vmatprep.subr.bf16.mxu1 %v18908_v32  ;;  %v18965_v31 = vld [vmem:[#allocation8 + $0xc9c] ss:$52 sps:$4 sm:$0xff]   ;;  %v18968_v32 = vld [vmem:[#allocation8 + $0xca4] ss:$52 sps:$4 sm:$0xff]   ;;  %v19001_v22 = vld [vmem:[#allocation8 + $0xf0c] ss:$52 sps:$4 sm:$0xff]  }
 0x402   :  { %v18971_v18 = vld [vmem:[#allocation8 + $0xd04] ss:$52 sps:$4 sm:$0xff]  }
 0x404   :  { %9985 = vmatpush1.bf16.msra.mxu0 %v18903_v33  ;;  %10272 = vmatpush1.bf16.msra.mxu1 %v18906_v34 }
 0x405   :  { %9986 = vmatprep.subr.bf16.mxu0 %v18911_v12  ;;  %10273 = vmatprep.subr.bf16.mxu1 %v18914_v35 }
 0x406   :  { %v22367_v11 = vpop.f32.mrb[16].mxu1 }
 0x407   :  { %v22369_v39 = vpop.f32.mrb[17].mxu1 }
 0x408   :  { %v1352_v26 = vpop.f32.mrb[18].mxu1  ;;  %9987 = vmatpush1.bf16.msra.mxu0 %v18909_v16  ;;  %10274 = vmatpush1.bf16.msra.mxu1 %v18912_v36  ;;  %v1351_v33 = vadd.f32 %v22369_v39, %v922_v61  ;;  %v18963_v16 = vld [vmem:[#allocation8 + $0xc98] ss:$52 sps:$4 sm:$0xff]   ;;  %v18966_v36 = vld [vmem:[#allocation8 + $0xca0] ss:$52 sps:$4 sm:$0xff]   ;;  %v22409_v61 = vsub.s32 4, %v22188_v44 }
 0x409   :  { %v1353_v46 = vpop.f32.mrb[19].mxu1  ;;  %9988 = vmatprep.subr.bf16.mxu0 %v18917_v37  ;;  %10275 = vmatprep.subr.bf16.mxu1 %v18920_v38  ;;  %v1520_v37 = vmax.f32 %v1308_v20, 0.0  ;;  %v18974_v26 = vld [vmem:[#allocation8 + $0xd0c] ss:$52 sps:$4 sm:$0xff]   ;;  %v19010_v20 = vld [vmem:[#allocation8 + $0xf7c] ss:$52 sps:$4 sm:$0xff]  }
 0x40a   :  { %v18972_v46 = vld [vmem:[#allocation8 + $0xd08] ss:$52 sps:$4 sm:$0xff]  }
 0x40b   :  { %v22390_v39 = vpack.c.bf16 %v1520_v37, %v1520_v37 }
 0x40c   :  { %9989 = vmatpush1.bf16.msra.mxu0 %v18915_v41  ;;  %10276 = vmatpush1.bf16.msra.mxu1 %v18918_v42  ;;  %v1523_v41 = vmax.f32 %v1351_v33, 0.0  ;;  %v18969_v42 = vld [vmem:[#allocation8 + $0xd00] ss:$52 sps:$4 sm:$0xff]   ;;  %v19008_v33 = vld [vmem:[#allocation8 + $0xf78] ss:$52 sps:$4 sm:$0xff]  }
 0x40d   :  { %9990 = vmatprep.subr.bf16.mxu0 %v18923_v48  ;;  %10277 = vmatprep.subr.bf16.mxu1 %v18926_v1  ;;  %v18977_v1 = vld [vmem:[#allocation8 + $0xd6c] ss:$52 sps:$4 sm:$0xff]  }
 0x40e   :  { %v22392_v48 = vpack.c.bf16 %v1523_v41, %v1523_v41 }
 0x410   :  { %9991 = vmatpush1.bf16.msra.mxu0 %v18921_v40  ;;  %10278 = vmatpush1.bf16.msra.mxu1 %v18924_v52  ;;  %v18980_v40 = vld [vmem:[#allocation8 + $0xd74] ss:$52 sps:$4 sm:$0xff]  }
 0x411   :  { %9992 = vmatprep.subr.bf16.mxu0 %v18929_v30  ;;  %10279 = vmatprep.subr.bf16.mxu1 %v18932_v53  ;;  %v18975_v52 = vld [vmem:[#allocation8 + $0xd68] ss:$52 sps:$4 sm:$0xff]   ;;  %v18978_v30 = vld [vmem:[#allocation8 + $0xd70] ss:$52 sps:$4 sm:$0xff]  }
 0x412   :  { %v18983_v53 = vld [vmem:[#allocation8 + $0xdd4] ss:$52 sps:$4 sm:$0xff]  }
 0x414   :  { %9993 = vmatpush1.bf16.msra.mxu0 %v18927_v54  ;;  %10280 = vmatpush1.bf16.msra.mxu1 %v18930_v55  ;;  %v22398_v54 = vld [vmem:[#allocation7 + $0x8] sm:$0x1f] }
 0x415   :  { %9994 = vmatprep.subr.bf16.mxu0 %v18935_v29  ;;  %10281 = vmatprep.subr.bf16.mxu1 %v18938_v56  ;;  %v18986_v55 = vld [vmem:[#allocation8 + $0xddc] ss:$52 sps:$4 sm:$0xff]   ;;  %v942_v29 = vrot.slane %v22398_v54, %v22376_v14  ;;  %v946_v56 = vrot.slane %v22398_v54, %v22357_v47 }
 0x416   :  { %v22371_v0 = vpop.f32.mrb[20].mxu1 }
 0x417   :  { %v22373_v4 = vpop.f32.mrb[21].mxu1 }
 0x418   :  { %v1393_v5 = vpop.f32.mrb[22].mxu1  ;;  %9995 = vmatpush1.bf16.msra.mxu0 %v18933_v57  ;;  %10282 = vmatpush1.bf16.msra.mxu1 %v18936_v58  ;;  %v18981_v57 = vld [vmem:[#allocation8 + $0xdd0] ss:$52 sps:$4 sm:$0xff]   ;;  %v18984_v58 = vld [vmem:[#allocation8 + $0xdd8] ss:$52 sps:$4 sm:$0xff]  }
 0x419   :  { %v1394_v8 = vpop.f32.mrb[23].mxu1  ;;  %9996 = vmatprep.subr.bf16.mxu0 %v18941_v60  ;;  %10283 = vmatprep.subr.bf16.mxu1 %v18944_v45  ;;  %v18989_v60 = vld [vmem:[#allocation8 + $0xe3c] ss:$52 sps:$4 sm:$0xff]   ;;  %v18992_v5 = vld [vmem:[#allocation8 + $0xe44] ss:$52 sps:$4 sm:$0xff]  }
 0x41c   :  { %9997 = vmatpush1.bf16.msra.mxu0 %v18939_v6  ;;  %10284 = vmatpush1.bf16.msra.mxu1 %v18942_v7 }
 0x41d   :  { %9998 = vmatprep.subr.bf16.mxu0 %v18947_v9  ;;  %10285 = vmatprep.subr.bf16.mxu1 %v18950_v43  ;;  %v18987_v43 = vld [vmem:[#allocation8 + $0xe38] ss:$52 sps:$4 sm:$0xff]  }
 0x420   :  { %9999 = vmatpush1.bf16.msra.mxu0 %v18945_v10  ;;  %10286 = vmatpush1.bf16.msra.mxu1 %v18948_v13  ;;  %v18990_v13 = vld [vmem:[#allocation8 + $0xe40] ss:$52 sps:$4 sm:$0xff]  }
 0x421   :  { %10000 = vmatprep.subr.bf16.mxu0 %v18953_v17  ;;  %10287 = vmatprep.subr.bf16.mxu1 %v18956_v19  ;;  %v18995_v17 = vld [vmem:[#allocation8 + $0xea4] ss:$52 sps:$4 sm:$0xff]   ;;  %v18998_v19 = vld [vmem:[#allocation8 + $0xeac] ss:$52 sps:$4 sm:$0xff]  }
 0x424   :  { %10001 = vmatpush1.bf16.msra.mxu0 %v18951_v21  ;;  %10288 = vmatpush1.bf16.msra.mxu1 %v18954_v3  ;;  %v18993_v21 = vld [vmem:[#allocation8 + $0xea0] ss:$52 sps:$4 sm:$0xff]   ;;  %v18996_v3 = vld [vmem:[#allocation8 + $0xea8] ss:$52 sps:$4 sm:$0xff]  }
 0x425   :  { %10002 = vmatprep.subr.bf16.mxu0 %v18959_v23  ;;  %10289 = vmatprep.subr.bf16.mxu1 %v18962_v24  ;;  %v19004_v23 = vld [vmem:[#allocation8 + $0xf14] ss:$52 sps:$4 sm:$0xff]  }
 0x426   :  { %v22386_v34 = vpop.f32.mrb[24].mxu1  ;;  %v18999_v24 = vld [vmem:[#allocation8 + $0xf08] ss:$52 sps:$4 sm:$0xff]  }
 0x427   :  { %v22388_v12 = vpop.f32.mrb[25].mxu1 }
 0x428   :  { %v1434_v35 = vpop.f32.mrb[26].mxu1  ;;  %10003 = vmatpush1.bf16.msra.mxu0 %v18957_v25  ;;  %10290 = vmatpush1.bf16.msra.mxu1 %v18960_v28  ;;  %v19002_v25 = vld [vmem:[#allocation8 + $0xf10] ss:$52 sps:$4 sm:$0xff]   ;;  %v19007_v28 = vld [vmem:[#allocation8 + $0xf74] ss:$52 sps:$4 sm:$0xff]  }
 0x429   :  { %v1435_v38 = vpop.f32.mrb[27].mxu1  ;;  %10004 = vmatprep.subr.bf16.mxu0 %v18965_v31  ;;  %10291 = vmatprep.subr.bf16.mxu1 %v18968_v32  ;;  %v950_v31 = vrot.slane %v22398_v54, %v22409_v61  ;;  %v19005_v32 = vld [vmem:[#allocation8 + $0xf70] ss:$52 sps:$4 sm:$0xff]  }
 0x42a   :  { %v19013_v35 = vld [vmem:[#allocation8 + $0xfdc] ss:$52 sps:$4 sm:$0xff]  }
 0x42c   :  { %10005 = vmatpush1.bf16.msra.mxu0 %v18963_v16  ;;  %10292 = vmatpush1.bf16.msra.mxu1 %v18966_v36  ;;  %v19016_v36 = vld [vmem:[#allocation8 + $0xfe4] ss:$52 sps:$4 sm:$0xff]  }
 0x42d   :  { %10015 = vmatprep.subr.bf16.mxu0 %v18971_v18  ;;  %10302 = vmatprep.subr.bf16.mxu1 %v18974_v26  ;;  %v19011_v26 = vld [vmem:[#allocation8 + $0xfd8] ss:$52 sps:$4 sm:$0xff]  }
 0x42f   :  { %10007 = vmatmul.mubr.bf16.vlgmr.msra.gmra.mrb[64].mxu0 %v22390_v39  ;;  %10294 = vmatmul.mubr.bf16.vlgmr.msra.gmra.mrb[36].mxu1 %v22390_v39 }
 0x430   :  { %10016 = vmatpush1.bf16.msra.mxu0 %v18969_v42  ;;  %10047 = vmatprep.mubr.bf16.mxu0 %v22392_v48  ;;  %v19014_v42 = vld [vmem:[#allocation8 + $0xfe0] ss:$52 sps:$4 sm:$0xff]  }
 0x431   :  { %10303 = vmatpush1.bf16.msra.mxu1 %v18972_v46  ;;  %10334 = vmatprep.mubr.bf16.mxu1 %v22392_v48  ;;  %v19019_v46 = vld [vmem:[#allocation8 + $0x1044] ss:$52 sps:$4 sm:$0xff]  }
 0x432   :  { %10017 = vmatprep.subr.bf16.mxu0 %v18977_v1  ;;  %10304 = vmatprep.subr.bf16.mxu1 %v18980_v40  ;;  %v19022_v1 = vld [vmem:[#allocation8 + $0x104c] ss:$52 sps:$4 sm:$0xff]  }
 0x433   :  { %v19017_v40 = vld [vmem:[#allocation8 + $0x1040] ss:$52 sps:$4 sm:$0xff]  }
 0x434   :  { %10018 = vmatpush1.bf16.msra.mxu0 %v18975_v52  ;;  %v19020_v52 = vld [vmem:[#allocation8 + $0x1048] ss:$52 sps:$4 sm:$0xff]  }
 0x435   :  { %10305 = vmatpush1.bf16.msra.mxu1 %v18978_v30  ;;  %10019 = vmatprep.subr.bf16.mxu0 %v18983_v53  ;;  %v19025_v30 = vld [vmem:[#allocation8 + $0x10ac] ss:$52 sps:$4 sm:$0xff]   ;;  %v19028_v53 = vld [vmem:[#allocation8 + $0x10b4] ss:$52 sps:$4 sm:$0xff]  }
 0x436   :  { %v1471_v45 = vpop.f32.mrb[28].mxu1  ;;  %10306 = vmatprep.subr.bf16.mxu1 %v18986_v55  ;;  %v19023_v55 = vld [vmem:[#allocation8 + $0x10a8] ss:$52 sps:$4 sm:$0xff]  }
 0x437   :  { %v22404_v6 = vadd.f32 %v1471_v45, %v942_v29  ;;  %v1473_v7 = vpop.f32.mrb[29].mxu1  ;;  %v19026_v29 = vld [vmem:[#allocation8 + $0x10b0] ss:$52 sps:$4 sm:$0xff]  }
 0x438   :  { %v22406_v8 = vadd.f32 %v1473_v7, %v946_v56  ;;  %v1475_v9 = vpop.f32.mrb[30].mxu1  ;;  %10020 = vmatpush1.bf16.msra.mxu0 %v18981_v57  ;;  %v19031_v56 = vld [vmem:[#allocation8 + $0x1114] ss:$52 sps:$4 sm:$0xff]   ;;  %v19034_v57 = vld [vmem:[#allocation8 + $0x111c] ss:$52 sps:$4 sm:$0xff]  }
 0x439   :  { %10307 = vmatpush1.bf16.msra.mxu1 %v18984_v58  ;;  %v1476_v10 = vpop.f32.mrb[31].mxu1  ;;  %10021 = vmatprep.subr.bf16.mxu0 %v18989_v60  ;;  %v19029_v58 = vld [vmem:[#allocation8 + $0x1110] ss:$52 sps:$4 sm:$0xff]   ;;  %v19032_v60 = vld [vmem:[#allocation8 + $0x1118] ss:$52 sps:$4 sm:$0xff]  }
 0x43a   :  { %10308 = vmatprep.subr.bf16.mxu1 %v18992_v5  ;;  %v19037_v45 = vld [vmem:[#allocation8 + $0x117c] ss:$52 sps:$4 sm:$0xff]   ;;  %v19040_v5 = vld [vmem:[#allocation8 + $0x1184] ss:$52 sps:$4 sm:$0xff]   ;;  %v19038_v9 = vld [vmem:[#allocation8 + $0x1180] ss:$52 sps:$4 sm:$0xff]  }
 0x43b   :  { %v19035_v7 = vld [vmem:[#allocation8 + $0x1178] ss:$52 sps:$4 sm:$0xff]  }
 0x43c   :  { %10022 = vmatpush1.bf16.msra.mxu0 %v18987_v43  ;;  %v19043_v43 = vld [vmem:[#allocation8 + $0x11e4] ss:$52 sps:$4 sm:$0xff]   ;;  %v19046_v10 = vld [vmem:[#allocation8 + $0x11ec] ss:$52 sps:$4 sm:$0xff]  }
 0x43d   :  { %10309 = vmatpush1.bf16.msra.mxu1 %v18990_v13  ;;  %10023 = vmatprep.subr.bf16.mxu0 %v18995_v17  ;;  %v19041_v13 = vld [vmem:[#allocation8 + $0x11e0] ss:$52 sps:$4 sm:$0xff]   ;;  %v19044_v17 = vld [vmem:[#allocation8 + $0x11e8] ss:$52 sps:$4 sm:$0xff]  }
 0x43e   :  { %10310 = vmatprep.subr.bf16.mxu1 %v18998_v19  ;;  %v19049_v19 = vld [vmem:[#allocation8 + $0x124c] ss:$52 sps:$4 sm:$0xff]  }
 0x440   :  { %10024 = vmatpush1.bf16.msra.mxu0 %v18993_v21  ;;  %v19052_v21 = vld [vmem:[#allocation8 + $0x1254] ss:$52 sps:$4 sm:$0xff]  }
 0x441   :  { %10311 = vmatpush1.bf16.msra.mxu1 %v18996_v3  ;;  %10025 = vmatprep.subr.bf16.mxu0 %v19001_v22  ;;  %v929_v3 = vsub.s32 7, %v22188_v44  ;;  %v19047_v22 = vld [vmem:[#allocation8 + $0x1248] ss:$52 sps:$4 sm:$0xff]  }
 0x442   :  { %10312 = vmatprep.subr.bf16.mxu1 %v19004_v23  ;;  %v918_v23 = vrot.slane %v22339_v59, %v22409_v61 }
 0x444   :  { %10026 = vmatpush1.bf16.msra.mxu0 %v18999_v24  ;;  %v19050_v24 = vld [vmem:[#allocation8 + $0x1250] ss:$52 sps:$4 sm:$0xff]  }
 0x445   :  { %10313 = vmatpush1.bf16.msra.mxu1 %v19002_v25  ;;  %10027 = vmatprep.subr.bf16.mxu0 %v19007_v28  ;;  %v19055_v25 = vld [vmem:[#allocation8 + $0x12b4] ss:$52 sps:$4 sm:$0xff]   ;;  %v19058_v28 = vld [vmem:[#allocation8 + $0x12bc] ss:$52 sps:$4 sm:$0xff]  }
 0x446   :  { %v1512_v16 = vpop.f32.mrb[32].mxu1  ;;  %10314 = vmatprep.subr.bf16.mxu1 %v19010_v20  ;;  %v930_v20 = vrot.slane %v22339_v59, %v929_v3 }
 0x447   :  { %v22413_v37 = vadd.f32 %v1512_v16, %v950_v31  ;;  %v18439_v38 = vpop.f32.mrb[33].mxu1  ;;  %v19053_v31 = vld [vmem:[#allocation8 + $0x12b0] ss:$52 sps:$4 sm:$0xff]  }
 0x448   :  { %v1515_v18 = vpop.f32.mrb[34].mxu1  ;;  %10028 = vmatpush1.bf16.msra.mxu0 %v19005_v32  ;;  %v1349_v32 = vadd.f32 %v22367_v11, %v918_v23  ;;  %v19064_v16 = vld [vmem:[#allocation8 + $0x1324] ss:$52 sps:$4 sm:$0xff]   ;;  %v19065_v11 = vld [vmem:[#allocation8 + $0x1380] ss:$52 sps:$4 sm:$0xff]  }
 0x449   :  { %10315 = vmatpush1.bf16.msra.mxu1 %v19008_v33  ;;  %v18440_v41 = vpop.f32.mrb[35].mxu1  ;;  %10029 = vmatprep.subr.bf16.mxu0 %v19013_v35  ;;  %v19056_v33 = vld [vmem:[#allocation8 + $0x12b8] ss:$52 sps:$4 sm:$0xff]   ;;  %v19061_v35 = vld [vmem:[#allocation8 + $0x131c] ss:$52 sps:$4 sm:$0xff]  }
 0x44a   :  { %10316 = vmatprep.subr.bf16.mxu1 %v19016_v36  ;;  %v1392_v36 = vadd.f32 %v22373_v4, %v930_v20  ;;  %v19059_v38 = vld [vmem:[#allocation8 + $0x1318] ss:$52 sps:$4 sm:$0xff]   ;;  %v1522_v18 = vmax.f32 %v1349_v32, 0.0  ;;  %v19103_v23 = vld [vmem:[#allocation8 + $0x15f4] ss:$52 sps:$4 sm:$0xff]  }
 0x44b   :  { %v19067_v41 = vld [vmem:[#allocation8 + $0x1384] ss:$52 sps:$4 sm:$0xff]   ;;  %v19109_v20 = vld [vmem:[#allocation8 + $0x165c] ss:$52 sps:$4 sm:$0xff]  }
 0x44c   :  { %10030 = vmatpush1.bf16.msra.mxu0 %v19011_v26  ;;  %v19062_v26 = vld [vmem:[#allocation8 + $0x1320] ss:$52 sps:$4 sm:$0xff]   ;;  %v19107_v32 = vld [vmem:[#allocation8 + $0x1658] ss:$52 sps:$4 sm:$0xff]  }
 0x44d   :  { %10317 = vmatpush1.bf16.msra.mxu1 %v19014_v42  ;;  %10031 = vmatprep.subr.bf16.mxu0 %v19019_v46  ;;  %v19070_v42 = vld [vmem:[#allocation8 + $0x138c] ss:$52 sps:$4 sm:$0xff]   ;;  %v1525_v46 = vmax.f32 %v1392_v36, 0.0 }
 0x44e   :  { %10318 = vmatprep.subr.bf16.mxu1 %v19022_v1  ;;  %v22423_v1 = vpack.c.bf16 %v1522_v18, %v1522_v18  ;;  %v19113_v36 = vld [vmem:[#allocation8 + $0x16c0] ss:$52 sps:$4 sm:$0xff]  }
 0x44f   :  { %v22425_v4 = vpack.c.bf16 %v1525_v46, %v1525_v46  ;;  %v19121_v18 = vld [vmem:[#allocation8 + $0x172c] ss:$52 sps:$4 sm:$0xff]   ;;  %v19127_v46 = vld [vmem:[#allocation8 + $0x1794] ss:$52 sps:$4 sm:$0xff]  }
 0x450   :  { %10032 = vmatpush1.bf16.msra.mxu0 %v19017_v40  ;;  %v19068_v40 = vld [vmem:[#allocation8 + $0x1388] ss:$52 sps:$4 sm:$0xff]  }
 0x451   :  { %10319 = vmatpush1.bf16.msra.mxu1 %v19020_v52  ;;  %10033 = vmatprep.subr.bf16.mxu0 %v19025_v30  ;;  %v19073_v52 = vld [vmem:[#allocation8 + $0x13ec] ss:$52 sps:$4 sm:$0xff]   ;;  %v19076_v30 = vld [vmem:[#allocation8 + $0x13f4] ss:$52 sps:$4 sm:$0xff]  }
 0x452   :  { %10320 = vmatprep.subr.bf16.mxu1 %v19028_v53  ;;  %v19071_v53 = vld [vmem:[#allocation8 + $0x13e8] ss:$52 sps:$4 sm:$0xff]  }
 0x454   :  { %10034 = vmatpush1.bf16.msra.mxu0 %v19023_v55  ;;  %v19074_v55 = vld [vmem:[#allocation8 + $0x13f0] ss:$52 sps:$4 sm:$0xff]  }
 0x455   :  { %10321 = vmatpush1.bf16.msra.mxu1 %v19026_v29  ;;  %10035 = vmatprep.subr.bf16.mxu0 %v19031_v56  ;;  %v19079_v29 = vld [vmem:[#allocation8 + $0x1454] ss:$52 sps:$4 sm:$0xff]   ;;  %v19082_v56 = vld [vmem:[#allocation8 + $0x145c] ss:$52 sps:$4 sm:$0xff]  }
 0x456   :  { %10322 = vmatprep.subr.bf16.mxu1 %v19034_v57  ;;  %v19077_v57 = vld [vmem:[#allocation8 + $0x1450] ss:$52 sps:$4 sm:$0xff]  }
 0x458   :  { %10036 = vmatpush1.bf16.msra.mxu0 %v19029_v58  ;;  %v19080_v58 = vld [vmem:[#allocation8 + $0x1458] ss:$52 sps:$4 sm:$0xff]  }
 0x459   :  { %10323 = vmatpush1.bf16.msra.mxu1 %v19032_v60  ;;  %10037 = vmatprep.subr.bf16.mxu0 %v19037_v45  ;;  %v19085_v60 = vld [vmem:[#allocation8 + $0x14bc] ss:$52 sps:$4 sm:$0xff]   ;;  %v19088_v45 = vld [vmem:[#allocation8 + $0x14c4] ss:$52 sps:$4 sm:$0xff]  }
 0x45a   :  { %10324 = vmatprep.subr.bf16.mxu1 %v19040_v5  ;;  %v19083_v5 = vld [vmem:[#allocation8 + $0x14b8] ss:$52 sps:$4 sm:$0xff]  }
 0x45c   :  { %10038 = vmatpush1.bf16.msra.mxu0 %v19035_v7  ;;  %v19086_v7 = vld [vmem:[#allocation8 + $0x14c0] ss:$52 sps:$4 sm:$0xff]  }
 0x45d   :  { %10325 = vmatpush1.bf16.msra.mxu1 %v19038_v9  ;;  %10039 = vmatprep.subr.bf16.mxu0 %v19043_v43  ;;  %v19091_v9 = vld [vmem:[#allocation8 + $0x1524] ss:$52 sps:$4 sm:$0xff]   ;;  %v19094_v43 = vld [vmem:[#allocation8 + $0x152c] ss:$52 sps:$4 sm:$0xff]  }
 0x45e   :  { %10326 = vmatprep.subr.bf16.mxu1 %v19046_v10  ;;  %v19089_v10 = vld [vmem:[#allocation8 + $0x1520] ss:$52 sps:$4 sm:$0xff]  }
 0x460   :  { %10040 = vmatpush1.bf16.msra.mxu0 %v19041_v13  ;;  %v19092_v13 = vld [vmem:[#allocation8 + $0x1528] ss:$52 sps:$4 sm:$0xff]  }
 0x461   :  { %10327 = vmatpush1.bf16.msra.mxu1 %v19044_v17  ;;  %10041 = vmatprep.subr.bf16.mxu0 %v19049_v19  ;;  %v19097_v17 = vld [vmem:[#allocation8 + $0x158c] ss:$52 sps:$4 sm:$0xff]   ;;  %v19100_v19 = vld [vmem:[#allocation8 + $0x1594] ss:$52 sps:$4 sm:$0xff]  }
 0x462   :  { %10328 = vmatprep.subr.bf16.mxu1 %v19052_v21  ;;  %v19095_v21 = vld [vmem:[#allocation8 + $0x1588] ss:$52 sps:$4 sm:$0xff]  }
 0x464   :  { %10042 = vmatpush1.bf16.msra.mxu0 %v19047_v22  ;;  %v19098_v22 = vld [vmem:[#allocation8 + $0x1590] ss:$52 sps:$4 sm:$0xff]  }
 0x465   :  { %10329 = vmatpush1.bf16.msra.mxu1 %v19050_v24  ;;  %10043 = vmatprep.subr.bf16.mxu0 %v19055_v25  ;;  %v19106_v24 = vld [vmem:[#allocation8 + $0x15fc] ss:$52 sps:$4 sm:$0xff]  }
 0x466   :  { %10330 = vmatprep.subr.bf16.mxu1 %v19058_v28  ;;  %v19101_v25 = vld [vmem:[#allocation8 + $0x15f0] ss:$52 sps:$4 sm:$0xff]   ;;  %v19104_v28 = vld [vmem:[#allocation8 + $0x15f8] ss:$52 sps:$4 sm:$0xff]  }
 0x468   :  { %10044 = vmatpush1.bf16.msra.mxu0 %v19053_v31  ;;  %v19112_v31 = vld [vmem:[#allocation8 + $0x1664] ss:$52 sps:$4 sm:$0xff]  }
 0x469   :  { %10331 = vmatpush1.bf16.msra.mxu1 %v19056_v33  ;;  %10045 = vmatprep.subr.bf16.mxu0 %v19061_v35  ;;  %v19110_v33 = vld [vmem:[#allocation8 + $0x1660] ss:$52 sps:$4 sm:$0xff]   ;;  %v19115_v35 = vld [vmem:[#allocation8 + $0x16c4] ss:$52 sps:$4 sm:$0xff]  }
 0x46a   :  { %10332 = vmatprep.subr.bf16.mxu1 %v19064_v16  ;;  %v19118_v16 = vld [vmem:[#allocation8 + $0x16cc] ss:$52 sps:$4 sm:$0xff]  }
 0x46c   :  { %10046 = vmatpush1.bf16.msra.mxu0 %v19059_v38  ;;  %v19116_v38 = vld [vmem:[#allocation8 + $0x16c8] ss:$52 sps:$4 sm:$0xff]  }
 0x46d   :  { %10333 = vmatpush1.bf16.msra.mxu1 %v19062_v26  ;;  %10056 = vmatprep.subr.bf16.mxu0 %v19067_v41  ;;  %v19124_v26 = vld [vmem:[#allocation8 + $0x1734] ss:$52 sps:$4 sm:$0xff]  }
 0x46e   :  { %10343 = vmatprep.subr.bf16.mxu1 %v19070_v42  ;;  %v19119_v41 = vld [vmem:[#allocation8 + $0x1728] ss:$52 sps:$4 sm:$0xff]   ;;  %v19122_v42 = vld [vmem:[#allocation8 + $0x1730] ss:$52 sps:$4 sm:$0xff]  }
 0x46f   :  { %10048 = vmatmul.mubr.bf16.vlgmr.msra.gmra.mrb[64].mxu0 %v22423_v1 }
 0x470   :  { %10335 = vmatmul.mubr.bf16.vlgmr.msra.gmra.mrb[36].mxu1 %v22423_v1  ;;  %10057 = vmatpush1.bf16.msra.mxu0 %v19065_v11  ;;  %v19130_v11 = vld [vmem:[#allocation8 + $0x179c] ss:$52 sps:$4 sm:$0xff]  }
 0x471   :  { %10088 = vmatprep.mubr.bf16.mxu0 %v22425_v4  ;;  %10344 = vmatpush1.bf16.msra.mxu1 %v19068_v40  ;;  %v19125_v40 = vld [vmem:[#allocation8 + $0x1790] ss:$52 sps:$4 sm:$0xff]  }
 0x472   :  { %10375 = vmatprep.mubr.bf16.mxu1 %v22425_v4  ;;  %10058 = vmatprep.subr.bf16.mxu0 %v19073_v52  ;;  %v19128_v52 = vld [vmem:[#allocation8 + $0x1798] ss:$52 sps:$4 sm:$0xff]  }
 0x473   :  { %10345 = vmatprep.subr.bf16.mxu1 %v19076_v30  ;;  %v19133_v30 = vld [vmem:[#allocation8 + $0x17fc] ss:$52 sps:$4 sm:$0xff]  }
 0x474   :  { %10059 = vmatpush1.bf16.msra.mxu0 %v19071_v53  ;;  %v19136_v53 = vld [vmem:[#allocation8 + $0x1804] ss:$52 sps:$4 sm:$0xff]  }
 0x475   :  { %10346 = vmatpush1.bf16.msra.mxu1 %v19074_v55  ;;  %10060 = vmatprep.subr.bf16.mxu0 %v19079_v29  ;;  %v19131_v55 = vld [vmem:[#allocation8 + $0x17f8] ss:$52 sps:$4 sm:$0xff]   ;;  %v19134_v29 = vld [vmem:[#allocation8 + $0x1800] ss:$52 sps:$4 sm:$0xff]  }
 0x476   :  { %10347 = vmatprep.subr.bf16.mxu1 %v19082_v56  ;;  %v19139_v56 = vld [vmem:[#allocation8 + $0x1864] ss:$52 sps:$4 sm:$0xff]  }
 0x478   :  { %10061 = vmatpush1.bf16.msra.mxu0 %v19077_v57  ;;  %v19142_v57 = vld [vmem:[#allocation8 + $0x186c] ss:$52 sps:$4 sm:$0xff]  }
 0x479   :  { %10348 = vmatpush1.bf16.msra.mxu1 %v19080_v58  ;;  %10062 = vmatprep.subr.bf16.mxu0 %v19085_v60  ;;  %v19137_v58 = vld [vmem:[#allocation8 + $0x1860] ss:$52 sps:$4 sm:$0xff]   ;;  %v925_v60 = vsub.s32 6, %v22188_v44 }
 0x47a   :  { %10349 = vmatprep.subr.bf16.mxu1 %v19088_v45  ;;  %v19140_v45 = vld [vmem:[#allocation8 + $0x1868] ss:$52 sps:$4 sm:$0xff]   ;;  %v21067_v44 = vld [vmem:[#allocation11 + $0x804] ss:$16 sps:$4 sm:$0xff]  }
 0x47c   :  { %10063 = vmatpush1.bf16.msra.mxu0 %v19083_v5  ;;  %v19145_v5 = vld [vmem:[#allocation8 + $0x18cc] ss:$52 sps:$4 sm:$0xff]  }
 0x47d   :  { %10350 = vmatpush1.bf16.msra.mxu1 %v19086_v7  ;;  %10064 = vmatprep.subr.bf16.mxu0 %v19091_v9  ;;  %v19148_v7 = vld [vmem:[#allocation8 + $0x18d4] ss:$52 sps:$4 sm:$0xff]  }
 0x47e   :  { %10351 = vmatprep.subr.bf16.mxu1 %v19094_v43  ;;  %v19143_v9 = vld [vmem:[#allocation8 + $0x18c8] ss:$52 sps:$4 sm:$0xff]   ;;  %v926_v43 = vrot.slane %v22339_v59, %v925_v60 }
 0x480   :  { %10065 = vmatpush1.bf16.msra.mxu0 %v19089_v10  ;;  %v19146_v10 = vld [vmem:[#allocation8 + $0x18d0] ss:$52 sps:$4 sm:$0xff]  }
 0x481   :  { %10352 = vmatpush1.bf16.msra.mxu1 %v19092_v13  ;;  %10066 = vmatprep.subr.bf16.mxu0 %v19097_v17  ;;  %v19151_v13 = vld [vmem:[#allocation8 + $0x1934] ss:$52 sps:$4 sm:$0xff]   ;;  %v19154_v17 = vld [vmem:[#allocation8 + $0x193c] ss:$52 sps:$4 sm:$0xff]  }
 0x482   :  { %10353 = vmatprep.subr.bf16.mxu1 %v19100_v19  ;;  %v938_v19 = vrot.slane %v22398_v54, %v22342_v15 }
 0x484   :  { %10067 = vmatpush1.bf16.msra.mxu0 %v19095_v21  ;;  %v19149_v21 = vld [vmem:[#allocation8 + $0x1930] ss:$52 sps:$4 sm:$0xff]   ;;  %v1433_v59 = vadd.f32 %v22388_v12, %v938_v19 }
 0x485   :  { %10354 = vmatpush1.bf16.msra.mxu1 %v19098_v22  ;;  %10068 = vmatprep.subr.bf16.mxu0 %v19103_v23  ;;  %v1390_v22 = vadd.f32 %v22371_v0, %v926_v43  ;;  %v19152_v23 = vld [vmem:[#allocation8 + $0x1938] ss:$52 sps:$4 sm:$0xff]   ;;  %v19161_v0 = vld [vmem:[#allocation8 + $0x1a00] ss:$52 sps:$4 sm:$0xff]   ;;  %v19205_v19 = vld [vmem:[#allocation8 + $0x1cdc] ss:$52 sps:$4 sm:$0xff]  }
 0x486   :  { %10355 = vmatprep.subr.bf16.mxu1 %v19106_v24  ;;  %v19157_v24 = vld [vmem:[#allocation8 + $0x199c] ss:$52 sps:$4 sm:$0xff]   ;;  %v19199_v43 = vld [vmem:[#allocation8 + $0x1c74] ss:$52 sps:$4 sm:$0xff]  }
 0x488   :  { %10069 = vmatpush1.bf16.msra.mxu0 %v19101_v25  ;;  %v19160_v25 = vld [vmem:[#allocation8 + $0x19a4] ss:$52 sps:$4 sm:$0xff]  }
 0x489   :  { %10356 = vmatpush1.bf16.msra.mxu1 %v19104_v28  ;;  %10070 = vmatprep.subr.bf16.mxu0 %v19109_v20  ;;  %v19155_v28 = vld [vmem:[#allocation8 + $0x1998] ss:$52 sps:$4 sm:$0xff]   ;;  %v1524_v20 = vmax.f32 %v1390_v22, 0.0 }
 0x48a   :  { %10357 = vmatprep.subr.bf16.mxu1 %v19112_v31  ;;  %v19158_v31 = vld [vmem:[#allocation8 + $0x19a0] ss:$52 sps:$4 sm:$0xff]   ;;  %v19203_v22 = vld [vmem:[#allocation8 + $0x1cd8] ss:$52 sps:$4 sm:$0xff]  }
 0x48c   :  { %10071 = vmatpush1.bf16.msra.mxu0 %v19107_v32  ;;  %v19163_v32 = vld [vmem:[#allocation8 + $0x1a04] ss:$52 sps:$4 sm:$0xff]  }
 0x48d   :  { %10358 = vmatpush1.bf16.msra.mxu1 %v19110_v33  ;;  %10072 = vmatprep.subr.bf16.mxu0 %v19115_v35  ;;  %v19166_v33 = vld [vmem:[#allocation8 + $0x1a0c] ss:$52 sps:$4 sm:$0xff]   ;;  %v1527_v35 = vmax.f32 %v1433_v59, 0.0 }
 0x48e   :  { %10359 = vmatprep.subr.bf16.mxu1 %v19118_v16  ;;  %v22439_v16 = vpack.c.bf16 %v1524_v20, %v1524_v20  ;;  %v19209_v59 = vld [vmem:[#allocation8 + $0x1d40] ss:$52 sps:$4 sm:$0xff]  }
 0x48f   :  { %v22441_v12 = vpack.c.bf16 %v1527_v35, %v1527_v35  ;;  %v19217_v20 = vld [vmem:[#allocation8 + $0x1dac] ss:$52 sps:$4 sm:$0xff]   ;;  %v19223_v35 = vld [vmem:[#allocation8 + $0x1e14] ss:$52 sps:$4 sm:$0xff]  }
 0x490   :  { %10073 = vmatpush1.bf16.msra.mxu0 %v19113_v36  ;;  %v19164_v36 = vld [vmem:[#allocation8 + $0x1a08] ss:$52 sps:$4 sm:$0xff]  }
 0x491   :  { %10360 = vmatpush1.bf16.msra.mxu1 %v19116_v38  ;;  %10074 = vmatprep.subr.bf16.mxu0 %v19121_v18  ;;  %v19169_v38 = vld [vmem:[#allocation8 + $0x1a6c] ss:$52 sps:$4 sm:$0xff]   ;;  %v19172_v18 = vld [vmem:[#allocation8 + $0x1a74] ss:$52 sps:$4 sm:$0xff]  }
 0x492   :  { %10361 = vmatprep.subr.bf16.mxu1 %v19124_v26  ;;  %v19167_v26 = vld [vmem:[#allocation8 + $0x1a68] ss:$52 sps:$4 sm:$0xff]  }
 0x494   :  { %10075 = vmatpush1.bf16.msra.mxu0 %v19119_v41  ;;  %v19170_v41 = vld [vmem:[#allocation8 + $0x1a70] ss:$52 sps:$4 sm:$0xff]  }
 0x495   :  { %10362 = vmatpush1.bf16.msra.mxu1 %v19122_v42  ;;  %10076 = vmatprep.subr.bf16.mxu0 %v19127_v46  ;;  %v19175_v42 = vld [vmem:[#allocation8 + $0x1ad4] ss:$52 sps:$4 sm:$0xff]   ;;  %v19178_v46 = vld [vmem:[#allocation8 + $0x1adc] ss:$52 sps:$4 sm:$0xff]  }
 0x496   :  { %10363 = vmatprep.subr.bf16.mxu1 %v19130_v11  ;;  %v19173_v11 = vld [vmem:[#allocation8 + $0x1ad0] ss:$52 sps:$4 sm:$0xff]  }
 0x498   :  { %10077 = vmatpush1.bf16.msra.mxu0 %v19125_v40  ;;  %v19176_v40 = vld [vmem:[#allocation8 + $0x1ad8] ss:$52 sps:$4 sm:$0xff]  }
 0x499   :  { %10364 = vmatpush1.bf16.msra.mxu1 %v19128_v52  ;;  %10078 = vmatprep.subr.bf16.mxu0 %v19133_v30  ;;  %v19181_v52 = vld [vmem:[#allocation8 + $0x1b3c] ss:$52 sps:$4 sm:$0xff]   ;;  %v19184_v30 = vld [vmem:[#allocation8 + $0x1b44] ss:$52 sps:$4 sm:$0xff]  }
 0x49a   :  { %10365 = vmatprep.subr.bf16.mxu1 %v19136_v53  ;;  %v19179_v53 = vld [vmem:[#allocation8 + $0x1b38] ss:$52 sps:$4 sm:$0xff]  }
 0x49c   :  { %10079 = vmatpush1.bf16.msra.mxu0 %v19131_v55  ;;  %v19182_v55 = vld [vmem:[#allocation8 + $0x1b40] ss:$52 sps:$4 sm:$0xff]  }
 0x49d   :  { %10366 = vmatpush1.bf16.msra.mxu1 %v19134_v29  ;;  %10080 = vmatprep.subr.bf16.mxu0 %v19139_v56  ;;  %v19187_v29 = vld [vmem:[#allocation8 + $0x1ba4] ss:$52 sps:$4 sm:$0xff]   ;;  %v19190_v56 = vld [vmem:[#allocation8 + $0x1bac] ss:$52 sps:$4 sm:$0xff]  }
 0x49e   :  { %10367 = vmatprep.subr.bf16.mxu1 %v19142_v57  ;;  %v19185_v57 = vld [vmem:[#allocation8 + $0x1ba0] ss:$52 sps:$4 sm:$0xff]  }
 0x4a0   :  { %10081 = vmatpush1.bf16.msra.mxu0 %v19137_v58  ;;  %v19188_v58 = vld [vmem:[#allocation8 + $0x1ba8] ss:$52 sps:$4 sm:$0xff]  }
 0x4a1   :  { %10368 = vmatpush1.bf16.msra.mxu1 %v19140_v45  ;;  %10082 = vmatprep.subr.bf16.mxu0 %v19145_v5  ;;  %v19193_v45 = vld [vmem:[#allocation8 + $0x1c0c] ss:$52 sps:$4 sm:$0xff]   ;;  %v19196_v5 = vld [vmem:[#allocation8 + $0x1c14] ss:$52 sps:$4 sm:$0xff]  }
 0x4a2   :  { %10369 = vmatprep.subr.bf16.mxu1 %v19148_v7  ;;  %v19191_v7 = vld [vmem:[#allocation8 + $0x1c08] ss:$52 sps:$4 sm:$0xff]  }
 0x4a4   :  { %10083 = vmatpush1.bf16.msra.mxu0 %v19143_v9  ;;  %v19194_v9 = vld [vmem:[#allocation8 + $0x1c10] ss:$52 sps:$4 sm:$0xff]  }
 0x4a5   :  { %10370 = vmatpush1.bf16.msra.mxu1 %v19146_v10  ;;  %10084 = vmatprep.subr.bf16.mxu0 %v19151_v13  ;;  %v19202_v10 = vld [vmem:[#allocation8 + $0x1c7c] ss:$52 sps:$4 sm:$0xff]  }
 0x4a6   :  { %10371 = vmatprep.subr.bf16.mxu1 %v19154_v17  ;;  %v19197_v13 = vld [vmem:[#allocation8 + $0x1c70] ss:$52 sps:$4 sm:$0xff]   ;;  %v19200_v17 = vld [vmem:[#allocation8 + $0x1c78] ss:$52 sps:$4 sm:$0xff]  }
 0x4a8   :  { %10085 = vmatpush1.bf16.msra.mxu0 %v19149_v21  ;;  %v19208_v21 = vld [vmem:[#allocation8 + $0x1ce4] ss:$52 sps:$4 sm:$0xff]  }
 0x4a9   :  { %10372 = vmatpush1.bf16.msra.mxu1 %v19152_v23  ;;  %10086 = vmatprep.subr.bf16.mxu0 %v19157_v24  ;;  %v19206_v23 = vld [vmem:[#allocation8 + $0x1ce0] ss:$52 sps:$4 sm:$0xff]   ;;  %v19211_v24 = vld [vmem:[#allocation8 + $0x1d44] ss:$52 sps:$4 sm:$0xff]  }
 0x4aa   :  { %10373 = vmatprep.subr.bf16.mxu1 %v19160_v25  ;;  %v19214_v25 = vld [vmem:[#allocation8 + $0x1d4c] ss:$52 sps:$4 sm:$0xff]  }
 0x4ac   :  { %10087 = vmatpush1.bf16.msra.mxu0 %v19155_v28  ;;  %v19212_v28 = vld [vmem:[#allocation8 + $0x1d48] ss:$52 sps:$4 sm:$0xff]  }
 0x4ad   :  { %10374 = vmatpush1.bf16.msra.mxu1 %v19158_v31  ;;  %10097 = vmatprep.subr.bf16.mxu0 %v19163_v32  ;;  %v19220_v31 = vld [vmem:[#allocation8 + $0x1db4] ss:$52 sps:$4 sm:$0xff]  }
 0x4ae   :  { %10384 = vmatprep.subr.bf16.mxu1 %v19166_v33  ;;  %v19215_v32 = vld [vmem:[#allocation8 + $0x1da8] ss:$52 sps:$4 sm:$0xff]   ;;  %v19218_v33 = vld [vmem:[#allocation8 + $0x1db0] ss:$52 sps:$4 sm:$0xff]  }
 0x4af   :  { %10089 = vmatmul.mubr.bf16.vlgmr.msra.gmra.mrb[64].mxu0 %v22439_v16 }
 0x4b0   :  { %10376 = vmatmul.mubr.bf16.vlgmr.msra.gmra.mrb[36].mxu1 %v22439_v16  ;;  %10098 = vmatpush1.bf16.msra.mxu0 %v19161_v0  ;;  %v19226_v0 = vld [vmem:[#allocation8 + $0x1e1c] ss:$52 sps:$4 sm:$0xff]  }
 0x4b1   :  { %10129 = vmatprep.mubr.bf16.mxu0 %v22441_v12  ;;  %10385 = vmatpush1.bf16.msra.mxu1 %v19164_v36  ;;  %v19221_v36 = vld [vmem:[#allocation8 + $0x1e10] ss:$52 sps:$4 sm:$0xff]  }
 0x4b2   :  { %10416 = vmatprep.mubr.bf16.mxu1 %v22441_v12  ;;  %10099 = vmatprep.subr.bf16.mxu0 %v19169_v38  ;;  %v19224_v38 = vld [vmem:[#allocation8 + $0x1e18] ss:$52 sps:$4 sm:$0xff]  }
 0x4b3   :  { %10386 = vmatprep.subr.bf16.mxu1 %v19172_v18  ;;  %v19229_v18 = vld [vmem:[#allocation8 + $0x1e7c] ss:$52 sps:$4 sm:$0xff]  }
 0x4b4   :  { %10100 = vmatpush1.bf16.msra.mxu0 %v19167_v26  ;;  %v19232_v26 = vld [vmem:[#allocation8 + $0x1e84] ss:$52 sps:$4 sm:$0xff]  }
 0x4b5   :  { %10387 = vmatpush1.bf16.msra.mxu1 %v19170_v41  ;;  %10101 = vmatprep.subr.bf16.mxu0 %v19175_v42  ;;  %v19227_v41 = vld [vmem:[#allocation8 + $0x1e78] ss:$52 sps:$4 sm:$0xff]   ;;  %v19230_v42 = vld [vmem:[#allocation8 + $0x1e80] ss:$52 sps:$4 sm:$0xff]  }
 0x4b6   :  { %10388 = vmatprep.subr.bf16.mxu1 %v19178_v46  ;;  %v19235_v46 = vld [vmem:[#allocation8 + $0x1ee4] ss:$52 sps:$4 sm:$0xff]  }
 0x4b8   :  { %10102 = vmatpush1.bf16.msra.mxu0 %v19173_v11  ;;  %v19238_v11 = vld [vmem:[#allocation8 + $0x1eec] ss:$52 sps:$4 sm:$0xff]  }
 0x4b9   :  { %10389 = vmatpush1.bf16.msra.mxu1 %v19176_v40  ;;  %10103 = vmatprep.subr.bf16.mxu0 %v19181_v52  ;;  %v19233_v40 = vld [vmem:[#allocation8 + $0x1ee0] ss:$52 sps:$4 sm:$0xff]   ;;  %v19236_v52 = vld [vmem:[#allocation8 + $0x1ee8] ss:$52 sps:$4 sm:$0xff]  }
 0x4ba   :  { %10390 = vmatprep.subr.bf16.mxu1 %v19184_v30  ;;  %v19241_v30 = vld [vmem:[#allocation8 + $0x1f4c] ss:$52 sps:$4 sm:$0xff]  }
 0x4bc   :  { %10104 = vmatpush1.bf16.msra.mxu0 %v19179_v53  ;;  %v19244_v53 = vld [vmem:[#allocation8 + $0x1f54] ss:$52 sps:$4 sm:$0xff]  }
 0x4bd   :  { %10391 = vmatpush1.bf16.msra.mxu1 %v19182_v55  ;;  %10105 = vmatprep.subr.bf16.mxu0 %v19187_v29  ;;  %v19239_v55 = vld [vmem:[#allocation8 + $0x1f48] ss:$52 sps:$4 sm:$0xff]   ;;  %v934_v29 = vrot.slane %v22398_v54, %v22337_v49  ;;  %v19254_v54 = vld [vmem:[#allocation8 + $0x2020] ss:$52 sps:$4 sm:$0xff]  }
 0x4be   :  { %10392 = vmatprep.subr.bf16.mxu1 %v19190_v56  ;;  %v19242_v56 = vld [vmem:[#allocation8 + $0x1f50] ss:$52 sps:$4 sm:$0xff]  }
 0x4c0   :  { %10106 = vmatpush1.bf16.msra.mxu0 %v19185_v57  ;;  %v19247_v57 = vld [vmem:[#allocation8 + $0x1fb4] ss:$52 sps:$4 sm:$0xff]  }
 0x4c1   :  { %10393 = vmatpush1.bf16.msra.mxu1 %v19188_v58  ;;  %10107 = vmatprep.subr.bf16.mxu0 %v19193_v45  ;;  %v19250_v58 = vld [vmem:[#allocation8 + $0x1fbc] ss:$52 sps:$4 sm:$0xff]  }
 0x4c2   :  { %10394 = vmatprep.subr.bf16.mxu1 %v19196_v5  ;;  %v19245_v45 = vld [vmem:[#allocation8 + $0x1fb0] ss:$52 sps:$4 sm:$0xff]   ;;  %v1431_v5 = vadd.f32 %v22386_v34, %v934_v29  ;;  %v19296_v29 = vld [vmem:[#allocation8 + $0x22f8] ss:$52 sps:$4 sm:$0xff]  }
 0x4c4   :  { %10108 = vmatpush1.bf16.msra.mxu0 %v19191_v7  ;;  %v19248_v7 = vld [vmem:[#allocation8 + $0x1fb8] ss:$52 sps:$4 sm:$0xff]  }
 0x4c5   :  { %10395 = vmatpush1.bf16.msra.mxu1 %v19194_v9  ;;  %10109 = vmatprep.subr.bf16.mxu0 %v19199_v43  ;;  %v19253_v9 = vld [vmem:[#allocation8 + $0x201c] ss:$52 sps:$4 sm:$0xff]   ;;  %v19256_v43 = vld [vmem:[#allocation8 + $0x2024] ss:$52 sps:$4 sm:$0xff]  }
 0x4c6   :  { %10396 = vmatprep.subr.bf16.mxu1 %v19202_v10  ;;  %v19251_v10 = vld [vmem:[#allocation8 + $0x2018] ss:$52 sps:$4 sm:$0xff]  }
 0x4c8   :  { %10110 = vmatpush1.bf16.msra.mxu0 %v19197_v13  ;;  %v1526_v13 = vmax.f32 %v1431_v5, 0.0  ;;  %v19307_v5 = vld [vmem:[#allocation8 + $0x23c4] ss:$52 sps:$4 sm:$0xff]  }
 0x4c9   :  { %10397 = vmatpush1.bf16.msra.mxu1 %v19200_v17  ;;  %10111 = vmatprep.subr.bf16.mxu0 %v19205_v19  ;;  %v19259_v17 = vld [vmem:[#allocation8 + $0x2084] ss:$52 sps:$4 sm:$0xff]   ;;  %v19262_v19 = vld [vmem:[#allocation8 + $0x208c] ss:$52 sps:$4 sm:$0xff]  }
 0x4ca   :  { %10398 = vmatprep.subr.bf16.mxu1 %v19208_v21  ;;  %v1529_v21 = vmax.f32 %v22406_v8, 0.0  ;;  %v22451_v34 = vpack.c.bf16 %v1526_v13, %v1526_v13  ;;  %v19266_v8 = vld [vmem:[#allocation8 + $0x20f0] ss:$52 sps:$4 sm:$0xff]   ;;  %v19316_v13 = vld [vmem:[#allocation8 + $0x2434] ss:$52 sps:$4 sm:$0xff]  }
 0x4cc   :  { %10112 = vmatpush1.bf16.msra.mxu0 %v19203_v22  ;;  %v19257_v22 = vld [vmem:[#allocation8 + $0x2080] ss:$52 sps:$4 sm:$0xff]  }
 0x4cd   :  { %10399 = vmatpush1.bf16.msra.mxu1 %v19206_v23  ;;  %10113 = vmatprep.subr.bf16.mxu0 %v19211_v24  ;;  %v19260_v23 = vld [vmem:[#allocation8 + $0x2088] ss:$52 sps:$4 sm:$0xff]   ;;  %v19265_v24 = vld [vmem:[#allocation8 + $0x20ec] ss:$52 sps:$4 sm:$0xff]  }
 0x4ce   :  { %10400 = vmatprep.subr.bf16.mxu1 %v19214_v25  ;;  %v22453_v25 = vpack.c.bf16 %v1529_v21, %v1529_v21  ;;  %v19322_v21 = vld [vmem:[#allocation8 + $0x249c] ss:$52 sps:$4 sm:$0xff]  }
 0x4d0   :  { %10114 = vmatpush1.bf16.msra.mxu0 %v19209_v59  ;;  %v19268_v59 = vld [vmem:[#allocation8 + $0x20f4] ss:$52 sps:$4 sm:$0xff]  }
 0x4d1   :  { %10401 = vmatpush1.bf16.msra.mxu1 %v19212_v28  ;;  %10115 = vmatprep.subr.bf16.mxu0 %v19217_v20  ;;  %v19263_v28 = vld [vmem:[#allocation8 + $0x20e8] ss:$52 sps:$4 sm:$0xff]  }
 0x4d2   :  { %10402 = vmatprep.subr.bf16.mxu1 %v19220_v31  ;;  %v19271_v20 = vld [vmem:[#allocation8 + $0x2154] ss:$52 sps:$4 sm:$0xff]   ;;  %v19274_v31 = vld [vmem:[#allocation8 + $0x215c] ss:$52 sps:$4 sm:$0xff]  }
 0x4d4   :  { %10116 = vmatpush1.bf16.msra.mxu0 %v19215_v32  ;;  %v19269_v32 = vld [vmem:[#allocation8 + $0x2150] ss:$52 sps:$4 sm:$0xff]  }
 0x4d5   :  { %10403 = vmatpush1.bf16.msra.mxu1 %v19218_v33  ;;  %10117 = vmatprep.subr.bf16.mxu0 %v19223_v35  ;;  %v19272_v33 = vld [vmem:[#allocation8 + $0x2158] ss:$52 sps:$4 sm:$0xff]   ;;  %v19277_v35 = vld [vmem:[#allocation8 + $0x21bc] ss:$52 sps:$4 sm:$0xff]  }
 0x4d6   :  { %10404 = vmatprep.subr.bf16.mxu1 %v19226_v0  ;;  %v19280_v0 = vld [vmem:[#allocation8 + $0x21c4] ss:$52 sps:$4 sm:$0xff]  }
 0x4d8   :  { %10118 = vmatpush1.bf16.msra.mxu0 %v19221_v36  ;;  %v19275_v36 = vld [vmem:[#allocation8 + $0x21b8] ss:$52 sps:$4 sm:$0xff]  }
 0x4d9   :  { %10405 = vmatpush1.bf16.msra.mxu1 %v19224_v38  ;;  %10119 = vmatprep.subr.bf16.mxu0 %v19229_v18  ;;  %v19278_v38 = vld [vmem:[#allocation8 + $0x21c0] ss:$52 sps:$4 sm:$0xff]   ;;  %v19283_v18 = vld [vmem:[#allocation8 + $0x2224] ss:$52 sps:$4 sm:$0xff]  }
 0x4da   :  { %10406 = vmatprep.subr.bf16.mxu1 %v19232_v26  ;;  %v19286_v26 = vld [vmem:[#allocation8 + $0x222c] ss:$52 sps:$4 sm:$0xff]  }
 0x4dc   :  { %10120 = vmatpush1.bf16.msra.mxu0 %v19227_v41  ;;  %v19281_v41 = vld [vmem:[#allocation8 + $0x2220] ss:$52 sps:$4 sm:$0xff]  }
 0x4dd   :  { %10407 = vmatpush1.bf16.msra.mxu1 %v19230_v42  ;;  %10121 = vmatprep.subr.bf16.mxu0 %v19235_v46  ;;  %v19284_v42 = vld [vmem:[#allocation8 + $0x2228] ss:$52 sps:$4 sm:$0xff]   ;;  %v19289_v46 = vld [vmem:[#allocation8 + $0x228c] ss:$52 sps:$4 sm:$0xff]  }
 0x4de   :  { %10408 = vmatprep.subr.bf16.mxu1 %v19238_v11  ;;  %v19292_v11 = vld [vmem:[#allocation8 + $0x2294] ss:$52 sps:$4 sm:$0xff]  }
 0x4e0   :  { %10122 = vmatpush1.bf16.msra.mxu0 %v19233_v40  ;;  %v19287_v40 = vld [vmem:[#allocation8 + $0x2288] ss:$52 sps:$4 sm:$0xff]  }
 0x4e1   :  { %10409 = vmatpush1.bf16.msra.mxu1 %v19236_v52  ;;  %10123 = vmatprep.subr.bf16.mxu0 %v19241_v30  ;;  %v19290_v52 = vld [vmem:[#allocation8 + $0x2290] ss:$52 sps:$4 sm:$0xff]   ;;  %v19295_v30 = vld [vmem:[#allocation8 + $0x22f4] ss:$52 sps:$4 sm:$0xff]  }
 0x4e2   :  { %10410 = vmatprep.subr.bf16.mxu1 %v19244_v53  ;;  %v19298_v53 = vld [vmem:[#allocation8 + $0x22fc] ss:$52 sps:$4 sm:$0xff]  }
 0x4e4   :  { %10124 = vmatpush1.bf16.msra.mxu0 %v19239_v55  ;;  %v19293_v55 = vld [vmem:[#allocation8 + $0x22f0] ss:$52 sps:$4 sm:$0xff]  }
 0x4e5   :  { %10411 = vmatpush1.bf16.msra.mxu1 %v19242_v56  ;;  %10125 = vmatprep.subr.bf16.mxu0 %v19247_v57  ;;  %v19301_v56 = vld [vmem:[#allocation8 + $0x235c] ss:$52 sps:$4 sm:$0xff]   ;;  %v19304_v57 = vld [vmem:[#allocation8 + $0x2364] ss:$52 sps:$4 sm:$0xff]  }
 0x4e6   :  { %10412 = vmatprep.subr.bf16.mxu1 %v19250_v58  ;;  %v19299_v58 = vld [vmem:[#allocation8 + $0x2358] ss:$52 sps:$4 sm:$0xff]  }
 0x4e8   :  { %10126 = vmatpush1.bf16.msra.mxu0 %v19245_v45  ;;  %v19302_v45 = vld [vmem:[#allocation8 + $0x2360] ss:$52 sps:$4 sm:$0xff]  }
 0x4e9   :  { %10413 = vmatpush1.bf16.msra.mxu1 %v19248_v7  ;;  %10127 = vmatprep.subr.bf16.mxu0 %v19253_v9  ;;  %v19310_v7 = vld [vmem:[#allocation8 + $0x23cc] ss:$52 sps:$4 sm:$0xff]  }
 0x4ea   :  { %10414 = vmatprep.subr.bf16.mxu1 %v19256_v43  ;;  %v19305_v9 = vld [vmem:[#allocation8 + $0x23c0] ss:$52 sps:$4 sm:$0xff]   ;;  %v19308_v43 = vld [vmem:[#allocation8 + $0x23c8] ss:$52 sps:$4 sm:$0xff]  }
 0x4ec   :  { %10128 = vmatpush1.bf16.msra.mxu0 %v19251_v10  ;;  %v19313_v10 = vld [vmem:[#allocation8 + $0x242c] ss:$52 sps:$4 sm:$0xff]  }
 0x4ed   :  { %10415 = vmatpush1.bf16.msra.mxu1 %v19254_v54  ;;  %10138 = vmatprep.subr.bf16.mxu0 %v19259_v17  ;;  %v19311_v54 = vld [vmem:[#allocation8 + $0x2428] ss:$52 sps:$4 sm:$0xff]   ;;  %v19314_v17 = vld [vmem:[#allocation8 + $0x2430] ss:$52 sps:$4 sm:$0xff]  }
 0x4ee   :  { %10425 = vmatprep.subr.bf16.mxu1 %v19262_v19  ;;  %v19319_v19 = vld [vmem:[#allocation8 + $0x2494] ss:$52 sps:$4 sm:$0xff]  }
 0x4ef   :  { %10130 = vmatmul.mubr.bf16.vlgmr.msra.gmra.mrb[64].mxu0 %v22451_v34 }
 0x4f0   :  { %10417 = vmatmul.mubr.bf16.vlgmr.msra.gmra.mrb[36].mxu1 %v22451_v34  ;;  %10139 = vmatpush1.bf16.msra.mxu0 %v19257_v22  ;;  %v19317_v22 = vld [vmem:[#allocation8 + $0x2490] ss:$52 sps:$4 sm:$0xff]  }
 0x4f1   :  { %10170 = vmatprep.mubr.bf16.mxu0 %v22453_v25  ;;  %10426 = vmatpush1.bf16.msra.mxu1 %v19260_v23  ;;  %v19320_v23 = vld [vmem:[#allocation8 + $0x2498] ss:$52 sps:$4 sm:$0xff]  }
 0x4f2   :  { %10457 = vmatprep.mubr.bf16.mxu1 %v22453_v25  ;;  %10140 = vmatprep.subr.bf16.mxu0 %v19265_v24  ;;  %v19325_v24 = vld [vmem:[#allocation8 + $0x24fc] ss:$52 sps:$4 sm:$0xff]  }
 0x4f3   :  { %10427 = vmatprep.subr.bf16.mxu1 %v19268_v59  ;;  %v19328_v59 = vld [vmem:[#allocation8 + $0x2504] ss:$52 sps:$4 sm:$0xff]  }
 0x4f4   :  { %10141 = vmatpush1.bf16.msra.mxu0 %v19263_v28  ;;  %v19323_v28 = vld [vmem:[#allocation8 + $0x24f8] ss:$52 sps:$4 sm:$0xff]  }
 0x4f5   :  { %10428 = vmatpush1.bf16.msra.mxu1 %v19266_v8  ;;  %10142 = vmatprep.subr.bf16.mxu0 %v19271_v20  ;;  %v19326_v8 = vld [vmem:[#allocation8 + $0x2500] ss:$52 sps:$4 sm:$0xff]   ;;  %v19331_v20 = vld [vmem:[#allocation8 + $0x2564] ss:$52 sps:$4 sm:$0xff]  }
 0x4f6   :  { %10429 = vmatprep.subr.bf16.mxu1 %v19274_v31  ;;  %v19334_v31 = vld [vmem:[#allocation8 + $0x256c] ss:$52 sps:$4 sm:$0xff]  }
 0x4f8   :  { %10143 = vmatpush1.bf16.msra.mxu0 %v19269_v32  ;;  %v19329_v32 = vld [vmem:[#allocation8 + $0x2560] ss:$52 sps:$4 sm:$0xff]  }
 0x4f9   :  { %10430 = vmatpush1.bf16.msra.mxu1 %v19272_v33  ;;  %10144 = vmatprep.subr.bf16.mxu0 %v19277_v35  ;;  %v19332_v33 = vld [vmem:[#allocation8 + $0x2568] ss:$52 sps:$4 sm:$0xff]   ;;  %v19337_v35 = vld [vmem:[#allocation8 + $0x25cc] ss:$52 sps:$4 sm:$0xff]  }
 0x4fa   :  { %10431 = vmatprep.subr.bf16.mxu1 %v19280_v0  ;;  %v19340_v0 = vld [vmem:[#allocation8 + $0x25d4] ss:$52 sps:$4 sm:$0xff]  }
 0x4fc   :  { %10145 = vmatpush1.bf16.msra.mxu0 %v19275_v36  ;;  %v19335_v36 = vld [vmem:[#allocation8 + $0x25c8] ss:$52 sps:$4 sm:$0xff]  }
 0x4fd   :  { %10432 = vmatpush1.bf16.msra.mxu1 %v19278_v38  ;;  %10146 = vmatprep.subr.bf16.mxu0 %v19283_v18  ;;  %v19338_v38 = vld [vmem:[#allocation8 + $0x25d0] ss:$52 sps:$4 sm:$0xff]   ;;  %v19343_v18 = vld [vmem:[#allocation8 + $0x2634] ss:$52 sps:$4 sm:$0xff]  }
 0x4fe   :  { %10433 = vmatprep.subr.bf16.mxu1 %v19286_v26  ;;  %v19346_v26 = vld [vmem:[#allocation8 + $0x263c] ss:$52 sps:$4 sm:$0xff]  }
 0x500   :  { %10147 = vmatpush1.bf16.msra.mxu0 %v19281_v41  ;;  %v19341_v41 = vld [vmem:[#allocation8 + $0x2630] ss:$52 sps:$4 sm:$0xff]  }
 0x501   :  { %10434 = vmatpush1.bf16.msra.mxu1 %v19284_v42  ;;  %10148 = vmatprep.subr.bf16.mxu0 %v19289_v46  ;;  %v19344_v42 = vld [vmem:[#allocation8 + $0x2638] ss:$52 sps:$4 sm:$0xff]   ;;  %v19349_v46 = vld [vmem:[#allocation8 + $0x269c] ss:$52 sps:$4 sm:$0xff]  }
 0x502   :  { %10435 = vmatprep.subr.bf16.mxu1 %v19292_v11  ;;  %v19352_v11 = vld [vmem:[#allocation8 + $0x26a4] ss:$52 sps:$4 sm:$0xff]  }
 0x504   :  { %10149 = vmatpush1.bf16.msra.mxu0 %v19287_v40  ;;  %v19347_v40 = vld [vmem:[#allocation8 + $0x2698] ss:$52 sps:$4 sm:$0xff]  }
 0x505   :  { %10436 = vmatpush1.bf16.msra.mxu1 %v19290_v52  ;;  %10150 = vmatprep.subr.bf16.mxu0 %v19295_v30  ;;  %v1528_v52 = vmax.f32 %v22404_v6, 0.0  ;;  %v19350_v30 = vld [vmem:[#allocation8 + $0x26a0] ss:$52 sps:$4 sm:$0xff]   ;;  %v19359_v6 = vld [vmem:[#allocation8 + $0x2768] ss:$52 sps:$4 sm:$0xff]  }
 0x506   :  { %10437 = vmatprep.subr.bf16.mxu1 %v19298_v53  ;;  %v19355_v53 = vld [vmem:[#allocation8 + $0x2704] ss:$52 sps:$4 sm:$0xff]  }
 0x508   :  { %10151 = vmatpush1.bf16.msra.mxu0 %v19293_v55  ;;  %v19358_v55 = vld [vmem:[#allocation8 + $0x1c] ss:$52 sps:$4 sm:$0xff]  }
 0x509   :  { %10438 = vmatpush1.bf16.msra.mxu1 %v19296_v29  ;;  %10152 = vmatprep.subr.bf16.mxu0 %v19301_v56  ;;  %v19353_v29 = vld [vmem:[#allocation8 + $0x2700] ss:$52 sps:$4 sm:$0xff]   ;;  %v22460_v56 = vpack.c.bf16 %v1528_v52, %v1528_v52 }
 0x50a   :  { %10439 = vmatprep.subr.bf16.mxu1 %v19304_v57  ;;  %v19356_v57 = vld [vmem:[#allocation8 + $0x18] ss:$52 sps:$4 sm:$0xff]   ;;  %v19409_v52 = vld [vmem:[#allocation8 + $0x2774] ss:$52 sps:$4 sm:$0xff]  }
 0x50c   :  { %10153 = vmatpush1.bf16.msra.mxu0 %v19299_v58  ;;  %v19361_v58 = vld [vmem:[#allocation8 + $0x276c] ss:$52 sps:$4 sm:$0xff]  }
 0x50d   :  { %10440 = vmatpush1.bf16.msra.mxu1 %v19302_v45  ;;  %10154 = vmatprep.subr.bf16.mxu0 %v19307_v5  ;;  %v19364_v45 = vld [vmem:[#allocation8 + $0x84] ss:$52 sps:$4 sm:$0xff]   ;;  %v19362_v5 = vld [vmem:[#allocation8 + $0x80] ss:$52 sps:$4 sm:$0xff]  }
 0x50e   :  { %10441 = vmatprep.subr.bf16.mxu1 %v19310_v7  ;;  %v19367_v7 = vld [vmem:[#allocation8 + $0x27d4] ss:$52 sps:$4 sm:$0xff]  }
 0x510   :  { %10155 = vmatpush1.bf16.msra.mxu0 %v19305_v9  ;;  %v19370_v9 = vld [vmem:[#allocation8 + $0xec] ss:$52 sps:$4 sm:$0xff]  }
 0x511   :  { %10442 = vmatpush1.bf16.msra.mxu1 %v19308_v43  ;;  %10156 = vmatprep.subr.bf16.mxu0 %v19313_v10  ;;  %v19365_v43 = vld [vmem:[#allocation8 + $0x27d0] ss:$52 sps:$4 sm:$0xff]   ;;  %v19368_v10 = vld [vmem:[#allocation8 + $0xe8] ss:$52 sps:$4 sm:$0xff]  }
 0x512   :  { %10443 = vmatprep.subr.bf16.mxu1 %v19316_v13  ;;  %v19373_v13 = vld [vmem:[#allocation8 + $0x283c] ss:$52 sps:$4 sm:$0xff]  }
 0x514   :  { %10157 = vmatpush1.bf16.msra.mxu0 %v19311_v54  ;;  %v19376_v54 = vld [vmem:[#allocation8 + $0x154] ss:$52 sps:$4 sm:$0xff]  }
 0x515   :  { %10444 = vmatpush1.bf16.msra.mxu1 %v19314_v17  ;;  %10158 = vmatprep.subr.bf16.mxu0 %v19319_v19  ;;  %v19371_v17 = vld [vmem:[#allocation8 + $0x2838] ss:$52 sps:$4 sm:$0xff]   ;;  %v19374_v19 = vld [vmem:[#allocation8 + $0x150] ss:$52 sps:$4 sm:$0xff]  }
 0x516   :  { %10445 = vmatprep.subr.bf16.mxu1 %v19322_v21  ;;  %v19379_v21 = vld [vmem:[#allocation8 + $0x28a4] ss:$52 sps:$4 sm:$0xff]  }
 0x518   :  { %10159 = vmatpush1.bf16.msra.mxu0 %v19317_v22  ;;  %v19382_v22 = vld [vmem:[#allocation8 + $0x1bc] ss:$52 sps:$4 sm:$0xff]  }
 0x519   :  { %10446 = vmatpush1.bf16.msra.mxu1 %v19320_v23  ;;  %10160 = vmatprep.subr.bf16.mxu0 %v19325_v24  ;;  %v19377_v23 = vld [vmem:[#allocation8 + $0x28a0] ss:$52 sps:$4 sm:$0xff]   ;;  %v19380_v24 = vld [vmem:[#allocation8 + $0x1b8] ss:$52 sps:$4 sm:$0xff]  }
 0x51a   :  { %10447 = vmatprep.subr.bf16.mxu1 %v19328_v59  ;;  %v19385_v59 = vld [vmem:[#allocation8 + $0x290c] ss:$52 sps:$4 sm:$0xff]  }
 0x51c   :  { %10161 = vmatpush1.bf16.msra.mxu0 %v19323_v28  ;;  %v19388_v28 = vld [vmem:[#allocation8 + $0x224] ss:$52 sps:$4 sm:$0xff]  }
 0x51d   :  { %10448 = vmatpush1.bf16.msra.mxu1 %v19326_v8  ;;  %10162 = vmatprep.subr.bf16.mxu0 %v19331_v20  ;;  %v19383_v8 = vld [vmem:[#allocation8 + $0x2908] ss:$52 sps:$4 sm:$0xff]   ;;  %v19386_v20 = vld [vmem:[#allocation8 + $0x220] ss:$52 sps:$4 sm:$0xff]  }
 0x51e   :  { %10449 = vmatprep.subr.bf16.mxu1 %v19334_v31  ;;  %v19391_v31 = vld [vmem:[#allocation8 + $0x2974] ss:$52 sps:$4 sm:$0xff]  }
 0x520   :  { %10163 = vmatpush1.bf16.msra.mxu0 %v19329_v32  ;;  %v19394_v32 = vld [vmem:[#allocation8 + $0x28c] ss:$52 sps:$4 sm:$0xff]  }
 0x521   :  { %10450 = vmatpush1.bf16.msra.mxu1 %v19332_v33  ;;  %10164 = vmatprep.subr.bf16.mxu0 %v19337_v35  ;;  %v19389_v33 = vld [vmem:[#allocation8 + $0x2970] ss:$52 sps:$4 sm:$0xff]   ;;  %v19392_v35 = vld [vmem:[#allocation8 + $0x288] ss:$52 sps:$4 sm:$0xff]  }
 0x522   :  { %10451 = vmatprep.subr.bf16.mxu1 %v19340_v0  ;;  %v19397_v0 = vld [vmem:[#allocation8 + $0x29dc] ss:$52 sps:$4 sm:$0xff]  }
 0x524   :  { %10165 = vmatpush1.bf16.msra.mxu0 %v19335_v36  ;;  %v19400_v36 = vld [vmem:[#allocation8 + $0x2f4] ss:$52 sps:$4 sm:$0xff]  }
 0x525   :  { %10452 = vmatpush1.bf16.msra.mxu1 %v19338_v38  ;;  %10166 = vmatprep.subr.bf16.mxu0 %v19343_v18  ;;  %v19395_v38 = vld [vmem:[#allocation8 + $0x29d8] ss:$52 sps:$4 sm:$0xff]   ;;  %v1530_v18 = vmax.f32 %v22413_v37, 0.0  ;;  %v19407_v37 = vld [vmem:[#allocation8 + $0x2770] ss:$52 sps:$4 sm:$0xff]  }
 0x526   :  { %10453 = vmatprep.subr.bf16.mxu1 %v19346_v26  ;;  %v19398_v26 = vld [vmem:[#allocation8 + $0x2f0] ss:$52 sps:$4 sm:$0xff]  }
 0x528   :  { %10167 = vmatpush1.bf16.msra.mxu0 %v19341_v41  ;;  %v19403_v41 = vld [vmem:[#allocation8 + $0x270c] ss:$52 sps:$4 sm:$0xff]  }
 0x529   :  { %10454 = vmatpush1.bf16.msra.mxu1 %v19344_v42  ;;  %10168 = vmatprep.subr.bf16.mxu0 %v19349_v46  ;;  %v19406_v42 = vld [vmem:[#allocation8 + $0x35c] ss:$52 sps:$4 sm:$0xff]  }
 0x52a   :  { %10455 = vmatprep.subr.bf16.mxu1 %v19352_v11  ;;  %v19401_v46 = vld [vmem:[#allocation8 + $0x2708] ss:$52 sps:$4 sm:$0xff]   ;;  %v22467_v11 = vpack.c.bf16 %v1530_v18, %v1530_v18  ;;  %v19455_v18 = vld [vmem:[#allocation8 + $0x78] ss:$52 sps:$4 sm:$0xff]  }
 0x52c   :  { %10169 = vmatpush1.bf16.msra.mxu0 %v19347_v40  ;;  %v19404_v40 = vld [vmem:[#allocation8 + $0x358] ss:$52 sps:$4 sm:$0xff]  }
 0x52d   :  { %10456 = vmatpush1.bf16.msra.mxu1 %v19350_v30  ;;  %10179 = vmatprep.subr.bf16.mxu0 %v19355_v53  ;;  %v19412_v30 = vld [vmem:[#allocation8 + $0x3c4] ss:$52 sps:$4 sm:$0xff]   ;;  %v19410_v53 = vld [vmem:[#allocation8 + $0x3c0] ss:$52 sps:$4 sm:$0xff]  }
 0x52e   :  { %10794 = vmatprep.subr.bf16.mxu1 %v19358_v55  ;;  %v19415_v55 = vld [vmem:[#allocation8 + $0x27dc] ss:$52 sps:$4 sm:$0xff]  }
 0x52f   :  { %10171 = vmatmul.mubr.bf16.vlgmr.msra.gmra.mrb[64].mxu0 %v22460_v56 }
 0x530   :  { %10458 = vmatmul.mubr.bf16.vlgmr.msra.gmra.mrb[36].mxu1 %v22460_v56  ;;  %10180 = vmatpush1.bf16.msra.mxu0 %v19353_v29  ;;  %v19418_v29 = vld [vmem:[#allocation8 + $0x42c] ss:$52 sps:$4 sm:$0xff]  }
 0x531   :  { %10795 = vmatpush1.bf16.msra.mxu1 %v19356_v57  ;;  %10826 = vmatprep.mubr.bf16.mxu1 %v22348_v62  ;;  %v19413_v57 = vld [vmem:[#allocation8 + $0x27d8] ss:$52 sps:$4 sm:$0xff]  }
 0x532   :  { %10181 = vmatprep.subr.bf16.mxu0 %v19361_v58  ;;  %10796 = vmatprep.subr.bf16.mxu1 %v19364_v45  ;;  %v19416_v58 = vld [vmem:[#allocation8 + $0x428] ss:$52 sps:$4 sm:$0xff]   ;;  %v19421_v45 = vld [vmem:[#allocation8 + $0x2844] ss:$52 sps:$4 sm:$0xff]  }
 0x533   :  { %10211 = vmatprep.mubr.bf16.mxu0 %v21763_v51 }
 0x534   :  { %10182 = vmatpush1.bf16.msra.mxu0 %v19359_v6  ;;  %v19424_v6 = vld [vmem:[#allocation8 + $0x494] ss:$52 sps:$4 sm:$0xff]  }
 0x535   :  { %10797 = vmatpush1.bf16.msra.mxu1 %v19362_v5  ;;  %10183 = vmatprep.subr.bf16.mxu0 %v19367_v7  ;;  %v19419_v5 = vld [vmem:[#allocation8 + $0x2840] ss:$52 sps:$4 sm:$0xff]   ;;  %v19422_v7 = vld [vmem:[#allocation8 + $0x490] ss:$52 sps:$4 sm:$0xff]  }
 0x536   :  { %10798 = vmatprep.subr.bf16.mxu1 %v19370_v9  ;;  %v19427_v9 = vld [vmem:[#allocation8 + $0x28ac] ss:$52 sps:$4 sm:$0xff]  }
 0x538   :  { %10184 = vmatpush1.bf16.msra.mxu0 %v19365_v43  ;;  %v19430_v43 = vld [vmem:[#allocation8 + $0x4fc] ss:$52 sps:$4 sm:$0xff]  }
 0x539   :  { %10799 = vmatpush1.bf16.msra.mxu1 %v19368_v10  ;;  %10185 = vmatprep.subr.bf16.mxu0 %v19373_v13  ;;  %v19425_v10 = vld [vmem:[#allocation8 + $0x28a8] ss:$52 sps:$4 sm:$0xff]   ;;  %v19428_v13 = vld [vmem:[#allocation8 + $0x4f8] ss:$52 sps:$4 sm:$0xff]  }
 0x53a   :  { %10800 = vmatprep.subr.bf16.mxu1 %v19376_v54  ;;  %v19433_v54 = vld [vmem:[#allocation8 + $0x2914] ss:$52 sps:$4 sm:$0xff]  }
 0x53c   :  { %10186 = vmatpush1.bf16.msra.mxu0 %v19371_v17  ;;  %v19436_v17 = vld [vmem:[#allocation8 + $0x564] ss:$52 sps:$4 sm:$0xff]  }
 0x53d   :  { %10801 = vmatpush1.bf16.msra.mxu1 %v19374_v19  ;;  %10187 = vmatprep.subr.bf16.mxu0 %v19379_v21  ;;  %v19431_v19 = vld [vmem:[#allocation8 + $0x2910] ss:$52 sps:$4 sm:$0xff]   ;;  %v19434_v21 = vld [vmem:[#allocation8 + $0x560] ss:$52 sps:$4 sm:$0xff]  }
 0x53e   :  { %10802 = vmatprep.subr.bf16.mxu1 %v19382_v22  ;;  %v19439_v22 = vld [vmem:[#allocation8 + $0x297c] ss:$52 sps:$4 sm:$0xff]  }
 0x540   :  { %10188 = vmatpush1.bf16.msra.mxu0 %v19377_v23  ;;  %v19442_v23 = vld [vmem:[#allocation8 + $0x5cc] ss:$52 sps:$4 sm:$0xff]  }
 0x541   :  { %10803 = vmatpush1.bf16.msra.mxu1 %v19380_v24  ;;  %10189 = vmatprep.subr.bf16.mxu0 %v19385_v59  ;;  %v19437_v24 = vld [vmem:[#allocation8 + $0x2978] ss:$52 sps:$4 sm:$0xff]   ;;  %v19440_v59 = vld [vmem:[#allocation8 + $0x5c8] ss:$52 sps:$4 sm:$0xff]  }
 0x542   :  { %10804 = vmatprep.subr.bf16.mxu1 %v19388_v28  ;;  %v19445_v28 = vld [vmem:[#allocation8 + $0x29e4] ss:$52 sps:$4 sm:$0xff]  }
 0x544   :  { %10190 = vmatpush1.bf16.msra.mxu0 %v19383_v8  ;;  %v19448_v8 = vld [vmem:[#allocation8 + $0x634] ss:$52 sps:$4 sm:$0xff]  }
 0x545   :  { %10805 = vmatpush1.bf16.msra.mxu1 %v19386_v20  ;;  %10191 = vmatprep.subr.bf16.mxu0 %v19391_v31  ;;  %v19443_v20 = vld [vmem:[#allocation8 + $0x29e0] ss:$52 sps:$4 sm:$0xff]   ;;  %v19446_v31 = vld [vmem:[#allocation8 + $0x630] ss:$52 sps:$4 sm:$0xff]  }
 0x546   :  { %10806 = vmatprep.subr.bf16.mxu1 %v19394_v32  ;;  %v19451_v32 = vld [vmem:[#allocation8 + $0x14] ss:$52 sps:$4 sm:$0xff]  }
 0x548   :  { %10192 = vmatpush1.bf16.msra.mxu0 %v19389_v33  ;;  %v19454_v33 = vld [vmem:[#allocation8 + $0x69c] ss:$52 sps:$4 sm:$0xff]  }
 0x549   :  { %10807 = vmatpush1.bf16.msra.mxu1 %v19392_v35  ;;  %10193 = vmatprep.subr.bf16.mxu0 %v19397_v0  ;;  %v19449_v35 = vld [vmem:[#allocation8 + $0x10] ss:$52 sps:$4 sm:$0xff]   ;;  %v19452_v0 = vld [vmem:[#allocation8 + $0x698] ss:$52 sps:$4 sm:$0xff]  }
 0x54a   :  { %10808 = vmatprep.subr.bf16.mxu1 %v19400_v36  ;;  %v19457_v36 = vld [vmem:[#allocation8 + $0x7c] ss:$52 sps:$4 sm:$0xff]  }
 0x54c   :  { %10194 = vmatpush1.bf16.msra.mxu0 %v19395_v38  ;;  %v19460_v38 = vld [vmem:[#allocation8 + $0x704] ss:$52 sps:$4 sm:$0xff]  }
 0x54d   :  { %10809 = vmatpush1.bf16.msra.mxu1 %v19398_v26  ;;  %10466 = vmatprep.subr.bf16.mxu0 %v19403_v41  ;;  %v19458_v26 = vld [vmem:[#allocation8 + $0x700] ss:$52 sps:$4 sm:$0xff]   ;;  %v19463_v41 = vld [vmem:[#allocation8 + $0xe4] ss:$52 sps:$4 sm:$0xff]  }
 0x54e   :  { %10810 = vmatprep.subr.bf16.mxu1 %v19406_v42  ;;  %v19466_v42 = vld [vmem:[#allocation8 + $0x76c] ss:$52 sps:$4 sm:$0xff]  }
 0x54f   :  { %10212 = vmatmul.mubr.bf16.vlgmr.msra.gmra.mrb[64].mxu0 %v22467_v11 }
 0x550   :  { %10467 = vmatpush1.bf16.msra.mxu0 %v19401_v46  ;;  %10498 = vmatprep.mubr.bf16.mxu0 %v21763_v51  ;;  %v19461_v46 = vld [vmem:[#allocation8 + $0xe0] ss:$52 sps:$4 sm:$0xff]  }
 0x551   :  { %10811 = vmatpush1.bf16.msra.mxu1 %v19404_v40  ;;  %10468 = vmatprep.subr.bf16.mxu0 %v19409_v52  ;;  %v19464_v40 = vld [vmem:[#allocation8 + $0x768] ss:$52 sps:$4 sm:$0xff]   ;;  %v19469_v52 = vld [vmem:[#allocation8 + $0x14c] ss:$52 sps:$4 sm:$0xff]  }
 0x552   :  { %10812 = vmatprep.subr.bf16.mxu1 %v19412_v30  ;;  %v19472_v30 = vld [vmem:[#allocation8 + $0x7d4] ss:$52 sps:$4 sm:$0xff]  }
 0x554   :  { %10469 = vmatpush1.bf16.msra.mxu0 %v19407_v37  ;;  %v19467_v37 = vld [vmem:[#allocation8 + $0x148] ss:$52 sps:$4 sm:$0xff]  }
 0x555   :  { %10813 = vmatpush1.bf16.msra.mxu1 %v19410_v53  ;;  %10470 = vmatprep.subr.bf16.mxu0 %v19415_v55  ;;  %v19470_v53 = vld [vmem:[#allocation8 + $0x7d0] ss:$52 sps:$4 sm:$0xff]   ;;  %v19475_v55 = vld [vmem:[#allocation8 + $0x1b4] ss:$52 sps:$4 sm:$0xff]  }
 0x556   :  { %10814 = vmatprep.subr.bf16.mxu1 %v19418_v29  ;;  %v19478_v29 = vld [vmem:[#allocation8 + $0x83c] ss:$52 sps:$4 sm:$0xff]  }
 0x558   :  { %10471 = vmatpush1.bf16.msra.mxu0 %v19413_v57  ;;  %v19473_v57 = vld [vmem:[#allocation8 + $0x1b0] ss:$52 sps:$4 sm:$0xff]  }
 0x559   :  { %10815 = vmatpush1.bf16.msra.mxu1 %v19416_v58  ;;  %10472 = vmatprep.subr.bf16.mxu0 %v19421_v45  ;;  %v19476_v58 = vld [vmem:[#allocation8 + $0x838] ss:$52 sps:$4 sm:$0xff]   ;;  %v19481_v45 = vld [vmem:[#allocation8 + $0x21c] ss:$52 sps:$4 sm:$0xff]  }
 0x55a   :  { %10816 = vmatprep.subr.bf16.mxu1 %v19424_v6  ;;  %v19484_v6 = vld [vmem:[#allocation8 + $0x8a4] ss:$52 sps:$4 sm:$0xff]  }
 0x55c   :  { %10473 = vmatpush1.bf16.msra.mxu0 %v19419_v5  ;;  %v19479_v5 = vld [vmem:[#allocation8 + $0x218] ss:$52 sps:$4 sm:$0xff]  }
 0x55d   :  { %10817 = vmatpush1.bf16.msra.mxu1 %v19422_v7  ;;  %10474 = vmatprep.subr.bf16.mxu0 %v19427_v9  ;;  %v19482_v7 = vld [vmem:[#allocation8 + $0x8a0] ss:$52 sps:$4 sm:$0xff]   ;;  %v19487_v9 = vld [vmem:[#allocation8 + $0x284] ss:$52 sps:$4 sm:$0xff]  }
 0x55e   :  { %10818 = vmatprep.subr.bf16.mxu1 %v19430_v43  ;;  %v19490_v43 = vld [vmem:[#allocation8 + $0x90c] ss:$52 sps:$4 sm:$0xff]  }
 0x560   :  { %10475 = vmatpush1.bf16.msra.mxu0 %v19425_v10  ;;  %v19485_v10 = vld [vmem:[#allocation8 + $0x280] ss:$52 sps:$4 sm:$0xff]  }
 0x561   :  { %10819 = vmatpush1.bf16.msra.mxu1 %v19428_v13  ;;  %10476 = vmatprep.subr.bf16.mxu0 %v19433_v54  ;;  %v19488_v13 = vld [vmem:[#allocation8 + $0x908] ss:$52 sps:$4 sm:$0xff]   ;;  %v19493_v54 = vld [vmem:[#allocation8 + $0x2ec] ss:$52 sps:$4 sm:$0xff]  }
 0x562   :  { %10820 = vmatprep.subr.bf16.mxu1 %v19436_v17  ;;  %v19496_v17 = vld [vmem:[#allocation8 + $0x974] ss:$52 sps:$4 sm:$0xff]  }
 0x564   :  { %10477 = vmatpush1.bf16.msra.mxu0 %v19431_v19  ;;  %v19491_v19 = vld [vmem:[#allocation8 + $0x2e8] ss:$52 sps:$4 sm:$0xff]  }
 0x565   :  { %10821 = vmatpush1.bf16.msra.mxu1 %v19434_v21  ;;  %10478 = vmatprep.subr.bf16.mxu0 %v19439_v22  ;;  %v19494_v21 = vld [vmem:[#allocation8 + $0x970] ss:$52 sps:$4 sm:$0xff]   ;;  %v19499_v22 = vld [vmem:[#allocation8 + $0x354] ss:$52 sps:$4 sm:$0xff]  }
 0x566   :  { %10822 = vmatprep.subr.bf16.mxu1 %v19442_v23  ;;  %v19502_v23 = vld [vmem:[#allocation8 + $0x9dc] ss:$52 sps:$4 sm:$0xff]  }
 0x568   :  { %10479 = vmatpush1.bf16.msra.mxu0 %v19437_v24  ;;  %v19497_v24 = vld [vmem:[#allocation8 + $0x350] ss:$52 sps:$4 sm:$0xff]  }
 0x569   :  { %10823 = vmatpush1.bf16.msra.mxu1 %v19440_v59  ;;  %10480 = vmatprep.subr.bf16.mxu0 %v19445_v28  ;;  %v19500_v59 = vld [vmem:[#allocation8 + $0x9d8] ss:$52 sps:$4 sm:$0xff]   ;;  %v19505_v28 = vld [vmem:[#allocation8 + $0x3bc] ss:$52 sps:$4 sm:$0xff]  }
 0x56a   :  { %10824 = vmatprep.subr.bf16.mxu1 %v19448_v8  ;;  %v19508_v8 = vld [vmem:[#allocation8 + $0xa44] ss:$52 sps:$4 sm:$0xff]  }
 0x56c   :  { %10481 = vmatpush1.bf16.msra.mxu0 %v19443_v20  ;;  %v19503_v20 = vld [vmem:[#allocation8 + $0x3b8] ss:$52 sps:$4 sm:$0xff]  }
 0x56d   :  { %10825 = vmatpush1.bf16.msra.mxu1 %v19446_v31  ;;  %10507 = vmatprep.subr.bf16.mxu0 %v19451_v32  ;;  %v19506_v31 = vld [vmem:[#allocation8 + $0xa40] ss:$52 sps:$4 sm:$0xff]   ;;  %v19511_v32 = vld [vmem:[#allocation8 + $0x424] ss:$52 sps:$4 sm:$0xff]  }
 0x56e   :  { %10835 = vmatprep.subr.bf16.mxu1 %v19454_v33  ;;  %v19514_v33 = vld [vmem:[#allocation8 + $0xaac] ss:$52 sps:$4 sm:$0xff]  }
 0x56f   :  { %10499 = vmatmul.mubr.bf16.vlgmr.msra.gmra.mrb[68].mxu0 %v22467_v11 }
 0x570   :  { %10827 = vmatmul.mubr.bf16.vlgmr.msra.gmra.mrb[40].mxu1 %v22350_v2  ;;  %10508 = vmatpush1.bf16.msra.mxu0 %v19449_v35  ;;  %v19509_v35 = vld [vmem:[#allocation8 + $0x420] ss:$52 sps:$4 sm:$0xff]  }
 0x571   :  { %10539 = vmatprep.mubr.bf16.mxu0 %v22348_v62  ;;  %10836 = vmatpush1.bf16.msra.mxu1 %v19452_v0  ;;  %v19512_v0 = vld [vmem:[#allocation8 + $0xaa8] ss:$52 sps:$4 sm:$0xff]  }
 0x572   :  { %10867 = vmatprep.mubr.bf16.mxu1 %v22363_v27  ;;  %10509 = vmatprep.subr.bf16.mxu0 %v19457_v36  ;;  %v19517_v36 = vld [vmem:[#allocation8 + $0x48c] ss:$52 sps:$4 sm:$0xff]  }
 0x573   :  { %10837 = vmatprep.subr.bf16.mxu1 %v19460_v38  ;;  %v19520_v38 = vld [vmem:[#allocation8 + $0xb14] ss:$52 sps:$4 sm:$0xff]  }
 0x574   :  { %10510 = vmatpush1.bf16.msra.mxu0 %v19455_v18  ;;  %v19515_v18 = vld [vmem:[#allocation8 + $0x488] ss:$52 sps:$4 sm:$0xff]  }
 0x575   :  { %10838 = vmatpush1.bf16.msra.mxu1 %v19458_v26  ;;  %10511 = vmatprep.subr.bf16.mxu0 %v19463_v41  ;;  %v19518_v26 = vld [vmem:[#allocation8 + $0xb10] ss:$52 sps:$4 sm:$0xff]   ;;  %v19523_v41 = vld [vmem:[#allocation8 + $0x4f4] ss:$52 sps:$4 sm:$0xff]  }
 0x576   :  { %10839 = vmatprep.subr.bf16.mxu1 %v19466_v42  ;;  %v19526_v42 = vld [vmem:[#allocation8 + $0xb7c] ss:$52 sps:$4 sm:$0xff]  }
 0x578   :  { %10512 = vmatpush1.bf16.msra.mxu0 %v19461_v46  ;;  %v19521_v46 = vld [vmem:[#allocation8 + $0x4f0] ss:$52 sps:$4 sm:$0xff]  }
 0x579   :  { %10840 = vmatpush1.bf16.msra.mxu1 %v19464_v40  ;;  %10513 = vmatprep.subr.bf16.mxu0 %v19469_v52  ;;  %v19524_v40 = vld [vmem:[#allocation8 + $0xb78] ss:$52 sps:$4 sm:$0xff]   ;;  %v19529_v52 = vld [vmem:[#allocation8 + $0x55c] ss:$52 sps:$4 sm:$0xff]  }
 0x57a   :  { %10841 = vmatprep.subr.bf16.mxu1 %v19472_v30  ;;  %v19532_v30 = vld [vmem:[#allocation8 + $0xbe4] ss:$52 sps:$4 sm:$0xff]  }
 0x57c   :  { %10514 = vmatpush1.bf16.msra.mxu0 %v19467_v37  ;;  %v19527_v37 = vld [vmem:[#allocation8 + $0x558] ss:$52 sps:$4 sm:$0xff]  }
 0x57d   :  { %10842 = vmatpush1.bf16.msra.mxu1 %v19470_v53  ;;  %10515 = vmatprep.subr.bf16.mxu0 %v19475_v55  ;;  %v19530_v53 = vld [vmem:[#allocation8 + $0xbe0] ss:$52 sps:$4 sm:$0xff]   ;;  %v19535_v55 = vld [vmem:[#allocation8 + $0x5c4] ss:$52 sps:$4 sm:$0xff]  }
 0x57e   :  { %10843 = vmatprep.subr.bf16.mxu1 %v19478_v29  ;;  %v19538_v29 = vld [vmem:[#allocation8 + $0xc4c] ss:$52 sps:$4 sm:$0xff]  }
 0x580   :  { %10516 = vmatpush1.bf16.msra.mxu0 %v19473_v57  ;;  %v19533_v57 = vld [vmem:[#allocation8 + $0x5c0] ss:$52 sps:$4 sm:$0xff]  }
 0x581   :  { %10844 = vmatpush1.bf16.msra.mxu1 %v19476_v58  ;;  %10517 = vmatprep.subr.bf16.mxu0 %v19481_v45  ;;  %v19536_v58 = vld [vmem:[#allocation8 + $0xc48] ss:$52 sps:$4 sm:$0xff]   ;;  %v19541_v45 = vld [vmem:[#allocation8 + $0x62c] ss:$52 sps:$4 sm:$0xff]  }
 0x582   :  { %10845 = vmatprep.subr.bf16.mxu1 %v19484_v6  ;;  %v19544_v6 = vld [vmem:[#allocation8 + $0xcb4] ss:$52 sps:$4 sm:$0xff]  }
 0x584   :  { %10518 = vmatpush1.bf16.msra.mxu0 %v19479_v5  ;;  %v19539_v5 = vld [vmem:[#allocation8 + $0x628] ss:$52 sps:$4 sm:$0xff]  }
 0x585   :  { %10846 = vmatpush1.bf16.msra.mxu1 %v19482_v7  ;;  %10519 = vmatprep.subr.bf16.mxu0 %v19487_v9  ;;  %v19542_v7 = vld [vmem:[#allocation8 + $0xcb0] ss:$52 sps:$4 sm:$0xff]   ;;  %v19547_v9 = vld [vmem:[#allocation8 + $0x694] ss:$52 sps:$4 sm:$0xff]  }
 0x586   :  { %10847 = vmatprep.subr.bf16.mxu1 %v19490_v43  ;;  %v19550_v43 = vld [vmem:[#allocation8 + $0xd1c] ss:$52 sps:$4 sm:$0xff]  }
 0x588   :  { %10520 = vmatpush1.bf16.msra.mxu0 %v19485_v10  ;;  %v19545_v10 = vld [vmem:[#allocation8 + $0x690] ss:$52 sps:$4 sm:$0xff]  }
 0x589   :  { %10848 = vmatpush1.bf16.msra.mxu1 %v19488_v13  ;;  %10521 = vmatprep.subr.bf16.mxu0 %v19493_v54  ;;  %v19548_v13 = vld [vmem:[#allocation8 + $0xd18] ss:$52 sps:$4 sm:$0xff]   ;;  %v19553_v54 = vld [vmem:[#allocation8 + $0x6fc] ss:$52 sps:$4 sm:$0xff]  }
 0x58a   :  { %10849 = vmatprep.subr.bf16.mxu1 %v19496_v17  ;;  %v19556_v17 = vld [vmem:[#allocation8 + $0xd84] ss:$52 sps:$4 sm:$0xff]  }
 0x58c   :  { %10522 = vmatpush1.bf16.msra.mxu0 %v19491_v19  ;;  %v19551_v19 = vld [vmem:[#allocation8 + $0x6f8] ss:$52 sps:$4 sm:$0xff]  }
 0x58d   :  { %10850 = vmatpush1.bf16.msra.mxu1 %v19494_v21  ;;  %10523 = vmatprep.subr.bf16.mxu0 %v19499_v22  ;;  %v19554_v21 = vld [vmem:[#allocation8 + $0xd80] ss:$52 sps:$4 sm:$0xff]   ;;  %v19559_v22 = vld [vmem:[#allocation8 + $0x764] ss:$52 sps:$4 sm:$0xff]  }
 0x58e   :  { %10851 = vmatprep.subr.bf16.mxu1 %v19502_v23  ;;  %v19562_v23 = vld [vmem:[#allocation8 + $0xdec] ss:$52 sps:$4 sm:$0xff]  }
 0x590   :  { %10524 = vmatpush1.bf16.msra.mxu0 %v19497_v24  ;;  %v19557_v24 = vld [vmem:[#allocation8 + $0x760] ss:$52 sps:$4 sm:$0xff]  }
 0x591   :  { %10852 = vmatpush1.bf16.msra.mxu1 %v19500_v59  ;;  %10525 = vmatprep.subr.bf16.mxu0 %v19505_v28  ;;  %v19560_v59 = vld [vmem:[#allocation8 + $0xde8] ss:$52 sps:$4 sm:$0xff]   ;;  %v19565_v28 = vld [vmem:[#allocation8 + $0x7cc] ss:$52 sps:$4 sm:$0xff]  }
 0x592   :  { %10853 = vmatprep.subr.bf16.mxu1 %v19508_v8  ;;  %v19568_v8 = vld [vmem:[#allocation8 + $0xe54] ss:$52 sps:$4 sm:$0xff]  }
 0x594   :  { %10526 = vmatpush1.bf16.msra.mxu0 %v19503_v20  ;;  %v19563_v20 = vld [vmem:[#allocation8 + $0x7c8] ss:$52 sps:$4 sm:$0xff]  }
 0x595   :  { %10854 = vmatpush1.bf16.msra.mxu1 %v19506_v31  ;;  %10527 = vmatprep.subr.bf16.mxu0 %v19511_v32  ;;  %v19566_v31 = vld [vmem:[#allocation8 + $0xe50] ss:$52 sps:$4 sm:$0xff]   ;;  %v19571_v32 = vld [vmem:[#allocation8 + $0x834] ss:$52 sps:$4 sm:$0xff]  }
 0x596   :  { %10855 = vmatprep.subr.bf16.mxu1 %v19514_v33  ;;  %v19574_v33 = vld [vmem:[#allocation8 + $0xebc] ss:$52 sps:$4 sm:$0xff]  }
 0x598   :  { %10528 = vmatpush1.bf16.msra.mxu0 %v19509_v35  ;;  %v19569_v35 = vld [vmem:[#allocation8 + $0x830] ss:$52 sps:$4 sm:$0xff]  }
 0x599   :  { %10856 = vmatpush1.bf16.msra.mxu1 %v19512_v0  ;;  %10529 = vmatprep.subr.bf16.mxu0 %v19517_v36  ;;  %v19572_v0 = vld [vmem:[#allocation8 + $0xeb8] ss:$52 sps:$4 sm:$0xff]   ;;  %v19577_v36 = vld [vmem:[#allocation8 + $0x89c] ss:$52 sps:$4 sm:$0xff]  }
 0x59a   :  { %10857 = vmatprep.subr.bf16.mxu1 %v19520_v38  ;;  %v19580_v38 = vld [vmem:[#allocation8 + $0xf24] ss:$52 sps:$4 sm:$0xff]  }
 0x59c   :  { %10530 = vmatpush1.bf16.msra.mxu0 %v19515_v18  ;;  %v19575_v18 = vld [vmem:[#allocation8 + $0x898] ss:$52 sps:$4 sm:$0xff]  }
 0x59d   :  { %10858 = vmatpush1.bf16.msra.mxu1 %v19518_v26  ;;  %10531 = vmatprep.subr.bf16.mxu0 %v19523_v41  ;;  %v19578_v26 = vld [vmem:[#allocation8 + $0xf20] ss:$52 sps:$4 sm:$0xff]   ;;  %v19583_v41 = vld [vmem:[#allocation8 + $0x904] ss:$52 sps:$4 sm:$0xff]  }
 0x59e   :  { %10859 = vmatprep.subr.bf16.mxu1 %v19526_v42  ;;  %v19586_v42 = vld [vmem:[#allocation8 + $0xf8c] ss:$52 sps:$4 sm:$0xff]  }
 0x5a0   :  { %10532 = vmatpush1.bf16.msra.mxu0 %v19521_v46  ;;  %v19581_v46 = vld [vmem:[#allocation8 + $0x900] ss:$52 sps:$4 sm:$0xff]  }
 0x5a1   :  { %10860 = vmatpush1.bf16.msra.mxu1 %v19524_v40  ;;  %10533 = vmatprep.subr.bf16.mxu0 %v19529_v52  ;;  %v19584_v40 = vld [vmem:[#allocation8 + $0xf88] ss:$52 sps:$4 sm:$0xff]   ;;  %v19589_v52 = vld [vmem:[#allocation8 + $0x96c] ss:$52 sps:$4 sm:$0xff]  }
 0x5a2   :  { %10861 = vmatprep.subr.bf16.mxu1 %v19532_v30  ;;  %v19592_v30 = vld [vmem:[#allocation8 + $0xff4] ss:$52 sps:$4 sm:$0xff]  }
 0x5a4   :  { %10534 = vmatpush1.bf16.msra.mxu0 %v19527_v37  ;;  %v19587_v37 = vld [vmem:[#allocation8 + $0x968] ss:$52 sps:$4 sm:$0xff]  }
 0x5a5   :  { %10862 = vmatpush1.bf16.msra.mxu1 %v19530_v53  ;;  %10535 = vmatprep.subr.bf16.mxu0 %v19535_v55  ;;  %v19590_v53 = vld [vmem:[#allocation8 + $0xff0] ss:$52 sps:$4 sm:$0xff]   ;;  %v19595_v55 = vld [vmem:[#allocation8 + $0x9d4] ss:$52 sps:$4 sm:$0xff]  }
 0x5a6   :  { %10863 = vmatprep.subr.bf16.mxu1 %v19538_v29  ;;  %v19598_v29 = vld [vmem:[#allocation8 + $0x105c] ss:$52 sps:$4 sm:$0xff]  }
 0x5a8   :  { %10536 = vmatpush1.bf16.msra.mxu0 %v19533_v57  ;;  %v19593_v57 = vld [vmem:[#allocation8 + $0x9d0] ss:$52 sps:$4 sm:$0xff]  }
 0x5a9   :  { %10864 = vmatpush1.bf16.msra.mxu1 %v19536_v58  ;;  %10537 = vmatprep.subr.bf16.mxu0 %v19541_v45  ;;  %v19596_v58 = vld [vmem:[#allocation8 + $0x1058] ss:$52 sps:$4 sm:$0xff]   ;;  %v19601_v45 = vld [vmem:[#allocation8 + $0xa3c] ss:$52 sps:$4 sm:$0xff]  }
 0x5aa   :  { %10865 = vmatprep.subr.bf16.mxu1 %v19544_v6  ;;  %v19604_v6 = vld [vmem:[#allocation8 + $0x10c4] ss:$52 sps:$4 sm:$0xff]  }
 0x5ac   :  { %10538 = vmatpush1.bf16.msra.mxu0 %v19539_v5  ;;  %v19599_v5 = vld [vmem:[#allocation8 + $0xa38] ss:$52 sps:$4 sm:$0xff]  }
 0x5ad   :  { %10866 = vmatpush1.bf16.msra.mxu1 %v19542_v7  ;;  %10548 = vmatprep.subr.bf16.mxu0 %v19547_v9  ;;  %v19602_v7 = vld [vmem:[#allocation8 + $0x10c0] ss:$52 sps:$4 sm:$0xff]   ;;  %v19607_v9 = vld [vmem:[#allocation8 + $0xaa4] ss:$52 sps:$4 sm:$0xff]  }
 0x5ae   :  { %10876 = vmatprep.subr.bf16.mxu1 %v19550_v43  ;;  %v19610_v43 = vld [vmem:[#allocation8 + $0x112c] ss:$52 sps:$4 sm:$0xff]  }
 0x5af   :  { %10540 = vmatmul.mubr.bf16.vlgmr.msra.gmra.mrb[72].mxu0 %v22350_v2 }
 0x5b0   :  { %10868 = vmatmul.mubr.bf16.vlgmr.msra.gmra.mrb[40].mxu1 %v22390_v39  ;;  %10549 = vmatpush1.bf16.msra.mxu0 %v19545_v10  ;;  %v19605_v10 = vld [vmem:[#allocation8 + $0xaa0] ss:$52 sps:$4 sm:$0xff]  }
 0x5b1   :  { %10580 = vmatprep.mubr.bf16.mxu0 %v22363_v27  ;;  %10877 = vmatpush1.bf16.msra.mxu1 %v19548_v13  ;;  %v19608_v13 = vld [vmem:[#allocation8 + $0x1128] ss:$52 sps:$4 sm:$0xff]  }
 0x5b2   :  { %10908 = vmatprep.mubr.bf16.mxu1 %v22392_v48  ;;  %10550 = vmatprep.subr.bf16.mxu0 %v19553_v54  ;;  %v19613_v54 = vld [vmem:[#allocation8 + $0xb0c] ss:$52 sps:$4 sm:$0xff]  }
 0x5b3   :  { %10878 = vmatprep.subr.bf16.mxu1 %v19556_v17  ;;  %v19616_v17 = vld [vmem:[#allocation8 + $0x1194] ss:$52 sps:$4 sm:$0xff]  }
 0x5b4   :  { %10551 = vmatpush1.bf16.msra.mxu0 %v19551_v19  ;;  %v19611_v19 = vld [vmem:[#allocation8 + $0xb08] ss:$52 sps:$4 sm:$0xff]  }
 0x5b5   :  { %10879 = vmatpush1.bf16.msra.mxu1 %v19554_v21  ;;  %10552 = vmatprep.subr.bf16.mxu0 %v19559_v22  ;;  %v19614_v21 = vld [vmem:[#allocation8 + $0x1190] ss:$52 sps:$4 sm:$0xff]   ;;  %v19619_v22 = vld [vmem:[#allocation8 + $0xb74] ss:$52 sps:$4 sm:$0xff]  }
 0x5b6   :  { %10880 = vmatprep.subr.bf16.mxu1 %v19562_v23  ;;  %v19622_v23 = vld [vmem:[#allocation8 + $0x11fc] ss:$52 sps:$4 sm:$0xff]  }
 0x5b8   :  { %10553 = vmatpush1.bf16.msra.mxu0 %v19557_v24  ;;  %v19617_v24 = vld [vmem:[#allocation8 + $0xb70] ss:$52 sps:$4 sm:$0xff]  }
 0x5b9   :  { %10881 = vmatpush1.bf16.msra.mxu1 %v19560_v59  ;;  %10554 = vmatprep.subr.bf16.mxu0 %v19565_v28  ;;  %v19620_v59 = vld [vmem:[#allocation8 + $0x11f8] ss:$52 sps:$4 sm:$0xff]   ;;  %v19625_v28 = vld [vmem:[#allocation8 + $0xbdc] ss:$52 sps:$4 sm:$0xff]  }
 0x5ba   :  { %10882 = vmatprep.subr.bf16.mxu1 %v19568_v8  ;;  %v19628_v8 = vld [vmem:[#allocation8 + $0x1264] ss:$52 sps:$4 sm:$0xff]  }
 0x5bc   :  { %10555 = vmatpush1.bf16.msra.mxu0 %v19563_v20  ;;  %v19623_v20 = vld [vmem:[#allocation8 + $0xbd8] ss:$52 sps:$4 sm:$0xff]  }
 0x5bd   :  { %10883 = vmatpush1.bf16.msra.mxu1 %v19566_v31  ;;  %10556 = vmatprep.subr.bf16.mxu0 %v19571_v32  ;;  %v19626_v31 = vld [vmem:[#allocation8 + $0x1260] ss:$52 sps:$4 sm:$0xff]   ;;  %v19631_v32 = vld [vmem:[#allocation8 + $0xc44] ss:$52 sps:$4 sm:$0xff]  }
 0x5be   :  { %10884 = vmatprep.subr.bf16.mxu1 %v19574_v33  ;;  %v19634_v33 = vld [vmem:[#allocation8 + $0x12cc] ss:$52 sps:$4 sm:$0xff]  }
 0x5c0   :  { %10557 = vmatpush1.bf16.msra.mxu0 %v19569_v35  ;;  %v19629_v35 = vld [vmem:[#allocation8 + $0xc40] ss:$52 sps:$4 sm:$0xff]  }
 0x5c1   :  { %10885 = vmatpush1.bf16.msra.mxu1 %v19572_v0  ;;  %10558 = vmatprep.subr.bf16.mxu0 %v19577_v36  ;;  %v19632_v0 = vld [vmem:[#allocation8 + $0x12c8] ss:$52 sps:$4 sm:$0xff]   ;;  %v19637_v36 = vld [vmem:[#allocation8 + $0xcac] ss:$52 sps:$4 sm:$0xff]  }
 0x5c2   :  { %10886 = vmatprep.subr.bf16.mxu1 %v19580_v38  ;;  %v19640_v38 = vld [vmem:[#allocation8 + $0x1334] ss:$52 sps:$4 sm:$0xff]  }
 0x5c4   :  { %10559 = vmatpush1.bf16.msra.mxu0 %v19575_v18  ;;  %v19635_v18 = vld [vmem:[#allocation8 + $0xca8] ss:$52 sps:$4 sm:$0xff]  }
 0x5c5   :  { %10887 = vmatpush1.bf16.msra.mxu1 %v19578_v26  ;;  %10560 = vmatprep.subr.bf16.mxu0 %v19583_v41  ;;  %v19638_v26 = vld [vmem:[#allocation8 + $0x1330] ss:$52 sps:$4 sm:$0xff]   ;;  %v19643_v41 = vld [vmem:[#allocation8 + $0xd14] ss:$52 sps:$4 sm:$0xff]  }
 0x5c6   :  { %10888 = vmatprep.subr.bf16.mxu1 %v19586_v42  ;;  %v19646_v42 = vld [vmem:[#allocation8 + $0x139c] ss:$52 sps:$4 sm:$0xff]  }
 0x5c8   :  { %10561 = vmatpush1.bf16.msra.mxu0 %v19581_v46  ;;  %v19641_v46 = vld [vmem:[#allocation8 + $0xd10] ss:$52 sps:$4 sm:$0xff]  }
 0x5c9   :  { %10889 = vmatpush1.bf16.msra.mxu1 %v19584_v40  ;;  %10562 = vmatprep.subr.bf16.mxu0 %v19589_v52  ;;  %v19644_v40 = vld [vmem:[#allocation8 + $0x1398] ss:$52 sps:$4 sm:$0xff]   ;;  %v19649_v52 = vld [vmem:[#allocation8 + $0xd7c] ss:$52 sps:$4 sm:$0xff]  }
 0x5ca   :  { %10890 = vmatprep.subr.bf16.mxu1 %v19592_v30  ;;  %v19652_v30 = vld [vmem:[#allocation8 + $0x1404] ss:$52 sps:$4 sm:$0xff]  }
 0x5cc   :  { %10563 = vmatpush1.bf16.msra.mxu0 %v19587_v37  ;;  %v19647_v37 = vld [vmem:[#allocation8 + $0xd78] ss:$52 sps:$4 sm:$0xff]  }
 0x5cd   :  { %10891 = vmatpush1.bf16.msra.mxu1 %v19590_v53  ;;  %10564 = vmatprep.subr.bf16.mxu0 %v19595_v55  ;;  %v19650_v53 = vld [vmem:[#allocation8 + $0x1400] ss:$52 sps:$4 sm:$0xff]   ;;  %v19655_v55 = vld [vmem:[#allocation8 + $0xde4] ss:$52 sps:$4 sm:$0xff]  }
 0x5ce   :  { %10892 = vmatprep.subr.bf16.mxu1 %v19598_v29  ;;  %v19658_v29 = vld [vmem:[#allocation8 + $0x146c] ss:$52 sps:$4 sm:$0xff]  }
 0x5d0   :  { %10565 = vmatpush1.bf16.msra.mxu0 %v19593_v57  ;;  %v19653_v57 = vld [vmem:[#allocation8 + $0xde0] ss:$52 sps:$4 sm:$0xff]  }
 0x5d1   :  { %10893 = vmatpush1.bf16.msra.mxu1 %v19596_v58  ;;  %10566 = vmatprep.subr.bf16.mxu0 %v19601_v45  ;;  %v19656_v58 = vld [vmem:[#allocation8 + $0x1468] ss:$52 sps:$4 sm:$0xff]   ;;  %v19661_v45 = vld [vmem:[#allocation8 + $0xe4c] ss:$52 sps:$4 sm:$0xff]  }
 0x5d2   :  { %10894 = vmatprep.subr.bf16.mxu1 %v19604_v6  ;;  %v19664_v6 = vld [vmem:[#allocation8 + $0x14d4] ss:$52 sps:$4 sm:$0xff]  }
 0x5d4   :  { %10567 = vmatpush1.bf16.msra.mxu0 %v19599_v5  ;;  %v19659_v5 = vld [vmem:[#allocation8 + $0xe48] ss:$52 sps:$4 sm:$0xff]  }
 0x5d5   :  { %10895 = vmatpush1.bf16.msra.mxu1 %v19602_v7  ;;  %10568 = vmatprep.subr.bf16.mxu0 %v19607_v9  ;;  %v19662_v7 = vld [vmem:[#allocation8 + $0x14d0] ss:$52 sps:$4 sm:$0xff]   ;;  %v19667_v9 = vld [vmem:[#allocation8 + $0xeb4] ss:$52 sps:$4 sm:$0xff]  }
 0x5d6   :  { %10896 = vmatprep.subr.bf16.mxu1 %v19610_v43  ;;  %v19670_v43 = vld [vmem:[#allocation8 + $0x153c] ss:$52 sps:$4 sm:$0xff]  }
 0x5d8   :  { %10569 = vmatpush1.bf16.msra.mxu0 %v19605_v10  ;;  %v19665_v10 = vld [vmem:[#allocation8 + $0xeb0] ss:$52 sps:$4 sm:$0xff]  }
 0x5d9   :  { %10897 = vmatpush1.bf16.msra.mxu1 %v19608_v13  ;;  %10570 = vmatprep.subr.bf16.mxu0 %v19613_v54  ;;  %v19668_v13 = vld [vmem:[#allocation8 + $0x1538] ss:$52 sps:$4 sm:$0xff]   ;;  %v19673_v54 = vld [vmem:[#allocation8 + $0xf1c] ss:$52 sps:$4 sm:$0xff]  }
 0x5da   :  { %10898 = vmatprep.subr.bf16.mxu1 %v19616_v17  ;;  %v19676_v17 = vld [vmem:[#allocation8 + $0x15a4] ss:$52 sps:$4 sm:$0xff]  }
 0x5dc   :  { %10571 = vmatpush1.bf16.msra.mxu0 %v19611_v19  ;;  %v19671_v19 = vld [vmem:[#allocation8 + $0xf18] ss:$52 sps:$4 sm:$0xff]  }
 0x5dd   :  { %10899 = vmatpush1.bf16.msra.mxu1 %v19614_v21  ;;  %10572 = vmatprep.subr.bf16.mxu0 %v19619_v22  ;;  %v19674_v21 = vld [vmem:[#allocation8 + $0x15a0] ss:$52 sps:$4 sm:$0xff]   ;;  %v19679_v22 = vld [vmem:[#allocation8 + $0xf84] ss:$52 sps:$4 sm:$0xff]  }
 0x5de   :  { %10900 = vmatprep.subr.bf16.mxu1 %v19622_v23  ;;  %v19682_v23 = vld [vmem:[#allocation8 + $0x160c] ss:$52 sps:$4 sm:$0xff]  }
 0x5e0   :  { %10573 = vmatpush1.bf16.msra.mxu0 %v19617_v24 }
 0x5e1   :  { %10901 = vmatpush1.bf16.msra.mxu1 %v19620_v59  ;;  %10574 = vmatprep.subr.bf16.mxu0 %v19625_v28  ;;  %v19677_v28 = vld [vmem:[#allocation8 + $0xf80] ss:$52 sps:$4 sm:$0xff]  }
 0x5e2   :  { %10902 = vmatprep.subr.bf16.mxu1 %v19628_v8 }
 0x5e4   :  { %10575 = vmatpush1.bf16.msra.mxu0 %v19623_v20  ;;  %v19680_v20 = vld [vmem:[#allocation8 + $0x1608] ss:$52 sps:$4 sm:$0xff]  }
 0x5e5   :  { %10903 = vmatpush1.bf16.msra.mxu1 %v19626_v31  ;;  %10576 = vmatprep.subr.bf16.mxu0 %v19631_v32  ;;  %v19685_v31 = vld [vmem:[#allocation8 + $0xfec] ss:$52 sps:$4 sm:$0xff]  }
 0x5e6   :  { %10904 = vmatprep.subr.bf16.mxu1 %v19634_v33  ;;  %v19688_v33 = vld [vmem:[#allocation8 + $0x1674] ss:$52 sps:$4 sm:$0xff]  }
 0x5e8   :  { %10577 = vmatpush1.bf16.msra.mxu0 %v19629_v35  ;;  %v19683_v35 = vld [vmem:[#allocation8 + $0xfe8] ss:$52 sps:$4 sm:$0xff]  }
 0x5e9   :  { %10905 = vmatpush1.bf16.msra.mxu1 %v19632_v0  ;;  %10578 = vmatprep.subr.bf16.mxu0 %v19637_v36  ;;  %v19686_v0 = vld [vmem:[#allocation8 + $0x1670] ss:$52 sps:$4 sm:$0xff]   ;;  %v19691_v36 = vld [vmem:[#allocation8 + $0x1054] ss:$52 sps:$4 sm:$0xff]  }
 0x5ea   :  { %10906 = vmatprep.subr.bf16.mxu1 %v19640_v38  ;;  %v19694_v38 = vld [vmem:[#allocation8 + $0x16dc] ss:$52 sps:$4 sm:$0xff]  }
 0x5ec   :  { %10579 = vmatpush1.bf16.msra.mxu0 %v19635_v18  ;;  %v19689_v18 = vld [vmem:[#allocation8 + $0x1050] ss:$52 sps:$4 sm:$0xff]  }
 0x5ed   :  { %10907 = vmatpush1.bf16.msra.mxu1 %v19638_v26  ;;  %10589 = vmatprep.subr.bf16.mxu0 %v19643_v41  ;;  %v19692_v26 = vld [vmem:[#allocation8 + $0x16d8] ss:$52 sps:$4 sm:$0xff]   ;;  %v19697_v41 = vld [vmem:[#allocation8 + $0x10bc] ss:$52 sps:$4 sm:$0xff]  }
 0x5ee   :  { %10917 = vmatprep.subr.bf16.mxu1 %v19646_v42  ;;  %v19700_v42 = vld [vmem:[#allocation8 + $0x1744] ss:$52 sps:$4 sm:$0xff]  }
 0x5ef   :  { %10581 = vmatmul.mubr.bf16.vlgmr.msra.gmra.mrb[72].mxu0 %v22390_v39 }
 0x5f0   :  { %10909 = vmatmul.mubr.bf16.vlgmr.msra.gmra.mrb[40].mxu1 %v22423_v1  ;;  %10590 = vmatpush1.bf16.msra.mxu0 %v19641_v46  ;;  %v19695_v46 = vld [vmem:[#allocation8 + $0x10b8] ss:$52 sps:$4 sm:$0xff]  }
 0x5f1   :  { %10621 = vmatprep.mubr.bf16.mxu0 %v22392_v48  ;;  %10918 = vmatpush1.bf16.msra.mxu1 %v19644_v40  ;;  %v19698_v40 = vld [vmem:[#allocation8 + $0x1740] ss:$52 sps:$4 sm:$0xff]  }
 0x5f2   :  { %10949 = vmatprep.mubr.bf16.mxu1 %v22425_v4  ;;  %10591 = vmatprep.subr.bf16.mxu0 %v19649_v52  ;;  %v19703_v52 = vld [vmem:[#allocation8 + $0x1124] ss:$52 sps:$4 sm:$0xff]  }
 0x5f3   :  { %10919 = vmatprep.subr.bf16.mxu1 %v19652_v30  ;;  %v19706_v30 = vld [vmem:[#allocation8 + $0x17ac] ss:$52 sps:$4 sm:$0xff]  }
 0x5f4   :  { %10592 = vmatpush1.bf16.msra.mxu0 %v19647_v37  ;;  %v19701_v37 = vld [vmem:[#allocation8 + $0x1120] ss:$52 sps:$4 sm:$0xff]  }
 0x5f5   :  { %10920 = vmatpush1.bf16.msra.mxu1 %v19650_v53  ;;  %10593 = vmatprep.subr.bf16.mxu0 %v19655_v55  ;;  %v19704_v53 = vld [vmem:[#allocation8 + $0x17a8] ss:$52 sps:$4 sm:$0xff]   ;;  %v19709_v55 = vld [vmem:[#allocation8 + $0x118c] ss:$52 sps:$4 sm:$0xff]  }
 0x5f6   :  { %10921 = vmatprep.subr.bf16.mxu1 %v19658_v29  ;;  %v19712_v29 = vld [vmem:[#allocation8 + $0x1814] ss:$52 sps:$4 sm:$0xff]  }
 0x5f8   :  { %10594 = vmatpush1.bf16.msra.mxu0 %v19653_v57  ;;  %v19707_v57 = vld [vmem:[#allocation8 + $0x1188] ss:$52 sps:$4 sm:$0xff]  }
 0x5f9   :  { %10922 = vmatpush1.bf16.msra.mxu1 %v19656_v58  ;;  %10595 = vmatprep.subr.bf16.mxu0 %v19661_v45  ;;  %v19710_v58 = vld [vmem:[#allocation8 + $0x1810] ss:$52 sps:$4 sm:$0xff]   ;;  %v19715_v45 = vld [vmem:[#allocation8 + $0x11f4] ss:$52 sps:$4 sm:$0xff]  }
 0x5fa   :  { %10923 = vmatprep.subr.bf16.mxu1 %v19664_v6  ;;  %v19718_v6 = vld [vmem:[#allocation8 + $0x187c] ss:$52 sps:$4 sm:$0xff]  }
 0x5fc   :  { %10596 = vmatpush1.bf16.msra.mxu0 %v19659_v5  ;;  %v19713_v5 = vld [vmem:[#allocation8 + $0x11f0] ss:$52 sps:$4 sm:$0xff]  }
 0x5fd   :  { %10924 = vmatpush1.bf16.msra.mxu1 %v19662_v7  ;;  %10597 = vmatprep.subr.bf16.mxu0 %v19667_v9  ;;  %v19716_v7 = vld [vmem:[#allocation8 + $0x1878] ss:$52 sps:$4 sm:$0xff]   ;;  %v19721_v9 = vld [vmem:[#allocation8 + $0x125c] ss:$52 sps:$4 sm:$0xff]  }
 0x5fe   :  { %10925 = vmatprep.subr.bf16.mxu1 %v19670_v43  ;;  %v19724_v43 = vld [vmem:[#allocation8 + $0x18e4] ss:$52 sps:$4 sm:$0xff]  }
 0x600   :  { %10598 = vmatpush1.bf16.msra.mxu0 %v19665_v10  ;;  %v19719_v10 = vld [vmem:[#allocation8 + $0x1258] ss:$52 sps:$4 sm:$0xff]  }
 0x601   :  { %10926 = vmatpush1.bf16.msra.mxu1 %v19668_v13  ;;  %10599 = vmatprep.subr.bf16.mxu0 %v19673_v54  ;;  %v19722_v13 = vld [vmem:[#allocation8 + $0x18e0] ss:$52 sps:$4 sm:$0xff]   ;;  %v19727_v54 = vld [vmem:[#allocation8 + $0x12c4] ss:$52 sps:$4 sm:$0xff]  }
 0x602   :  { %10927 = vmatprep.subr.bf16.mxu1 %v19676_v17 }
 0x603   :  { %v22483_v24 = vpop.f32.mrb[36].mxu1 }
 0x604   :  { %v22485_v59 = vpop.f32.mrb[37].mxu1  ;;  %10600 = vmatpush1.bf16.msra.mxu0 %v19671_v19  ;;  %v19730_v19 = vld [vmem:[#allocation8 + $0x194c] ss:$52 sps:$4 sm:$0xff]  }
 0x605   :  { %v10463_v8 = vpop.f32.mrb[38].mxu1  ;;  %10928 = vmatpush1.bf16.msra.mxu1 %v19674_v21  ;;  %10601 = vmatprep.subr.bf16.mxu0 %v19679_v22 }
 0x606   :  { %v10464_v32 = vpop.f32.mrb[39].mxu1  ;;  %10929 = vmatprep.subr.bf16.mxu1 %v19682_v23  ;;  %v19725_v23 = vld [vmem:[#allocation8 + $0x12c0] ss:$52 sps:$4 sm:$0xff]   ;;  %v19728_v8 = vld [vmem:[#allocation8 + $0x1948] ss:$52 sps:$4 sm:$0xff]  }
 0x607   :  { %v19731_v32 = vld [vmem:[#allocation8 + $0x1328] ss:$52 sps:$4 sm:$0xff]  }
 0x608   :  { %10602 = vmatpush1.bf16.msra.mxu0 %v19677_v28 }
 0x609   :  { %10930 = vmatpush1.bf16.msra.mxu1 %v19680_v20  ;;  %10603 = vmatprep.subr.bf16.mxu0 %v19685_v31  ;;  %v19733_v20 = vld [vmem:[#allocation8 + $0x132c] ss:$52 sps:$4 sm:$0xff]   ;;  %v19736_v31 = vld [vmem:[#allocation8 + $0x19b4] ss:$52 sps:$4 sm:$0xff]  }
 0x60a   :  { %10931 = vmatprep.subr.bf16.mxu1 %v19688_v33  ;;  %v19734_v33 = vld [vmem:[#allocation8 + $0x19b0] ss:$52 sps:$4 sm:$0xff]  }
 0x60c   :  { %10604 = vmatpush1.bf16.msra.mxu0 %v19683_v35  ;;  %v19739_v35 = vld [vmem:[#allocation8 + $0x1394] ss:$52 sps:$4 sm:$0xff]  }
 0x60d   :  { %10932 = vmatpush1.bf16.msra.mxu1 %v19686_v0  ;;  %10605 = vmatprep.subr.bf16.mxu0 %v19691_v36  ;;  %v19742_v0 = vld [vmem:[#allocation8 + $0x1a1c] ss:$52 sps:$4 sm:$0xff]  }
 0x60e   :  { %10933 = vmatprep.subr.bf16.mxu1 %v19694_v38  ;;  %v19737_v36 = vld [vmem:[#allocation8 + $0x1390] ss:$52 sps:$4 sm:$0xff]   ;;  %v19740_v38 = vld [vmem:[#allocation8 + $0x1a18] ss:$52 sps:$4 sm:$0xff]  }
 0x610   :  { %10606 = vmatpush1.bf16.msra.mxu0 %v19689_v18  ;;  %v19745_v18 = vld [vmem:[#allocation8 + $0x13fc] ss:$52 sps:$4 sm:$0xff]  }
 0x611   :  { %10934 = vmatpush1.bf16.msra.mxu1 %v19692_v26  ;;  %10607 = vmatprep.subr.bf16.mxu0 %v19697_v41  ;;  %v19748_v26 = vld [vmem:[#allocation8 + $0x1a84] ss:$52 sps:$4 sm:$0xff]  }
 0x612   :  { %10935 = vmatprep.subr.bf16.mxu1 %v19700_v42  ;;  %v19743_v41 = vld [vmem:[#allocation8 + $0x13f8] ss:$52 sps:$4 sm:$0xff]   ;;  %v19746_v42 = vld [vmem:[#allocation8 + $0x1a80] ss:$52 sps:$4 sm:$0xff]  }
 0x614   :  { %10608 = vmatpush1.bf16.msra.mxu0 %v19695_v46  ;;  %v19751_v46 = vld [vmem:[#allocation8 + $0x1464] ss:$52 sps:$4 sm:$0xff]  }
 0x615   :  { %10936 = vmatpush1.bf16.msra.mxu1 %v19698_v40  ;;  %10609 = vmatprep.subr.bf16.mxu0 %v19703_v52  ;;  %v19754_v40 = vld [vmem:[#allocation8 + $0x1aec] ss:$52 sps:$4 sm:$0xff]  }
 0x616   :  { %10937 = vmatprep.subr.bf16.mxu1 %v19706_v30  ;;  %v19749_v52 = vld [vmem:[#allocation8 + $0x1460] ss:$52 sps:$4 sm:$0xff]   ;;  %v19752_v30 = vld [vmem:[#allocation8 + $0x1ae8] ss:$52 sps:$4 sm:$0xff]  }
 0x618   :  { %10610 = vmatpush1.bf16.msra.mxu0 %v19701_v37  ;;  %v19757_v37 = vld [vmem:[#allocation8 + $0x14cc] ss:$52 sps:$4 sm:$0xff]  }
 0x619   :  { %10938 = vmatpush1.bf16.msra.mxu1 %v19704_v53  ;;  %10611 = vmatprep.subr.bf16.mxu0 %v19709_v55  ;;  %v19760_v53 = vld [vmem:[#allocation8 + $0x1b54] ss:$52 sps:$4 sm:$0xff]  }
 0x61a   :  { %10939 = vmatprep.subr.bf16.mxu1 %v19712_v29  ;;  %v19755_v55 = vld [vmem:[#allocation8 + $0x14c8] ss:$52 sps:$4 sm:$0xff]   ;;  %v19758_v29 = vld [vmem:[#allocation8 + $0x1b50] ss:$52 sps:$4 sm:$0xff]  }
 0x61c   :  { %10612 = vmatpush1.bf16.msra.mxu0 %v19707_v57  ;;  %v19763_v57 = vld [vmem:[#allocation8 + $0x1534] ss:$52 sps:$4 sm:$0xff]  }
 0x61d   :  { %10940 = vmatpush1.bf16.msra.mxu1 %v19710_v58  ;;  %10613 = vmatprep.subr.bf16.mxu0 %v19715_v45  ;;  %v3000_v58 = vld [vmem:[#allocation10] sm:$0xff]  ;;  %v19766_v45 = vld [vmem:[#allocation8 + $0x1bbc] ss:$52 sps:$4 sm:$0xff]  }
 0x61e   :  { %10941 = vmatprep.subr.bf16.mxu1 %v19718_v6  ;;  %v19761_v6 = vld [vmem:[#allocation8 + $0x1530] ss:$52 sps:$4 sm:$0xff]  }
 0x620   :  { %10614 = vmatpush1.bf16.msra.mxu0 %v19713_v5  ;;  %v3015_v5 = vrot.slane %v3000_v58, %v22376_v14 }
 0x621   :  { %10942 = vmatpush1.bf16.msra.mxu1 %v19716_v7  ;;  %10615 = vmatprep.subr.bf16.mxu0 %v19721_v9  ;;  %v19764_v7 = vld [vmem:[#allocation8 + $0x1bb8] ss:$52 sps:$4 sm:$0xff]   ;;  %v19769_v9 = vld [vmem:[#allocation8 + $0x159c] ss:$52 sps:$4 sm:$0xff]  }
 0x622   :  { %v22487_v17 = vpop.f32.mrb[64].mxu0  ;;  %10943 = vmatprep.subr.bf16.mxu1 %v19724_v43  ;;  %v3019_v43 = vrot.slane %v3000_v58, %v22357_v47  ;;  %v19805_v58 = vld [vmem:[#allocation8 + $0x180c] ss:$52 sps:$4 sm:$0xff]  }
 0x623   :  { %v22489_v21 = vpop.f32.mrb[65].mxu0 }
 0x624   :  { %v10217_v22 = vpop.f32.mrb[66].mxu0  ;;  %10616 = vmatpush1.bf16.msra.mxu0 %v19719_v10  ;;  %v19772_v10 = vld [vmem:[#allocation8 + $0x1c24] ss:$52 sps:$4 sm:$0xff]  }
 0x625   :  { %10944 = vmatpush1.bf16.msra.mxu1 %v19722_v13  ;;  %v10218_v28 = vpop.f32.mrb[67].mxu0  ;;  %10617 = vmatprep.subr.bf16.mxu0 %v19727_v54  ;;  %v19767_v13 = vld [vmem:[#allocation8 + $0x1598] ss:$52 sps:$4 sm:$0xff]   ;;  %v18469_v54 = vadd.f32 %v22483_v24, %v3015_v5  ;;  %v19776_v24 = vld [vmem:[#allocation8 + $0x1c88] ss:$52 sps:$4 sm:$0xff]  }
 0x626   :  { %10945 = vmatprep.subr.bf16.mxu1 %v19730_v19  ;;  %v19770_v19 = vld [vmem:[#allocation8 + $0x1c20] ss:$52 sps:$4 sm:$0xff]   ;;  %v19775_v22 = vld [vmem:[#allocation8 + $0x1604] ss:$52 sps:$4 sm:$0xff]  }
 0x627   :  { %v19806_v5 = vld [vmem:[#allocation8 + $0x1e90] ss:$52 sps:$4 sm:$0xff]  }
 0x628   :  { %10618 = vmatpush1.bf16.msra.mxu0 %v19725_v23  ;;  %v18471_v23 = vadd.f32 %v22485_v59, %v3019_v43  ;;  %v19779_v59 = vld [vmem:[#allocation8 + $0x1668] ss:$52 sps:$4 sm:$0xff]   ;;  %v19809_v43 = vld [vmem:[#allocation8 + $0x1870] ss:$52 sps:$4 sm:$0xff]  }
 0x629   :  { %10946 = vmatpush1.bf16.msra.mxu1 %v19728_v8  ;;  %10619 = vmatprep.subr.bf16.mxu0 %v19733_v20  ;;  %v19778_v8 = vld [vmem:[#allocation8 + $0x1c8c] ss:$52 sps:$4 sm:$0xff]  }
 0x62a   :  { %10947 = vmatprep.subr.bf16.mxu1 %v19736_v31 }
 0x62c   :  { %10620 = vmatpush1.bf16.msra.mxu0 %v19731_v32 }
 0x62d   :  { %10948 = vmatpush1.bf16.msra.mxu1 %v19734_v33  ;;  %10630 = vmatprep.subr.bf16.mxu0 %v19739_v35  ;;  %v19773_v35 = vld [vmem:[#allocation8 + $0x1600] ss:$52 sps:$4 sm:$0xff]  }
 0x62e   :  { %10958 = vmatprep.subr.bf16.mxu1 %v19742_v0 }
 0x62f   :  { %10622 = vmatmul.mubr.bf16.vlgmr.msra.gmra.mrb[72].mxu0 %v22423_v1 }
 0x630   :  { %10950 = vmatmul.mubr.bf16.vlgmr.msra.gmra.mrb[40].mxu1 %v22439_v16  ;;  %10631 = vmatpush1.bf16.msra.mxu0 %v19737_v36  ;;  %v19781_v36 = vld [vmem:[#allocation8 + $0x166c] ss:$52 sps:$4 sm:$0xff]  }
 0x631   :  { %10662 = vmatprep.mubr.bf16.mxu0 %v22425_v4  ;;  %10959 = vmatpush1.bf16.msra.mxu1 %v19740_v38  ;;  %v19784_v38 = vld [vmem:[#allocation8 + $0x1cf4] ss:$52 sps:$4 sm:$0xff]  }
 0x632   :  { %10990 = vmatprep.mubr.bf16.mxu1 %v22441_v12  ;;  %10632 = vmatprep.subr.bf16.mxu0 %v19745_v18  ;;  %v19782_v18 = vld [vmem:[#allocation8 + $0x1cf0] ss:$52 sps:$4 sm:$0xff]  }
 0x633   :  { %10960 = vmatprep.subr.bf16.mxu1 %v19748_v26  ;;  %v19787_v26 = vld [vmem:[#allocation8 + $0x16d4] ss:$52 sps:$4 sm:$0xff]  }
 0x634   :  { %10633 = vmatpush1.bf16.msra.mxu0 %v19743_v41  ;;  %v19790_v41 = vld [vmem:[#allocation8 + $0x1d5c] ss:$52 sps:$4 sm:$0xff]  }
 0x635   :  { %10961 = vmatpush1.bf16.msra.mxu1 %v19746_v42  ;;  %10634 = vmatprep.subr.bf16.mxu0 %v19751_v46  ;;  %v19785_v42 = vld [vmem:[#allocation8 + $0x16d0] ss:$52 sps:$4 sm:$0xff]   ;;  %v19788_v46 = vld [vmem:[#allocation8 + $0x1d58] ss:$52 sps:$4 sm:$0xff]  }
 0x636   :  { %10962 = vmatprep.subr.bf16.mxu1 %v19754_v40  ;;  %v19793_v40 = vld [vmem:[#allocation8 + $0x173c] ss:$52 sps:$4 sm:$0xff]  }
 0x638   :  { %10635 = vmatpush1.bf16.msra.mxu0 %v19749_v52  ;;  %v19796_v52 = vld [vmem:[#allocation8 + $0x1dc4] ss:$52 sps:$4 sm:$0xff]  }
 0x639   :  { %10963 = vmatpush1.bf16.msra.mxu1 %v19752_v30  ;;  %10636 = vmatprep.subr.bf16.mxu0 %v19757_v37  ;;  %v19791_v30 = vld [vmem:[#allocation8 + $0x1738] ss:$52 sps:$4 sm:$0xff]   ;;  %v19794_v37 = vld [vmem:[#allocation8 + $0x1dc0] ss:$52 sps:$4 sm:$0xff]  }
 0x63a   :  { %10964 = vmatprep.subr.bf16.mxu1 %v19760_v53  ;;  %v19799_v53 = vld [vmem:[#allocation8 + $0x17a4] ss:$52 sps:$4 sm:$0xff]  }
 0x63c   :  { %10637 = vmatpush1.bf16.msra.mxu0 %v19755_v55  ;;  %v19802_v55 = vld [vmem:[#allocation8 + $0x1e2c] ss:$52 sps:$4 sm:$0xff]  }
 0x63d   :  { %10965 = vmatpush1.bf16.msra.mxu1 %v19758_v29  ;;  %10638 = vmatprep.subr.bf16.mxu0 %v19763_v57  ;;  %v19797_v29 = vld [vmem:[#allocation8 + $0x17a0] ss:$52 sps:$4 sm:$0xff]   ;;  %v19800_v57 = vld [vmem:[#allocation8 + $0x1e28] ss:$52 sps:$4 sm:$0xff]  }
 0x63e   :  { %10966 = vmatprep.subr.bf16.mxu1 %v19766_v45  ;;  %v19808_v45 = vld [vmem:[#allocation8 + $0x1e94] ss:$52 sps:$4 sm:$0xff]  }
 0x640   :  { %10639 = vmatpush1.bf16.msra.mxu0 %v19761_v6  ;;  %v19803_v6 = vld [vmem:[#allocation8 + $0x1808] ss:$52 sps:$4 sm:$0xff]  }
 0x641   :  { %10967 = vmatpush1.bf16.msra.mxu1 %v19764_v7  ;;  %10640 = vmatprep.subr.bf16.mxu0 %v19769_v9  ;;  %v19811_v7 = vld [vmem:[#allocation8 + $0x1874] ss:$52 sps:$4 sm:$0xff]   ;;  %v19814_v9 = vld [vmem:[#allocation8 + $0x1efc] ss:$52 sps:$4 sm:$0xff]  }
 0x642   :  { %v10500_v28 = vpop.f32.mrb[68].mxu0  ;;  %10968 = vmatprep.subr.bf16.mxu1 %v19772_v10  ;;  %v19812_v10 = vld [vmem:[#allocation8 + $0x1ef8] ss:$52 sps:$4 sm:$0xff]  }
 0x643   :  { %v22499_v20 = vadd.f32 %v18469_v54, %v10500_v28  ;;  %v10502_v31 = vpop.f32.mrb[69].mxu0  ;;  %v19820_v54 = vld [vmem:[#allocation8 + $0x1f64] ss:$52 sps:$4 sm:$0xff]   ;;  %v19826_v28 = vld [vmem:[#allocation8 + $0x1fcc] ss:$52 sps:$4 sm:$0xff]  }
 0x644   :  { %v22501_v32 = vadd.f32 %v18471_v23, %v10502_v31  ;;  %v10504_v33 = vpop.f32.mrb[70].mxu0  ;;  %10641 = vmatpush1.bf16.msra.mxu0 %v19767_v13  ;;  %v19817_v13 = vld [vmem:[#allocation8 + $0x18dc] ss:$52 sps:$4 sm:$0xff]   ;;  %v19823_v23 = vld [vmem:[#allocation8 + $0x1944] ss:$52 sps:$4 sm:$0xff]  }
 0x645   :  { %10969 = vmatpush1.bf16.msra.mxu1 %v19770_v19  ;;  %v10505_v0 = vpop.f32.mrb[71].mxu0  ;;  %10642 = vmatprep.subr.bf16.mxu0 %v19775_v22  ;;  %v19815_v19 = vld [vmem:[#allocation8 + $0x18d8] ss:$52 sps:$4 sm:$0xff]   ;;  %v19818_v22 = vld [vmem:[#allocation8 + $0x1f60] ss:$52 sps:$4 sm:$0xff]  }
 0x646   :  { %10970 = vmatprep.subr.bf16.mxu1 %v19778_v8  ;;  %v19821_v8 = vld [vmem:[#allocation8 + $0x1940] ss:$52 sps:$4 sm:$0xff]   ;;  %v19824_v31 = vld [vmem:[#allocation8 + $0x1fc8] ss:$52 sps:$4 sm:$0xff]  }
 0x647   :  { %v19829_v33 = vld [vmem:[#allocation8 + $0x19ac] ss:$52 sps:$4 sm:$0xff]   ;;  %v19827_v0 = vld [vmem:[#allocation8 + $0x19a8] ss:$52 sps:$4 sm:$0xff]  }
 0x648   :  { %10643 = vmatpush1.bf16.msra.mxu0 %v19773_v35  ;;  %v19832_v35 = vld [vmem:[#allocation8 + $0x2034] ss:$52 sps:$4 sm:$0xff]  }
 0x649   :  { %10971 = vmatpush1.bf16.msra.mxu1 %v19776_v24  ;;  %10644 = vmatprep.subr.bf16.mxu0 %v19781_v36  ;;  %v19830_v24 = vld [vmem:[#allocation8 + $0x2030] ss:$52 sps:$4 sm:$0xff]   ;;  %v19835_v36 = vld [vmem:[#allocation8 + $0x1a14] ss:$52 sps:$4 sm:$0xff]  }
 0x64a   :  { %10972 = vmatprep.subr.bf16.mxu1 %v19784_v38  ;;  %v19838_v38 = vld [vmem:[#allocation8 + $0x209c] ss:$52 sps:$4 sm:$0xff]  }
 0x64c   :  { %10645 = vmatpush1.bf16.msra.mxu0 %v19779_v59  ;;  %v19833_v59 = vld [vmem:[#allocation8 + $0x1a10] ss:$52 sps:$4 sm:$0xff]  }
 0x64d   :  { %10973 = vmatpush1.bf16.msra.mxu1 %v19782_v18  ;;  %10646 = vmatprep.subr.bf16.mxu0 %v19787_v26  ;;  %v19836_v18 = vld [vmem:[#allocation8 + $0x2098] ss:$52 sps:$4 sm:$0xff]   ;;  %v19841_v26 = vld [vmem:[#allocation8 + $0x1a7c] ss:$52 sps:$4 sm:$0xff]  }
 0x64e   :  { %10974 = vmatprep.subr.bf16.mxu1 %v19790_v41  ;;  %v19844_v41 = vld [vmem:[#allocation8 + $0x2104] ss:$52 sps:$4 sm:$0xff]  }
 0x650   :  { %10647 = vmatpush1.bf16.msra.mxu0 %v19785_v42  ;;  %v19839_v42 = vld [vmem:[#allocation8 + $0x1a78] ss:$52 sps:$4 sm:$0xff]  }
 0x651   :  { %10975 = vmatpush1.bf16.msra.mxu1 %v19788_v46  ;;  %10648 = vmatprep.subr.bf16.mxu0 %v19793_v40  ;;  %v19842_v46 = vld [vmem:[#allocation8 + $0x2100] ss:$52 sps:$4 sm:$0xff]   ;;  %v19847_v40 = vld [vmem:[#allocation8 + $0x1ae4] ss:$52 sps:$4 sm:$0xff]  }
 0x652   :  { %10976 = vmatprep.subr.bf16.mxu1 %v19796_v52  ;;  %v19850_v52 = vld [vmem:[#allocation8 + $0x216c] ss:$52 sps:$4 sm:$0xff]  }
 0x654   :  { %10649 = vmatpush1.bf16.msra.mxu0 %v19791_v30  ;;  %v19845_v30 = vld [vmem:[#allocation8 + $0x1ae0] ss:$52 sps:$4 sm:$0xff]  }
 0x655   :  { %10977 = vmatpush1.bf16.msra.mxu1 %v19794_v37  ;;  %10650 = vmatprep.subr.bf16.mxu0 %v19799_v53  ;;  %v19848_v37 = vld [vmem:[#allocation8 + $0x2168] ss:$52 sps:$4 sm:$0xff]   ;;  %v19853_v53 = vld [vmem:[#allocation8 + $0x1b4c] ss:$52 sps:$4 sm:$0xff]  }
 0x656   :  { %10978 = vmatprep.subr.bf16.mxu1 %v19802_v55  ;;  %v19856_v55 = vld [vmem:[#allocation8 + $0x21d4] ss:$52 sps:$4 sm:$0xff]  }
 0x658   :  { %10651 = vmatpush1.bf16.msra.mxu0 %v19797_v29  ;;  %v19851_v29 = vld [vmem:[#allocation8 + $0x1b48] ss:$52 sps:$4 sm:$0xff]  }
 0x659   :  { %10979 = vmatpush1.bf16.msra.mxu1 %v19800_v57  ;;  %10652 = vmatprep.subr.bf16.mxu0 %v19805_v58  ;;  %v19854_v57 = vld [vmem:[#allocation8 + $0x21d0] ss:$52 sps:$4 sm:$0xff]   ;;  %v19859_v58 = vld [vmem:[#allocation8 + $0x1bb4] ss:$52 sps:$4 sm:$0xff]  }
 0x65a   :  { %10980 = vmatprep.subr.bf16.mxu1 %v19808_v45  ;;  %v19862_v45 = vld [vmem:[#allocation8 + $0x223c] ss:$52 sps:$4 sm:$0xff]  }
 0x65c   :  { %10653 = vmatpush1.bf16.msra.mxu0 %v19803_v6  ;;  %v19857_v6 = vld [vmem:[#allocation8 + $0x1bb0] ss:$52 sps:$4 sm:$0xff]  }
 0x65d   :  { %10981 = vmatpush1.bf16.msra.mxu1 %v19806_v5  ;;  %10654 = vmatprep.subr.bf16.mxu0 %v19811_v7  ;;  %v19860_v5 = vld [vmem:[#allocation8 + $0x2238] ss:$52 sps:$4 sm:$0xff]   ;;  %v19865_v7 = vld [vmem:[#allocation8 + $0x1c1c] ss:$52 sps:$4 sm:$0xff]  }
 0x65e   :  { %10982 = vmatprep.subr.bf16.mxu1 %v19814_v9  ;;  %v19868_v9 = vld [vmem:[#allocation8 + $0x22a4] ss:$52 sps:$4 sm:$0xff]  }
 0x660   :  { %10655 = vmatpush1.bf16.msra.mxu0 %v19809_v43  ;;  %v19863_v43 = vld [vmem:[#allocation8 + $0x1c18] ss:$52 sps:$4 sm:$0xff]  }
 0x661   :  { %10983 = vmatpush1.bf16.msra.mxu1 %v19812_v10  ;;  %10656 = vmatprep.subr.bf16.mxu0 %v19817_v13  ;;  %v19866_v10 = vld [vmem:[#allocation8 + $0x22a0] ss:$52 sps:$4 sm:$0xff]   ;;  %v19871_v13 = vld [vmem:[#allocation8 + $0x1c84] ss:$52 sps:$4 sm:$0xff]  }
 0x662   :  { %10984 = vmatprep.subr.bf16.mxu1 %v19820_v54  ;;  %v19874_v54 = vld [vmem:[#allocation8 + $0x230c] ss:$52 sps:$4 sm:$0xff]  }
 0x664   :  { %10657 = vmatpush1.bf16.msra.mxu0 %v19815_v19  ;;  %v19869_v19 = vld [vmem:[#allocation8 + $0x1c80] ss:$52 sps:$4 sm:$0xff]  }
 0x665   :  { %10985 = vmatpush1.bf16.msra.mxu1 %v19818_v22  ;;  %10658 = vmatprep.subr.bf16.mxu0 %v19823_v23  ;;  %v19872_v22 = vld [vmem:[#allocation8 + $0x2308] ss:$52 sps:$4 sm:$0xff]   ;;  %v19877_v23 = vld [vmem:[#allocation8 + $0x1cec] ss:$52 sps:$4 sm:$0xff]  }
 0x666   :  { %10986 = vmatprep.subr.bf16.mxu1 %v19826_v28  ;;  %v19880_v28 = vld [vmem:[#allocation8 + $0x2374] ss:$52 sps:$4 sm:$0xff]  }
 0x668   :  { %10659 = vmatpush1.bf16.msra.mxu0 %v19821_v8  ;;  %v19875_v8 = vld [vmem:[#allocation8 + $0x1ce8] ss:$52 sps:$4 sm:$0xff]  }
 0x669   :  { %10987 = vmatpush1.bf16.msra.mxu1 %v19824_v31  ;;  %10660 = vmatprep.subr.bf16.mxu0 %v19829_v33  ;;  %v19878_v31 = vld [vmem:[#allocation8 + $0x2370] ss:$52 sps:$4 sm:$0xff]   ;;  %v19883_v33 = vld [vmem:[#allocation8 + $0x1d54] ss:$52 sps:$4 sm:$0xff]  }
 0x66a   :  { %10988 = vmatprep.subr.bf16.mxu1 %v19832_v35  ;;  %v19886_v35 = vld [vmem:[#allocation8 + $0x23dc] ss:$52 sps:$4 sm:$0xff]  }
 0x66c   :  { %10661 = vmatpush1.bf16.msra.mxu0 %v19827_v0  ;;  %v19881_v0 = vld [vmem:[#allocation8 + $0x1d50] ss:$52 sps:$4 sm:$0xff]  }
 0x66d   :  { %10989 = vmatpush1.bf16.msra.mxu1 %v19830_v24  ;;  %10671 = vmatprep.subr.bf16.mxu0 %v19835_v36  ;;  %v19884_v24 = vld [vmem:[#allocation8 + $0x23d8] ss:$52 sps:$4 sm:$0xff]   ;;  %v19889_v36 = vld [vmem:[#allocation8 + $0x1dbc] ss:$52 sps:$4 sm:$0xff]  }
 0x66e   :  { %10999 = vmatprep.subr.bf16.mxu1 %v19838_v38  ;;  %v19892_v38 = vld [vmem:[#allocation8 + $0x2444] ss:$52 sps:$4 sm:$0xff]  }
 0x66f   :  { %10663 = vmatmul.mubr.bf16.vlgmr.msra.gmra.mrb[72].mxu0 %v22439_v16 }
 0x670   :  { %10991 = vmatmul.mubr.bf16.vlgmr.msra.gmra.mrb[40].mxu1 %v22451_v34  ;;  %10672 = vmatpush1.bf16.msra.mxu0 %v19833_v59  ;;  %v19887_v59 = vld [vmem:[#allocation8 + $0x1db8] ss:$52 sps:$4 sm:$0xff]  }
 0x671   :  { %10703 = vmatprep.mubr.bf16.mxu0 %v22441_v12  ;;  %11000 = vmatpush1.bf16.msra.mxu1 %v19836_v18  ;;  %v19890_v18 = vld [vmem:[#allocation8 + $0x2440] ss:$52 sps:$4 sm:$0xff]  }
 0x672   :  { %11031 = vmatprep.mubr.bf16.mxu1 %v22453_v25  ;;  %10673 = vmatprep.subr.bf16.mxu0 %v19841_v26  ;;  %v19895_v26 = vld [vmem:[#allocation8 + $0x1e24] ss:$52 sps:$4 sm:$0xff]  }
 0x673   :  { %11001 = vmatprep.subr.bf16.mxu1 %v19844_v41  ;;  %v19898_v41 = vld [vmem:[#allocation8 + $0x24ac] ss:$52 sps:$4 sm:$0xff]  }
 0x674   :  { %10674 = vmatpush1.bf16.msra.mxu0 %v19839_v42  ;;  %v19893_v42 = vld [vmem:[#allocation8 + $0x1e20] ss:$52 sps:$4 sm:$0xff]  }
 0x675   :  { %11002 = vmatpush1.bf16.msra.mxu1 %v19842_v46  ;;  %10675 = vmatprep.subr.bf16.mxu0 %v19847_v40  ;;  %v19896_v46 = vld [vmem:[#allocation8 + $0x24a8] ss:$52 sps:$4 sm:$0xff]   ;;  %v19901_v40 = vld [vmem:[#allocation8 + $0x1e8c] ss:$52 sps:$4 sm:$0xff]  }
 0x676   :  { %11003 = vmatprep.subr.bf16.mxu1 %v19850_v52  ;;  %v19904_v52 = vld [vmem:[#allocation8 + $0x2514] ss:$52 sps:$4 sm:$0xff]  }
 0x678   :  { %10676 = vmatpush1.bf16.msra.mxu0 %v19845_v30  ;;  %v19899_v30 = vld [vmem:[#allocation8 + $0x1e88] ss:$52 sps:$4 sm:$0xff]  }
 0x679   :  { %11004 = vmatpush1.bf16.msra.mxu1 %v19848_v37  ;;  %10677 = vmatprep.subr.bf16.mxu0 %v19853_v53  ;;  %v19902_v37 = vld [vmem:[#allocation8 + $0x2510] ss:$52 sps:$4 sm:$0xff]   ;;  %v19907_v53 = vld [vmem:[#allocation8 + $0x1ef4] ss:$52 sps:$4 sm:$0xff]  }
 0x67a   :  { %11005 = vmatprep.subr.bf16.mxu1 %v19856_v55  ;;  %v19910_v55 = vld [vmem:[#allocation8 + $0x257c] ss:$52 sps:$4 sm:$0xff]  }
 0x67c   :  { %10678 = vmatpush1.bf16.msra.mxu0 %v19851_v29  ;;  %v19905_v29 = vld [vmem:[#allocation8 + $0x1ef0] ss:$52 sps:$4 sm:$0xff]  }
 0x67d   :  { %11006 = vmatpush1.bf16.msra.mxu1 %v19854_v57  ;;  %10679 = vmatprep.subr.bf16.mxu0 %v19859_v58  ;;  %v19908_v57 = vld [vmem:[#allocation8 + $0x2578] ss:$52 sps:$4 sm:$0xff]   ;;  %v19913_v58 = vld [vmem:[#allocation8 + $0x1f5c] ss:$52 sps:$4 sm:$0xff]  }
 0x67e   :  { %11007 = vmatprep.subr.bf16.mxu1 %v19862_v45  ;;  %v19916_v45 = vld [vmem:[#allocation8 + $0x25e4] ss:$52 sps:$4 sm:$0xff]  }
 0x680   :  { %10680 = vmatpush1.bf16.msra.mxu0 %v19857_v6  ;;  %v19911_v6 = vld [vmem:[#allocation8 + $0x1f58] ss:$52 sps:$4 sm:$0xff]  }
 0x681   :  { %11008 = vmatpush1.bf16.msra.mxu1 %v19860_v5  ;;  %10681 = vmatprep.subr.bf16.mxu0 %v19865_v7  ;;  %v19914_v5 = vld [vmem:[#allocation8 + $0x25e0] ss:$52 sps:$4 sm:$0xff]   ;;  %v19919_v7 = vld [vmem:[#allocation8 + $0x1fc4] ss:$52 sps:$4 sm:$0xff]  }
 0x682   :  { %11009 = vmatprep.subr.bf16.mxu1 %v19868_v9  ;;  %v19922_v9 = vld [vmem:[#allocation8 + $0x264c] ss:$52 sps:$4 sm:$0xff]  }
 0x684   :  { %10682 = vmatpush1.bf16.msra.mxu0 %v19863_v43  ;;  %v19917_v43 = vld [vmem:[#allocation8 + $0x1fc0] ss:$52 sps:$4 sm:$0xff]  }
 0x685   :  { %11010 = vmatpush1.bf16.msra.mxu1 %v19866_v10  ;;  %10683 = vmatprep.subr.bf16.mxu0 %v19871_v13  ;;  %v19920_v10 = vld [vmem:[#allocation8 + $0x2648] ss:$52 sps:$4 sm:$0xff]   ;;  %v19925_v13 = vld [vmem:[#allocation8 + $0x202c] ss:$52 sps:$4 sm:$0xff]  }
 0x686   :  { %11011 = vmatprep.subr.bf16.mxu1 %v19874_v54  ;;  %v19928_v54 = vld [vmem:[#allocation8 + $0x26b4] ss:$52 sps:$4 sm:$0xff]  }
 0x688   :  { %10684 = vmatpush1.bf16.msra.mxu0 %v19869_v19  ;;  %v19923_v19 = vld [vmem:[#allocation8 + $0x2028] ss:$52 sps:$4 sm:$0xff]  }
 0x689   :  { %11012 = vmatpush1.bf16.msra.mxu1 %v19872_v22  ;;  %10685 = vmatprep.subr.bf16.mxu0 %v19877_v23  ;;  %v19926_v22 = vld [vmem:[#allocation8 + $0x26b0] ss:$52 sps:$4 sm:$0xff]   ;;  %v19931_v23 = vld [vmem:[#allocation8 + $0x2094] ss:$52 sps:$4 sm:$0xff]  }
 0x68a   :  { %11013 = vmatprep.subr.bf16.mxu1 %v19880_v28  ;;  %v19934_v28 = vld [vmem:[#allocation8 + $0x271c] ss:$52 sps:$4 sm:$0xff]  }
 0x68c   :  { %10686 = vmatpush1.bf16.msra.mxu0 %v19875_v8  ;;  %v19929_v8 = vld [vmem:[#allocation8 + $0x2090] ss:$52 sps:$4 sm:$0xff]  }
 0x68d   :  { %11014 = vmatpush1.bf16.msra.mxu1 %v19878_v31  ;;  %10687 = vmatprep.subr.bf16.mxu0 %v19883_v33  ;;  %v19932_v31 = vld [vmem:[#allocation8 + $0x2718] ss:$52 sps:$4 sm:$0xff]   ;;  %v19937_v33 = vld [vmem:[#allocation8 + $0x20fc] ss:$52 sps:$4 sm:$0xff]  }
 0x68e   :  { %11015 = vmatprep.subr.bf16.mxu1 %v19886_v35  ;;  %v19940_v35 = vld [vmem:[#allocation8 + $0x2784] ss:$52 sps:$4 sm:$0xff]  }
 0x690   :  { %10688 = vmatpush1.bf16.msra.mxu0 %v19881_v0  ;;  %v19935_v0 = vld [vmem:[#allocation8 + $0x20f8] ss:$52 sps:$4 sm:$0xff]  }
 0x691   :  { %11016 = vmatpush1.bf16.msra.mxu1 %v19884_v24  ;;  %10689 = vmatprep.subr.bf16.mxu0 %v19889_v36  ;;  %v19938_v24 = vld [vmem:[#allocation8 + $0x2780] ss:$52 sps:$4 sm:$0xff]   ;;  %v19943_v36 = vld [vmem:[#allocation8 + $0x2164] ss:$52 sps:$4 sm:$0xff]  }
 0x692   :  { %11017 = vmatprep.subr.bf16.mxu1 %v19892_v38  ;;  %v19946_v38 = vld [vmem:[#allocation8 + $0x27ec] ss:$52 sps:$4 sm:$0xff]  }
 0x694   :  { %10690 = vmatpush1.bf16.msra.mxu0 %v19887_v59  ;;  %v19941_v59 = vld [vmem:[#allocation8 + $0x2160] ss:$52 sps:$4 sm:$0xff]  }
 0x695   :  { %11018 = vmatpush1.bf16.msra.mxu1 %v19890_v18  ;;  %10691 = vmatprep.subr.bf16.mxu0 %v19895_v26  ;;  %v19944_v18 = vld [vmem:[#allocation8 + $0x27e8] ss:$52 sps:$4 sm:$0xff]   ;;  %v19949_v26 = vld [vmem:[#allocation8 + $0x21cc] ss:$52 sps:$4 sm:$0xff]  }
 0x696   :  { %11019 = vmatprep.subr.bf16.mxu1 %v19898_v41  ;;  %v19952_v41 = vld [vmem:[#allocation8 + $0x2854] ss:$52 sps:$4 sm:$0xff]  }
 0x698   :  { %10692 = vmatpush1.bf16.msra.mxu0 %v19893_v42  ;;  %v19947_v42 = vld [vmem:[#allocation8 + $0x21c8] ss:$52 sps:$4 sm:$0xff]  }
 0x699   :  { %11020 = vmatpush1.bf16.msra.mxu1 %v19896_v46  ;;  %10693 = vmatprep.subr.bf16.mxu0 %v19901_v40  ;;  %v19950_v46 = vld [vmem:[#allocation8 + $0x2850] ss:$52 sps:$4 sm:$0xff]   ;;  %v19955_v40 = vld [vmem:[#allocation8 + $0x2234] ss:$52 sps:$4 sm:$0xff]  }
 0x69a   :  { %11021 = vmatprep.subr.bf16.mxu1 %v19904_v52  ;;  %v19958_v52 = vld [vmem:[#allocation8 + $0x28bc] ss:$52 sps:$4 sm:$0xff]  }
 0x69c   :  { %10694 = vmatpush1.bf16.msra.mxu0 %v19899_v30  ;;  %v19953_v30 = vld [vmem:[#allocation8 + $0x2230] ss:$52 sps:$4 sm:$0xff]  }
 0x69d   :  { %11022 = vmatpush1.bf16.msra.mxu1 %v19902_v37  ;;  %10695 = vmatprep.subr.bf16.mxu0 %v19907_v53  ;;  %v19956_v37 = vld [vmem:[#allocation8 + $0x28b8] ss:$52 sps:$4 sm:$0xff]   ;;  %v19961_v53 = vld [vmem:[#allocation8 + $0x229c] ss:$52 sps:$4 sm:$0xff]  }
 0x69e   :  { %11023 = vmatprep.subr.bf16.mxu1 %v19910_v55  ;;  %v19964_v55 = vld [vmem:[#allocation8 + $0x2924] ss:$52 sps:$4 sm:$0xff]  }
 0x6a0   :  { %10696 = vmatpush1.bf16.msra.mxu0 %v19905_v29  ;;  %v19959_v29 = vld [vmem:[#allocation8 + $0x2298] ss:$52 sps:$4 sm:$0xff]  }
 0x6a1   :  { %11024 = vmatpush1.bf16.msra.mxu1 %v19908_v57  ;;  %10697 = vmatprep.subr.bf16.mxu0 %v19913_v58  ;;  %v19962_v57 = vld [vmem:[#allocation8 + $0x2920] ss:$52 sps:$4 sm:$0xff]   ;;  %v19967_v58 = vld [vmem:[#allocation8 + $0x2304] ss:$52 sps:$4 sm:$0xff]  }
 0x6a2   :  { %11025 = vmatprep.subr.bf16.mxu1 %v19916_v45  ;;  %v19970_v45 = vld [vmem:[#allocation8 + $0x298c] ss:$52 sps:$4 sm:$0xff]  }
 0x6a4   :  { %10698 = vmatpush1.bf16.msra.mxu0 %v19911_v6  ;;  %v19965_v6 = vld [vmem:[#allocation8 + $0x2300] ss:$52 sps:$4 sm:$0xff]  }
 0x6a5   :  { %11026 = vmatpush1.bf16.msra.mxu1 %v19914_v5  ;;  %10699 = vmatprep.subr.bf16.mxu0 %v19919_v7  ;;  %v19968_v5 = vld [vmem:[#allocation8 + $0x2988] ss:$52 sps:$4 sm:$0xff]   ;;  %v19973_v7 = vld [vmem:[#allocation8 + $0x236c] ss:$52 sps:$4 sm:$0xff]  }
 0x6a6   :  { %11027 = vmatprep.subr.bf16.mxu1 %v19922_v9  ;;  %v19976_v9 = vld [vmem:[#allocation8 + $0x29f4] ss:$52 sps:$4 sm:$0xff]  }
 0x6a8   :  { %10700 = vmatpush1.bf16.msra.mxu0 %v19917_v43  ;;  %v19971_v43 = vld [vmem:[#allocation8 + $0x2368] ss:$52 sps:$4 sm:$0xff]  }
 0x6a9   :  { %11028 = vmatpush1.bf16.msra.mxu1 %v19920_v10  ;;  %10701 = vmatprep.subr.bf16.mxu0 %v19925_v13  ;;  %v19974_v10 = vld [vmem:[#allocation8 + $0x29f0] ss:$52 sps:$4 sm:$0xff]   ;;  %v19979_v13 = vld [vmem:[#allocation8 + $0x23d4] ss:$52 sps:$4 sm:$0xff]  }
 0x6aa   :  { %11029 = vmatprep.subr.bf16.mxu1 %v19928_v54  ;;  %v19982_v54 = vld [vmem:[#allocation8 + $0x2c] ss:$52 sps:$4 sm:$0xff]  }
 0x6ac   :  { %10702 = vmatpush1.bf16.msra.mxu0 %v19923_v19  ;;  %v19977_v19 = vld [vmem:[#allocation8 + $0x23d0] ss:$52 sps:$4 sm:$0xff]  }
 0x6ad   :  { %11030 = vmatpush1.bf16.msra.mxu1 %v19926_v22  ;;  %10712 = vmatprep.subr.bf16.mxu0 %v19931_v23  ;;  %v19980_v22 = vld [vmem:[#allocation8 + $0x28] ss:$52 sps:$4 sm:$0xff]  }
 0x6ae   :  { %11040 = vmatprep.subr.bf16.mxu1 %v19934_v28  ;;  %v19985_v23 = vld [vmem:[#allocation8 + $0x243c] ss:$52 sps:$4 sm:$0xff]   ;;  %v19988_v28 = vld [vmem:[#allocation8 + $0x94] ss:$52 sps:$4 sm:$0xff]  }
 0x6af   :  { %10704 = vmatmul.mubr.bf16.vlgmr.msra.gmra.mrb[72].mxu0 %v22451_v34 }
 0x6b0   :  { %11032 = vmatmul.mubr.bf16.vlgmr.msra.gmra.mrb[40].mxu1 %v22460_v56  ;;  %10713 = vmatpush1.bf16.msra.mxu0 %v19929_v8  ;;  %v19983_v8 = vld [vmem:[#allocation8 + $0x2438] ss:$52 sps:$4 sm:$0xff]  }
 0x6b1   :  { %10744 = vmatprep.mubr.bf16.mxu0 %v22453_v25  ;;  %11041 = vmatpush1.bf16.msra.mxu1 %v19932_v31  ;;  %v19986_v31 = vld [vmem:[#allocation8 + $0x90] ss:$52 sps:$4 sm:$0xff]  }
 0x6b2   :  { %10714 = vmatprep.subr.bf16.mxu0 %v19937_v33  ;;  %11042 = vmatprep.subr.bf16.mxu1 %v19940_v35  ;;  %v19991_v33 = vld [vmem:[#allocation8 + $0x24a4] ss:$52 sps:$4 sm:$0xff]   ;;  %v19994_v35 = vld [vmem:[#allocation8 + $0xfc] ss:$52 sps:$4 sm:$0xff]  }
 0x6b3   :  { %11072 = vmatprep.mubr.bf16.mxu1 %v21763_v51 }
 0x6b4   :  { %10715 = vmatpush1.bf16.msra.mxu0 %v19935_v0  ;;  %v19989_v0 = vld [vmem:[#allocation8 + $0x24a0] ss:$52 sps:$4 sm:$0xff]  }
 0x6b5   :  { %11043 = vmatpush1.bf16.msra.mxu1 %v19938_v24  ;;  %10716 = vmatprep.subr.bf16.mxu0 %v19943_v36  ;;  %v19992_v24 = vld [vmem:[#allocation8 + $0xf8] ss:$52 sps:$4 sm:$0xff]  }
 0x6b6   :  { %11044 = vmatprep.subr.bf16.mxu1 %v19946_v38  ;;  %v19997_v36 = vld [vmem:[#allocation8 + $0x250c] ss:$52 sps:$4 sm:$0xff]   ;;  %v20000_v38 = vld [vmem:[#allocation8 + $0x164] ss:$52 sps:$4 sm:$0xff]  }
 0x6b8   :  { %10717 = vmatpush1.bf16.msra.mxu0 %v19941_v59  ;;  %v19995_v59 = vld [vmem:[#allocation8 + $0x2508] ss:$52 sps:$4 sm:$0xff]  }
 0x6b9   :  { %11045 = vmatpush1.bf16.msra.mxu1 %v19944_v18  ;;  %10718 = vmatprep.subr.bf16.mxu0 %v19949_v26  ;;  %v19998_v18 = vld [vmem:[#allocation8 + $0x160] ss:$52 sps:$4 sm:$0xff]  }
 0x6ba   :  { %11046 = vmatprep.subr.bf16.mxu1 %v19952_v41  ;;  %v20003_v26 = vld [vmem:[#allocation8 + $0x2574] ss:$52 sps:$4 sm:$0xff]   ;;  %v20006_v41 = vld [vmem:[#allocation8 + $0x1cc] ss:$52 sps:$4 sm:$0xff]  }
 0x6bc   :  { %10719 = vmatpush1.bf16.msra.mxu0 %v19947_v42  ;;  %v20001_v42 = vld [vmem:[#allocation8 + $0x2570] ss:$52 sps:$4 sm:$0xff]  }
 0x6bd   :  { %11047 = vmatpush1.bf16.msra.mxu1 %v19950_v46  ;;  %10720 = vmatprep.subr.bf16.mxu0 %v19955_v40  ;;  %v20004_v46 = vld [vmem:[#allocation8 + $0x1c8] ss:$52 sps:$4 sm:$0xff]  }
 0x6be   :  { %11048 = vmatprep.subr.bf16.mxu1 %v19958_v52  ;;  %v20009_v40 = vld [vmem:[#allocation8 + $0x25dc] ss:$52 sps:$4 sm:$0xff]   ;;  %v20012_v52 = vld [vmem:[#allocation8 + $0x234] ss:$52 sps:$4 sm:$0xff]  }
 0x6c0   :  { %10721 = vmatpush1.bf16.msra.mxu0 %v19953_v30  ;;  %v20007_v30 = vld [vmem:[#allocation8 + $0x25d8] ss:$52 sps:$4 sm:$0xff]  }
 0x6c1   :  { %11049 = vmatpush1.bf16.msra.mxu1 %v19956_v37  ;;  %10722 = vmatprep.subr.bf16.mxu0 %v19961_v53  ;;  %v20010_v37 = vld [vmem:[#allocation8 + $0x230] ss:$52 sps:$4 sm:$0xff]  }
 0x6c2   :  { %11050 = vmatprep.subr.bf16.mxu1 %v19964_v55  ;;  %v20015_v53 = vld [vmem:[#allocation8 + $0x2644] ss:$52 sps:$4 sm:$0xff]   ;;  %v20018_v55 = vld [vmem:[#allocation8 + $0x29c] ss:$52 sps:$4 sm:$0xff]  }
 0x6c4   :  { %10723 = vmatpush1.bf16.msra.mxu0 %v19959_v29  ;;  %v20013_v29 = vld [vmem:[#allocation8 + $0x2640] ss:$52 sps:$4 sm:$0xff]  }
 0x6c5   :  { %11051 = vmatpush1.bf16.msra.mxu1 %v19962_v57  ;;  %10724 = vmatprep.subr.bf16.mxu0 %v19967_v58  ;;  %v20016_v57 = vld [vmem:[#allocation8 + $0x298] ss:$52 sps:$4 sm:$0xff]  }
 0x6c6   :  { %11052 = vmatprep.subr.bf16.mxu1 %v19970_v45  ;;  %v20021_v58 = vld [vmem:[#allocation8 + $0x26ac] ss:$52 sps:$4 sm:$0xff]   ;;  %v20024_v45 = vld [vmem:[#allocation8 + $0x304] ss:$52 sps:$4 sm:$0xff]  }
 0x6c8   :  { %10725 = vmatpush1.bf16.msra.mxu0 %v19965_v6  ;;  %v20019_v6 = vld [vmem:[#allocation8 + $0x26a8] ss:$52 sps:$4 sm:$0xff]  }
 0x6c9   :  { %11053 = vmatpush1.bf16.msra.mxu1 %v19968_v5  ;;  %10726 = vmatprep.subr.bf16.mxu0 %v19973_v7  ;;  %v20022_v5 = vld [vmem:[#allocation8 + $0x300] ss:$52 sps:$4 sm:$0xff]  }
 0x6ca   :  { %11054 = vmatprep.subr.bf16.mxu1 %v19976_v9  ;;  %v20027_v7 = vld [vmem:[#allocation8 + $0x2714] ss:$52 sps:$4 sm:$0xff]   ;;  %v20030_v9 = vld [vmem:[#allocation8 + $0x36c] ss:$52 sps:$4 sm:$0xff]  }
 0x6cc   :  { %10727 = vmatpush1.bf16.msra.mxu0 %v19971_v43  ;;  %v20025_v43 = vld [vmem:[#allocation8 + $0x2710] ss:$52 sps:$4 sm:$0xff]  }
 0x6cd   :  { %11055 = vmatpush1.bf16.msra.mxu1 %v19974_v10  ;;  %10728 = vmatprep.subr.bf16.mxu0 %v19979_v13  ;;  %v20028_v10 = vld [vmem:[#allocation8 + $0x368] ss:$52 sps:$4 sm:$0xff]  }
 0x6ce   :  { %11368 = vmatprep.subr.bf16.mxu1 %v19982_v54  ;;  %v20033_v13 = vld [vmem:[#allocation8 + $0x277c] ss:$52 sps:$4 sm:$0xff]   ;;  %v20036_v54 = vld [vmem:[#allocation8 + $0x3d4] ss:$52 sps:$4 sm:$0xff]  }
 0x6d0   :  { %11073 = vmatmul.mubr.bf16.vlgmr.msra.gmra.mrb[40].mxu1 %v22467_v11  ;;  %10729 = vmatpush1.bf16.msra.mxu0 %v19977_v19  ;;  %v20031_v19 = vld [vmem:[#allocation8 + $0x2778] ss:$52 sps:$4 sm:$0xff]  }
 0x6d1   :  { %11369 = vmatpush1.bf16.msra.mxu1 %v19980_v22  ;;  %11400 = vmatprep.mubr.bf16.mxu1 %v22348_v62  ;;  %v20034_v22 = vld [vmem:[#allocation8 + $0x3d0] ss:$52 sps:$4 sm:$0xff]  }
 0x6d2   :  { %10730 = vmatprep.subr.bf16.mxu0 %v19985_v23  ;;  %11370 = vmatprep.subr.bf16.mxu1 %v19988_v28  ;;  %v20039_v23 = vld [vmem:[#allocation8 + $0x27e4] ss:$52 sps:$4 sm:$0xff]   ;;  %v20042_v28 = vld [vmem:[#allocation8 + $0x43c] ss:$52 sps:$4 sm:$0xff]  }
 0x6d4   :  { %10731 = vmatpush1.bf16.msra.mxu0 %v19983_v8  ;;  %v20037_v8 = vld [vmem:[#allocation8 + $0x27e0] ss:$52 sps:$4 sm:$0xff]  }
 0x6d5   :  { %11371 = vmatpush1.bf16.msra.mxu1 %v19986_v31  ;;  %10732 = vmatprep.subr.bf16.mxu0 %v19991_v33  ;;  %v20040_v31 = vld [vmem:[#allocation8 + $0x438] ss:$52 sps:$4 sm:$0xff]  }
 0x6d6   :  { %11372 = vmatprep.subr.bf16.mxu1 %v19994_v35  ;;  %v20045_v33 = vld [vmem:[#allocation8 + $0x284c] ss:$52 sps:$4 sm:$0xff]   ;;  %v20048_v35 = vld [vmem:[#allocation8 + $0x4a4] ss:$52 sps:$4 sm:$0xff]  }
 0x6d8   :  { %10733 = vmatpush1.bf16.msra.mxu0 %v19989_v0  ;;  %v20043_v0 = vld [vmem:[#allocation8 + $0x2848] ss:$52 sps:$4 sm:$0xff]  }
 0x6d9   :  { %11373 = vmatpush1.bf16.msra.mxu1 %v19992_v24  ;;  %10734 = vmatprep.subr.bf16.mxu0 %v19997_v36  ;;  %v20046_v24 = vld [vmem:[#allocation8 + $0x4a0] ss:$52 sps:$4 sm:$0xff]  }
 0x6da   :  { %11374 = vmatprep.subr.bf16.mxu1 %v20000_v38  ;;  %v20051_v36 = vld [vmem:[#allocation8 + $0x28b4] ss:$52 sps:$4 sm:$0xff]   ;;  %v20054_v38 = vld [vmem:[#allocation8 + $0x50c] ss:$52 sps:$4 sm:$0xff]  }
 0x6dc   :  { %10735 = vmatpush1.bf16.msra.mxu0 %v19995_v59  ;;  %v20049_v59 = vld [vmem:[#allocation8 + $0x28b0] ss:$52 sps:$4 sm:$0xff]  }
 0x6dd   :  { %11375 = vmatpush1.bf16.msra.mxu1 %v19998_v18  ;;  %10736 = vmatprep.subr.bf16.mxu0 %v20003_v26  ;;  %v20052_v18 = vld [vmem:[#allocation8 + $0x508] ss:$52 sps:$4 sm:$0xff]  }
 0x6de   :  { %11376 = vmatprep.subr.bf16.mxu1 %v20006_v41  ;;  %v20057_v26 = vld [vmem:[#allocation8 + $0x291c] ss:$52 sps:$4 sm:$0xff]   ;;  %v20060_v41 = vld [vmem:[#allocation8 + $0x574] ss:$52 sps:$4 sm:$0xff]  }
 0x6e0   :  { %10737 = vmatpush1.bf16.msra.mxu0 %v20001_v42  ;;  %v20055_v42 = vld [vmem:[#allocation8 + $0x2918] ss:$52 sps:$4 sm:$0xff]  }
 0x6e1   :  { %11377 = vmatpush1.bf16.msra.mxu1 %v20004_v46  ;;  %10738 = vmatprep.subr.bf16.mxu0 %v20009_v40  ;;  %v20058_v46 = vld [vmem:[#allocation8 + $0x570] ss:$52 sps:$4 sm:$0xff]  }
 0x6e2   :  { %11378 = vmatprep.subr.bf16.mxu1 %v20012_v52  ;;  %v20063_v40 = vld [vmem:[#allocation8 + $0x2984] ss:$52 sps:$4 sm:$0xff]   ;;  %v20066_v52 = vld [vmem:[#allocation8 + $0x5dc] ss:$52 sps:$4 sm:$0xff]  }
 0x6e4   :  { %10739 = vmatpush1.bf16.msra.mxu0 %v20007_v30  ;;  %v20061_v30 = vld [vmem:[#allocation8 + $0x2980] ss:$52 sps:$4 sm:$0xff]  }
 0x6e5   :  { %11379 = vmatpush1.bf16.msra.mxu1 %v20010_v37  ;;  %10740 = vmatprep.subr.bf16.mxu0 %v20015_v53  ;;  %v20064_v37 = vld [vmem:[#allocation8 + $0x5d8] ss:$52 sps:$4 sm:$0xff]  }
 0x6e6   :  { %11380 = vmatprep.subr.bf16.mxu1 %v20018_v55  ;;  %v20069_v53 = vld [vmem:[#allocation8 + $0x29ec] ss:$52 sps:$4 sm:$0xff]   ;;  %v20072_v55 = vld [vmem:[#allocation8 + $0x644] ss:$52 sps:$4 sm:$0xff]  }
 0x6e8   :  { %10741 = vmatpush1.bf16.msra.mxu0 %v20013_v29  ;;  %v20067_v29 = vld [vmem:[#allocation8 + $0x29e8] ss:$52 sps:$4 sm:$0xff]  }
 0x6e9   :  { %11381 = vmatpush1.bf16.msra.mxu1 %v20016_v57  ;;  %10742 = vmatprep.subr.bf16.mxu0 %v20021_v58  ;;  %v20070_v57 = vld [vmem:[#allocation8 + $0x640] ss:$52 sps:$4 sm:$0xff]   ;;  %v20075_v58 = vld [vmem:[#allocation8 + $0x24] ss:$52 sps:$4 sm:$0xff]  }
 0x6ea   :  { %11382 = vmatprep.subr.bf16.mxu1 %v20024_v45  ;;  %v20078_v45 = vld [vmem:[#allocation8 + $0x6ac] ss:$52 sps:$4 sm:$0xff]  }
 0x6ec   :  { %10743 = vmatpush1.bf16.msra.mxu0 %v20019_v6  ;;  %v20073_v6 = vld [vmem:[#allocation8 + $0x20] ss:$52 sps:$4 sm:$0xff]  }
 0x6ed   :  { %11383 = vmatpush1.bf16.msra.mxu1 %v20022_v5  ;;  %10753 = vmatprep.subr.bf16.mxu0 %v20027_v7  ;;  %v20076_v5 = vld [vmem:[#allocation8 + $0x6a8] ss:$52 sps:$4 sm:$0xff]   ;;  %v20081_v7 = vld [vmem:[#allocation8 + $0x8c] ss:$52 sps:$4 sm:$0xff]  }
 0x6ee   :  { %11384 = vmatprep.subr.bf16.mxu1 %v20030_v9  ;;  %v20084_v9 = vld [vmem:[#allocation8 + $0x714] ss:$52 sps:$4 sm:$0xff]  }
 0x6ef   :  { %10745 = vmatmul.mubr.bf16.vlgmr.msra.gmra.mrb[72].mxu0 %v22460_v56 }
 0x6f0   :  { %10754 = vmatpush1.bf16.msra.mxu0 %v20025_v43  ;;  %10785 = vmatprep.mubr.bf16.mxu0 %v21763_v51  ;;  %v20079_v43 = vld [vmem:[#allocation8 + $0x88] ss:$52 sps:$4 sm:$0xff]  }
 0x6f1   :  { %11385 = vmatpush1.bf16.msra.mxu1 %v20028_v10  ;;  %10755 = vmatprep.subr.bf16.mxu0 %v20033_v13  ;;  %v20082_v10 = vld [vmem:[#allocation8 + $0x710] ss:$52 sps:$4 sm:$0xff]   ;;  %v20087_v13 = vld [vmem:[#allocation8 + $0xf4] ss:$52 sps:$4 sm:$0xff]  }
 0x6f2   :  { %11386 = vmatprep.subr.bf16.mxu1 %v20036_v54  ;;  %v20090_v54 = vld [vmem:[#allocation8 + $0x77c] ss:$52 sps:$4 sm:$0xff]  }
 0x6f4   :  { %10756 = vmatpush1.bf16.msra.mxu0 %v20031_v19  ;;  %v20085_v19 = vld [vmem:[#allocation8 + $0xf0] ss:$52 sps:$4 sm:$0xff]  }
 0x6f5   :  { %11387 = vmatpush1.bf16.msra.mxu1 %v20034_v22  ;;  %10757 = vmatprep.subr.bf16.mxu0 %v20039_v23  ;;  %v20088_v22 = vld [vmem:[#allocation8 + $0x778] ss:$52 sps:$4 sm:$0xff]   ;;  %v20093_v23 = vld [vmem:[#allocation8 + $0x15c] ss:$52 sps:$4 sm:$0xff]  }
 0x6f6   :  { %11388 = vmatprep.subr.bf16.mxu1 %v20042_v28  ;;  %v20096_v28 = vld [vmem:[#allocation8 + $0x7e4] ss:$52 sps:$4 sm:$0xff]  }
 0x6f8   :  { %10758 = vmatpush1.bf16.msra.mxu0 %v20037_v8  ;;  %v20091_v8 = vld [vmem:[#allocation8 + $0x158] ss:$52 sps:$4 sm:$0xff]  }
 0x6f9   :  { %11389 = vmatpush1.bf16.msra.mxu1 %v20040_v31  ;;  %10759 = vmatprep.subr.bf16.mxu0 %v20045_v33  ;;  %v20094_v31 = vld [vmem:[#allocation8 + $0x7e0] ss:$52 sps:$4 sm:$0xff]   ;;  %v20099_v33 = vld [vmem:[#allocation8 + $0x1c4] ss:$52 sps:$4 sm:$0xff]  }
 0x6fa   :  { %11390 = vmatprep.subr.bf16.mxu1 %v20048_v35  ;;  %v20102_v35 = vld [vmem:[#allocation8 + $0x84c] ss:$52 sps:$4 sm:$0xff]  }
 0x6fc   :  { %10760 = vmatpush1.bf16.msra.mxu0 %v20043_v0  ;;  %v20097_v0 = vld [vmem:[#allocation8 + $0x1c0] ss:$52 sps:$4 sm:$0xff]  }
 0x6fd   :  { %11391 = vmatpush1.bf16.msra.mxu1 %v20046_v24  ;;  %10761 = vmatprep.subr.bf16.mxu0 %v20051_v36  ;;  %v20100_v24 = vld [vmem:[#allocation8 + $0x848] ss:$52 sps:$4 sm:$0xff]   ;;  %v20105_v36 = vld [vmem:[#allocation8 + $0x22c] ss:$52 sps:$4 sm:$0xff]  }
 0x6fe   :  { %11392 = vmatprep.subr.bf16.mxu1 %v20054_v38  ;;  %v20108_v38 = vld [vmem:[#allocation8 + $0x8b4] ss:$52 sps:$4 sm:$0xff]  }
 0x700   :  { %10762 = vmatpush1.bf16.msra.mxu0 %v20049_v59  ;;  %v20103_v59 = vld [vmem:[#allocation8 + $0x228] ss:$52 sps:$4 sm:$0xff]  }
 0x701   :  { %11393 = vmatpush1.bf16.msra.mxu1 %v20052_v18  ;;  %10763 = vmatprep.subr.bf16.mxu0 %v20057_v26  ;;  %v20106_v18 = vld [vmem:[#allocation8 + $0x8b0] ss:$52 sps:$4 sm:$0xff]   ;;  %v20111_v26 = vld [vmem:[#allocation8 + $0x294] ss:$52 sps:$4 sm:$0xff]  }
 0x702   :  { %11394 = vmatprep.subr.bf16.mxu1 %v20060_v41  ;;  %v20114_v41 = vld [vmem:[#allocation8 + $0x91c] ss:$52 sps:$4 sm:$0xff]  }
 0x704   :  { %10764 = vmatpush1.bf16.msra.mxu0 %v20055_v42  ;;  %v20109_v42 = vld [vmem:[#allocation8 + $0x290] ss:$52 sps:$4 sm:$0xff]  }
 0x705   :  { %11395 = vmatpush1.bf16.msra.mxu1 %v20058_v46  ;;  %10765 = vmatprep.subr.bf16.mxu0 %v20063_v40  ;;  %v20112_v46 = vld [vmem:[#allocation8 + $0x918] ss:$52 sps:$4 sm:$0xff]   ;;  %v20117_v40 = vld [vmem:[#allocation8 + $0x2fc] ss:$52 sps:$4 sm:$0xff]  }
 0x706   :  { %11396 = vmatprep.subr.bf16.mxu1 %v20066_v52  ;;  %v20120_v52 = vld [vmem:[#allocation8 + $0x984] ss:$52 sps:$4 sm:$0xff]  }
 0x708   :  { %10766 = vmatpush1.bf16.msra.mxu0 %v20061_v30  ;;  %v20115_v30 = vld [vmem:[#allocation8 + $0x2f8] ss:$52 sps:$4 sm:$0xff]  }
 0x709   :  { %11397 = vmatpush1.bf16.msra.mxu1 %v20064_v37  ;;  %10767 = vmatprep.subr.bf16.mxu0 %v20069_v53  ;;  %v20118_v37 = vld [vmem:[#allocation8 + $0x980] ss:$52 sps:$4 sm:$0xff]   ;;  %v20123_v53 = vld [vmem:[#allocation8 + $0x364] ss:$52 sps:$4 sm:$0xff]  }
 0x70a   :  { %11398 = vmatprep.subr.bf16.mxu1 %v20072_v55  ;;  %v20126_v55 = vld [vmem:[#allocation8 + $0x9ec] ss:$52 sps:$4 sm:$0xff]  }
 0x70c   :  { %10768 = vmatpush1.bf16.msra.mxu0 %v20067_v29  ;;  %v20121_v29 = vld [vmem:[#allocation8 + $0x360] ss:$52 sps:$4 sm:$0xff]  }
 0x70d   :  { %11399 = vmatpush1.bf16.msra.mxu1 %v20070_v57  ;;  %11081 = vmatprep.subr.bf16.mxu0 %v20075_v58  ;;  %v20124_v57 = vld [vmem:[#allocation8 + $0x9e8] ss:$52 sps:$4 sm:$0xff]   ;;  %v20129_v58 = vld [vmem:[#allocation8 + $0x3cc] ss:$52 sps:$4 sm:$0xff]  }
 0x70e   :  { %11409 = vmatprep.subr.bf16.mxu1 %v20078_v45  ;;  %v20132_v45 = vld [vmem:[#allocation8 + $0xa54] ss:$52 sps:$4 sm:$0xff]  }
 0x70f   :  { %10786 = vmatmul.mubr.bf16.vlgmr.msra.gmra.mrb[72].mxu0 %v22467_v11 }
 0x710   :  { %11401 = vmatmul.mubr.bf16.vlgmr.msra.gmra.mrb[44].mxu1 %v22350_v2  ;;  %11082 = vmatpush1.bf16.msra.mxu0 %v20073_v6  ;;  %v20127_v6 = vld [vmem:[#allocation8 + $0x3c8] ss:$52 sps:$4 sm:$0xff]  }
 0x711   :  { %11113 = vmatprep.mubr.bf16.mxu0 %v22348_v62  ;;  %11410 = vmatpush1.bf16.msra.mxu1 %v20076_v5  ;;  %v20130_v5 = vld [vmem:[#allocation8 + $0xa50] ss:$52 sps:$4 sm:$0xff]  }
 0x712   :  { %11441 = vmatprep.mubr.bf16.mxu1 %v22363_v27  ;;  %11083 = vmatprep.subr.bf16.mxu0 %v20081_v7  ;;  %v20135_v7 = vld [vmem:[#allocation8 + $0x434] ss:$52 sps:$4 sm:$0xff]  }
 0x713   :  { %11411 = vmatprep.subr.bf16.mxu1 %v20084_v9  ;;  %v20138_v9 = vld [vmem:[#allocation8 + $0xabc] ss:$52 sps:$4 sm:$0xff]  }
 0x714   :  { %11084 = vmatpush1.bf16.msra.mxu0 %v20079_v43  ;;  %v20133_v43 = vld [vmem:[#allocation8 + $0x430] ss:$52 sps:$4 sm:$0xff]  }
 0x715   :  { %11412 = vmatpush1.bf16.msra.mxu1 %v20082_v10  ;;  %11085 = vmatprep.subr.bf16.mxu0 %v20087_v13  ;;  %v20136_v10 = vld [vmem:[#allocation8 + $0xab8] ss:$52 sps:$4 sm:$0xff]   ;;  %v20141_v13 = vld [vmem:[#allocation8 + $0x49c] ss:$52 sps:$4 sm:$0xff]  }
 0x716   :  { %11413 = vmatprep.subr.bf16.mxu1 %v20090_v54  ;;  %v20144_v54 = vld [vmem:[#allocation8 + $0xb24] ss:$52 sps:$4 sm:$0xff]  }
 0x718   :  { %11086 = vmatpush1.bf16.msra.mxu0 %v20085_v19  ;;  %v20139_v19 = vld [vmem:[#allocation8 + $0x498] ss:$52 sps:$4 sm:$0xff]  }
 0x719   :  { %11414 = vmatpush1.bf16.msra.mxu1 %v20088_v22  ;;  %11087 = vmatprep.subr.bf16.mxu0 %v20093_v23  ;;  %v20142_v22 = vld [vmem:[#allocation8 + $0xb20] ss:$52 sps:$4 sm:$0xff]   ;;  %v20147_v23 = vld [vmem:[#allocation8 + $0x504] ss:$52 sps:$4 sm:$0xff]  }
 0x71a   :  { %11415 = vmatprep.subr.bf16.mxu1 %v20096_v28  ;;  %v20150_v28 = vld [vmem:[#allocation8 + $0xb8c] ss:$52 sps:$4 sm:$0xff]  }
 0x71c   :  { %11088 = vmatpush1.bf16.msra.mxu0 %v20091_v8  ;;  %v20145_v8 = vld [vmem:[#allocation8 + $0x500] ss:$52 sps:$4 sm:$0xff]  }
 0x71d   :  { %11416 = vmatpush1.bf16.msra.mxu1 %v20094_v31  ;;  %11089 = vmatprep.subr.bf16.mxu0 %v20099_v33  ;;  %v20148_v31 = vld [vmem:[#allocation8 + $0xb88] ss:$52 sps:$4 sm:$0xff]   ;;  %v20153_v33 = vld [vmem:[#allocation8 + $0x56c] ss:$52 sps:$4 sm:$0xff]  }
 0x71e   :  { %11417 = vmatprep.subr.bf16.mxu1 %v20102_v35  ;;  %v20156_v35 = vld [vmem:[#allocation8 + $0xbf4] ss:$52 sps:$4 sm:$0xff]  }
 0x720   :  { %11090 = vmatpush1.bf16.msra.mxu0 %v20097_v0  ;;  %v20151_v0 = vld [vmem:[#allocation8 + $0x568] ss:$52 sps:$4 sm:$0xff]  }
 0x721   :  { %11418 = vmatpush1.bf16.msra.mxu1 %v20100_v24  ;;  %11091 = vmatprep.subr.bf16.mxu0 %v20105_v36  ;;  %v20154_v24 = vld [vmem:[#allocation8 + $0xbf0] ss:$52 sps:$4 sm:$0xff]   ;;  %v20159_v36 = vld [vmem:[#allocation8 + $0x5d4] ss:$52 sps:$4 sm:$0xff]  }
 0x722   :  { %11419 = vmatprep.subr.bf16.mxu1 %v20108_v38  ;;  %v20162_v38 = vld [vmem:[#allocation8 + $0xc5c] ss:$52 sps:$4 sm:$0xff]  }
 0x724   :  { %11092 = vmatpush1.bf16.msra.mxu0 %v20103_v59  ;;  %v20157_v59 = vld [vmem:[#allocation8 + $0x5d0] ss:$52 sps:$4 sm:$0xff]  }
 0x725   :  { %11420 = vmatpush1.bf16.msra.mxu1 %v20106_v18  ;;  %11093 = vmatprep.subr.bf16.mxu0 %v20111_v26  ;;  %v20160_v18 = vld [vmem:[#allocation8 + $0xc58] ss:$52 sps:$4 sm:$0xff]   ;;  %v20165_v26 = vld [vmem:[#allocation8 + $0x63c] ss:$52 sps:$4 sm:$0xff]  }
 0x726   :  { %11421 = vmatprep.subr.bf16.mxu1 %v20114_v41  ;;  %v20168_v41 = vld [vmem:[#allocation8 + $0xcc4] ss:$52 sps:$4 sm:$0xff]  }
 0x728   :  { %11094 = vmatpush1.bf16.msra.mxu0 %v20109_v42  ;;  %v20163_v42 = vld [vmem:[#allocation8 + $0x638] ss:$52 sps:$4 sm:$0xff]  }
 0x729   :  { %11422 = vmatpush1.bf16.msra.mxu1 %v20112_v46  ;;  %11095 = vmatprep.subr.bf16.mxu0 %v20117_v40  ;;  %v20166_v46 = vld [vmem:[#allocation8 + $0xcc0] ss:$52 sps:$4 sm:$0xff]   ;;  %v20171_v40 = vld [vmem:[#allocation8 + $0x6a4] ss:$52 sps:$4 sm:$0xff]  }
 0x72a   :  { %11423 = vmatprep.subr.bf16.mxu1 %v20120_v52  ;;  %v20174_v52 = vld [vmem:[#allocation8 + $0xd2c] ss:$52 sps:$4 sm:$0xff]  }
 0x72c   :  { %11096 = vmatpush1.bf16.msra.mxu0 %v20115_v30  ;;  %v20169_v30 = vld [vmem:[#allocation8 + $0x6a0] ss:$52 sps:$4 sm:$0xff]  }
 0x72d   :  { %11424 = vmatpush1.bf16.msra.mxu1 %v20118_v37  ;;  %11097 = vmatprep.subr.bf16.mxu0 %v20123_v53  ;;  %v20172_v37 = vld [vmem:[#allocation8 + $0xd28] ss:$52 sps:$4 sm:$0xff]   ;;  %v20177_v53 = vld [vmem:[#allocation8 + $0x70c] ss:$52 sps:$4 sm:$0xff]  }
 0x72e   :  { %11425 = vmatprep.subr.bf16.mxu1 %v20126_v55  ;;  %v20180_v55 = vld [vmem:[#allocation8 + $0xd94] ss:$52 sps:$4 sm:$0xff]  }
 0x730   :  { %11098 = vmatpush1.bf16.msra.mxu0 %v20121_v29  ;;  %v20175_v29 = vld [vmem:[#allocation8 + $0x708] ss:$52 sps:$4 sm:$0xff]  }
 0x731   :  { %11426 = vmatpush1.bf16.msra.mxu1 %v20124_v57  ;;  %11099 = vmatprep.subr.bf16.mxu0 %v20129_v58  ;;  %v20178_v57 = vld [vmem:[#allocation8 + $0xd90] ss:$52 sps:$4 sm:$0xff]   ;;  %v20183_v58 = vld [vmem:[#allocation8 + $0x774] ss:$52 sps:$4 sm:$0xff]  }
 0x732   :  { %11427 = vmatprep.subr.bf16.mxu1 %v20132_v45  ;;  %v20186_v45 = vld [vmem:[#allocation8 + $0xdfc] ss:$52 sps:$4 sm:$0xff]  }
 0x734   :  { %11100 = vmatpush1.bf16.msra.mxu0 %v20127_v6  ;;  %v20181_v6 = vld [vmem:[#allocation8 + $0x770] ss:$52 sps:$4 sm:$0xff]  }
 0x735   :  { %11428 = vmatpush1.bf16.msra.mxu1 %v20130_v5  ;;  %11101 = vmatprep.subr.bf16.mxu0 %v20135_v7  ;;  %v20184_v5 = vld [vmem:[#allocation8 + $0xdf8] ss:$52 sps:$4 sm:$0xff]   ;;  %v20189_v7 = vld [vmem:[#allocation8 + $0x7dc] ss:$52 sps:$4 sm:$0xff]  }
 0x736   :  { %11429 = vmatprep.subr.bf16.mxu1 %v20138_v9  ;;  %v20192_v9 = vld [vmem:[#allocation8 + $0xe64] ss:$52 sps:$4 sm:$0xff]  }
 0x738   :  { %11102 = vmatpush1.bf16.msra.mxu0 %v20133_v43  ;;  %v20187_v43 = vld [vmem:[#allocation8 + $0x7d8] ss:$52 sps:$4 sm:$0xff]  }
 0x739   :  { %11430 = vmatpush1.bf16.msra.mxu1 %v20136_v10  ;;  %11103 = vmatprep.subr.bf16.mxu0 %v20141_v13  ;;  %v20190_v10 = vld [vmem:[#allocation8 + $0xe60] ss:$52 sps:$4 sm:$0xff]   ;;  %v20195_v13 = vld [vmem:[#allocation8 + $0x844] ss:$52 sps:$4 sm:$0xff]  }
 0x73a   :  { %11431 = vmatprep.subr.bf16.mxu1 %v20144_v54  ;;  %v20198_v54 = vld [vmem:[#allocation8 + $0xecc] ss:$52 sps:$4 sm:$0xff]  }
 0x73c   :  { %11104 = vmatpush1.bf16.msra.mxu0 %v20139_v19  ;;  %v20193_v19 = vld [vmem:[#allocation8 + $0x840] ss:$52 sps:$4 sm:$0xff]  }
 0x73d   :  { %11432 = vmatpush1.bf16.msra.mxu1 %v20142_v22  ;;  %11105 = vmatprep.subr.bf16.mxu0 %v20147_v23  ;;  %v20196_v22 = vld [vmem:[#allocation8 + $0xec8] ss:$52 sps:$4 sm:$0xff]   ;;  %v20201_v23 = vld [vmem:[#allocation8 + $0x8ac] ss:$52 sps:$4 sm:$0xff]  }
 0x73e   :  { %11433 = vmatprep.subr.bf16.mxu1 %v20150_v28  ;;  %v20204_v28 = vld [vmem:[#allocation8 + $0xf34] ss:$52 sps:$4 sm:$0xff]  }
 0x740   :  { %11106 = vmatpush1.bf16.msra.mxu0 %v20145_v8  ;;  %v20199_v8 = vld [vmem:[#allocation8 + $0x8a8] ss:$52 sps:$4 sm:$0xff]  }
 0x741   :  { %11434 = vmatpush1.bf16.msra.mxu1 %v20148_v31  ;;  %11107 = vmatprep.subr.bf16.mxu0 %v20153_v33  ;;  %v20202_v31 = vld [vmem:[#allocation8 + $0xf30] ss:$52 sps:$4 sm:$0xff]   ;;  %v20207_v33 = vld [vmem:[#allocation8 + $0x914] ss:$52 sps:$4 sm:$0xff]  }
 0x742   :  { %11435 = vmatprep.subr.bf16.mxu1 %v20156_v35  ;;  %v20210_v35 = vld [vmem:[#allocation8 + $0xf9c] ss:$52 sps:$4 sm:$0xff]  }
 0x744   :  { %11108 = vmatpush1.bf16.msra.mxu0 %v20151_v0  ;;  %v20205_v0 = vld [vmem:[#allocation8 + $0x910] ss:$52 sps:$4 sm:$0xff]  }
 0x745   :  { %11436 = vmatpush1.bf16.msra.mxu1 %v20154_v24  ;;  %11109 = vmatprep.subr.bf16.mxu0 %v20159_v36  ;;  %v20208_v24 = vld [vmem:[#allocation8 + $0xf98] ss:$52 sps:$4 sm:$0xff]   ;;  %v20213_v36 = vld [vmem:[#allocation8 + $0x97c] ss:$52 sps:$4 sm:$0xff]  }
 0x746   :  { %11437 = vmatprep.subr.bf16.mxu1 %v20162_v38  ;;  %v20216_v38 = vld [vmem:[#allocation8 + $0x1004] ss:$52 sps:$4 sm:$0xff]  }
 0x748   :  { %11110 = vmatpush1.bf16.msra.mxu0 %v20157_v59  ;;  %v20211_v59 = vld [vmem:[#allocation8 + $0x978] ss:$52 sps:$4 sm:$0xff]  }
 0x749   :  { %11438 = vmatpush1.bf16.msra.mxu1 %v20160_v18  ;;  %11111 = vmatprep.subr.bf16.mxu0 %v20165_v26  ;;  %v20214_v18 = vld [vmem:[#allocation8 + $0x1000] ss:$52 sps:$4 sm:$0xff]   ;;  %v20219_v26 = vld [vmem:[#allocation8 + $0x9e4] ss:$52 sps:$4 sm:$0xff]  }
 0x74a   :  { %11439 = vmatprep.subr.bf16.mxu1 %v20168_v41  ;;  %v20222_v41 = vld [vmem:[#allocation8 + $0x106c] ss:$52 sps:$4 sm:$0xff]  }
 0x74c   :  { %11112 = vmatpush1.bf16.msra.mxu0 %v20163_v42  ;;  %v20217_v42 = vld [vmem:[#allocation8 + $0x9e0] ss:$52 sps:$4 sm:$0xff]  }
 0x74d   :  { %11440 = vmatpush1.bf16.msra.mxu1 %v20166_v46  ;;  %11122 = vmatprep.subr.bf16.mxu0 %v20171_v40  ;;  %v20220_v46 = vld [vmem:[#allocation8 + $0x1068] ss:$52 sps:$4 sm:$0xff]   ;;  %v20225_v40 = vld [vmem:[#allocation8 + $0xa4c] ss:$52 sps:$4 sm:$0xff]  }
 0x74e   :  { %11450 = vmatprep.subr.bf16.mxu1 %v20174_v52  ;;  %v20228_v52 = vld [vmem:[#allocation8 + $0x10d4] ss:$52 sps:$4 sm:$0xff]  }
 0x74f   :  { %11114 = vmatmul.mubr.bf16.vlgmr.msra.gmra.mrb[76].mxu0 %v22350_v2 }
 0x750   :  { %11442 = vmatmul.mubr.bf16.vlgmr.msra.gmra.mrb[44].mxu1 %v22390_v39  ;;  %11123 = vmatpush1.bf16.msra.mxu0 %v20169_v30  ;;  %v20223_v30 = vld [vmem:[#allocation8 + $0xa48] ss:$52 sps:$4 sm:$0xff]  }
 0x751   :  { %11154 = vmatprep.mubr.bf16.mxu0 %v22363_v27  ;;  %11451 = vmatpush1.bf16.msra.mxu1 %v20172_v37  ;;  %v20226_v37 = vld [vmem:[#allocation8 + $0x10d0] ss:$52 sps:$4 sm:$0xff]  }
 0x752   :  { %11482 = vmatprep.mubr.bf16.mxu1 %v22392_v48  ;;  %11124 = vmatprep.subr.bf16.mxu0 %v20177_v53  ;;  %v20231_v53 = vld [vmem:[#allocation8 + $0xab4] ss:$52 sps:$4 sm:$0xff]  }
 0x753   :  { %11452 = vmatprep.subr.bf16.mxu1 %v20180_v55  ;;  %v20234_v55 = vld [vmem:[#allocation8 + $0x113c] ss:$52 sps:$4 sm:$0xff]  }
 0x754   :  { %11125 = vmatpush1.bf16.msra.mxu0 %v20175_v29  ;;  %v20229_v29 = vld [vmem:[#allocation8 + $0xab0] ss:$52 sps:$4 sm:$0xff]  }
 0x755   :  { %11453 = vmatpush1.bf16.msra.mxu1 %v20178_v57  ;;  %11126 = vmatprep.subr.bf16.mxu0 %v20183_v58  ;;  %v20232_v57 = vld [vmem:[#allocation8 + $0x1138] ss:$52 sps:$4 sm:$0xff]   ;;  %v20237_v58 = vld [vmem:[#allocation8 + $0xb1c] ss:$52 sps:$4 sm:$0xff]  }
 0x756   :  { %11454 = vmatprep.subr.bf16.mxu1 %v20186_v45  ;;  %v20240_v45 = vld [vmem:[#allocation8 + $0x11a4] ss:$52 sps:$4 sm:$0xff]  }
 0x758   :  { %11127 = vmatpush1.bf16.msra.mxu0 %v20181_v6  ;;  %v20235_v6 = vld [vmem:[#allocation8 + $0xb18] ss:$52 sps:$4 sm:$0xff]  }
 0x759   :  { %11455 = vmatpush1.bf16.msra.mxu1 %v20184_v5  ;;  %11128 = vmatprep.subr.bf16.mxu0 %v20189_v7  ;;  %v20238_v5 = vld [vmem:[#allocation8 + $0x11a0] ss:$52 sps:$4 sm:$0xff]   ;;  %v20243_v7 = vld [vmem:[#allocation8 + $0xb84] ss:$52 sps:$4 sm:$0xff]  }
 0x75a   :  { %11456 = vmatprep.subr.bf16.mxu1 %v20192_v9  ;;  %v20246_v9 = vld [vmem:[#allocation8 + $0x120c] ss:$52 sps:$4 sm:$0xff]  }
 0x75c   :  { %11129 = vmatpush1.bf16.msra.mxu0 %v20187_v43  ;;  %v20241_v43 = vld [vmem:[#allocation8 + $0xb80] ss:$52 sps:$4 sm:$0xff]  }
 0x75d   :  { %11457 = vmatpush1.bf16.msra.mxu1 %v20190_v10  ;;  %11130 = vmatprep.subr.bf16.mxu0 %v20195_v13  ;;  %v20244_v10 = vld [vmem:[#allocation8 + $0x1208] ss:$52 sps:$4 sm:$0xff]   ;;  %v20249_v13 = vld [vmem:[#allocation8 + $0xbec] ss:$52 sps:$4 sm:$0xff]  }
 0x75e   :  { %11458 = vmatprep.subr.bf16.mxu1 %v20198_v54  ;;  %v20252_v54 = vld [vmem:[#allocation8 + $0x1274] ss:$52 sps:$4 sm:$0xff]  }
 0x760   :  { %11131 = vmatpush1.bf16.msra.mxu0 %v20193_v19  ;;  %v20247_v19 = vld [vmem:[#allocation8 + $0xbe8] ss:$52 sps:$4 sm:$0xff]  }
 0x761   :  { %11459 = vmatpush1.bf16.msra.mxu1 %v20196_v22  ;;  %11132 = vmatprep.subr.bf16.mxu0 %v20201_v23  ;;  %v20250_v22 = vld [vmem:[#allocation8 + $0x1270] ss:$52 sps:$4 sm:$0xff]   ;;  %v20255_v23 = vld [vmem:[#allocation8 + $0xc54] ss:$52 sps:$4 sm:$0xff]  }
 0x762   :  { %11460 = vmatprep.subr.bf16.mxu1 %v20204_v28  ;;  %v20258_v28 = vld [vmem:[#allocation8 + $0x12dc] ss:$52 sps:$4 sm:$0xff]  }
 0x764   :  { %11133 = vmatpush1.bf16.msra.mxu0 %v20199_v8  ;;  %v20253_v8 = vld [vmem:[#allocation8 + $0xc50] ss:$52 sps:$4 sm:$0xff]  }
 0x765   :  { %11461 = vmatpush1.bf16.msra.mxu1 %v20202_v31  ;;  %11134 = vmatprep.subr.bf16.mxu0 %v20207_v33  ;;  %v20256_v31 = vld [vmem:[#allocation8 + $0x12d8] ss:$52 sps:$4 sm:$0xff]   ;;  %v20261_v33 = vld [vmem:[#allocation8 + $0xcbc] ss:$52 sps:$4 sm:$0xff]  }
 0x766   :  { %11462 = vmatprep.subr.bf16.mxu1 %v20210_v35  ;;  %v20264_v35 = vld [vmem:[#allocation8 + $0x1344] ss:$52 sps:$4 sm:$0xff]  }
 0x768   :  { %11135 = vmatpush1.bf16.msra.mxu0 %v20205_v0  ;;  %v20259_v0 = vld [vmem:[#allocation8 + $0xcb8] ss:$52 sps:$4 sm:$0xff]  }
 0x769   :  { %11463 = vmatpush1.bf16.msra.mxu1 %v20208_v24  ;;  %11136 = vmatprep.subr.bf16.mxu0 %v20213_v36  ;;  %v20262_v24 = vld [vmem:[#allocation8 + $0x1340] ss:$52 sps:$4 sm:$0xff]   ;;  %v20267_v36 = vld [vmem:[#allocation8 + $0xd24] ss:$52 sps:$4 sm:$0xff]  }
 0x76a   :  { %11464 = vmatprep.subr.bf16.mxu1 %v20216_v38  ;;  %v20270_v38 = vld [vmem:[#allocation8 + $0x13ac] ss:$52 sps:$4 sm:$0xff]  }
 0x76c   :  { %11137 = vmatpush1.bf16.msra.mxu0 %v20211_v59  ;;  %v20265_v59 = vld [vmem:[#allocation8 + $0xd20] ss:$52 sps:$4 sm:$0xff]  }
 0x76d   :  { %11465 = vmatpush1.bf16.msra.mxu1 %v20214_v18  ;;  %11138 = vmatprep.subr.bf16.mxu0 %v20219_v26  ;;  %v20268_v18 = vld [vmem:[#allocation8 + $0x13a8] ss:$52 sps:$4 sm:$0xff]   ;;  %v20273_v26 = vld [vmem:[#allocation8 + $0xd8c] ss:$52 sps:$4 sm:$0xff]  }
 0x76e   :  { %11466 = vmatprep.subr.bf16.mxu1 %v20222_v41  ;;  %v20276_v41 = vld [vmem:[#allocation8 + $0x1414] ss:$52 sps:$4 sm:$0xff]  }
 0x770   :  { %11139 = vmatpush1.bf16.msra.mxu0 %v20217_v42  ;;  %v20271_v42 = vld [vmem:[#allocation8 + $0xd88] ss:$52 sps:$4 sm:$0xff]  }
 0x771   :  { %11467 = vmatpush1.bf16.msra.mxu1 %v20220_v46  ;;  %11140 = vmatprep.subr.bf16.mxu0 %v20225_v40  ;;  %v20274_v46 = vld [vmem:[#allocation8 + $0x1410] ss:$52 sps:$4 sm:$0xff]   ;;  %v20279_v40 = vld [vmem:[#allocation8 + $0xdf4] ss:$52 sps:$4 sm:$0xff]  }
 0x772   :  { %11468 = vmatprep.subr.bf16.mxu1 %v20228_v52  ;;  %v20282_v52 = vld [vmem:[#allocation8 + $0x147c] ss:$52 sps:$4 sm:$0xff]  }
 0x774   :  { %11141 = vmatpush1.bf16.msra.mxu0 %v20223_v30  ;;  %v20277_v30 = vld [vmem:[#allocation8 + $0xdf0] ss:$52 sps:$4 sm:$0xff]  }
 0x775   :  { %11469 = vmatpush1.bf16.msra.mxu1 %v20226_v37  ;;  %11142 = vmatprep.subr.bf16.mxu0 %v20231_v53  ;;  %v20280_v37 = vld [vmem:[#allocation8 + $0x1478] ss:$52 sps:$4 sm:$0xff]   ;;  %v20285_v53 = vld [vmem:[#allocation8 + $0xe5c] ss:$52 sps:$4 sm:$0xff]  }
 0x776   :  { %11470 = vmatprep.subr.bf16.mxu1 %v20234_v55  ;;  %v20288_v55 = vld [vmem:[#allocation8 + $0x14e4] ss:$52 sps:$4 sm:$0xff]  }
 0x778   :  { %11143 = vmatpush1.bf16.msra.mxu0 %v20229_v29  ;;  %v20283_v29 = vld [vmem:[#allocation8 + $0xe58] ss:$52 sps:$4 sm:$0xff]  }
 0x779   :  { %11471 = vmatpush1.bf16.msra.mxu1 %v20232_v57  ;;  %11144 = vmatprep.subr.bf16.mxu0 %v20237_v58  ;;  %v20286_v57 = vld [vmem:[#allocation8 + $0x14e0] ss:$52 sps:$4 sm:$0xff]   ;;  %v20291_v58 = vld [vmem:[#allocation8 + $0xec4] ss:$52 sps:$4 sm:$0xff]  }
 0x77a   :  { %11472 = vmatprep.subr.bf16.mxu1 %v20240_v45  ;;  %v20294_v45 = vld [vmem:[#allocation8 + $0x154c] ss:$52 sps:$4 sm:$0xff]  }
 0x77c   :  { %11145 = vmatpush1.bf16.msra.mxu0 %v20235_v6  ;;  %v20289_v6 = vld [vmem:[#allocation8 + $0xec0] ss:$52 sps:$4 sm:$0xff]  }
 0x77d   :  { %11473 = vmatpush1.bf16.msra.mxu1 %v20238_v5  ;;  %11146 = vmatprep.subr.bf16.mxu0 %v20243_v7  ;;  %v20292_v5 = vld [vmem:[#allocation8 + $0x1548] ss:$52 sps:$4 sm:$0xff]   ;;  %v20297_v7 = vld [vmem:[#allocation8 + $0xf2c] ss:$52 sps:$4 sm:$0xff]  }
 0x77e   :  { %11474 = vmatprep.subr.bf16.mxu1 %v20246_v9  ;;  %v20300_v9 = vld [vmem:[#allocation8 + $0x15b4] ss:$52 sps:$4 sm:$0xff]  }
 0x780   :  { %11147 = vmatpush1.bf16.msra.mxu0 %v20241_v43  ;;  %v20295_v43 = vld [vmem:[#allocation8 + $0xf28] ss:$52 sps:$4 sm:$0xff]  }
 0x781   :  { %11475 = vmatpush1.bf16.msra.mxu1 %v20244_v10  ;;  %11148 = vmatprep.subr.bf16.mxu0 %v20249_v13  ;;  %v20298_v10 = vld [vmem:[#allocation8 + $0x15b0] ss:$52 sps:$4 sm:$0xff]   ;;  %v20303_v13 = vld [vmem:[#allocation8 + $0xf94] ss:$52 sps:$4 sm:$0xff]  }
 0x782   :  { %11476 = vmatprep.subr.bf16.mxu1 %v20252_v54  ;;  %v20306_v54 = vld [vmem:[#allocation8 + $0x161c] ss:$52 sps:$4 sm:$0xff]  }
 0x784   :  { %11149 = vmatpush1.bf16.msra.mxu0 %v20247_v19 }
 0x785   :  { %11477 = vmatpush1.bf16.msra.mxu1 %v20250_v22  ;;  %11150 = vmatprep.subr.bf16.mxu0 %v20255_v23  ;;  %v20301_v23 = vld [vmem:[#allocation8 + $0xf90] ss:$52 sps:$4 sm:$0xff]  }
 0x786   :  { %11478 = vmatprep.subr.bf16.mxu1 %v20258_v28 }
 0x788   :  { %11151 = vmatpush1.bf16.msra.mxu0 %v20253_v8  ;;  %v20304_v8 = vld [vmem:[#allocation8 + $0x1618] ss:$52 sps:$4 sm:$0xff]  }
 0x789   :  { %11479 = vmatpush1.bf16.msra.mxu1 %v20256_v31  ;;  %11152 = vmatprep.subr.bf16.mxu0 %v20261_v33  ;;  %v20309_v31 = vld [vmem:[#allocation8 + $0xffc] ss:$52 sps:$4 sm:$0xff]  }
 0x78a   :  { %11480 = vmatprep.subr.bf16.mxu1 %v20264_v35  ;;  %v20312_v35 = vld [vmem:[#allocation8 + $0x1684] ss:$52 sps:$4 sm:$0xff]  }
 0x78c   :  { %11153 = vmatpush1.bf16.msra.mxu0 %v20259_v0  ;;  %v20307_v0 = vld [vmem:[#allocation8 + $0xff8] ss:$52 sps:$4 sm:$0xff]  }
 0x78d   :  { %11481 = vmatpush1.bf16.msra.mxu1 %v20262_v24  ;;  %11163 = vmatprep.subr.bf16.mxu0 %v20267_v36  ;;  %v20310_v24 = vld [vmem:[#allocation8 + $0x1680] ss:$52 sps:$4 sm:$0xff]   ;;  %v20315_v36 = vld [vmem:[#allocation8 + $0x1064] ss:$52 sps:$4 sm:$0xff]  }
 0x78e   :  { %11491 = vmatprep.subr.bf16.mxu1 %v20270_v38  ;;  %v20318_v38 = vld [vmem:[#allocation8 + $0x16ec] ss:$52 sps:$4 sm:$0xff]  }
 0x78f   :  { %11155 = vmatmul.mubr.bf16.vlgmr.msra.gmra.mrb[76].mxu0 %v22390_v39 }
 0x790   :  { %11483 = vmatmul.mubr.bf16.vlgmr.msra.gmra.mrb[44].mxu1 %v22423_v1  ;;  %11164 = vmatpush1.bf16.msra.mxu0 %v20265_v59  ;;  %v20313_v59 = vld [vmem:[#allocation8 + $0x1060] ss:$52 sps:$4 sm:$0xff]  }
 0x791   :  { %11195 = vmatprep.mubr.bf16.mxu0 %v22392_v48  ;;  %11492 = vmatpush1.bf16.msra.mxu1 %v20268_v18  ;;  %v20316_v18 = vld [vmem:[#allocation8 + $0x16e8] ss:$52 sps:$4 sm:$0xff]  }
 0x792   :  { %11523 = vmatprep.mubr.bf16.mxu1 %v22425_v4  ;;  %11165 = vmatprep.subr.bf16.mxu0 %v20273_v26  ;;  %v20321_v26 = vld [vmem:[#allocation8 + $0x10cc] ss:$52 sps:$4 sm:$0xff]  }
 0x793   :  { %11493 = vmatprep.subr.bf16.mxu1 %v20276_v41  ;;  %v20324_v41 = vld [vmem:[#allocation8 + $0x1754] ss:$52 sps:$4 sm:$0xff]  }
 0x794   :  { %11166 = vmatpush1.bf16.msra.mxu0 %v20271_v42  ;;  %v20319_v42 = vld [vmem:[#allocation8 + $0x10c8] ss:$52 sps:$4 sm:$0xff]  }
 0x795   :  { %11494 = vmatpush1.bf16.msra.mxu1 %v20274_v46  ;;  %11167 = vmatprep.subr.bf16.mxu0 %v20279_v40  ;;  %v20322_v46 = vld [vmem:[#allocation8 + $0x1750] ss:$52 sps:$4 sm:$0xff]   ;;  %v20327_v40 = vld [vmem:[#allocation8 + $0x1134] ss:$52 sps:$4 sm:$0xff]  }
 0x796   :  { %11495 = vmatprep.subr.bf16.mxu1 %v20282_v52  ;;  %v20330_v52 = vld [vmem:[#allocation8 + $0x17bc] ss:$52 sps:$4 sm:$0xff]  }
 0x798   :  { %11168 = vmatpush1.bf16.msra.mxu0 %v20277_v30  ;;  %v20325_v30 = vld [vmem:[#allocation8 + $0x1130] ss:$52 sps:$4 sm:$0xff]  }
 0x799   :  { %11496 = vmatpush1.bf16.msra.mxu1 %v20280_v37  ;;  %11169 = vmatprep.subr.bf16.mxu0 %v20285_v53  ;;  %v20328_v37 = vld [vmem:[#allocation8 + $0x17b8] ss:$52 sps:$4 sm:$0xff]   ;;  %v20333_v53 = vld [vmem:[#allocation8 + $0x119c] ss:$52 sps:$4 sm:$0xff]  }
 0x79a   :  { %11497 = vmatprep.subr.bf16.mxu1 %v20288_v55  ;;  %v20336_v55 = vld [vmem:[#allocation8 + $0x1824] ss:$52 sps:$4 sm:$0xff]  }
 0x79c   :  { %11170 = vmatpush1.bf16.msra.mxu0 %v20283_v29  ;;  %v20331_v29 = vld [vmem:[#allocation8 + $0x1198] ss:$52 sps:$4 sm:$0xff]  }
 0x79d   :  { %11498 = vmatpush1.bf16.msra.mxu1 %v20286_v57  ;;  %11171 = vmatprep.subr.bf16.mxu0 %v20291_v58  ;;  %v20334_v57 = vld [vmem:[#allocation8 + $0x1820] ss:$52 sps:$4 sm:$0xff]   ;;  %v20339_v58 = vld [vmem:[#allocation8 + $0x1204] ss:$52 sps:$4 sm:$0xff]  }
 0x79e   :  { %11499 = vmatprep.subr.bf16.mxu1 %v20294_v45  ;;  %v20342_v45 = vld [vmem:[#allocation8 + $0x188c] ss:$52 sps:$4 sm:$0xff]  }
 0x7a0   :  { %11172 = vmatpush1.bf16.msra.mxu0 %v20289_v6  ;;  %v20337_v6 = vld [vmem:[#allocation8 + $0x1200] ss:$52 sps:$4 sm:$0xff]  }
 0x7a1   :  { %11500 = vmatpush1.bf16.msra.mxu1 %v20292_v5  ;;  %11173 = vmatprep.subr.bf16.mxu0 %v20297_v7  ;;  %v20340_v5 = vld [vmem:[#allocation8 + $0x1888] ss:$52 sps:$4 sm:$0xff]   ;;  %v20345_v7 = vld [vmem:[#allocation8 + $0x126c] ss:$52 sps:$4 sm:$0xff]  }
 0x7a2   :  { %11501 = vmatprep.subr.bf16.mxu1 %v20300_v9  ;;  %v20348_v9 = vld [vmem:[#allocation8 + $0x18f4] ss:$52 sps:$4 sm:$0xff]  }
 0x7a3   :  { %v22527_v19 = vpop.f32.mrb[40].mxu1 }
 0x7a4   :  { %v22529_v22 = vpop.f32.mrb[41].mxu1  ;;  %11174 = vmatpush1.bf16.msra.mxu0 %v20295_v43  ;;  %v20343_v43 = vld [vmem:[#allocation8 + $0x1268] ss:$52 sps:$4 sm:$0xff]  }
 0x7a5   :  { %v11078_v28 = vpop.f32.mrb[42].mxu1  ;;  %11502 = vmatpush1.bf16.msra.mxu1 %v20298_v10  ;;  %11175 = vmatprep.subr.bf16.mxu0 %v20303_v13  ;;  %v20346_v10 = vld [vmem:[#allocation8 + $0x18f0] ss:$52 sps:$4 sm:$0xff]   ;;  %v20351_v13 = vld [vmem:[#allocation8 + $0x12d4] ss:$52 sps:$4 sm:$0xff]  }
 0x7a6   :  { %v11079_v33 = vpop.f32.mrb[43].mxu1  ;;  %11503 = vmatprep.subr.bf16.mxu1 %v20306_v54  ;;  %v20354_v54 = vld [vmem:[#allocation8 + $0x195c] ss:$52 sps:$4 sm:$0xff]   ;;  %v20352_v28 = vld [vmem:[#allocation8 + $0x1958] ss:$52 sps:$4 sm:$0xff]  }
 0x7a7   :  { %v20355_v33 = vld [vmem:[#allocation8 + $0x1338] ss:$52 sps:$4 sm:$0xff]  }
 0x7a8   :  { %11176 = vmatpush1.bf16.msra.mxu0 %v20301_v23  ;;  %v20349_v23 = vld [vmem:[#allocation8 + $0x12d0] ss:$52 sps:$4 sm:$0xff]  }
 0x7a9   :  { %11504 = vmatpush1.bf16.msra.mxu1 %v20304_v8  ;;  %11177 = vmatprep.subr.bf16.mxu0 %v20309_v31  ;;  %v20357_v8 = vld [vmem:[#allocation8 + $0x133c] ss:$52 sps:$4 sm:$0xff]   ;;  %v20360_v31 = vld [vmem:[#allocation8 + $0x19c4] ss:$52 sps:$4 sm:$0xff]  }
 0x7aa   :  { %11505 = vmatprep.subr.bf16.mxu1 %v20312_v35  ;;  %v20358_v35 = vld [vmem:[#allocation8 + $0x19c0] ss:$52 sps:$4 sm:$0xff]  }
 0x7ac   :  { %11178 = vmatpush1.bf16.msra.mxu0 %v20307_v0  ;;  %v20363_v0 = vld [vmem:[#allocation8 + $0x13a4] ss:$52 sps:$4 sm:$0xff]  }
 0x7ad   :  { %11506 = vmatpush1.bf16.msra.mxu1 %v20310_v24  ;;  %11179 = vmatprep.subr.bf16.mxu0 %v20315_v36  ;;  %v20366_v24 = vld [vmem:[#allocation8 + $0x1a2c] ss:$52 sps:$4 sm:$0xff]  }
 0x7ae   :  { %11507 = vmatprep.subr.bf16.mxu1 %v20318_v38  ;;  %v20361_v36 = vld [vmem:[#allocation8 + $0x13a0] ss:$52 sps:$4 sm:$0xff]   ;;  %v20364_v38 = vld [vmem:[#allocation8 + $0x1a28] ss:$52 sps:$4 sm:$0xff]  }
 0x7b0   :  { %11180 = vmatpush1.bf16.msra.mxu0 %v20313_v59  ;;  %v20369_v59 = vld [vmem:[#allocation8 + $0x140c] ss:$52 sps:$4 sm:$0xff]  }
 0x7b1   :  { %11508 = vmatpush1.bf16.msra.mxu1 %v20316_v18  ;;  %11181 = vmatprep.subr.bf16.mxu0 %v20321_v26  ;;  %v20372_v18 = vld [vmem:[#allocation8 + $0x1a94] ss:$52 sps:$4 sm:$0xff]  }
 0x7b2   :  { %11509 = vmatprep.subr.bf16.mxu1 %v20324_v41  ;;  %v20367_v26 = vld [vmem:[#allocation8 + $0x1408] ss:$52 sps:$4 sm:$0xff]   ;;  %v20370_v41 = vld [vmem:[#allocation8 + $0x1a90] ss:$52 sps:$4 sm:$0xff]  }
 0x7b4   :  { %11182 = vmatpush1.bf16.msra.mxu0 %v20319_v42  ;;  %v20375_v42 = vld [vmem:[#allocation8 + $0x1474] ss:$52 sps:$4 sm:$0xff]  }
 0x7b5   :  { %11510 = vmatpush1.bf16.msra.mxu1 %v20322_v46  ;;  %11183 = vmatprep.subr.bf16.mxu0 %v20327_v40  ;;  %v20378_v46 = vld [vmem:[#allocation8 + $0x1afc] ss:$52 sps:$4 sm:$0xff]  }
 0x7b6   :  { %11511 = vmatprep.subr.bf16.mxu1 %v20330_v52  ;;  %v20373_v40 = vld [vmem:[#allocation8 + $0x1470] ss:$52 sps:$4 sm:$0xff]   ;;  %v20376_v52 = vld [vmem:[#allocation8 + $0x1af8] ss:$52 sps:$4 sm:$0xff]  }
 0x7b8   :  { %11184 = vmatpush1.bf16.msra.mxu0 %v20325_v30  ;;  %v20381_v30 = vld [vmem:[#allocation8 + $0x14dc] ss:$52 sps:$4 sm:$0xff]  }
 0x7b9   :  { %11512 = vmatpush1.bf16.msra.mxu1 %v20328_v37  ;;  %11185 = vmatprep.subr.bf16.mxu0 %v20333_v53  ;;  %v20384_v37 = vld [vmem:[#allocation8 + $0x1b64] ss:$52 sps:$4 sm:$0xff]  }
 0x7ba   :  { %11513 = vmatprep.subr.bf16.mxu1 %v20336_v55  ;;  %v20379_v53 = vld [vmem:[#allocation8 + $0x14d8] ss:$52 sps:$4 sm:$0xff]   ;;  %v20382_v55 = vld [vmem:[#allocation8 + $0x1b60] ss:$52 sps:$4 sm:$0xff]  }
 0x7bc   :  { %11186 = vmatpush1.bf16.msra.mxu0 %v20331_v29  ;;  %v20387_v29 = vld [vmem:[#allocation8 + $0x1544] ss:$52 sps:$4 sm:$0xff]  }
 0x7bd   :  { %11514 = vmatpush1.bf16.msra.mxu1 %v20334_v57  ;;  %11187 = vmatprep.subr.bf16.mxu0 %v20339_v58  ;;  %v20390_v57 = vld [vmem:[#allocation8 + $0x1bcc] ss:$52 sps:$4 sm:$0xff]  }
 0x7be   :  { %11515 = vmatprep.subr.bf16.mxu1 %v20342_v45  ;;  %v20385_v58 = vld [vmem:[#allocation8 + $0x1540] ss:$52 sps:$4 sm:$0xff]   ;;  %v20388_v45 = vld [vmem:[#allocation8 + $0x1bc8] ss:$52 sps:$4 sm:$0xff]  }
 0x7c0   :  { %11188 = vmatpush1.bf16.msra.mxu0 %v20337_v6  ;;  %v20393_v6 = vld [vmem:[#allocation8 + $0x15ac] ss:$52 sps:$4 sm:$0xff]  }
 0x7c1   :  { %11516 = vmatpush1.bf16.msra.mxu1 %v20340_v5  ;;  %11189 = vmatprep.subr.bf16.mxu0 %v20345_v7  ;;  %v20396_v5 = vld [vmem:[#allocation8 + $0x1c34] ss:$52 sps:$4 sm:$0xff]  }
 0x7c2   :  { %11517 = vmatprep.subr.bf16.mxu1 %v20348_v9  ;;  %v20391_v7 = vld [vmem:[#allocation8 + $0x15a8] ss:$52 sps:$4 sm:$0xff]   ;;  %v20394_v9 = vld [vmem:[#allocation8 + $0x1c30] ss:$52 sps:$4 sm:$0xff]  }
 0x7c4   :  { %11190 = vmatpush1.bf16.msra.mxu0 %v20343_v43  ;;  %v20399_v43 = vld [vmem:[#allocation8 + $0x1614] ss:$52 sps:$4 sm:$0xff]  }
 0x7c5   :  { %11518 = vmatpush1.bf16.msra.mxu1 %v20346_v10  ;;  %11191 = vmatprep.subr.bf16.mxu0 %v20351_v13  ;;  %v20402_v13 = vld [vmem:[#allocation8 + $0x1c9c] ss:$52 sps:$4 sm:$0xff]  }
 0x7c6   :  { %11519 = vmatprep.subr.bf16.mxu1 %v20354_v54 }
 0x7c8   :  { %11192 = vmatpush1.bf16.msra.mxu0 %v20349_v23 }
 0x7c9   :  { %11520 = vmatpush1.bf16.msra.mxu1 %v20352_v28  ;;  %11193 = vmatprep.subr.bf16.mxu0 %v20357_v8  ;;  %v20397_v28 = vld [vmem:[#allocation8 + $0x1610] ss:$52 sps:$4 sm:$0xff]  }
 0x7ca   :  { %11521 = vmatprep.subr.bf16.mxu1 %v20360_v31  ;;  %v20400_v31 = vld [vmem:[#allocation8 + $0x1c98] ss:$52 sps:$4 sm:$0xff]  }
 0x7cc   :  { %11194 = vmatpush1.bf16.msra.mxu0 %v20355_v33  ;;  %v20405_v33 = vld [vmem:[#allocation8 + $0x167c] ss:$52 sps:$4 sm:$0xff]  }
 0x7cd   :  { %11522 = vmatpush1.bf16.msra.mxu1 %v20358_v35  ;;  %11204 = vmatprep.subr.bf16.mxu0 %v20363_v0  ;;  %v20408_v35 = vld [vmem:[#allocation8 + $0x1d04] ss:$52 sps:$4 sm:$0xff]  }
 0x7ce   :  { %11532 = vmatprep.subr.bf16.mxu1 %v20366_v24  ;;  %v20403_v0 = vld [vmem:[#allocation8 + $0x1678] ss:$52 sps:$4 sm:$0xff]   ;;  %v20406_v24 = vld [vmem:[#allocation8 + $0x1d00] ss:$52 sps:$4 sm:$0xff]  }
 0x7cf   :  { %11196 = vmatmul.mubr.bf16.vlgmr.msra.gmra.mrb[76].mxu0 %v22423_v1 }
 0x7d0   :  { %11524 = vmatmul.mubr.bf16.vlgmr.msra.gmra.mrb[44].mxu1 %v22439_v16  ;;  %11205 = vmatpush1.bf16.msra.mxu0 %v20361_v36  ;;  %v20411_v36 = vld [vmem:[#allocation8 + $0x16e4] ss:$52 sps:$4 sm:$0xff]  }
 0x7d1   :  { %11236 = vmatprep.mubr.bf16.mxu0 %v22425_v4  ;;  %11533 = vmatpush1.bf16.msra.mxu1 %v20364_v38  ;;  %v20414_v38 = vld [vmem:[#allocation8 + $0x1d6c] ss:$52 sps:$4 sm:$0xff]  }
 0x7d2   :  { %11564 = vmatprep.mubr.bf16.mxu1 %v22441_v12  ;;  %11206 = vmatprep.subr.bf16.mxu0 %v20369_v59  ;;  %v20409_v59 = vld [vmem:[#allocation8 + $0x16e0] ss:$52 sps:$4 sm:$0xff]  }
 0x7d3   :  { %11534 = vmatprep.subr.bf16.mxu1 %v20372_v18  ;;  %v20412_v18 = vld [vmem:[#allocation8 + $0x1d68] ss:$52 sps:$4 sm:$0xff]  }
 0x7d4   :  { %11207 = vmatpush1.bf16.msra.mxu0 %v20367_v26  ;;  %v20417_v26 = vld [vmem:[#allocation8 + $0x174c] ss:$52 sps:$4 sm:$0xff]  }
 0x7d5   :  { %11535 = vmatpush1.bf16.msra.mxu1 %v20370_v41  ;;  %11208 = vmatprep.subr.bf16.mxu0 %v20375_v42  ;;  %v20420_v41 = vld [vmem:[#allocation8 + $0x1dd4] ss:$52 sps:$4 sm:$0xff]  }
 0x7d6   :  { %11536 = vmatprep.subr.bf16.mxu1 %v20378_v46  ;;  %v20415_v42 = vld [vmem:[#allocation8 + $0x1748] ss:$52 sps:$4 sm:$0xff]   ;;  %v20418_v46 = vld [vmem:[#allocation8 + $0x1dd0] ss:$52 sps:$4 sm:$0xff]  }
 0x7d8   :  { %11209 = vmatpush1.bf16.msra.mxu0 %v20373_v40  ;;  %v20423_v40 = vld [vmem:[#allocation8 + $0x17b4] ss:$52 sps:$4 sm:$0xff]  }
 0x7d9   :  { %11537 = vmatpush1.bf16.msra.mxu1 %v20376_v52  ;;  %11210 = vmatprep.subr.bf16.mxu0 %v20381_v30  ;;  %v20426_v52 = vld [vmem:[#allocation8 + $0x1e3c] ss:$52 sps:$4 sm:$0xff]  }
 0x7da   :  { %11538 = vmatprep.subr.bf16.mxu1 %v20384_v37  ;;  %v20421_v30 = vld [vmem:[#allocation8 + $0x17b0] ss:$52 sps:$4 sm:$0xff]   ;;  %v20424_v37 = vld [vmem:[#allocation8 + $0x1e38] ss:$52 sps:$4 sm:$0xff]  }
 0x7dc   :  { %11211 = vmatpush1.bf16.msra.mxu0 %v20379_v53  ;;  %v20429_v53 = vld [vmem:[#allocation8 + $0x181c] ss:$52 sps:$4 sm:$0xff]  }
 0x7dd   :  { %11539 = vmatpush1.bf16.msra.mxu1 %v20382_v55  ;;  %11212 = vmatprep.subr.bf16.mxu0 %v20387_v29  ;;  %v20432_v55 = vld [vmem:[#allocation8 + $0x1ea4] ss:$52 sps:$4 sm:$0xff]  }
 0x7de   :  { %11540 = vmatprep.subr.bf16.mxu1 %v20390_v57  ;;  %v20427_v29 = vld [vmem:[#allocation8 + $0x1818] ss:$52 sps:$4 sm:$0xff]   ;;  %v20430_v57 = vld [vmem:[#allocation8 + $0x1ea0] ss:$52 sps:$4 sm:$0xff]  }
 0x7e0   :  { %11213 = vmatpush1.bf16.msra.mxu0 %v20385_v58  ;;  %v20435_v58 = vld [vmem:[#allocation8 + $0x1884] ss:$52 sps:$4 sm:$0xff]  }
 0x7e1   :  { %11541 = vmatpush1.bf16.msra.mxu1 %v20388_v45  ;;  %11214 = vmatprep.subr.bf16.mxu0 %v20393_v6  ;;  %v20438_v45 = vld [vmem:[#allocation8 + $0x1f0c] ss:$52 sps:$4 sm:$0xff]  }
 0x7e2   :  { %v22535_v10 = vpop.f32.mrb[72].mxu0  ;;  %11542 = vmatprep.subr.bf16.mxu1 %v20396_v5  ;;  %v20433_v6 = vld [vmem:[#allocation8 + $0x1880] ss:$52 sps:$4 sm:$0xff]   ;;  %v20436_v5 = vld [vmem:[#allocation8 + $0x1f08] ss:$52 sps:$4 sm:$0xff]  }
 0x7e3   :  { %v22537_v54 = vpop.f32.mrb[73].mxu0 }
 0x7e4   :  { %v10791_v23 = vpop.f32.mrb[74].mxu0  ;;  %11215 = vmatpush1.bf16.msra.mxu0 %v20391_v7  ;;  %v20441_v7 = vld [vmem:[#allocation8 + $0x18ec] ss:$52 sps:$4 sm:$0xff]  }
 0x7e5   :  { %11543 = vmatpush1.bf16.msra.mxu1 %v20394_v9  ;;  %v10792_v8 = vpop.f32.mrb[75].mxu0  ;;  %11216 = vmatprep.subr.bf16.mxu0 %v20399_v43  ;;  %v20444_v9 = vld [vmem:[#allocation8 + $0x1f74] ss:$52 sps:$4 sm:$0xff]  }
 0x7e6   :  { %11544 = vmatprep.subr.bf16.mxu1 %v20402_v13  ;;  %v20439_v43 = vld [vmem:[#allocation8 + $0x18e8] ss:$52 sps:$4 sm:$0xff]   ;;  %v20442_v13 = vld [vmem:[#allocation8 + $0x1f70] ss:$52 sps:$4 sm:$0xff]  }
 0x7e7   :  { %v20447_v23 = vld [vmem:[#allocation8 + $0x1954] ss:$52 sps:$4 sm:$0xff]   ;;  %v20445_v8 = vld [vmem:[#allocation8 + $0x1950] ss:$52 sps:$4 sm:$0xff]  }
 0x7e8   :  { %11217 = vmatpush1.bf16.msra.mxu0 %v20397_v28  ;;  %v20450_v28 = vld [vmem:[#allocation8 + $0x1fdc] ss:$52 sps:$4 sm:$0xff]  }
 0x7e9   :  { %11545 = vmatpush1.bf16.msra.mxu1 %v20400_v31  ;;  %11218 = vmatprep.subr.bf16.mxu0 %v20405_v33  ;;  %v20448_v31 = vld [vmem:[#allocation8 + $0x1fd8] ss:$52 sps:$4 sm:$0xff]   ;;  %v20453_v33 = vld [vmem:[#allocation8 + $0x19bc] ss:$52 sps:$4 sm:$0xff]  }
 0x7ea   :  { %11546 = vmatprep.subr.bf16.mxu1 %v20408_v35  ;;  %v20456_v35 = vld [vmem:[#allocation8 + $0x2044] ss:$52 sps:$4 sm:$0xff]  }
 0x7ec   :  { %11219 = vmatpush1.bf16.msra.mxu0 %v20403_v0  ;;  %v20451_v0 = vld [vmem:[#allocation8 + $0x19b8] ss:$52 sps:$4 sm:$0xff]  }
 0x7ed   :  { %11547 = vmatpush1.bf16.msra.mxu1 %v20406_v24  ;;  %11220 = vmatprep.subr.bf16.mxu0 %v20411_v36  ;;  %v20454_v24 = vld [vmem:[#allocation8 + $0x2040] ss:$52 sps:$4 sm:$0xff]   ;;  %v20459_v36 = vld [vmem:[#allocation8 + $0x1a24] ss:$52 sps:$4 sm:$0xff]  }
 0x7ee   :  { %11548 = vmatprep.subr.bf16.mxu1 %v20414_v38  ;;  %v20462_v38 = vld [vmem:[#allocation8 + $0x20ac] ss:$52 sps:$4 sm:$0xff]  }
 0x7f0   :  { %11221 = vmatpush1.bf16.msra.mxu0 %v20409_v59  ;;  %v20457_v59 = vld [vmem:[#allocation8 + $0x1a20] ss:$52 sps:$4 sm:$0xff]  }
 0x7f1   :  { %11549 = vmatpush1.bf16.msra.mxu1 %v20412_v18  ;;  %11222 = vmatprep.subr.bf16.mxu0 %v20417_v26  ;;  %v20460_v18 = vld [vmem:[#allocation8 + $0x20a8] ss:$52 sps:$4 sm:$0xff]   ;;  %v20465_v26 = vld [vmem:[#allocation8 + $0x1a8c] ss:$52 sps:$4 sm:$0xff]  }
 0x7f2   :  { %11550 = vmatprep.subr.bf16.mxu1 %v20420_v41  ;;  %v20468_v41 = vld [vmem:[#allocation8 + $0x2114] ss:$52 sps:$4 sm:$0xff]  }
 0x7f4   :  { %11223 = vmatpush1.bf16.msra.mxu0 %v20415_v42  ;;  %v20463_v42 = vld [vmem:[#allocation8 + $0x1a88] ss:$52 sps:$4 sm:$0xff]  }
 0x7f5   :  { %11551 = vmatpush1.bf16.msra.mxu1 %v20418_v46  ;;  %11224 = vmatprep.subr.bf16.mxu0 %v20423_v40  ;;  %v20466_v46 = vld [vmem:[#allocation8 + $0x2110] ss:$52 sps:$4 sm:$0xff]   ;;  %v20471_v40 = vld [vmem:[#allocation8 + $0x1af4] ss:$52 sps:$4 sm:$0xff]  }
 0x7f6   :  { %11552 = vmatprep.subr.bf16.mxu1 %v20426_v52  ;;  %v20474_v52 = vld [vmem:[#allocation8 + $0x217c] ss:$52 sps:$4 sm:$0xff]  }
 0x7f8   :  { %11225 = vmatpush1.bf16.msra.mxu0 %v20421_v30  ;;  %v20469_v30 = vld [vmem:[#allocation8 + $0x1af0] ss:$52 sps:$4 sm:$0xff]  }
 0x7f9   :  { %11553 = vmatpush1.bf16.msra.mxu1 %v20424_v37  ;;  %11226 = vmatprep.subr.bf16.mxu0 %v20429_v53  ;;  %v20472_v37 = vld [vmem:[#allocation8 + $0x2178] ss:$52 sps:$4 sm:$0xff]   ;;  %v20477_v53 = vld [vmem:[#allocation8 + $0x1b5c] ss:$52 sps:$4 sm:$0xff]  }
 0x7fa   :  { %11554 = vmatprep.subr.bf16.mxu1 %v20432_v55  ;;  %v20480_v55 = vld [vmem:[#allocation8 + $0x21e4] ss:$52 sps:$4 sm:$0xff]  }
 0x7fc   :  { %11227 = vmatpush1.bf16.msra.mxu0 %v20427_v29  ;;  %v20475_v29 = vld [vmem:[#allocation8 + $0x1b58] ss:$52 sps:$4 sm:$0xff]  }
 0x7fd   :  { %11555 = vmatpush1.bf16.msra.mxu1 %v20430_v57  ;;  %11228 = vmatprep.subr.bf16.mxu0 %v20435_v58  ;;  %v20478_v57 = vld [vmem:[#allocation8 + $0x21e0] ss:$52 sps:$4 sm:$0xff]   ;;  %v20483_v58 = vld [vmem:[#allocation8 + $0x1bc4] ss:$52 sps:$4 sm:$0xff]  }
 0x7fe   :  { %11556 = vmatprep.subr.bf16.mxu1 %v20438_v45  ;;  %v20486_v45 = vld [vmem:[#allocation8 + $0x224c] ss:$52 sps:$4 sm:$0xff]  }
 0x800   :  { %11229 = vmatpush1.bf16.msra.mxu0 %v20433_v6  ;;  %v20481_v6 = vld [vmem:[#allocation8 + $0x1bc0] ss:$52 sps:$4 sm:$0xff]  }
 0x801   :  { %11557 = vmatpush1.bf16.msra.mxu1 %v20436_v5  ;;  %11230 = vmatprep.subr.bf16.mxu0 %v20441_v7  ;;  %v20484_v5 = vld [vmem:[#allocation8 + $0x2248] ss:$52 sps:$4 sm:$0xff]   ;;  %v20489_v7 = vld [vmem:[#allocation8 + $0x1c2c] ss:$52 sps:$4 sm:$0xff]  }
 0x802   :  { %11558 = vmatprep.subr.bf16.mxu1 %v20444_v9  ;;  %v20492_v9 = vld [vmem:[#allocation8 + $0x22b4] ss:$52 sps:$4 sm:$0xff]  }
 0x804   :  { %11231 = vmatpush1.bf16.msra.mxu0 %v20439_v43  ;;  %v20487_v43 = vld [vmem:[#allocation8 + $0x1c28] ss:$52 sps:$4 sm:$0xff]  }
 0x805   :  { %11559 = vmatpush1.bf16.msra.mxu1 %v20442_v13  ;;  %11232 = vmatprep.subr.bf16.mxu0 %v20447_v23  ;;  %v20490_v13 = vld [vmem:[#allocation8 + $0x22b0] ss:$52 sps:$4 sm:$0xff]   ;;  %v20495_v23 = vld [vmem:[#allocation8 + $0x1c94] ss:$52 sps:$4 sm:$0xff]  }
 0x806   :  { %11560 = vmatprep.subr.bf16.mxu1 %v20450_v28  ;;  %v20498_v28 = vld [vmem:[#allocation8 + $0x231c] ss:$52 sps:$4 sm:$0xff]  }
 0x808   :  { %11233 = vmatpush1.bf16.msra.mxu0 %v20445_v8  ;;  %v20493_v8 = vld [vmem:[#allocation8 + $0x1c90] ss:$52 sps:$4 sm:$0xff]  }
 0x809   :  { %11561 = vmatpush1.bf16.msra.mxu1 %v20448_v31  ;;  %11234 = vmatprep.subr.bf16.mxu0 %v20453_v33  ;;  %v20496_v31 = vld [vmem:[#allocation8 + $0x2318] ss:$52 sps:$4 sm:$0xff]   ;;  %v20501_v33 = vld [vmem:[#allocation8 + $0x1cfc] ss:$52 sps:$4 sm:$0xff]  }
 0x80a   :  { %11562 = vmatprep.subr.bf16.mxu1 %v20456_v35  ;;  %v20504_v35 = vld [vmem:[#allocation8 + $0x2384] ss:$52 sps:$4 sm:$0xff]  }
 0x80c   :  { %11235 = vmatpush1.bf16.msra.mxu0 %v20451_v0  ;;  %v20499_v0 = vld [vmem:[#allocation8 + $0x1cf8] ss:$52 sps:$4 sm:$0xff]  }
 0x80d   :  { %11563 = vmatpush1.bf16.msra.mxu1 %v20454_v24  ;;  %11245 = vmatprep.subr.bf16.mxu0 %v20459_v36  ;;  %v20502_v24 = vld [vmem:[#allocation8 + $0x2380] ss:$52 sps:$4 sm:$0xff]   ;;  %v20507_v36 = vld [vmem:[#allocation8 + $0x1d64] ss:$52 sps:$4 sm:$0xff]  }
 0x80e   :  { %11573 = vmatprep.subr.bf16.mxu1 %v20462_v38  ;;  %v20510_v38 = vld [vmem:[#allocation8 + $0x23ec] ss:$52 sps:$4 sm:$0xff]  }
 0x80f   :  { %11237 = vmatmul.mubr.bf16.vlgmr.msra.gmra.mrb[76].mxu0 %v22439_v16 }
 0x810   :  { %11565 = vmatmul.mubr.bf16.vlgmr.msra.gmra.mrb[44].mxu1 %v22451_v34  ;;  %11246 = vmatpush1.bf16.msra.mxu0 %v20457_v59  ;;  %v20505_v59 = vld [vmem:[#allocation8 + $0x1d60] ss:$52 sps:$4 sm:$0xff]  }
 0x811   :  { %11277 = vmatprep.mubr.bf16.mxu0 %v22441_v12  ;;  %11574 = vmatpush1.bf16.msra.mxu1 %v20460_v18  ;;  %v20508_v18 = vld [vmem:[#allocation8 + $0x23e8] ss:$52 sps:$4 sm:$0xff]  }
 0x812   :  { %11605 = vmatprep.mubr.bf16.mxu1 %v22453_v25  ;;  %11247 = vmatprep.subr.bf16.mxu0 %v20465_v26  ;;  %v20513_v26 = vld [vmem:[#allocation8 + $0x1dcc] ss:$52 sps:$4 sm:$0xff]  }
 0x813   :  { %11575 = vmatprep.subr.bf16.mxu1 %v20468_v41  ;;  %v20516_v41 = vld [vmem:[#allocation8 + $0x2454] ss:$52 sps:$4 sm:$0xff]  }
 0x814   :  { %11248 = vmatpush1.bf16.msra.mxu0 %v20463_v42  ;;  %v20511_v42 = vld [vmem:[#allocation8 + $0x1dc8] ss:$52 sps:$4 sm:$0xff]  }
 0x815   :  { %11576 = vmatpush1.bf16.msra.mxu1 %v20466_v46  ;;  %11249 = vmatprep.subr.bf16.mxu0 %v20471_v40  ;;  %v20514_v46 = vld [vmem:[#allocation8 + $0x2450] ss:$52 sps:$4 sm:$0xff]   ;;  %v20519_v40 = vld [vmem:[#allocation8 + $0x1e34] ss:$52 sps:$4 sm:$0xff]  }
 0x816   :  { %11577 = vmatprep.subr.bf16.mxu1 %v20474_v52  ;;  %v20522_v52 = vld [vmem:[#allocation8 + $0x24bc] ss:$52 sps:$4 sm:$0xff]  }
 0x818   :  { %11250 = vmatpush1.bf16.msra.mxu0 %v20469_v30  ;;  %v20517_v30 = vld [vmem:[#allocation8 + $0x1e30] ss:$52 sps:$4 sm:$0xff]  }
 0x819   :  { %11578 = vmatpush1.bf16.msra.mxu1 %v20472_v37  ;;  %11251 = vmatprep.subr.bf16.mxu0 %v20477_v53  ;;  %v20520_v37 = vld [vmem:[#allocation8 + $0x24b8] ss:$52 sps:$4 sm:$0xff]   ;;  %v20525_v53 = vld [vmem:[#allocation8 + $0x1e9c] ss:$52 sps:$4 sm:$0xff]  }
 0x81a   :  { %11579 = vmatprep.subr.bf16.mxu1 %v20480_v55  ;;  %v20528_v55 = vld [vmem:[#allocation8 + $0x2524] ss:$52 sps:$4 sm:$0xff]  }
 0x81c   :  { %11252 = vmatpush1.bf16.msra.mxu0 %v20475_v29  ;;  %v20523_v29 = vld [vmem:[#allocation8 + $0x1e98] ss:$52 sps:$4 sm:$0xff]  }
 0x81d   :  { %11580 = vmatpush1.bf16.msra.mxu1 %v20478_v57  ;;  %11253 = vmatprep.subr.bf16.mxu0 %v20483_v58  ;;  %v20526_v57 = vld [vmem:[#allocation8 + $0x2520] ss:$52 sps:$4 sm:$0xff]   ;;  %v20531_v58 = vld [vmem:[#allocation8 + $0x1f04] ss:$52 sps:$4 sm:$0xff]  }
 0x81e   :  { %11581 = vmatprep.subr.bf16.mxu1 %v20486_v45  ;;  %v20534_v45 = vld [vmem:[#allocation8 + $0x258c] ss:$52 sps:$4 sm:$0xff]  }
 0x820   :  { %11254 = vmatpush1.bf16.msra.mxu0 %v20481_v6  ;;  %v20529_v6 = vld [vmem:[#allocation8 + $0x1f00] ss:$52 sps:$4 sm:$0xff]  }
 0x821   :  { %11582 = vmatpush1.bf16.msra.mxu1 %v20484_v5  ;;  %11255 = vmatprep.subr.bf16.mxu0 %v20489_v7  ;;  %v20532_v5 = vld [vmem:[#allocation8 + $0x2588] ss:$52 sps:$4 sm:$0xff]   ;;  %v20537_v7 = vld [vmem:[#allocation8 + $0x1f6c] ss:$52 sps:$4 sm:$0xff]  }
 0x822   :  { %11583 = vmatprep.subr.bf16.mxu1 %v20492_v9  ;;  %v20540_v9 = vld [vmem:[#allocation8 + $0x25f4] ss:$52 sps:$4 sm:$0xff]  }
 0x824   :  { %11256 = vmatpush1.bf16.msra.mxu0 %v20487_v43  ;;  %v20535_v43 = vld [vmem:[#allocation8 + $0x1f68] ss:$52 sps:$4 sm:$0xff]  }
 0x825   :  { %11584 = vmatpush1.bf16.msra.mxu1 %v20490_v13  ;;  %11257 = vmatprep.subr.bf16.mxu0 %v20495_v23  ;;  %v20538_v13 = vld [vmem:[#allocation8 + $0x25f0] ss:$52 sps:$4 sm:$0xff]   ;;  %v20543_v23 = vld [vmem:[#allocation8 + $0x1fd4] ss:$52 sps:$4 sm:$0xff]  }
 0x826   :  { %11585 = vmatprep.subr.bf16.mxu1 %v20498_v28  ;;  %v20546_v28 = vld [vmem:[#allocation8 + $0x265c] ss:$52 sps:$4 sm:$0xff]  }
 0x828   :  { %11258 = vmatpush1.bf16.msra.mxu0 %v20493_v8  ;;  %v20541_v8 = vld [vmem:[#allocation8 + $0x1fd0] ss:$52 sps:$4 sm:$0xff]  }
 0x829   :  { %11586 = vmatpush1.bf16.msra.mxu1 %v20496_v31  ;;  %11259 = vmatprep.subr.bf16.mxu0 %v20501_v33  ;;  %v20544_v31 = vld [vmem:[#allocation8 + $0x2658] ss:$52 sps:$4 sm:$0xff]   ;;  %v20549_v33 = vld [vmem:[#allocation8 + $0x203c] ss:$52 sps:$4 sm:$0xff]  }
 0x82a   :  { %11587 = vmatprep.subr.bf16.mxu1 %v20504_v35  ;;  %v20552_v35 = vld [vmem:[#allocation8 + $0x26c4] ss:$52 sps:$4 sm:$0xff]  }
 0x82c   :  { %11260 = vmatpush1.bf16.msra.mxu0 %v20499_v0  ;;  %v20547_v0 = vld [vmem:[#allocation8 + $0x2038] ss:$52 sps:$4 sm:$0xff]  }
 0x82d   :  { %11588 = vmatpush1.bf16.msra.mxu1 %v20502_v24  ;;  %11261 = vmatprep.subr.bf16.mxu0 %v20507_v36  ;;  %v20550_v24 = vld [vmem:[#allocation8 + $0x26c0] ss:$52 sps:$4 sm:$0xff]   ;;  %v20555_v36 = vld [vmem:[#allocation8 + $0x20a4] ss:$52 sps:$4 sm:$0xff]  }
 0x82e   :  { %11589 = vmatprep.subr.bf16.mxu1 %v20510_v38  ;;  %v20558_v38 = vld [vmem:[#allocation8 + $0x272c] ss:$52 sps:$4 sm:$0xff]  }
 0x830   :  { %11262 = vmatpush1.bf16.msra.mxu0 %v20505_v59  ;;  %v20553_v59 = vld [vmem:[#allocation8 + $0x20a0] ss:$52 sps:$4 sm:$0xff]  }
 0x831   :  { %11590 = vmatpush1.bf16.msra.mxu1 %v20508_v18  ;;  %11263 = vmatprep.subr.bf16.mxu0 %v20513_v26  ;;  %v20556_v18 = vld [vmem:[#allocation8 + $0x2728] ss:$52 sps:$4 sm:$0xff]   ;;  %v20561_v26 = vld [vmem:[#allocation8 + $0x210c] ss:$52 sps:$4 sm:$0xff]  }
 0x832   :  { %11591 = vmatprep.subr.bf16.mxu1 %v20516_v41  ;;  %v20564_v41 = vld [vmem:[#allocation8 + $0x2794] ss:$52 sps:$4 sm:$0xff]  }
 0x834   :  { %11264 = vmatpush1.bf16.msra.mxu0 %v20511_v42  ;;  %v20559_v42 = vld [vmem:[#allocation8 + $0x2108] ss:$52 sps:$4 sm:$0xff]  }
 0x835   :  { %11592 = vmatpush1.bf16.msra.mxu1 %v20514_v46  ;;  %11265 = vmatprep.subr.bf16.mxu0 %v20519_v40  ;;  %v20562_v46 = vld [vmem:[#allocation8 + $0x2790] ss:$52 sps:$4 sm:$0xff]   ;;  %v20567_v40 = vld [vmem:[#allocation8 + $0x2174] ss:$52 sps:$4 sm:$0xff]  }
 0x836   :  { %11593 = vmatprep.subr.bf16.mxu1 %v20522_v52  ;;  %v20570_v52 = vld [vmem:[#allocation8 + $0x27fc] ss:$52 sps:$4 sm:$0xff]  }
 0x838   :  { %11266 = vmatpush1.bf16.msra.mxu0 %v20517_v30  ;;  %v20565_v30 = vld [vmem:[#allocation8 + $0x2170] ss:$52 sps:$4 sm:$0xff]  }
 0x839   :  { %11594 = vmatpush1.bf16.msra.mxu1 %v20520_v37  ;;  %11267 = vmatprep.subr.bf16.mxu0 %v20525_v53  ;;  %v20568_v37 = vld [vmem:[#allocation8 + $0x27f8] ss:$52 sps:$4 sm:$0xff]   ;;  %v20573_v53 = vld [vmem:[#allocation8 + $0x21dc] ss:$52 sps:$4 sm:$0xff]  }
 0x83a   :  { %11595 = vmatprep.subr.bf16.mxu1 %v20528_v55  ;;  %v20576_v55 = vld [vmem:[#allocation8 + $0x2864] ss:$52 sps:$4 sm:$0xff]  }
 0x83c   :  { %11268 = vmatpush1.bf16.msra.mxu0 %v20523_v29  ;;  %v20571_v29 = vld [vmem:[#allocation8 + $0x21d8] ss:$52 sps:$4 sm:$0xff]  }
 0x83d   :  { %11596 = vmatpush1.bf16.msra.mxu1 %v20526_v57  ;;  %11269 = vmatprep.subr.bf16.mxu0 %v20531_v58  ;;  %v20574_v57 = vld [vmem:[#allocation8 + $0x2860] ss:$52 sps:$4 sm:$0xff]   ;;  %v20579_v58 = vld [vmem:[#allocation8 + $0x2244] ss:$52 sps:$4 sm:$0xff]  }
 0x83e   :  { %11597 = vmatprep.subr.bf16.mxu1 %v20534_v45  ;;  %v20582_v45 = vld [vmem:[#allocation8 + $0x28cc] ss:$52 sps:$4 sm:$0xff]  }
 0x840   :  { %11270 = vmatpush1.bf16.msra.mxu0 %v20529_v6  ;;  %v20577_v6 = vld [vmem:[#allocation8 + $0x2240] ss:$52 sps:$4 sm:$0xff]  }
 0x841   :  { %11598 = vmatpush1.bf16.msra.mxu1 %v20532_v5  ;;  %11271 = vmatprep.subr.bf16.mxu0 %v20537_v7  ;;  %v20580_v5 = vld [vmem:[#allocation8 + $0x28c8] ss:$52 sps:$4 sm:$0xff]   ;;  %v20585_v7 = vld [vmem:[#allocation8 + $0x22ac] ss:$52 sps:$4 sm:$0xff]  }
 0x842   :  { %11599 = vmatprep.subr.bf16.mxu1 %v20540_v9  ;;  %v20588_v9 = vld [vmem:[#allocation8 + $0x2934] ss:$52 sps:$4 sm:$0xff]  }
 0x844   :  { %11272 = vmatpush1.bf16.msra.mxu0 %v20535_v43  ;;  %v20583_v43 = vld [vmem:[#allocation8 + $0x22a8] ss:$52 sps:$4 sm:$0xff]  }
 0x845   :  { %11600 = vmatpush1.bf16.msra.mxu1 %v20538_v13  ;;  %11273 = vmatprep.subr.bf16.mxu0 %v20543_v23  ;;  %v20586_v13 = vld [vmem:[#allocation8 + $0x2930] ss:$52 sps:$4 sm:$0xff]   ;;  %v20591_v23 = vld [vmem:[#allocation8 + $0x2314] ss:$52 sps:$4 sm:$0xff]  }
 0x846   :  { %11601 = vmatprep.subr.bf16.mxu1 %v20546_v28  ;;  %v20594_v28 = vld [vmem:[#allocation8 + $0x299c] ss:$52 sps:$4 sm:$0xff]  }
 0x848   :  { %11274 = vmatpush1.bf16.msra.mxu0 %v20541_v8  ;;  %v20589_v8 = vld [vmem:[#allocation8 + $0x2310] ss:$52 sps:$4 sm:$0xff]  }
 0x849   :  { %11602 = vmatpush1.bf16.msra.mxu1 %v20544_v31  ;;  %11275 = vmatprep.subr.bf16.mxu0 %v20549_v33  ;;  %v20592_v31 = vld [vmem:[#allocation8 + $0x2998] ss:$52 sps:$4 sm:$0xff]   ;;  %v20597_v33 = vld [vmem:[#allocation8 + $0x237c] ss:$52 sps:$4 sm:$0xff]  }
 0x84a   :  { %11603 = vmatprep.subr.bf16.mxu1 %v20552_v35  ;;  %v20600_v35 = vld [vmem:[#allocation8 + $0x2a04] ss:$52 sps:$4 sm:$0xff]  }
 0x84c   :  { %11276 = vmatpush1.bf16.msra.mxu0 %v20547_v0  ;;  %v20595_v0 = vld [vmem:[#allocation8 + $0x2378] ss:$52 sps:$4 sm:$0xff]  }
 0x84d   :  { %11604 = vmatpush1.bf16.msra.mxu1 %v20550_v24  ;;  %11286 = vmatprep.subr.bf16.mxu0 %v20555_v36  ;;  %v20598_v24 = vld [vmem:[#allocation8 + $0x2a00] ss:$52 sps:$4 sm:$0xff]   ;;  %v20603_v36 = vld [vmem:[#allocation8 + $0x23e4] ss:$52 sps:$4 sm:$0xff]  }
 0x84e   :  { %11614 = vmatprep.subr.bf16.mxu1 %v20558_v38  ;;  %v20604_v38 = vld [vmem:[#allocation8 + $0x9f0] ss:$52 sps:$4 sm:$0xff]  }
 0x84f   :  { %11278 = vmatmul.mubr.bf16.vlgmr.msra.gmra.mrb[76].mxu0 %v22451_v34 }
 0x850   :  { %11606 = vmatmul.mubr.bf16.vlgmr.msra.gmra.mrb[44].mxu1 %v22460_v56  ;;  %11287 = vmatpush1.bf16.msra.mxu0 %v20553_v59  ;;  %v20601_v59 = vld [vmem:[#allocation8 + $0x23e0] ss:$52 sps:$4 sm:$0xff]  }
 0x851   :  { %11318 = vmatprep.mubr.bf16.mxu0 %v22453_v25  ;;  %11615 = vmatpush1.bf16.msra.mxu1 %v20556_v18  ;;  %v20605_v18 = vld [vmem:[#allocation8 + $0x6b0] ss:$52 sps:$4 sm:$0xff]  }
 0x852   :  { %11288 = vmatprep.subr.bf16.mxu0 %v20561_v26  ;;  %11616 = vmatprep.subr.bf16.mxu1 %v20564_v41  ;;  %v20608_v26 = vld [vmem:[#allocation8 + $0x244c] ss:$52 sps:$4 sm:$0xff]  }
 0x853   :  { %11646 = vmatprep.mubr.bf16.mxu1 %v21763_v51  ;;  %v20609_v41 = vld [vmem:[#allocation8 + $0xa58] ss:$52 sps:$4 sm:$0xff]  }
 0x854   :  { %11289 = vmatpush1.bf16.msra.mxu0 %v20559_v42  ;;  %v20606_v42 = vld [vmem:[#allocation8 + $0x2448] ss:$52 sps:$4 sm:$0xff]  }
 0x855   :  { %11617 = vmatpush1.bf16.msra.mxu1 %v20562_v46  ;;  %11290 = vmatprep.subr.bf16.mxu0 %v20567_v40  ;;  %v20610_v46 = vld [vmem:[#allocation8 + $0x718] ss:$52 sps:$4 sm:$0xff]   ;;  %v20613_v40 = vld [vmem:[#allocation8 + $0x24b4] ss:$52 sps:$4 sm:$0xff]  }
 0x856   :  { %11618 = vmatprep.subr.bf16.mxu1 %v20570_v52  ;;  %v20614_v52 = vld [vmem:[#allocation8 + $0xac0] ss:$52 sps:$4 sm:$0xff]  }
 0x858   :  { %11291 = vmatpush1.bf16.msra.mxu0 %v20565_v30  ;;  %v20611_v30 = vld [vmem:[#allocation8 + $0x24b0] ss:$52 sps:$4 sm:$0xff]  }
 0x859   :  { %11619 = vmatpush1.bf16.msra.mxu1 %v20568_v37  ;;  %11292 = vmatprep.subr.bf16.mxu0 %v20573_v53  ;;  %v20615_v37 = vld [vmem:[#allocation8 + $0x780] ss:$52 sps:$4 sm:$0xff]   ;;  %v20618_v53 = vld [vmem:[#allocation8 + $0x251c] ss:$52 sps:$4 sm:$0xff]  }
 0x85a   :  { %11620 = vmatprep.subr.bf16.mxu1 %v20576_v55  ;;  %v20619_v55 = vld [vmem:[#allocation8 + $0xb28] ss:$52 sps:$4 sm:$0xff]  }
 0x85c   :  { %11293 = vmatpush1.bf16.msra.mxu0 %v20571_v29  ;;  %v20616_v29 = vld [vmem:[#allocation8 + $0x2518] ss:$52 sps:$4 sm:$0xff]  }
 0x85d   :  { %11621 = vmatpush1.bf16.msra.mxu1 %v20574_v57  ;;  %11294 = vmatprep.subr.bf16.mxu0 %v20579_v58  ;;  %v20620_v57 = vld [vmem:[#allocation8 + $0x7e8] ss:$52 sps:$4 sm:$0xff]   ;;  %v20623_v58 = vld [vmem:[#allocation8 + $0x2584] ss:$52 sps:$4 sm:$0xff]  }
 0x85e   :  { %11622 = vmatprep.subr.bf16.mxu1 %v20582_v45  ;;  %v20621_v45 = vld [vmem:[#allocation8 + $0x2580] ss:$52 sps:$4 sm:$0xff]  }
 0x860   :  { %11295 = vmatpush1.bf16.msra.mxu0 %v20577_v6  ;;  %v20625_v6 = vld [vmem:[#allocation8 + $0x850] ss:$52 sps:$4 sm:$0xff]  }
 0x861   :  { %11623 = vmatpush1.bf16.msra.mxu1 %v20580_v5  ;;  %11296 = vmatprep.subr.bf16.mxu0 %v20585_v7  ;;  %v20628_v5 = vld [vmem:[#allocation8 + $0x25ec] ss:$52 sps:$4 sm:$0xff]  }
 0x862   :  { %11624 = vmatprep.subr.bf16.mxu1 %v20588_v9  ;;  %v20629_v7 = vld [vmem:[#allocation8 + $0xbf8] ss:$52 sps:$4 sm:$0xff]   ;;  %v20626_v9 = vld [vmem:[#allocation8 + $0x25e8] ss:$52 sps:$4 sm:$0xff]  }
 0x864   :  { %11297 = vmatpush1.bf16.msra.mxu0 %v20583_v43  ;;  %v20630_v43 = vld [vmem:[#allocation8 + $0x8b8] ss:$52 sps:$4 sm:$0xff]  }
 0x865   :  { %11625 = vmatpush1.bf16.msra.mxu1 %v20586_v13  ;;  %11298 = vmatprep.subr.bf16.mxu0 %v20591_v23  ;;  %v20633_v13 = vld [vmem:[#allocation8 + $0x2654] ss:$52 sps:$4 sm:$0xff]  }
 0x866   :  { %11626 = vmatprep.subr.bf16.mxu1 %v20594_v28  ;;  %v20634_v23 = vld [vmem:[#allocation8 + $0xc60] ss:$52 sps:$4 sm:$0xff]   ;;  %v20631_v28 = vld [vmem:[#allocation8 + $0x2650] ss:$52 sps:$4 sm:$0xff]  }
 0x868   :  { %11299 = vmatpush1.bf16.msra.mxu0 %v20589_v8  ;;  %v20635_v8 = vld [vmem:[#allocation8 + $0x920] ss:$52 sps:$4 sm:$0xff]  }
 0x869   :  { %11627 = vmatpush1.bf16.msra.mxu1 %v20592_v31  ;;  %11300 = vmatprep.subr.bf16.mxu0 %v20597_v33  ;;  %v20638_v31 = vld [vmem:[#allocation8 + $0x26bc] ss:$52 sps:$4 sm:$0xff]  }
 0x86a   :  { %11628 = vmatprep.subr.bf16.mxu1 %v20600_v35  ;;  %v20639_v33 = vld [vmem:[#allocation8 + $0xcc8] ss:$52 sps:$4 sm:$0xff]   ;;  %v20636_v35 = vld [vmem:[#allocation8 + $0x26b8] ss:$52 sps:$4 sm:$0xff]  }
 0x86c   :  { %11301 = vmatpush1.bf16.msra.mxu0 %v20595_v0  ;;  %v20640_v0 = vld [vmem:[#allocation8 + $0x988] ss:$52 sps:$4 sm:$0xff]  }
 0x86d   :  { %11629 = vmatpush1.bf16.msra.mxu1 %v20598_v24  ;;  %11302 = vmatprep.subr.bf16.mxu0 %v20603_v36  ;;  %v20643_v24 = vld [vmem:[#allocation8 + $0x2724] ss:$52 sps:$4 sm:$0xff]  }
 0x86e   :  { %18140 = vmatprep.subr.bf16.mxu1 %v20604_v38  ;;  %v20644_v36 = vld [vmem:[#allocation8 + $0x16f0] ss:$52 sps:$4 sm:$0xff]   ;;  %v20641_v38 = vld [vmem:[#allocation8 + $0x2720] ss:$52 sps:$4 sm:$0xff]  }
 0x870   :  { %11647 = vmatmul.mubr.bf16.vlgmr.msra.gmra.mrb[44].mxu1 %v22467_v11  ;;  %11303 = vmatpush1.bf16.msra.mxu0 %v20601_v59  ;;  %v20645_v59 = vld [vmem:[#allocation8 + $0x13b0] ss:$52 sps:$4 sm:$0xff]  }
 0x871   :  { %18141 = vmatpush3.bf16.msra.mxu1 %v20605_v18  ;;  %11727 = vmatprep.mubr.bf16.mxu1 %v22363_v27  ;;  %v20624_v27 = vld [vmem:[#allocation8 + $0xb90] ss:$52 sps:$4 sm:$0xff]   ;;  %v20648_v18 = vld [vmem:[#allocation8 + $0x278c] ss:$52 sps:$4 sm:$0xff]  }
 0x872   :  { %11304 = vmatprep.subr.bf16.mxu0 %v20608_v26  ;;  %18142 = vmatprep.subr.bf16.mxu1 %v20609_v41  ;;  %v20649_v26 = vld [vmem:[#allocation8 + $0x1758] ss:$52 sps:$4 sm:$0xff]   ;;  %v20646_v41 = vld [vmem:[#allocation8 + $0x2788] ss:$52 sps:$4 sm:$0xff]  }
 0x874   :  { %11305 = vmatpush1.bf16.msra.mxu0 %v20606_v42  ;;  %v20650_v42 = vld [vmem:[#allocation8 + $0x1418] ss:$52 sps:$4 sm:$0xff]  }
 0x875   :  { %18143 = vmatpush3.bf16.msra.mxu1 %v20610_v46  ;;  %11306 = vmatprep.subr.bf16.mxu0 %v20613_v40  ;;  %v20653_v46 = vld [vmem:[#allocation8 + $0x27f4] ss:$52 sps:$4 sm:$0xff]  }
 0x876   :  { %18144 = vmatprep.subr.bf16.mxu1 %v20614_v52  ;;  %v20654_v40 = vld [vmem:[#allocation8 + $0x17c0] ss:$52 sps:$4 sm:$0xff]   ;;  %v20651_v52 = vld [vmem:[#allocation8 + $0x27f0] ss:$52 sps:$4 sm:$0xff]  }
 0x878   :  { %11307 = vmatpush1.bf16.msra.mxu0 %v20611_v30  ;;  %v20655_v30 = vld [vmem:[#allocation8 + $0x1480] ss:$52 sps:$4 sm:$0xff]  }
 0x879   :  { %18145 = vmatpush3.bf16.msra.mxu1 %v20615_v37  ;;  %11308 = vmatprep.subr.bf16.mxu0 %v20618_v53  ;;  %v20658_v37 = vld [vmem:[#allocation8 + $0x285c] ss:$52 sps:$4 sm:$0xff]   ;;  %v20656_v53 = vld [vmem:[#allocation8 + $0x2858] ss:$52 sps:$4 sm:$0xff]  }
 0x87a   :  { %18146 = vmatprep.subr.bf16.mxu1 %v20619_v55  ;;  %v20663_v55 = vld [vmem:[#allocation8 + $0x28c4] ss:$52 sps:$4 sm:$0xff]  }
 0x87c   :  { %11309 = vmatpush1.bf16.msra.mxu0 %v20616_v29  ;;  %v20664_v29 = vld [vmem:[#allocation8 + $0x1890] ss:$52 sps:$4 sm:$0xff]  }
 0x87d   :  { %18147 = vmatpush3.bf16.msra.mxu1 %v20620_v57  ;;  %11310 = vmatprep.subr.bf16.mxu0 %v20623_v58  ;;  %v20661_v57 = vld [vmem:[#allocation8 + $0x28c0] ss:$52 sps:$4 sm:$0xff]   ;;  %v20665_v58 = vld [vmem:[#allocation8 + $0x1550] ss:$52 sps:$4 sm:$0xff]  }
 0x87e   :  { %18148 = vmatprep.subr.bf16.mxu1 %v20624_v27  ;;  %v20668_v27 = vld [vmem:[#allocation8 + $0x292c] ss:$52 sps:$4 sm:$0xff]  }
 0x880   :  { %11311 = vmatpush1.bf16.msra.mxu0 %v20621_v45  ;;  %v20669_v45 = vld [vmem:[#allocation8 + $0x18f8] ss:$52 sps:$4 sm:$0xff]  }
 0x881   :  { %18149 = vmatpush3.bf16.msra.mxu1 %v20625_v6  ;;  %11312 = vmatprep.subr.bf16.mxu0 %v20628_v5  ;;  %v20666_v6 = vld [vmem:[#allocation8 + $0x2928] ss:$52 sps:$4 sm:$0xff]   ;;  %v20670_v5 = vld [vmem:[#allocation8 + $0x15b8] ss:$52 sps:$4 sm:$0xff]  }
 0x882   :  { %18150 = vmatprep.subr.bf16.mxu1 %v20629_v7  ;;  %v20673_v7 = vld [vmem:[#allocation8 + $0x2994] ss:$52 sps:$4 sm:$0xff]  }
 0x884   :  { %11313 = vmatpush1.bf16.msra.mxu0 %v20626_v9  ;;  %v20674_v9 = vld [vmem:[#allocation8 + $0x1960] ss:$52 sps:$4 sm:$0xff]  }
 0x885   :  { %18151 = vmatpush3.bf16.msra.mxu1 %v20630_v43  ;;  %11314 = vmatprep.subr.bf16.mxu0 %v20633_v13  ;;  %v20671_v43 = vld [vmem:[#allocation8 + $0x2990] ss:$52 sps:$4 sm:$0xff]   ;;  %v20675_v13 = vld [vmem:[#allocation8 + $0x1620] ss:$52 sps:$4 sm:$0xff]  }
 0x886   :  { %18152 = vmatprep.subr.bf16.mxu1 %v20634_v23  ;;  %v20678_v23 = vld [vmem:[#allocation8 + $0x29fc] ss:$52 sps:$4 sm:$0xff]  }
 0x888   :  { %11315 = vmatpush1.bf16.msra.mxu0 %v20631_v28  ;;  %v20679_v28 = vld [vmem:[#allocation8 + $0x19c8] ss:$52 sps:$4 sm:$0xff]  }
 0x889   :  { %18153 = vmatpush3.bf16.msra.mxu1 %v20635_v8  ;;  %11316 = vmatprep.subr.bf16.mxu0 %v20638_v31  ;;  %v20676_v8 = vld [vmem:[#allocation8 + $0x29f8] ss:$52 sps:$4 sm:$0xff]   ;;  %v20680_v31 = vld [vmem:[#allocation8 + $0x1688] ss:$52 sps:$4 sm:$0xff]  }
 0x88a   :  { %18154 = vmatprep.subr.bf16.mxu1 %v20639_v33  ;;  %v20681_v33 = vld [vmem:[#allocation8 + $0x370] ss:$52 sps:$4 sm:$0xff]  }
 0x88c   :  { %11317 = vmatpush1.bf16.msra.mxu0 %v20636_v35  ;;  %v20682_v35 = vld [vmem:[#allocation8 + $0x23f0] ss:$52 sps:$4 sm:$0xff]  }
 0x88d   :  { %18155 = vmatpush3.bf16.msra.mxu1 %v20640_v0  ;;  %11327 = vmatprep.subr.bf16.mxu0 %v20643_v24  ;;  %v20683_v0 = vld [vmem:[#allocation8 + $0x30] ss:$52 sps:$4 sm:$0xff]  }
 0x88e   :  { %18184 = vmatprep.subr.bf16.mxu1 %v20644_v36  ;;  %v20684_v24 = vld [vmem:[#allocation8 + $0x20b0] ss:$52 sps:$4 sm:$0xff]   ;;  %v20685_v36 = vld [vmem:[#allocation8 + $0x3d8] ss:$52 sps:$4 sm:$0xff]  }
 0x88f   :  { %11319 = vmatmul.mubr.bf16.vlgmr.msra.gmra.mrb[76].mxu0 %v22460_v56 }
 0x890   :  { %11728 = vmatmul.mubr.bf16.vlgmr.msra.gmra.mrb[48].mxu1 %v22390_v39  ;;  %11328 = vmatpush1.bf16.msra.mxu0 %v20641_v38  ;;  %v20659_v39 = vld [vmem:[#allocation8 + $0x1828] ss:$52 sps:$4 sm:$0xff]   ;;  %v20686_v38 = vld [vmem:[#allocation8 + $0x2458] ss:$52 sps:$4 sm:$0xff]  }
 0x891   :  { %18185 = vmatpush3.bf16.msra.mxu1 %v20645_v59  ;;  %11807 = vmatprep.mubr.bf16.mxu1 %v22425_v4  ;;  %v20660_v4 = vld [vmem:[#allocation8 + $0x14e8] ss:$52 sps:$4 sm:$0xff]   ;;  %v20687_v59 = vld [vmem:[#allocation8 + $0x98] ss:$52 sps:$4 sm:$0xff]  }
 0x892   :  { %11329 = vmatprep.subr.bf16.mxu0 %v20648_v18  ;;  %18186 = vmatprep.subr.bf16.mxu1 %v20649_v26  ;;  %v20688_v18 = vld [vmem:[#allocation8 + $0x2118] ss:$52 sps:$4 sm:$0xff]   ;;  %v20689_v26 = vld [vmem:[#allocation8 + $0x440] ss:$52 sps:$4 sm:$0xff]  }
 0x893   :  { %11359 = vmatprep.mubr.bf16.mxu0 %v21763_v51 }
 0x894   :  { %11330 = vmatpush1.bf16.msra.mxu0 %v20646_v41  ;;  %v20690_v41 = vld [vmem:[#allocation8 + $0x24c0] ss:$52 sps:$4 sm:$0xff]  }
 0x895   :  { %18187 = vmatpush3.bf16.msra.mxu1 %v20650_v42  ;;  %11331 = vmatprep.subr.bf16.mxu0 %v20653_v46  ;;  %v20691_v42 = vld [vmem:[#allocation8 + $0x100] ss:$52 sps:$4 sm:$0xff]  }
 0x896   :  { %18188 = vmatprep.subr.bf16.mxu1 %v20654_v40  ;;  %v20692_v46 = vld [vmem:[#allocation8 + $0x2180] ss:$52 sps:$4 sm:$0xff]   ;;  %v20693_v40 = vld [vmem:[#allocation8 + $0x4a8] ss:$52 sps:$4 sm:$0xff]  }
 0x898   :  { %11332 = vmatpush1.bf16.msra.mxu0 %v20651_v52  ;;  %v20695_v52 = vld [vmem:[#allocation8 + $0x168] ss:$52 sps:$4 sm:$0xff]  }
 0x899   :  { %18189 = vmatpush3.bf16.msra.mxu1 %v20655_v30  ;;  %11333 = vmatprep.subr.bf16.mxu0 %v20658_v37  ;;  %v20697_v30 = vld [vmem:[#allocation8 + $0x510] ss:$52 sps:$4 sm:$0xff]  }
 0x89a   :  { %18190 = vmatprep.subr.bf16.mxu1 %v20659_v39  ;;  %v20698_v37 = vld [vmem:[#allocation8 + $0x2590] ss:$52 sps:$4 sm:$0xff]  }
 0x89b   :  { %v20700_v39 = vld [vmem:[#allocation8 + $0x2250] ss:$52 sps:$4 sm:$0xff]  }
 0x89c   :  { %11334 = vmatpush1.bf16.msra.mxu0 %v20656_v53  ;;  %v20701_v53 = vld [vmem:[#allocation8 + $0x578] ss:$52 sps:$4 sm:$0xff]  }
 0x89d   :  { %18191 = vmatpush3.bf16.msra.mxu1 %v20660_v4  ;;  %11335 = vmatprep.subr.bf16.mxu0 %v20663_v55  ;;  %v20702_v4 = vld [vmem:[#allocation8 + $0x25f8] ss:$52 sps:$4 sm:$0xff]  }
 0x89e   :  { %18192 = vmatprep.subr.bf16.mxu1 %v20664_v29  ;;  %v20703_v55 = vld [vmem:[#allocation8 + $0x238] ss:$52 sps:$4 sm:$0xff]  }
 0x89f   :  { %v20704_v29 = vld [vmem:[#allocation8 + $0x22b8] ss:$52 sps:$4 sm:$0xff]  }
 0x8a0   :  { %11336 = vmatpush1.bf16.msra.mxu0 %v20661_v57  ;;  %v20705_v57 = vld [vmem:[#allocation8 + $0x5e0] ss:$52 sps:$4 sm:$0xff]  }
 0x8a1   :  { %18193 = vmatpush3.bf16.msra.mxu1 %v20665_v58  ;;  %11337 = vmatprep.subr.bf16.mxu0 %v20668_v27  ;;  %v20706_v58 = vld [vmem:[#allocation8 + $0x2660] ss:$52 sps:$4 sm:$0xff]  }
 0x8a2   :  { %18194 = vmatprep.subr.bf16.mxu1 %v20669_v45  ;;  %v20707_v27 = vld [vmem:[#allocation8 + $0x2a0] ss:$52 sps:$4 sm:$0xff]  }
 0x8a3   :  { %v20708_v45 = vld [vmem:[#allocation8 + $0x2320] ss:$52 sps:$4 sm:$0xff]  }
 0x8a4   :  { %11338 = vmatpush1.bf16.msra.mxu0 %v20666_v6  ;;  %v20709_v6 = vld [vmem:[#allocation8 + $0x648] ss:$52 sps:$4 sm:$0xff]  }
 0x8a5   :  { %18195 = vmatpush3.bf16.msra.mxu1 %v20670_v5  ;;  %11339 = vmatprep.subr.bf16.mxu0 %v20673_v7  ;;  %v20710_v5 = vld [vmem:[#allocation8 + $0x26c8] ss:$52 sps:$4 sm:$0xff]   ;;  %v22557_v7 = vld [vmem:[#allocation10] sm:$0xff] }
 0x8a6   :  { %18196 = vmatprep.subr.bf16.mxu1 %v20674_v9  ;;  %v3011_v9 = vrot.slane %v22557_v7, %v22342_v15 }
 0x8a8   :  { %11340 = vmatpush1.bf16.msra.mxu0 %v20671_v43  ;;  %v20711_v43 = vld [vmem:[#allocation8 + $0x308] ss:$52 sps:$4 sm:$0xff]  }
 0x8a9   :  { %18197 = vmatpush3.bf16.msra.mxu1 %v20675_v13  ;;  %11341 = vmatprep.subr.bf16.mxu0 %v20678_v23  ;;  %v20712_v13 = vld [vmem:[#allocation8 + $0x2388] ss:$52 sps:$4 sm:$0xff]   ;;  %v20713_v23 = vld [vmem:[#allocation8 + $0x1070] ss:$52 sps:$4 sm:$0xff]  }
 0x8aa   :  { %18198 = vmatprep.subr.bf16.mxu1 %v20679_v28  ;;  %v20716_v28 = vld [vmem:[#allocation11 + $0x4] ss:$16 sps:$4 sm:$0xff]  }
 0x8ac   :  { %11342 = vmatpush1.bf16.msra.mxu0 %v20676_v8  ;;  %v18468_v8 = vadd.f32 %v22489_v21, %v3011_v9  ;;  %v20719_v21 = vld [vmem:[#allocation11 + $0x20] ss:$16 sps:$4 sm:$0xff]  }
 0x8ad   :  { %18199 = vmatpush3.bf16.msra.mxu1 %v20680_v31  ;;  %18118 = vmatprep.subr.bf16.mxu0 %v20681_v33  ;;  %v20717_v31 = vld [vmem:[#allocation8 + $0xd30] ss:$52 sps:$4 sm:$0xff]   ;;  %v20758_v9 = vld [vmem:[#allocation8 + $0x1dd8] ss:$52 sps:$4 sm:$0xff]  }
 0x8ae   :  { %18228 = vmatprep.subr.bf16.mxu1 %v20682_v35  ;;  %v20714_v33 = vld [vmem:[#allocation11] ss:$16 sps:$4 sm:$0xff]  }
 0x8af   :  { %11360 = vmatmul.mubr.bf16.vlgmr.msra.gmra.mrb[76].mxu0 %v22467_v11  ;;  %v20718_v35 = vld [vmem:[#allocation8 + $0x10d8] ss:$52 sps:$4 sm:$0xff]  }
 0x8b0   :  { %11808 = vmatmul.mubr.bf16.vlgmr.msra.gmra.mrb[52].mxu1 %v22439_v16  ;;  %18119 = vmatpush3.bf16.msra.mxu0 %v20683_v0  ;;  %v20694_v16 = vld [vmem:[#allocation8 + $0x2528] ss:$52 sps:$4 sm:$0xff]   ;;  %v20721_v0 = vld [vmem:[#allocation11 + $0x24] ss:$16 sps:$4 sm:$0xff]  }
 0x8b1   :  { %11687 = vmatprep.mubr.bf16.mxu0 %v22348_v62  ;;  %18229 = vmatpush3.bf16.msra.mxu1 %v20684_v24  ;;  %v20696_v62 = vld [vmem:[#allocation8 + $0x21e8] ss:$52 sps:$4 sm:$0xff]   ;;  %v22563_v24 = vpack.c.bf16 %v18468_v8, %v18468_v8  ;;  %v20766_v8 = vld [vmem:[#allocation11 + $0x144] ss:$16 sps:$4 sm:$0xff]  }
 0x8b2   :  { %11887 = vmatprep.mubr.bf16.mxu1 %v22453_v25  ;;  %18120 = vmatprep.subr.bf16.mxu0 %v20685_v36  ;;  %v20699_v25 = vld [vmem:[#allocation8 + $0x1d0] ss:$52 sps:$4 sm:$0xff]   ;;  %v20722_v36 = vld [vmem:[#allocation8 + $0xd98] ss:$52 sps:$4 sm:$0xff]  }
 0x8b3   :  { %18230 = vmatprep.subr.bf16.mxu1 %v20686_v38  ;;  %v20723_v38 = vld [vmem:[#allocation8 + $0x1140] ss:$52 sps:$4 sm:$0xff]  }
 0x8b4   :  { %18121 = vmatpush3.bf16.msra.mxu0 %v20687_v59  ;;  %v20726_v59 = vld [vmem:[#allocation11 + $0x44] ss:$16 sps:$4 sm:$0xff]  }
 0x8b5   :  { %18231 = vmatpush3.bf16.msra.mxu1 %v20688_v18  ;;  %18122 = vmatprep.subr.bf16.mxu0 %v20689_v26  ;;  %v20727_v18 = vld [vmem:[#allocation8 + $0xe00] ss:$52 sps:$4 sm:$0xff]   ;;  %v20728_v26 = vld [vmem:[#allocation8 + $0x11a8] ss:$52 sps:$4 sm:$0xff]  }
 0x8b6   :  { %18232 = vmatprep.subr.bf16.mxu1 %v20690_v41  ;;  %v20732_v41 = vld [vmem:[#allocation8 + $0xe68] ss:$52 sps:$4 sm:$0xff]  }
 0x8b8   :  { %18123 = vmatpush3.bf16.msra.mxu0 %v20691_v42  ;;  %v20733_v42 = vld [vmem:[#allocation8 + $0x1210] ss:$52 sps:$4 sm:$0xff]  }
 0x8b9   :  { %18233 = vmatpush3.bf16.msra.mxu1 %v20692_v46  ;;  %18124 = vmatprep.subr.bf16.mxu0 %v20693_v40  ;;  %v20736_v46 = vld [vmem:[#allocation11 + $0x84] ss:$16 sps:$4 sm:$0xff]  }
 0x8ba   :  { %18234 = vmatprep.subr.bf16.mxu1 %v20694_v16  ;;  %v20737_v40 = vld [vmem:[#allocation8 + $0xed0] ss:$52 sps:$4 sm:$0xff]  }
 0x8bb   :  { %v20734_v16 = vld [vmem:[#allocation11 + $0x80] ss:$16 sps:$4 sm:$0xff]  }
 0x8bc   :  { %18125 = vmatpush3.bf16.msra.mxu0 %v20695_v52  ;;  %v20738_v52 = vld [vmem:[#allocation8 + $0x1278] ss:$52 sps:$4 sm:$0xff]  }
 0x8bd   :  { %18235 = vmatpush3.bf16.msra.mxu1 %v20696_v62  ;;  %18126 = vmatprep.subr.bf16.mxu0 %v20697_v30  ;;  %v20741_v62 = vld [vmem:[#allocation11 + $0xa4] ss:$16 sps:$4 sm:$0xff]   ;;  %v20742_v30 = vld [vmem:[#allocation8 + $0xf38] ss:$52 sps:$4 sm:$0xff]  }
 0x8be   :  { %18236 = vmatprep.subr.bf16.mxu1 %v20698_v37  ;;  %v20739_v37 = vld [vmem:[#allocation11 + $0xa0] ss:$16 sps:$4 sm:$0xff]  }
 0x8c0   :  { %18127 = vmatpush3.bf16.msra.mxu0 %v20699_v25  ;;  %v20743_v25 = vld [vmem:[#allocation8 + $0x12e0] ss:$52 sps:$4 sm:$0xff]  }
 0x8c1   :  { %18237 = vmatpush3.bf16.msra.mxu1 %v20700_v39  ;;  %18128 = vmatprep.subr.bf16.mxu0 %v20701_v53  ;;  %v20746_v39 = vld [vmem:[#allocation11 + $0xc4] ss:$16 sps:$4 sm:$0xff]  }
 0x8c2   :  { %18238 = vmatprep.subr.bf16.mxu1 %v20702_v4  ;;  %v20747_v53 = vld [vmem:[#allocation8 + $0xfa0] ss:$52 sps:$4 sm:$0xff]  }
 0x8c3   :  { %v20744_v4 = vld [vmem:[#allocation11 + $0xc0] ss:$16 sps:$4 sm:$0xff]  }
 0x8c4   :  { %18129 = vmatpush3.bf16.msra.mxu0 %v20703_v55  ;;  %v20748_v55 = vld [vmem:[#allocation8 + $0x1348] ss:$52 sps:$4 sm:$0xff]  }
 0x8c5   :  { %18239 = vmatpush3.bf16.msra.mxu1 %v20704_v29  ;;  %18130 = vmatprep.subr.bf16.mxu0 %v20705_v57  ;;  %v20751_v29 = vld [vmem:[#allocation11 + $0xe4] ss:$16 sps:$4 sm:$0xff]   ;;  %v20752_v57 = vld [vmem:[#allocation8 + $0x1008] ss:$52 sps:$4 sm:$0xff]  }
 0x8c6   :  { %18240 = vmatprep.subr.bf16.mxu1 %v20706_v58  ;;  %v20749_v58 = vld [vmem:[#allocation11 + $0xe0] ss:$16 sps:$4 sm:$0xff]  }
 0x8c8   :  { %18131 = vmatpush3.bf16.msra.mxu0 %v20707_v27  ;;  %v20753_v27 = vld [vmem:[#allocation8 + $0x1d70] ss:$52 sps:$4 sm:$0xff]  }
 0x8c9   :  { %18241 = vmatpush3.bf16.msra.mxu1 %v20708_v45  ;;  %18132 = vmatprep.subr.bf16.mxu0 %v20709_v6  ;;  %v20756_v45 = vld [vmem:[#allocation11 + $0x104] ss:$16 sps:$4 sm:$0xff]  }
 0x8ca   :  { %18242 = vmatprep.subr.bf16.mxu1 %v20710_v5  ;;  %v20757_v6 = vld [vmem:[#allocation8 + $0x1a30] ss:$52 sps:$4 sm:$0xff]  }
 0x8cb   :  { %v20754_v5 = vld [vmem:[#allocation11 + $0x100] ss:$16 sps:$4 sm:$0xff]  }
 0x8cc   :  { %18133 = vmatpush3.bf16.msra.mxu0 %v20711_v43  ;;  %v20761_v43 = vld [vmem:[#allocation11 + $0x124] ss:$16 sps:$4 sm:$0xff]  }
 0x8cd   :  { %18243 = vmatpush3.bf16.msra.mxu1 %v20712_v13  ;;  %18162 = vmatprep.subr.bf16.mxu0 %v20713_v23  ;;  %v20762_v13 = vld [vmem:[#allocation8 + $0x1a98] ss:$52 sps:$4 sm:$0xff]  }
 0x8ce   :  { %14466 = vmatprep.subr.bf16.mxu1 %v20716_v28  ;;  %v20759_v23 = vld [vmem:[#allocation11 + $0x120] ss:$16 sps:$4 sm:$0xff]  }
 0x8cf   :  { %11688 = vmatmul.mubr.bf16.vlgmr.msra.gmra.mrb[80].mxu0 %v22350_v2  ;;  %v20724_v2 = vld [vmem:[#allocation11 + $0x40] ss:$16 sps:$4 sm:$0xff]  }
 0x8d0   :  { %11888 = vmatmul.mubr.bf16.vlgmr.msra.gmra.mrb[56].mxu1 %v22460_v56  ;;  %18163 = vmatpush3.bf16.msra.mxu0 %v20717_v31  ;;  %v20731_v56 = vld [vmem:[#allocation11 + $0x64] ss:$16 sps:$4 sm:$0xff]  }
 0x8d1   :  { %11767 = vmatprep.mubr.bf16.mxu0 %v22392_v48  ;;  %14467 = vmatpush1.bf16.msra.mxu1 %v20714_v33  ;;  %v20729_v48 = vld [vmem:[#allocation11 + $0x60] ss:$16 sps:$4 sm:$0xff]  }
 0x8d2   :  { %14498 = vmatprep.mubr.bf16.mxu1 %v22563_v24  ;;  %18164 = vmatprep.subr.bf16.mxu0 %v20718_v35  ;;  %v20763_v28 = vld [vmem:[#allocation8 + $0x1e40] ss:$52 sps:$4 sm:$0xff]   ;;  %v20768_v35 = vld [vmem:[#allocation8 + $0x1ea8] ss:$52 sps:$4 sm:$0xff]  }
 0x8d3   :  { %14468 = vmatprep.subr.bf16.mxu1 %v20721_v0  ;;  %v20767_v31 = vld [vmem:[#allocation8 + $0x1b00] ss:$52 sps:$4 sm:$0xff]  }
 0x8d4   :  { %18165 = vmatpush3.bf16.msra.mxu0 %v20722_v36  ;;  %v20764_v33 = vld [vmem:[#allocation11 + $0x140] ss:$16 sps:$4 sm:$0xff]   ;;  %v20771_v0 = vld [vmem:[#allocation11 + $0x164] ss:$16 sps:$4 sm:$0xff]  }
 0x8d5   :  { %14469 = vmatpush1.bf16.msra.mxu1 %v20719_v21  ;;  %18166 = vmatprep.subr.bf16.mxu0 %v20723_v38  ;;  %v20773_v36 = vld [vmem:[#allocation8 + $0x1f10] ss:$52 sps:$4 sm:$0xff]  }
 0x8d6   :  { %14470 = vmatprep.subr.bf16.mxu1 %v20726_v59  ;;  %v20776_v21 = vld [vmem:[#allocation11 + $0x184] ss:$16 sps:$4 sm:$0xff]   ;;  %v20774_v59 = vld [vmem:[#allocation11 + $0x180] ss:$16 sps:$4 sm:$0xff]  }
 0x8d7   :  { %v20777_v38 = vld [vmem:[#allocation8 + $0x1bd0] ss:$52 sps:$4 sm:$0xff]  }
 0x8d8   :  { %18167 = vmatpush3.bf16.msra.mxu0 %v20727_v18  ;;  %v20778_v18 = vld [vmem:[#allocation8 + $0x1f78] ss:$52 sps:$4 sm:$0xff]  }
 0x8d9   :  { %14471 = vmatpush1.bf16.msra.mxu1 %v20724_v2  ;;  %18168 = vmatprep.subr.bf16.mxu0 %v20728_v26  ;;  %v20781_v2 = vld [vmem:[#allocation11 + $0x1a4] ss:$16 sps:$4 sm:$0xff]   ;;  %v20782_v26 = vld [vmem:[#allocation8 + $0x1c38] ss:$52 sps:$4 sm:$0xff]  }
 0x8da   :  { %14472 = vmatprep.subr.bf16.mxu1 %v20731_v56  ;;  %v20779_v56 = vld [vmem:[#allocation11 + $0x1a0] ss:$16 sps:$4 sm:$0xff]  }
 0x8dc   :  { %18169 = vmatpush3.bf16.msra.mxu0 %v20732_v41  ;;  %v20783_v41 = vld [vmem:[#allocation8 + $0x1fe0] ss:$52 sps:$4 sm:$0xff]  }
 0x8dd   :  { %14473 = vmatpush1.bf16.msra.mxu1 %v20729_v48  ;;  %18170 = vmatprep.subr.bf16.mxu0 %v20733_v42  ;;  %v20786_v48 = vld [vmem:[#allocation11 + $0x1c4] ss:$16 sps:$4 sm:$0xff]  }
 0x8de   :  { %14474 = vmatprep.subr.bf16.mxu1 %v20736_v46  ;;  %v20787_v42 = vld [vmem:[#allocation8 + $0x1ca0] ss:$52 sps:$4 sm:$0xff]  }
 0x8df   :  { %v20784_v46 = vld [vmem:[#allocation11 + $0x1c0] ss:$16 sps:$4 sm:$0xff]  }
 0x8e0   :  { %18171 = vmatpush3.bf16.msra.mxu0 %v20737_v40  ;;  %v20788_v40 = vld [vmem:[#allocation8 + $0x2048] ss:$52 sps:$4 sm:$0xff]  }
 0x8e1   :  { %14475 = vmatpush1.bf16.msra.mxu1 %v20734_v16  ;;  %18172 = vmatprep.subr.bf16.mxu0 %v20738_v52  ;;  %v3007_v16 = vrot.slane %v22557_v7, %v22337_v49  ;;  %v20791_v52 = vld [vmem:[#allocation11 + $0x1e4] ss:$16 sps:$4 sm:$0xff]  }
 0x8e2   :  { %14476 = vmatprep.subr.bf16.mxu1 %v20741_v62  ;;  %v20792_v62 = vld [vmem:[#allocation8 + $0x1d08] ss:$52 sps:$4 sm:$0xff]  }
 0x8e4   :  { %18173 = vmatpush3.bf16.msra.mxu0 %v20742_v30  ;;  %v20789_v30 = vld [vmem:[#allocation11 + $0x1e0] ss:$16 sps:$4 sm:$0xff]  }
 0x8e5   :  { %14477 = vmatpush1.bf16.msra.mxu1 %v20739_v37  ;;  %18174 = vmatprep.subr.bf16.mxu0 %v20743_v25  ;;  %v18467_v37 = vadd.f32 %v22487_v17, %v3007_v16  ;;  %v20795_v25 = vld [vmem:[#allocation11 + $0x204] ss:$16 sps:$4 sm:$0xff]   ;;  %v20800_v17 = vld [vmem:[#allocation8 + $0x2798] ss:$52 sps:$4 sm:$0xff]  }
 0x8e6   :  { %14478 = vmatprep.subr.bf16.mxu1 %v20746_v39  ;;  %v20796_v39 = vld [vmem:[#allocation8 + $0x2730] ss:$52 sps:$4 sm:$0xff]  }
 0x8e7   :  { %v20843_v16 = vld [vmem:[#allocation11 + $0x360] ss:$16 sps:$4 sm:$0xff]  }
 0x8e8   :  { %18175 = vmatpush3.bf16.msra.mxu0 %v20747_v53  ;;  %v20793_v53 = vld [vmem:[#allocation11 + $0x200] ss:$16 sps:$4 sm:$0xff]  }
 0x8e9   :  { %14479 = vmatpush1.bf16.msra.mxu1 %v20744_v4  ;;  %18176 = vmatprep.subr.bf16.mxu0 %v20748_v55  ;;  %v22574_v4 = vpack.c.bf16 %v18467_v37, %v18467_v37  ;;  %v20799_v55 = vld [vmem:[#allocation11 + $0x224] ss:$16 sps:$4 sm:$0xff]   ;;  %v20860_v37 = vld [vmem:[#allocation11 + $0xac] ss:$16 sps:$4 sm:$0xff]  }
 0x8ea   :  { %14480 = vmatprep.subr.bf16.mxu1 %v20751_v29  ;;  %v22578_v29 = vpack.c.bf16 %v22501_v32, %v22501_v32  ;;  %v20804_v32 = vld [vmem:[#allocation8 + $0x2800] ss:$52 sps:$4 sm:$0xff]  }
 0x8ec   :  { %18177 = vmatpush3.bf16.msra.mxu0 %v20752_v57  ;;  %v20797_v57 = vld [vmem:[#allocation11 + $0x220] ss:$16 sps:$4 sm:$0xff]  }
 0x8ed   :  { %14481 = vmatpush1.bf16.msra.mxu1 %v20749_v58  ;;  %18206 = vmatprep.subr.bf16.mxu0 %v20753_v27  ;;  %v20803_v58 = vld [vmem:[#allocation11 + $0x244] ss:$16 sps:$4 sm:$0xff]  }
 0x8ee   :  { %14482 = vmatprep.subr.bf16.mxu1 %v20756_v45  ;;  %v20807_v27 = vld [vmem:[#allocation11 + $0x264] ss:$16 sps:$4 sm:$0xff]   ;;  %v20808_v45 = vld [vmem:[#allocation8 + $0x2868] ss:$52 sps:$4 sm:$0xff]  }
 0x8ef   :  { %11768 = vmatmul.mubr.bf16.vlgmr.msra.gmra.mrb[84].mxu0 %v22423_v1  ;;  %v20772_v1 = vld [vmem:[#allocation8 + $0x1b68] ss:$52 sps:$4 sm:$0xff]  }
 0x8f0   :  { %18207 = vmatpush3.bf16.msra.mxu0 %v20757_v6  ;;  %11847 = vmatprep.mubr.bf16.mxu0 %v22441_v12  ;;  %v20769_v12 = vld [vmem:[#allocation11 + $0x160] ss:$16 sps:$4 sm:$0xff]  }
 0x8f1   :  { %14483 = vmatpush1.bf16.msra.mxu1 %v20754_v5  ;;  %18208 = vmatprep.subr.bf16.mxu0 %v20758_v9  ;;  %v20805_v6 = vld [vmem:[#allocation11 + $0x260] ss:$16 sps:$4 sm:$0xff]   ;;  %v20811_v5 = vld [vmem:[#allocation11 + $0x284] ss:$16 sps:$4 sm:$0xff]  }
 0x8f2   :  { %14484 = vmatprep.subr.bf16.mxu1 %v20761_v43  ;;  %v20812_v9 = vld [vmem:[#allocation8 + $0x28d0] ss:$52 sps:$4 sm:$0xff]  }
 0x8f3   :  { %v20809_v43 = vld [vmem:[#allocation11 + $0x280] ss:$16 sps:$4 sm:$0xff]  }
 0x8f4   :  { %18209 = vmatpush3.bf16.msra.mxu0 %v20762_v13  ;;  %v20815_v13 = vld [vmem:[#allocation11 + $0x2a4] ss:$16 sps:$4 sm:$0xff]  }
 0x8f5   :  { %14485 = vmatpush1.bf16.msra.mxu1 %v20759_v23  ;;  %18210 = vmatprep.subr.bf16.mxu0 %v20763_v28  ;;  %v20816_v23 = vld [vmem:[#allocation8 + $0x2938] ss:$52 sps:$4 sm:$0xff]  }
 0x8f6   :  { %14486 = vmatprep.subr.bf16.mxu1 %v20766_v8  ;;  %v20813_v28 = vld [vmem:[#allocation11 + $0x2a0] ss:$16 sps:$4 sm:$0xff]   ;;  %v20819_v8 = vld [vmem:[#allocation11 + $0x2c4] ss:$16 sps:$4 sm:$0xff]  }
 0x8f8   :  { %18211 = vmatpush3.bf16.msra.mxu0 %v20767_v31  ;;  %v20820_v31 = vld [vmem:[#allocation8 + $0x29a0] ss:$52 sps:$4 sm:$0xff]  }
 0x8f9   :  { %14487 = vmatpush1.bf16.msra.mxu1 %v20764_v33  ;;  %18212 = vmatprep.subr.bf16.mxu0 %v20768_v35  ;;  %v20817_v33 = vld [vmem:[#allocation11 + $0x2c0] ss:$16 sps:$4 sm:$0xff]   ;;  %v20823_v35 = vld [vmem:[#allocation11 + $0x2e4] ss:$16 sps:$4 sm:$0xff]  }
 0x8fa   :  { %14488 = vmatprep.subr.bf16.mxu1 %v20771_v0  ;;  %v20824_v0 = vld [vmem:[#allocation8 + $0x2a08] ss:$52 sps:$4 sm:$0xff]  }
 0x8fc   :  { %18213 = vmatpush3.bf16.msra.mxu0 %v20772_v1  ;;  %v20821_v1 = vld [vmem:[#allocation11 + $0x2e0] ss:$16 sps:$4 sm:$0xff]  }
 0x8fd   :  { %14489 = vmatpush1.bf16.msra.mxu1 %v20769_v12  ;;  %18214 = vmatprep.subr.bf16.mxu0 %v20773_v36  ;;  %v20830_v12 = vld [vmem:[#allocation11 + $0xc] ss:$16 sps:$4 sm:$0xff]   ;;  %v20827_v36 = vld [vmem:[#allocation11 + $0x304] ss:$16 sps:$4 sm:$0xff]  }
 0x8fe   :  { %14490 = vmatprep.subr.bf16.mxu1 %v20776_v21  ;;  %v20828_v21 = vld [vmem:[#allocation11 + $0x8] ss:$16 sps:$4 sm:$0xff]  }
 0x900   :  { %18215 = vmatpush3.bf16.msra.mxu0 %v20777_v38  ;;  %v20825_v38 = vld [vmem:[#allocation11 + $0x300] ss:$16 sps:$4 sm:$0xff]  }
 0x901   :  { %14491 = vmatpush1.bf16.msra.mxu1 %v20774_v59  ;;  %18216 = vmatprep.subr.bf16.mxu0 %v20778_v18  ;;  %v20836_v59 = vld [vmem:[#allocation11 + $0x2c] ss:$16 sps:$4 sm:$0xff]   ;;  %v20833_v18 = vld [vmem:[#allocation11 + $0x324] ss:$16 sps:$4 sm:$0xff]  }
 0x902   :  { %14492 = vmatprep.subr.bf16.mxu1 %v20781_v2  ;;  %v20834_v2 = vld [vmem:[#allocation11 + $0x28] ss:$16 sps:$4 sm:$0xff]  }
 0x904   :  { %18217 = vmatpush3.bf16.msra.mxu0 %v20782_v26  ;;  %v20831_v26 = vld [vmem:[#allocation11 + $0x320] ss:$16 sps:$4 sm:$0xff]  }
 0x905   :  { %14493 = vmatpush1.bf16.msra.mxu1 %v20779_v56  ;;  %18218 = vmatprep.subr.bf16.mxu0 %v20783_v41  ;;  %v20842_v56 = vld [vmem:[#allocation11 + $0x4c] ss:$16 sps:$4 sm:$0xff]   ;;  %v20839_v41 = vld [vmem:[#allocation11 + $0x344] ss:$16 sps:$4 sm:$0xff]  }
 0x906   :  { %14494 = vmatprep.subr.bf16.mxu1 %v20786_v48  ;;  %v20840_v48 = vld [vmem:[#allocation11 + $0x48] ss:$16 sps:$4 sm:$0xff]  }
 0x908   :  { %18219 = vmatpush3.bf16.msra.mxu0 %v20787_v42  ;;  %v20837_v42 = vld [vmem:[#allocation11 + $0x340] ss:$16 sps:$4 sm:$0xff]  }
 0x909   :  { %14495 = vmatpush1.bf16.msra.mxu1 %v20784_v46  ;;  %18220 = vmatprep.subr.bf16.mxu0 %v20788_v40  ;;  %v20848_v46 = vld [vmem:[#allocation11 + $0x6c] ss:$16 sps:$4 sm:$0xff]   ;;  %v20845_v40 = vld [vmem:[#allocation11 + $0x364] ss:$16 sps:$4 sm:$0xff]  }
 0x90a   :  { %14496 = vmatprep.subr.bf16.mxu1 %v20791_v52  ;;  %v20851_v52 = vld [vmem:[#allocation11 + $0x384] ss:$16 sps:$4 sm:$0xff]  }
 0x90c   :  { %18221 = vmatpush3.bf16.msra.mxu0 %v20792_v62  ;;  %v20852_v62 = vld [vmem:[#allocation11 + $0x88] ss:$16 sps:$4 sm:$0xff]  }
 0x90d   :  { %14497 = vmatpush1.bf16.msra.mxu1 %v20789_v30  ;;  %18441 = vmatprep.subr.bf16.mxu0 %v21764_v50  ;;  %v20849_v30 = vld [vmem:[#allocation11 + $0x380] ss:$16 sps:$4 sm:$0xff]  }
 0x90e   :  { %14507 = vmatprep.subr.bf16.mxu1 %v20795_v25  ;;  %v20857_v25 = vld [vmem:[#allocation11 + $0x3a4] ss:$16 sps:$4 sm:$0xff]  }
 0x90f   :  { %11848 = vmatmul.mubr.bf16.vlgmr.msra.gmra.mrb[88].mxu0 %v22451_v34  ;;  %v20801_v34 = vld [vmem:[#allocation11 + $0x240] ss:$16 sps:$4 sm:$0xff]  }
 0x910   :  { %14499 = vmatmul.mubr.bf16.vlgmr.msra.gmra.mrb[60].mxu1 %v22574_v4  ;;  %18442 = vmatpush3.bf16.msra.mxu0 %v20796_v39  ;;  %v20858_v39 = vld [vmem:[#allocation11 + $0xa8] ss:$16 sps:$4 sm:$0xff]  }
 0x911   :  { %14508 = vmatpush1.bf16.msra.mxu1 %v20793_v53  ;;  %14539 = vmatprep.mubr.bf16.mxu1 %v22578_v29  ;;  %v20855_v53 = vld [vmem:[#allocation11 + $0x3a0] ss:$16 sps:$4 sm:$0xff]  }
 0x912   :  { %18443 = vmatprep.subr.bf16.mxu0 %v21764_v50  ;;  %14509 = vmatprep.subr.bf16.mxu1 %v20799_v55  ;;  %v20866_v55 = vld [vmem:[#allocation11 + $0xcc] ss:$16 sps:$4 sm:$0xff]  }
 0x913   :  { %18457 = vmatprep.mubr.msk.bf16.mxu0 %vm21765_vm1, %v21764_v50 }
 0x914   :  { %18444 = vmatpush3.bf16.msra.mxu0 %v20800_v17  ;;  %v20863_v17 = vld [vmem:[#allocation11 + $0x3c4] ss:$16 sps:$4 sm:$0xff]  }
 0x915   :  { %14510 = vmatpush1.bf16.msra.mxu1 %v20797_v57  ;;  %18445 = vmatprep.subr.bf16.mxu0 %v21764_v50 }
 0x916   :  { %14511 = vmatprep.subr.bf16.mxu1 %v20803_v58 }
 0x918   :  { %18446 = vmatpush3.bf16.msra.mxu0 %v20804_v32  ;;  %v20864_v32 = vld [vmem:[#allocation11 + $0xc8] ss:$16 sps:$4 sm:$0xff]  }
 0x919   :  { %14512 = vmatpush1.bf16.msra.mxu1 %v20801_v34  ;;  %18447 = vmatprep.subr.bf16.mxu0 %v21764_v50 }
 0x91a   :  { %14513 = vmatprep.subr.bf16.mxu1 %v20807_v27  ;;  %v20861_v27 = vld [vmem:[#allocation11 + $0x3c0] ss:$16 sps:$4 sm:$0xff]  }
 0x91c   :  { %18448 = vmatpush3.bf16.msra.mxu0 %v20808_v45  ;;  %v20872_v45 = vld [vmem:[#allocation11 + $0xec] ss:$16 sps:$4 sm:$0xff]  }
 0x91d   :  { %14514 = vmatpush1.bf16.msra.mxu1 %v20805_v6  ;;  %18449 = vmatprep.subr.bf16.mxu0 %v21764_v50 }
 0x91e   :  { %14515 = vmatprep.subr.bf16.mxu1 %v20811_v5  ;;  %v20869_v5 = vld [vmem:[#allocation11 + $0x3e4] ss:$16 sps:$4 sm:$0xff]  }
 0x920   :  { %18450 = vmatpush3.bf16.msra.mxu0 %v20812_v9  ;;  %v3027_v9 = vrot.slane %v22557_v7, %v921_v63  ;;  %v20881_v63 = vld [vmem:[#allocation11 + $0x424] ss:$16 sps:$4 sm:$0xff]  }
 0x921   :  { %14516 = vmatpush1.bf16.msra.mxu1 %v20809_v43  ;;  %18451 = vmatprep.subr.bf16.mxu0 %v21764_v50  ;;  %v20870_v43 = vld [vmem:[#allocation11 + $0xe8] ss:$16 sps:$4 sm:$0xff]  }
 0x922   :  { %14517 = vmatprep.subr.bf16.mxu1 %v20815_v13  ;;  %v20867_v13 = vld [vmem:[#allocation11 + $0x3e0] ss:$16 sps:$4 sm:$0xff]  }
 0x924   :  { %18452 = vmatpush3.bf16.msra.mxu0 %v20816_v23  ;;  %v20878_v23 = vld [vmem:[#allocation11 + $0x10c] ss:$16 sps:$4 sm:$0xff]  }
 0x925   :  { %14518 = vmatpush1.bf16.msra.mxu1 %v20813_v28  ;;  %18453 = vmatprep.subr.bf16.mxu0 %v21764_v50  ;;  %v20875_v28 = vld [vmem:[#allocation11 + $0x404] ss:$16 sps:$4 sm:$0xff]  }
 0x926   :  { %14519 = vmatprep.subr.bf16.mxu1 %v20819_v8  ;;  %v18474_v8 = vadd.f32 %v22537_v54, %v3027_v9  ;;  %v20879_v54 = vld [vmem:[#allocation11 + $0x420] ss:$16 sps:$4 sm:$0xff]  }
 0x927   :  { %v20921_v9 = vld [vmem:[#allocation11 + $0x500] ss:$16 sps:$4 sm:$0xff]  }
 0x928   :  { %18454 = vmatpush3.bf16.msra.mxu0 %v20820_v31  ;;  %v20876_v31 = vld [vmem:[#allocation11 + $0x108] ss:$16 sps:$4 sm:$0xff]  }
 0x929   :  { %14520 = vmatpush1.bf16.msra.mxu1 %v20817_v33  ;;  %18455 = vmatprep.subr.bf16.mxu0 %v21764_v50  ;;  %v20873_v33 = vld [vmem:[#allocation11 + $0x400] ss:$16 sps:$4 sm:$0xff]  }
 0x92a   :  { %14521 = vmatprep.subr.bf16.mxu1 %v20823_v35  ;;  %v22604_v35 = vpack.c.bf16 %v22499_v20, %v22499_v20  ;;  %v20888_v20 = vld [vmem:[#allocation11 + $0x148] ss:$16 sps:$4 sm:$0xff]  }
 0x92c   :  { %18456 = vmatpush3.bf16.msra.mxu0 %v20824_v0  ;;  %v20884_v0 = vld [vmem:[#allocation11 + $0x12c] ss:$16 sps:$4 sm:$0xff]  }
 0x92d   :  { %14522 = vmatpush1.bf16.msra.mxu1 %v20821_v1  ;;  %14753 = vmatprep.subr.bf16.mxu0 %v20830_v12  ;;  %v22606_v1 = vpack.c.bf16 %v18474_v8, %v18474_v8  ;;  %v20882_v12 = vld [vmem:[#allocation11 + $0x128] ss:$16 sps:$4 sm:$0xff]   ;;  %v20938_v8 = vld [vmem:[#allocation11 + $0x24c] ss:$16 sps:$4 sm:$0xff]  }
 0x92e   :  { %14523 = vmatprep.subr.bf16.mxu1 %v20827_v36  ;;  %v20890_v36 = vld [vmem:[#allocation11 + $0x14c] ss:$16 sps:$4 sm:$0xff]  }
 0x92f   :  { %18458 = vmatmul.mubr.bf16.vlgmr.msra.gmra.mrb[92].mxu0 %v22467_v11  ;;  %v20846_v11 = vld [vmem:[#allocation11 + $0x68] ss:$16 sps:$4 sm:$0xff]  }
 0x930   :  { %14754 = vmatpush1.bf16.msra.mxu0 %v20828_v21  ;;  %14785 = vmatprep.mubr.bf16.mxu0 %v22563_v24  ;;  %v20854_v24 = vld [vmem:[#allocation11 + $0x8c] ss:$16 sps:$4 sm:$0xff]   ;;  %v20887_v21 = vld [vmem:[#allocation11 + $0x444] ss:$16 sps:$4 sm:$0xff]  }
 0x931   :  { %14524 = vmatpush1.bf16.msra.mxu1 %v20825_v38  ;;  %14755 = vmatprep.subr.bf16.mxu0 %v20836_v59  ;;  %v20885_v38 = vld [vmem:[#allocation11 + $0x440] ss:$16 sps:$4 sm:$0xff]   ;;  %v20896_v59 = vld [vmem:[#allocation11 + $0x16c] ss:$16 sps:$4 sm:$0xff]  }
 0x932   :  { %14525 = vmatprep.subr.bf16.mxu1 %v20833_v18  ;;  %v20893_v18 = vld [vmem:[#allocation11 + $0x464] ss:$16 sps:$4 sm:$0xff]  }
 0x934   :  { %14756 = vmatpush1.bf16.msra.mxu0 %v20834_v2  ;;  %v20894_v2 = vld [vmem:[#allocation11 + $0x168] ss:$16 sps:$4 sm:$0xff]  }
 0x935   :  { %14526 = vmatpush1.bf16.msra.mxu1 %v20831_v26  ;;  %14757 = vmatprep.subr.bf16.mxu0 %v20842_v56  ;;  %v20891_v26 = vld [vmem:[#allocation11 + $0x460] ss:$16 sps:$4 sm:$0xff]   ;;  %v20902_v56 = vld [vmem:[#allocation11 + $0x18c] ss:$16 sps:$4 sm:$0xff]  }
 0x936   :  { %14527 = vmatprep.subr.bf16.mxu1 %v20839_v41  ;;  %v20899_v41 = vld [vmem:[#allocation11 + $0x484] ss:$16 sps:$4 sm:$0xff]  }
 0x938   :  { %14758 = vmatpush1.bf16.msra.mxu0 %v20840_v48  ;;  %v20900_v48 = vld [vmem:[#allocation11 + $0x188] ss:$16 sps:$4 sm:$0xff]  }
 0x939   :  { %14528 = vmatpush1.bf16.msra.mxu1 %v20837_v42  ;;  %14759 = vmatprep.subr.bf16.mxu0 %v20848_v46  ;;  %v20897_v42 = vld [vmem:[#allocation11 + $0x480] ss:$16 sps:$4 sm:$0xff]   ;;  %v20908_v46 = vld [vmem:[#allocation11 + $0x1ac] ss:$16 sps:$4 sm:$0xff]  }
 0x93a   :  { %14529 = vmatprep.subr.bf16.mxu1 %v20845_v40  ;;  %v20905_v40 = vld [vmem:[#allocation11 + $0x4a4] ss:$16 sps:$4 sm:$0xff]  }
 0x93c   :  { %14760 = vmatpush1.bf16.msra.mxu0 %v20846_v11  ;;  %v20906_v11 = vld [vmem:[#allocation11 + $0x1a8] ss:$16 sps:$4 sm:$0xff]  }
 0x93d   :  { %14530 = vmatpush1.bf16.msra.mxu1 %v20843_v16  ;;  %14761 = vmatprep.subr.bf16.mxu0 %v20854_v24  ;;  %v20903_v16 = vld [vmem:[#allocation11 + $0x4a0] ss:$16 sps:$4 sm:$0xff]   ;;  %v20914_v24 = vld [vmem:[#allocation11 + $0x1cc] ss:$16 sps:$4 sm:$0xff]  }
 0x93e   :  { %14531 = vmatprep.subr.bf16.mxu1 %v20851_v52  ;;  %v20911_v52 = vld [vmem:[#allocation11 + $0x4c4] ss:$16 sps:$4 sm:$0xff]  }
 0x940   :  { %14762 = vmatpush1.bf16.msra.mxu0 %v20852_v62 }
 0x941   :  { %14532 = vmatpush1.bf16.msra.mxu1 %v20849_v30  ;;  %14763 = vmatprep.subr.bf16.mxu0 %v20860_v37  ;;  %v20912_v37 = vld [vmem:[#allocation11 + $0x1c8] ss:$16 sps:$4 sm:$0xff]  }
 0x942   :  { %14533 = vmatprep.subr.bf16.mxu1 %v20857_v25 }
 0x943   :  { %v22594_v57 = vpop.f32.mrb[44].mxu1 }
 0x944   :  { %v22596_v58 = vpop.f32.mrb[45].mxu1  ;;  %14764 = vmatpush1.bf16.msra.mxu0 %v20858_v39 }
 0x945   :  { %v11652_v34 = vpop.f32.mrb[46].mxu1  ;;  %14534 = vmatpush1.bf16.msra.mxu1 %v20855_v53  ;;  %14765 = vmatprep.subr.bf16.mxu0 %v20866_v55  ;;  %v20909_v53 = vld [vmem:[#allocation11 + $0x4c0] ss:$16 sps:$4 sm:$0xff]   ;;  %v20920_v55 = vld [vmem:[#allocation11 + $0x1ec] ss:$16 sps:$4 sm:$0xff]  }
 0x946   :  { %v11653_v6 = vpop.f32.mrb[47].mxu1  ;;  %14535 = vmatprep.subr.bf16.mxu1 %v20863_v17  ;;  %v20918_v34 = vld [vmem:[#allocation11 + $0x1e8] ss:$16 sps:$4 sm:$0xff]  }
 0x947   :  { %v20923_v6 = vld [vmem:[#allocation11 + $0x504] ss:$16 sps:$4 sm:$0xff]  }
 0x948   :  { %14766 = vmatpush1.bf16.msra.mxu0 %v20864_v32  ;;  %v20917_v32 = vld [vmem:[#allocation11 + $0x4e4] ss:$16 sps:$4 sm:$0xff]  }
 0x949   :  { %14536 = vmatpush1.bf16.msra.mxu1 %v20861_v27  ;;  %14767 = vmatprep.subr.bf16.mxu0 %v20872_v45  ;;  %v20915_v27 = vld [vmem:[#allocation11 + $0x4e0] ss:$16 sps:$4 sm:$0xff]   ;;  %v20926_v45 = vld [vmem:[#allocation11 + $0x20c] ss:$16 sps:$4 sm:$0xff]  }
 0x94a   :  { %14537 = vmatprep.subr.bf16.mxu1 %v20869_v5  ;;  %v20924_v5 = vld [vmem:[#allocation11 + $0x208] ss:$16 sps:$4 sm:$0xff]  }
 0x94c   :  { %14768 = vmatpush1.bf16.msra.mxu0 %v20870_v43  ;;  %v20932_v43 = vld [vmem:[#allocation11 + $0x22c] ss:$16 sps:$4 sm:$0xff]  }
 0x94d   :  { %14538 = vmatpush1.bf16.msra.mxu1 %v20867_v13  ;;  %14769 = vmatprep.subr.bf16.mxu0 %v20878_v23  ;;  %v20929_v13 = vld [vmem:[#allocation11 + $0x524] ss:$16 sps:$4 sm:$0xff]   ;;  %v20930_v23 = vld [vmem:[#allocation11 + $0x228] ss:$16 sps:$4 sm:$0xff]  }
 0x94e   :  { %14548 = vmatprep.subr.bf16.mxu1 %v20875_v28  ;;  %v20927_v28 = vld [vmem:[#allocation11 + $0x520] ss:$16 sps:$4 sm:$0xff]  }
 0x950   :  { %14540 = vmatmul.mubr.bf16.vlgmr.msra.gmra.mrb[60].mxu1 %v22604_v35  ;;  %14770 = vmatpush1.bf16.msra.mxu0 %v20876_v31  ;;  %v20935_v31 = vld [vmem:[#allocation11 + $0x544] ss:$16 sps:$4 sm:$0xff]  }
 0x951   :  { %14549 = vmatpush1.bf16.msra.mxu1 %v20873_v33  ;;  %14580 = vmatprep.mubr.bf16.mxu1 %v22606_v1  ;;  %v20936_v33 = vld [vmem:[#allocation11 + $0x248] ss:$16 sps:$4 sm:$0xff]  }
 0x952   :  { %14550 = vmatprep.subr.bf16.mxu1 %v20881_v63  ;;  %14771 = vmatprep.subr.bf16.mxu0 %v20884_v0  ;;  %v20933_v63 = vld [vmem:[#allocation11 + $0x540] ss:$16 sps:$4 sm:$0xff]   ;;  %v20944_v0 = vld [vmem:[#allocation11 + $0x26c] ss:$16 sps:$4 sm:$0xff]  }
 0x954   :  { %14772 = vmatpush1.bf16.msra.mxu0 %v20882_v12  ;;  %v20941_v12 = vld [vmem:[#allocation11 + $0x564] ss:$16 sps:$4 sm:$0xff]  }
 0x955   :  { %14551 = vmatpush1.bf16.msra.mxu1 %v20879_v54  ;;  %14773 = vmatprep.subr.bf16.mxu0 %v20890_v36  ;;  %v20939_v54 = vld [vmem:[#allocation11 + $0x560] ss:$16 sps:$4 sm:$0xff]   ;;  %v20947_v36 = vld [vmem:[#allocation11 + $0x584] ss:$16 sps:$4 sm:$0xff]  }
 0x956   :  { %14552 = vmatprep.subr.bf16.mxu1 %v20887_v21  ;;  %v20948_v21 = vld [vmem:[#allocation11 + $0x288] ss:$16 sps:$4 sm:$0xff]  }
 0x958   :  { %14774 = vmatpush1.bf16.msra.mxu0 %v20888_v20  ;;  %v20945_v20 = vld [vmem:[#allocation11 + $0x580] ss:$16 sps:$4 sm:$0xff]  }
 0x959   :  { %14553 = vmatpush1.bf16.msra.mxu1 %v20885_v38  ;;  %14775 = vmatprep.subr.bf16.mxu0 %v20896_v59  ;;  %v20956_v38 = vld [vmem:[#allocation11 + $0x2ac] ss:$16 sps:$4 sm:$0xff]   ;;  %v20953_v59 = vld [vmem:[#allocation11 + $0x5a4] ss:$16 sps:$4 sm:$0xff]  }
 0x95a   :  { %14554 = vmatprep.subr.bf16.mxu1 %v20893_v18  ;;  %v20954_v18 = vld [vmem:[#allocation11 + $0x2a8] ss:$16 sps:$4 sm:$0xff]  }
 0x95c   :  { %14776 = vmatpush1.bf16.msra.mxu0 %v20894_v2  ;;  %v20951_v2 = vld [vmem:[#allocation11 + $0x5a0] ss:$16 sps:$4 sm:$0xff]  }
 0x95d   :  { %14555 = vmatpush1.bf16.msra.mxu1 %v20891_v26  ;;  %14777 = vmatprep.subr.bf16.mxu0 %v20902_v56  ;;  %v20962_v26 = vld [vmem:[#allocation11 + $0x2cc] ss:$16 sps:$4 sm:$0xff]  }
 0x95e   :  { %14556 = vmatprep.subr.bf16.mxu1 %v20899_v41  ;;  %v20959_v41 = vld [vmem:[#allocation11 + $0x5c4] ss:$16 sps:$4 sm:$0xff]  }
 0x960   :  { %14778 = vmatpush1.bf16.msra.mxu0 %v20900_v48 }
 0x961   :  { %14557 = vmatpush1.bf16.msra.mxu1 %v20897_v42  ;;  %14779 = vmatprep.subr.bf16.mxu0 %v20908_v46 }
 0x962   :  { %14558 = vmatprep.subr.bf16.mxu1 %v20905_v40 }
 0x963   :  { %v18156_v62 = vpop.f32.mrb[48].mxu1 }
 0x964   :  { %v18157_v30 = vpop.f32.mrb[49].mxu1  ;;  %14780 = vmatpush1.bf16.msra.mxu0 %v20906_v11  ;;  %v20960_v11 = vld [vmem:[#allocation11 + $0x2c8] ss:$16 sps:$4 sm:$0xff]  }
 0x965   :  { %v22610_v25 = vadd.f32 %v18157_v30, %v18156_v62  ;;  %v18159_v39 = vpop.f32.mrb[50].mxu1  ;;  %14559 = vmatpush1.bf16.msra.mxu1 %v20903_v16  ;;  %14781 = vmatprep.subr.bf16.mxu0 %v20914_v24  ;;  %v20957_v62 = vld [vmem:[#allocation11 + $0x5c0] ss:$16 sps:$4 sm:$0xff]   ;;  %v20968_v30 = vld [vmem:[#allocation11 + $0x2ec] ss:$16 sps:$4 sm:$0xff]  }
 0x966   :  { %v18160_v17 = vpop.f32.mrb[51].mxu1  ;;  %14560 = vmatprep.subr.bf16.mxu1 %v20911_v52 }
 0x967   :  { %v20966_v17 = vld [vmem:[#allocation11 + $0x2e8] ss:$16 sps:$4 sm:$0xff]  }
 0x968   :  { %14782 = vmatpush1.bf16.msra.mxu0 %v20912_v37  ;;  %v3023_v37 = vrot.slane %v22557_v7, %v22409_v61 }
 0x969   :  { %14561 = vmatpush1.bf16.msra.mxu1 %v20909_v53  ;;  %14783 = vmatprep.subr.bf16.mxu0 %v20920_v55  ;;  %v20965_v53 = vld [vmem:[#allocation11 + $0x5e4] ss:$16 sps:$4 sm:$0xff]   ;;  %v3035_v55 = vrot.slane %v22557_v7, %v929_v3  ;;  %v20980_v7 = vld [vmem:[#allocation11 + $0x32c] ss:$16 sps:$4 sm:$0xff]  }
 0x96a   :  { %14562 = vmatprep.subr.bf16.mxu1 %v20917_v32  ;;  %v20963_v32 = vld [vmem:[#allocation11 + $0x5e0] ss:$16 sps:$4 sm:$0xff]   ;;  %v20977_v3 = vld [vmem:[#allocation11 + $0x624] ss:$16 sps:$4 sm:$0xff]  }
 0x96c   :  { %14784 = vmatpush1.bf16.msra.mxu0 %v20918_v34  ;;  %v20974_v34 = vld [vmem:[#allocation11 + $0x30c] ss:$16 sps:$4 sm:$0xff]  }
 0x96d   :  { %14563 = vmatpush1.bf16.msra.mxu1 %v20915_v27  ;;  %14794 = vmatprep.subr.bf16.mxu0 %v20926_v45  ;;  %v18473_v27 = vadd.f32 %v22535_v10, %v3023_v37  ;;  %v20971_v45 = vld [vmem:[#allocation11 + $0x604] ss:$16 sps:$4 sm:$0xff]   ;;  %v20978_v10 = vld [vmem:[#allocation11 + $0x328] ss:$16 sps:$4 sm:$0xff]  }
 0x96e   :  { %14564 = vmatprep.subr.bf16.mxu1 %v20923_v6  ;;  %v18476_v6 = vadd.f32 %v22529_v22, %v3035_v55  ;;  %v20975_v22 = vld [vmem:[#allocation11 + $0x620] ss:$16 sps:$4 sm:$0xff]   ;;  %v21016_v55 = vld [vmem:[#allocation11 + $0x3ec] ss:$16 sps:$4 sm:$0xff]  }
 0x96f   :  { %14786 = vmatmul.mubr.bf16.vlgmr.msra.gmra.mrb[96].mxu0 %v22574_v4  ;;  %v20942_v4 = vld [vmem:[#allocation11 + $0x268] ss:$16 sps:$4 sm:$0xff]  }
 0x970   :  { %14795 = vmatpush1.bf16.msra.mxu0 %v20924_v5  ;;  %14826 = vmatprep.mubr.bf16.mxu0 %v22578_v29  ;;  %v20950_v29 = vld [vmem:[#allocation11 + $0x28c] ss:$16 sps:$4 sm:$0xff]   ;;  %v20972_v5 = vld [vmem:[#allocation11 + $0x308] ss:$16 sps:$4 sm:$0xff]  }
 0x971   :  { %14565 = vmatpush1.bf16.msra.mxu1 %v20921_v9  ;;  %14796 = vmatprep.subr.bf16.mxu0 %v20932_v43  ;;  %v20969_v9 = vld [vmem:[#allocation11 + $0x600] ss:$16 sps:$4 sm:$0xff]   ;;  %v22627_v43 = vpack.c.bf16 %v18473_v27, %v18473_v27 }
 0x972   :  { %14566 = vmatprep.subr.bf16.mxu1 %v20929_v13  ;;  %v22629_v13 = vpack.c.bf16 %v18476_v6, %v18476_v6  ;;  %v21022_v6 = vld [vmem:[#allocation11 + $0x40c] ss:$16 sps:$4 sm:$0xff]  }
 0x974   :  { %14797 = vmatpush1.bf16.msra.mxu0 %v20930_v23  ;;  %v20986_v23 = vld [vmem:[#allocation11 + $0x34c] ss:$16 sps:$4 sm:$0xff]  }
 0x975   :  { %14567 = vmatpush1.bf16.msra.mxu1 %v20927_v28  ;;  %14798 = vmatprep.subr.bf16.mxu0 %v20938_v8  ;;  %v20983_v28 = vld [vmem:[#allocation11 + $0x644] ss:$16 sps:$4 sm:$0xff]   ;;  %v20984_v8 = vld [vmem:[#allocation11 + $0x348] ss:$16 sps:$4 sm:$0xff]  }
 0x976   :  { %14568 = vmatprep.subr.bf16.mxu1 %v20935_v31  ;;  %v20981_v31 = vld [vmem:[#allocation11 + $0x640] ss:$16 sps:$4 sm:$0xff]  }
 0x978   :  { %14799 = vmatpush1.bf16.msra.mxu0 %v20936_v33  ;;  %v20992_v33 = vld [vmem:[#allocation11 + $0x36c] ss:$16 sps:$4 sm:$0xff]  }
 0x979   :  { %14569 = vmatpush1.bf16.msra.mxu1 %v20933_v63  ;;  %14800 = vmatprep.subr.bf16.mxu0 %v20944_v0  ;;  %v20989_v63 = vld [vmem:[#allocation11 + $0x664] ss:$16 sps:$4 sm:$0xff]   ;;  %v20990_v0 = vld [vmem:[#allocation11 + $0x368] ss:$16 sps:$4 sm:$0xff]  }
 0x97a   :  { %14570 = vmatprep.subr.bf16.mxu1 %v20941_v12  ;;  %v20987_v12 = vld [vmem:[#allocation11 + $0x660] ss:$16 sps:$4 sm:$0xff]  }
 0x97c   :  { %14801 = vmatpush1.bf16.msra.mxu0 %v20942_v4  ;;  %v20998_v4 = vld [vmem:[#allocation11 + $0x38c] ss:$16 sps:$4 sm:$0xff]  }
 0x97d   :  { %14571 = vmatpush1.bf16.msra.mxu1 %v20939_v54  ;;  %14802 = vmatprep.subr.bf16.mxu0 %v20950_v29  ;;  %v20995_v54 = vld [vmem:[#allocation11 + $0x684] ss:$16 sps:$4 sm:$0xff]   ;;  %v20996_v29 = vld [vmem:[#allocation11 + $0x388] ss:$16 sps:$4 sm:$0xff]  }
 0x97e   :  { %14572 = vmatprep.subr.bf16.mxu1 %v20947_v36  ;;  %v20993_v36 = vld [vmem:[#allocation11 + $0x680] ss:$16 sps:$4 sm:$0xff]  }
 0x980   :  { %14803 = vmatpush1.bf16.msra.mxu0 %v20948_v21  ;;  %v21004_v21 = vld [vmem:[#allocation11 + $0x3ac] ss:$16 sps:$4 sm:$0xff]  }
 0x981   :  { %14573 = vmatpush1.bf16.msra.mxu1 %v20945_v20  ;;  %14804 = vmatprep.subr.bf16.mxu0 %v20956_v38  ;;  %v21001_v20 = vld [vmem:[#allocation11 + $0x6a4] ss:$16 sps:$4 sm:$0xff]   ;;  %v21002_v38 = vld [vmem:[#allocation11 + $0x3a8] ss:$16 sps:$4 sm:$0xff]  }
 0x982   :  { %v22614_v56 = vpop.f32.mrb[76].mxu0  ;;  %14574 = vmatprep.subr.bf16.mxu1 %v20953_v59  ;;  %v22633_v59 = vld [vmem:[#allocation10 + $0x8] sm:$0x1f] }
 0x983   :  { %v18200_v48 = vpop.f32.mrb[52].mxu1  ;;  %v22616_v42 = vpop.f32.mrb[77].mxu0 }
 0x984   :  { %v18201_v46 = vpop.f32.mrb[53].mxu1  ;;  %v11365_v40 = vpop.f32.mrb[78].mxu0  ;;  %14805 = vmatpush1.bf16.msra.mxu0 %v20954_v18  ;;  %v20999_v18 = vld [vmem:[#allocation11 + $0x6a0] ss:$16 sps:$4 sm:$0xff]  }
 0x985   :  { %v22618_v16 = vadd.f32 %v18201_v46, %v18200_v48  ;;  %v18203_v24 = vpop.f32.mrb[54].mxu1  ;;  %14575 = vmatpush1.bf16.msra.mxu1 %v20951_v2  ;;  %v11366_v52 = vpop.f32.mrb[79].mxu0  ;;  %14806 = vmatprep.subr.bf16.mxu0 %v20962_v26  ;;  %v21010_v2 = vld [vmem:[#allocation11 + $0x3cc] ss:$16 sps:$4 sm:$0xff]   ;;  %v21007_v48 = vld [vmem:[#allocation11 + $0x6c4] ss:$16 sps:$4 sm:$0xff]  }
 0x986   :  { %v18204_v39 = vpop.f32.mrb[55].mxu1  ;;  %14576 = vmatprep.subr.bf16.mxu1 %v20959_v41  ;;  %v3055_v41 = vrot.slane %v22633_v59, %v22409_v61  ;;  %v21013_v61 = vld [vmem:[#allocation11 + $0x6e4] ss:$16 sps:$4 sm:$0xff]  }
 0x988   :  { %14807 = vmatpush1.bf16.msra.mxu0 %v20960_v11 }
 0x989   :  { %14577 = vmatpush1.bf16.msra.mxu1 %v20957_v62  ;;  %14808 = vmatprep.subr.bf16.mxu0 %v20968_v30  ;;  %v21008_v62 = vld [vmem:[#allocation11 + $0x3c8] ss:$16 sps:$4 sm:$0xff]  }
 0x98a   :  { %14578 = vmatprep.subr.bf16.mxu1 %v20965_v53  ;;  %v21005_v53 = vld [vmem:[#allocation11 + $0x6c0] ss:$16 sps:$4 sm:$0xff]  }
 0x98c   :  { %14809 = vmatpush1.bf16.msra.mxu0 %v20966_v17 }
 0x98d   :  { %14579 = vmatpush1.bf16.msra.mxu1 %v20963_v32  ;;  %14810 = vmatprep.subr.bf16.mxu0 %v20974_v34  ;;  %v21014_v34 = vld [vmem:[#allocation11 + $0x3e8] ss:$16 sps:$4 sm:$0xff]  }
 0x98e   :  { %14589 = vmatprep.subr.bf16.mxu1 %v20971_v45  ;;  %v21011_v45 = vld [vmem:[#allocation11 + $0x6e0] ss:$16 sps:$4 sm:$0xff]  }
 0x990   :  { %14581 = vmatmul.mubr.bf16.vlgmr.msra.gmra.mrb[60].mxu1 %v22627_v43  ;;  %14811 = vmatpush1.bf16.msra.mxu0 %v20972_v5  ;;  %v21019_v5 = vld [vmem:[#allocation11 + $0x704] ss:$16 sps:$4 sm:$0xff]  }
 0x991   :  { %14590 = vmatpush1.bf16.msra.mxu1 %v20969_v9  ;;  %14621 = vmatprep.mubr.bf16.mxu1 %v22629_v13  ;;  %v21020_v9 = vld [vmem:[#allocation11 + $0x408] ss:$16 sps:$4 sm:$0xff]  }
 0x992   :  { %14591 = vmatprep.subr.bf16.mxu1 %v20977_v3  ;;  %14812 = vmatprep.subr.bf16.mxu0 %v20980_v7  ;;  %v21017_v3 = vld [vmem:[#allocation11 + $0x700] ss:$16 sps:$4 sm:$0xff]   ;;  %v21028_v7 = vld [vmem:[#allocation11 + $0x42c] ss:$16 sps:$4 sm:$0xff]  }
 0x994   :  { %14813 = vmatpush1.bf16.msra.mxu0 %v20978_v10  ;;  %v21025_v10 = vld [vmem:[#allocation11 + $0x724] ss:$16 sps:$4 sm:$0xff]  }
 0x995   :  { %14592 = vmatpush1.bf16.msra.mxu1 %v20975_v22  ;;  %14814 = vmatprep.subr.bf16.mxu0 %v20986_v23  ;;  %v21023_v22 = vld [vmem:[#allocation11 + $0x720] ss:$16 sps:$4 sm:$0xff]   ;;  %v21034_v23 = vld [vmem:[#allocation11 + $0x44c] ss:$16 sps:$4 sm:$0xff]  }
 0x996   :  { %14593 = vmatprep.subr.bf16.mxu1 %v20983_v28  ;;  %v21031_v28 = vld [vmem:[#allocation11 + $0x744] ss:$16 sps:$4 sm:$0xff]  }
 0x998   :  { %14815 = vmatpush1.bf16.msra.mxu0 %v20984_v8  ;;  %v21032_v8 = vld [vmem:[#allocation11 + $0x448] ss:$16 sps:$4 sm:$0xff]  }
 0x999   :  { %14594 = vmatpush1.bf16.msra.mxu1 %v20981_v31  ;;  %14816 = vmatprep.subr.bf16.mxu0 %v20992_v33  ;;  %v21029_v31 = vld [vmem:[#allocation11 + $0x740] ss:$16 sps:$4 sm:$0xff]   ;;  %v21040_v33 = vld [vmem:[#allocation11 + $0x46c] ss:$16 sps:$4 sm:$0xff]  }
 0x99a   :  { %14595 = vmatprep.subr.bf16.mxu1 %v20989_v63  ;;  %v21037_v63 = vld [vmem:[#allocation11 + $0x764] ss:$16 sps:$4 sm:$0xff]  }
 0x99c   :  { %14817 = vmatpush1.bf16.msra.mxu0 %v20990_v0  ;;  %v21035_v0 = vld [vmem:[#allocation11 + $0x760] ss:$16 sps:$4 sm:$0xff]  }
 0x99d   :  { %14596 = vmatpush1.bf16.msra.mxu1 %v20987_v12  ;;  %14818 = vmatprep.subr.bf16.mxu0 %v20998_v4  ;;  %v21043_v12 = vld [vmem:[#allocation11 + $0x784] ss:$16 sps:$4 sm:$0xff]   ;;  %v21044_v4 = vld [vmem:[#allocation11 + $0x488] ss:$16 sps:$4 sm:$0xff]  }
 0x99e   :  { %14597 = vmatprep.subr.bf16.mxu1 %v20995_v54  ;;  %v21041_v54 = vld [vmem:[#allocation11 + $0x780] ss:$16 sps:$4 sm:$0xff]  }
 0x9a0   :  { %14819 = vmatpush1.bf16.msra.mxu0 %v20996_v29  ;;  %v21052_v29 = vld [vmem:[#allocation11 + $0x4ac] ss:$16 sps:$4 sm:$0xff]  }
 0x9a1   :  { %14598 = vmatpush1.bf16.msra.mxu1 %v20993_v36  ;;  %14820 = vmatprep.subr.bf16.mxu0 %v21004_v21  ;;  %v21049_v36 = vld [vmem:[#allocation11 + $0x7a4] ss:$16 sps:$4 sm:$0xff]   ;;  %v21050_v21 = vld [vmem:[#allocation11 + $0x4a8] ss:$16 sps:$4 sm:$0xff]  }
 0x9a2   :  { %v18134_v26 = vpop.f32.mrb[80].mxu0  ;;  %14599 = vmatprep.subr.bf16.mxu1 %v21001_v20  ;;  %v21047_v20 = vld [vmem:[#allocation11 + $0x7a0] ss:$16 sps:$4 sm:$0xff]  }
 0x9a3   :  { %v18244_v46 = vpop.f32.mrb[56].mxu1  ;;  %v18135_v40 = vpop.f32.mrb[81].mxu0 }
 0x9a4   :  { %v18136_v11 = vadd.f32 %v18135_v40, %v18134_v26  ;;  %v18245_v24 = vpop.f32.mrb[57].mxu1  ;;  %v18137_v52 = vpop.f32.mrb[82].mxu0  ;;  %14821 = vmatpush1.bf16.msra.mxu0 %v21002_v38  ;;  %v21058_v38 = vld [vmem:[#allocation11 + $0x4cc] ss:$16 sps:$4 sm:$0xff]  }
 0x9a5   :  { %v22637_v30 = vadd.f32 %v18245_v24, %v18244_v46  ;;  %v18247_v37 = vpop.f32.mrb[58].mxu1  ;;  %14600 = vmatpush1.bf16.msra.mxu1 %v20999_v18  ;;  %v18138_v39 = vpop.f32.mrb[83].mxu0  ;;  %14822 = vmatprep.subr.bf16.mxu0 %v21010_v2  ;;  %v21055_v2 = vld [vmem:[#allocation11 + $0x7c4] ss:$16 sps:$4 sm:$0xff]   ;;  %v21056_v46 = vld [vmem:[#allocation11 + $0x4c8] ss:$16 sps:$4 sm:$0xff]  }
 0x9a6   :  { %v11690_v17 = vadd.f32 %v18136_v11, %v3055_v41  ;;  %v18248_v32 = vpop.f32.mrb[59].mxu1  ;;  %14601 = vmatprep.subr.bf16.mxu1 %v21007_v48  ;;  %v21053_v11 = vld [vmem:[#allocation11 + $0x7c0] ss:$16 sps:$4 sm:$0xff]   ;;  %v21064_v24 = vld [vmem:[#allocation11 + $0x4ec] ss:$16 sps:$4 sm:$0xff]  }
 0x9a7   :  { %v21491_v52 = vld [vmem:[#allocation10] sm:$0xff] }
 0x9a8   :  { %14823 = vmatpush1.bf16.msra.mxu0 %v21008_v62  ;;  %v22640_v27 = vadd.f32 %v22610_v25, %v11690_v17  ;;  %v21026_v25 = vld [vmem:[#allocation11 + $0x428] ss:$16 sps:$4 sm:$0xff]   ;;  %v3031_v62 = vrot.slane %v21491_v52, %v925_v60  ;;  %v21061_v39 = vld [vmem:[#allocation11 + $0x7e4] ss:$16 sps:$4 sm:$0xff]   ;;  %v21059_v32 = vld [vmem:[#allocation11 + $0x7e0] ss:$16 sps:$4 sm:$0xff]  }
 0x9a9   :  { %14602 = vmatpush1.bf16.msra.mxu1 %v21005_v53  ;;  %14824 = vmatprep.subr.bf16.mxu0 %v21016_v55  ;;  %v3043_v53 = vrot.slane %v22633_v59, %v22342_v15  ;;  %v21062_v55 = vld [vmem:[#allocation11 + $0x4e8] ss:$16 sps:$4 sm:$0xff]   ;;  %v21118_v52 = vld [vmem:[#allocation11 + $0x60c] ss:$16 sps:$4 sm:$0xff]  }
 0x9aa   :  { %14603 = vmatprep.subr.bf16.mxu1 %v21013_v61  ;;  %v21070_v61 = vld [vmem:[#allocation11 + $0x50c] ss:$16 sps:$4 sm:$0xff]  }
 0x9ab   :  { %v18478_v60 = vadd.f32 %v22616_v42, %v3043_v53  ;;  %v21071_v42 = vld [vmem:[#allocation11 + $0x820] ss:$16 sps:$4 sm:$0xff]   ;;  %v21124_v53 = vld [vmem:[#allocation11 + $0x62c] ss:$16 sps:$4 sm:$0xff]  }
 0x9ac   :  { %14825 = vmatpush1.bf16.msra.mxu0 %v21014_v34  ;;  %v18475_v34 = vadd.f32 %v22527_v19, %v3031_v62  ;;  %v21074_v19 = vld [vmem:[#allocation11 + $0x528] ss:$16 sps:$4 sm:$0xff]   ;;  %v21115_v62 = vld [vmem:[#allocation11 + $0x904] ss:$16 sps:$4 sm:$0xff]  }
 0x9ad   :  { %14604 = vmatpush1.bf16.msra.mxu1 %v21011_v45  ;;  %14835 = vmatprep.subr.bf16.mxu0 %v21022_v6  ;;  %v21065_v45 = vld [vmem:[#allocation11 + $0x800] ss:$16 sps:$4 sm:$0xff]  }
 0x9ae   :  { %14605 = vmatprep.subr.bf16.mxu1 %v21019_v5  ;;  %v22654_v6 = vpack.c.bf16 %v18475_v34, %v18475_v34  ;;  %v21076_v5 = vld [vmem:[#allocation11 + $0x52c] ss:$16 sps:$4 sm:$0xff]   ;;  %v21128_v34 = vld [vmem:[#allocation11 + $0x648] ss:$16 sps:$4 sm:$0xff]  }
 0x9af   :  { %14827 = vmatmul.mubr.bf16.vlgmr.msra.gmra.mrb[96].mxu0 %v22604_v35  ;;  %v21038_v35 = vld [vmem:[#allocation11 + $0x468] ss:$16 sps:$4 sm:$0xff]  }
 0x9b0   :  { %14836 = vmatpush1.bf16.msra.mxu0 %v21020_v9  ;;  %14867 = vmatprep.mubr.bf16.mxu0 %v22606_v1  ;;  %v21046_v1 = vld [vmem:[#allocation11 + $0x48c] ss:$16 sps:$4 sm:$0xff]   ;;  %v22656_v9 = vpack.c.bf16 %v18478_v60, %v18478_v60 }
 0x9b1   :  { %14606 = vmatpush1.bf16.msra.mxu1 %v21017_v3  ;;  %14837 = vmatprep.subr.bf16.mxu0 %v21028_v7  ;;  %v21082_v3 = vld [vmem:[#allocation11 + $0x54c] ss:$16 sps:$4 sm:$0xff]   ;;  %v21079_v7 = vld [vmem:[#allocation11 + $0x844] ss:$16 sps:$4 sm:$0xff]  }
 0x9b2   :  { %14607 = vmatprep.subr.bf16.mxu1 %v21025_v10  ;;  %v21080_v10 = vld [vmem:[#allocation11 + $0x548] ss:$16 sps:$4 sm:$0xff]   ;;  %v21136_v60 = vld [vmem:[#allocation11 + $0x66c] ss:$16 sps:$4 sm:$0xff]  }
 0x9b4   :  { %14838 = vmatpush1.bf16.msra.mxu0 %v21026_v25  ;;  %v21077_v25 = vld [vmem:[#allocation11 + $0x840] ss:$16 sps:$4 sm:$0xff]  }
 0x9b5   :  { %14608 = vmatpush1.bf16.msra.mxu1 %v21023_v22  ;;  %14839 = vmatprep.subr.bf16.mxu0 %v21034_v23  ;;  %v21088_v22 = vld [vmem:[#allocation11 + $0x56c] ss:$16 sps:$4 sm:$0xff]   ;;  %v21085_v23 = vld [vmem:[#allocation11 + $0x864] ss:$16 sps:$4 sm:$0xff]  }
 0x9b6   :  { %14609 = vmatprep.subr.bf16.mxu1 %v21031_v28  ;;  %v21086_v28 = vld [vmem:[#allocation11 + $0x568] ss:$16 sps:$4 sm:$0xff]  }
 0x9b8   :  { %14840 = vmatpush1.bf16.msra.mxu0 %v21032_v8  ;;  %v21083_v8 = vld [vmem:[#allocation11 + $0x860] ss:$16 sps:$4 sm:$0xff]  }
 0x9b9   :  { %14610 = vmatpush1.bf16.msra.mxu1 %v21029_v31  ;;  %14841 = vmatprep.subr.bf16.mxu0 %v21040_v33  ;;  %v21094_v31 = vld [vmem:[#allocation11 + $0x58c] ss:$16 sps:$4 sm:$0xff]   ;;  %v21091_v33 = vld [vmem:[#allocation11 + $0x884] ss:$16 sps:$4 sm:$0xff]  }
 0x9ba   :  { %14611 = vmatprep.subr.bf16.mxu1 %v21037_v63  ;;  %v21092_v63 = vld [vmem:[#allocation11 + $0x588] ss:$16 sps:$4 sm:$0xff]  }
 0x9bc   :  { %14842 = vmatpush1.bf16.msra.mxu0 %v21038_v35  ;;  %v21089_v35 = vld [vmem:[#allocation11 + $0x880] ss:$16 sps:$4 sm:$0xff]  }
 0x9bd   :  { %14612 = vmatpush1.bf16.msra.mxu1 %v21035_v0  ;;  %14843 = vmatprep.subr.bf16.mxu0 %v21046_v1  ;;  %v21100_v0 = vld [vmem:[#allocation11 + $0x5ac] ss:$16 sps:$4 sm:$0xff]   ;;  %v21097_v1 = vld [vmem:[#allocation11 + $0x8a4] ss:$16 sps:$4 sm:$0xff]  }
 0x9be   :  { %14613 = vmatprep.subr.bf16.mxu1 %v21043_v12  ;;  %v21098_v12 = vld [vmem:[#allocation11 + $0x5a8] ss:$16 sps:$4 sm:$0xff]  }
 0x9c0   :  { %14844 = vmatpush1.bf16.msra.mxu0 %v21044_v4  ;;  %v21095_v4 = vld [vmem:[#allocation11 + $0x8a0] ss:$16 sps:$4 sm:$0xff]  }
 0x9c1   :  { %14614 = vmatpush1.bf16.msra.mxu1 %v21041_v54  ;;  %14845 = vmatprep.subr.bf16.mxu0 %v21052_v29  ;;  %v21106_v54 = vld [vmem:[#allocation11 + $0x5cc] ss:$16 sps:$4 sm:$0xff]  }
 0x9c2   :  { %v18178_v18 = vpop.f32.mrb[84].mxu0  ;;  %14615 = vmatprep.subr.bf16.mxu1 %v21049_v36  ;;  %v21103_v36 = vld [vmem:[#allocation11 + $0x8c4] ss:$16 sps:$4 sm:$0xff]  }
 0x9c3   :  { %v18179_v26 = vpop.f32.mrb[85].mxu0 }
 0x9c4   :  { %v18180_v41 = vadd.f32 %v18179_v26, %v18178_v18  ;;  %v18181_v48 = vpop.f32.mrb[86].mxu0  ;;  %14846 = vmatpush1.bf16.msra.mxu0 %v21050_v21  ;;  %v21104_v18 = vld [vmem:[#allocation11 + $0x5c8] ss:$16 sps:$4 sm:$0xff]   ;;  %v21101_v26 = vld [vmem:[#allocation11 + $0x8c0] ss:$16 sps:$4 sm:$0xff]  }
 0x9c5   :  { %14616 = vmatpush1.bf16.msra.mxu1 %v21047_v20  ;;  %v18182_v40 = vpop.f32.mrb[87].mxu0  ;;  %14847 = vmatprep.subr.bf16.mxu0 %v21058_v38 }
 0x9c6   :  { %v11770_v37 = vadd.f32 %v18180_v41, %v22640_v27  ;;  %14617 = vmatprep.subr.bf16.mxu1 %v21055_v2  ;;  %v21068_v27 = vld [vmem:[#allocation11 + $0x508] ss:$16 sps:$4 sm:$0xff]   ;;  %v21112_v41 = vld [vmem:[#allocation11 + $0x5ec] ss:$16 sps:$4 sm:$0xff]  }
 0x9c7   :  { %v21110_v40 = vld [vmem:[#allocation11 + $0x5e8] ss:$16 sps:$4 sm:$0xff]  }
 0x9c8   :  { %14848 = vmatpush1.bf16.msra.mxu0 %v21056_v46  ;;  %v22650_v17 = vadd.f32 %v22618_v16, %v11770_v37  ;;  %v21073_v16 = vld [vmem:[#allocation11 + $0x824] ss:$16 sps:$4 sm:$0xff]   ;;  %v21116_v37 = vld [vmem:[#allocation11 + $0x608] ss:$16 sps:$4 sm:$0xff]  }
 0x9c9   :  { %14618 = vmatpush1.bf16.msra.mxu1 %v21053_v11  ;;  %14849 = vmatprep.subr.bf16.mxu0 %v21064_v24  ;;  %v21109_v46 = vld [vmem:[#allocation11 + $0x8e4] ss:$16 sps:$4 sm:$0xff]   ;;  %v21107_v24 = vld [vmem:[#allocation11 + $0x8e0] ss:$16 sps:$4 sm:$0xff]  }
 0x9ca   :  { %14619 = vmatprep.subr.bf16.mxu1 %v21061_v39  ;;  %v21113_v39 = vld [vmem:[#allocation11 + $0x900] ss:$16 sps:$4 sm:$0xff]  }
 0x9cc   :  { %14850 = vmatpush1.bf16.msra.mxu0 %v21062_v55  ;;  %v21121_v55 = vld [vmem:[#allocation11 + $0x924] ss:$16 sps:$4 sm:$0xff]  }
 0x9cd   :  { %14620 = vmatpush1.bf16.msra.mxu1 %v21059_v32  ;;  %14851 = vmatprep.subr.bf16.mxu0 %v21070_v61  ;;  %v21130_v32 = vld [vmem:[#allocation11 + $0x64c] ss:$16 sps:$4 sm:$0xff]   ;;  %v21127_v61 = vld [vmem:[#allocation11 + $0x944] ss:$16 sps:$4 sm:$0xff]  }
 0x9ce   :  { %14630 = vmatprep.subr.bf16.mxu1 %v21067_v44  ;;  %v21125_v44 = vld [vmem:[#allocation11 + $0x940] ss:$16 sps:$4 sm:$0xff]  }
 0x9d0   :  { %14622 = vmatmul.mubr.bf16.vlgmr.msra.gmra.mrb[60].mxu1 %v22654_v6  ;;  %14852 = vmatpush1.bf16.msra.mxu0 %v21068_v27  ;;  %v21133_v27 = vld [vmem:[#allocation11 + $0x964] ss:$16 sps:$4 sm:$0xff]  }
 0x9d1   :  { %14631 = vmatpush1.bf16.msra.mxu1 %v21065_v45  ;;  %14662 = vmatprep.mubr.bf16.mxu1 %v22656_v9  ;;  %v21131_v45 = vld [vmem:[#allocation11 + $0x960] ss:$16 sps:$4 sm:$0xff]  }
 0x9d2   :  { %14632 = vmatprep.subr.bf16.mxu1 %v21073_v16  ;;  %14853 = vmatprep.subr.bf16.mxu0 %v21076_v5  ;;  %v21139_v16 = vld [vmem:[#allocation11 + $0x984] ss:$16 sps:$4 sm:$0xff]   ;;  %v21140_v5 = vld [vmem:[#allocation11 + $0x688] ss:$16 sps:$4 sm:$0xff]  }
 0x9d4   :  { %14854 = vmatpush1.bf16.msra.mxu0 %v21074_v19  ;;  %v21137_v19 = vld [vmem:[#allocation11 + $0x980] ss:$16 sps:$4 sm:$0xff]  }
 0x9d5   :  { %14633 = vmatpush1.bf16.msra.mxu1 %v21071_v42  ;;  %14855 = vmatprep.subr.bf16.mxu0 %v21082_v3  ;;  %v21148_v42 = vld [vmem:[#allocation11 + $0x6ac] ss:$16 sps:$4 sm:$0xff]   ;;  %v21145_v3 = vld [vmem:[#allocation11 + $0x9a4] ss:$16 sps:$4 sm:$0xff]  }
 0x9d6   :  { %14634 = vmatprep.subr.bf16.mxu1 %v21079_v7  ;;  %v21146_v7 = vld [vmem:[#allocation11 + $0x6a8] ss:$16 sps:$4 sm:$0xff]  }
 0x9d8   :  { %14856 = vmatpush1.bf16.msra.mxu0 %v21080_v10  ;;  %v21143_v10 = vld [vmem:[#allocation11 + $0x9a0] ss:$16 sps:$4 sm:$0xff]  }
 0x9d9   :  { %14635 = vmatpush1.bf16.msra.mxu1 %v21077_v25  ;;  %14857 = vmatprep.subr.bf16.mxu0 %v21088_v22  ;;  %v21154_v25 = vld [vmem:[#allocation11 + $0x6cc] ss:$16 sps:$4 sm:$0xff]  }
 0x9da   :  { %14636 = vmatprep.subr.bf16.mxu1 %v21085_v23  ;;  %v21151_v23 = vld [vmem:[#allocation11 + $0x9c4] ss:$16 sps:$4 sm:$0xff]  }
 0x9dc   :  { %14858 = vmatpush1.bf16.msra.mxu0 %v21086_v28 }
 0x9dd   :  { %14637 = vmatpush1.bf16.msra.mxu1 %v21083_v8  ;;  %14859 = vmatprep.subr.bf16.mxu0 %v21094_v31 }
 0x9de   :  { %14638 = vmatprep.subr.bf16.mxu1 %v21091_v33  ;;  %v21152_v33 = vld [vmem:[#allocation11 + $0x6c8] ss:$16 sps:$4 sm:$0xff]  }
 0x9e0   :  { %14860 = vmatpush1.bf16.msra.mxu0 %v21092_v63 }
 0x9e1   :  { %14639 = vmatpush1.bf16.msra.mxu1 %v21089_v35  ;;  %14861 = vmatprep.subr.bf16.mxu0 %v21100_v0  ;;  %v21149_v35 = vld [vmem:[#allocation11 + $0x9c0] ss:$16 sps:$4 sm:$0xff]   ;;  %v21160_v0 = vld [vmem:[#allocation11 + $0x6ec] ss:$16 sps:$4 sm:$0xff]  }
 0x9e2   :  { %v18222_v29 = vpop.f32.mrb[88].mxu0  ;;  %14640 = vmatprep.subr.bf16.mxu1 %v21097_v1  ;;  %v3039_v1 = vrot.slane %v22633_v59, %v22337_v49 }
 0x9e3   :  { %v18223_v21 = vpop.f32.mrb[89].mxu0 }
 0x9e4   :  { %v18224_v20 = vadd.f32 %v18223_v21, %v18222_v29  ;;  %v18225_v38 = vpop.f32.mrb[90].mxu0  ;;  %14862 = vmatpush1.bf16.msra.mxu0 %v21098_v12  ;;  %v21157_v12 = vld [vmem:[#allocation11 + $0x9e4] ss:$16 sps:$4 sm:$0xff]   ;;  %v21155_v29 = vld [vmem:[#allocation11 + $0x9e0] ss:$16 sps:$4 sm:$0xff]   ;;  %v18477_v21 = vadd.f32 %v22614_v56, %v3039_v1 }
 0x9e5   :  { %14641 = vmatpush1.bf16.msra.mxu1 %v21095_v4  ;;  %v18226_v2 = vpop.f32.mrb[91].mxu0  ;;  %14863 = vmatprep.subr.bf16.mxu0 %v21106_v54  ;;  %v3051_v4 = vrot.slane %v22633_v59, %v22357_v47  ;;  %v21158_v54 = vld [vmem:[#allocation11 + $0x6e8] ss:$16 sps:$4 sm:$0xff]   ;;  %v21232_v1 = vld [vmem:[#allocation11 + $0x86c] ss:$16 sps:$4 sm:$0xff]  }
 0x9e6   :  { %v11850_v48 = vadd.f32 %v18224_v20, %v22650_v17  ;;  %14642 = vmatprep.subr.bf16.mxu1 %v21103_v36  ;;  %v21119_v17 = vld [vmem:[#allocation11 + $0x920] ss:$16 sps:$4 sm:$0xff]   ;;  %v21166_v36 = vld [vmem:[#allocation11 + $0x70c] ss:$16 sps:$4 sm:$0xff]   ;;  %v21163_v20 = vld [vmem:[#allocation11 + $0xa04] ss:$16 sps:$4 sm:$0xff]  }
 0x9e7   :  { %v18480_v38 = vadd.f32 %v22596_v58, %v3051_v4  ;;  %v21161_v2 = vld [vmem:[#allocation11 + $0xa00] ss:$16 sps:$4 sm:$0xff]   ;;  %v21170_v56 = vld [vmem:[#allocation11 + $0x728] ss:$16 sps:$4 sm:$0xff]  }
 0x9e8   :  { %14864 = vmatpush1.bf16.msra.mxu0 %v21104_v18  ;;  %v11890_v11 = vadd.f32 %v22637_v30, %v11850_v48  ;;  %v21122_v30 = vld [vmem:[#allocation11 + $0x628] ss:$16 sps:$4 sm:$0xff]   ;;  %v21172_v48 = vld [vmem:[#allocation11 + $0x72c] ss:$16 sps:$4 sm:$0xff]   ;;  %v21167_v58 = vld [vmem:[#allocation11 + $0xa20] ss:$16 sps:$4 sm:$0xff]  }
 0x9e9   :  { %14643 = vmatpush1.bf16.msra.mxu1 %v21101_v26  ;;  %14865 = vmatprep.subr.bf16.mxu0 %v21112_v41  ;;  %v21164_v18 = vld [vmem:[#allocation11 + $0x708] ss:$16 sps:$4 sm:$0xff]   ;;  %v22672_v26 = vpack.c.bf16 %v18477_v21, %v18477_v21  ;;  %v21169_v41 = vld [vmem:[#allocation11 + $0xa24] ss:$16 sps:$4 sm:$0xff]   ;;  %v21227_v4 = vld [vmem:[#allocation11 + $0xb60] ss:$16 sps:$4 sm:$0xff]  }
 0x9ea   :  { %14644 = vmatprep.subr.bf16.mxu1 %v21109_v46  ;;  %v22674_v46 = vpack.c.bf16 %v18480_v38, %v18480_v38  ;;  %v21244_v21 = vld [vmem:[#allocation11 + $0x8ac] ss:$16 sps:$4 sm:$0xff]   ;;  %v21242_v38 = vld [vmem:[#allocation11 + $0x8a8] ss:$16 sps:$4 sm:$0xff]  }
 0x9ec   :  { %14866 = vmatpush1.bf16.msra.mxu0 %v21110_v40  ;;  %v21178_v40 = vld [vmem:[#allocation11 + $0x74c] ss:$16 sps:$4 sm:$0xff]  }
 0x9ed   :  { %14645 = vmatpush1.bf16.msra.mxu1 %v21107_v24  ;;  %14876 = vmatprep.subr.bf16.mxu0 %v21118_v52  ;;  %v21176_v24 = vld [vmem:[#allocation11 + $0x748] ss:$16 sps:$4 sm:$0xff]   ;;  %v21173_v52 = vld [vmem:[#allocation11 + $0xa40] ss:$16 sps:$4 sm:$0xff]  }
 0x9ee   :  { %14646 = vmatprep.subr.bf16.mxu1 %v21115_v62  ;;  %v21184_v62 = vld [vmem:[#allocation11 + $0x76c] ss:$16 sps:$4 sm:$0xff]  }
 0x9ef   :  { %14868 = vmatmul.mubr.bf16.vlgmr.msra.gmra.mrb[96].mxu0 %v22627_v43  ;;  %v21134_v43 = vld [vmem:[#allocation11 + $0x668] ss:$16 sps:$4 sm:$0xff]  }
 0x9f0   :  { %14877 = vmatpush1.bf16.msra.mxu0 %v21116_v37  ;;  %14908 = vmatprep.mubr.bf16.mxu0 %v22629_v13  ;;  %v21142_v13 = vld [vmem:[#allocation11 + $0x68c] ss:$16 sps:$4 sm:$0xff]   ;;  %v21181_v37 = vld [vmem:[#allocation11 + $0xa64] ss:$16 sps:$4 sm:$0xff]  }
 0x9f1   :  { %14647 = vmatpush1.bf16.msra.mxu1 %v21113_v39  ;;  %14878 = vmatprep.subr.bf16.mxu0 %v21124_v53  ;;  %v21182_v39 = vld [vmem:[#allocation11 + $0x768] ss:$16 sps:$4 sm:$0xff]   ;;  %v21179_v53 = vld [vmem:[#allocation11 + $0xa60] ss:$16 sps:$4 sm:$0xff]  }
 0x9f2   :  { %14648 = vmatprep.subr.bf16.mxu1 %v21121_v55  ;;  %v21190_v55 = vld [vmem:[#allocation11 + $0x78c] ss:$16 sps:$4 sm:$0xff]  }
 0x9f4   :  { %14879 = vmatpush1.bf16.msra.mxu0 %v21122_v30  ;;  %v21187_v30 = vld [vmem:[#allocation11 + $0xa84] ss:$16 sps:$4 sm:$0xff]  }
 0x9f5   :  { %14649 = vmatpush1.bf16.msra.mxu1 %v21119_v17  ;;  %14880 = vmatprep.subr.bf16.mxu0 %v21130_v32  ;;  %v21188_v17 = vld [vmem:[#allocation11 + $0x788] ss:$16 sps:$4 sm:$0xff]   ;;  %v21185_v32 = vld [vmem:[#allocation11 + $0xa80] ss:$16 sps:$4 sm:$0xff]  }
 0x9f6   :  { %14650 = vmatprep.subr.bf16.mxu1 %v21127_v61  ;;  %v21196_v61 = vld [vmem:[#allocation11 + $0x7ac] ss:$16 sps:$4 sm:$0xff]  }
 0x9f8   :  { %14881 = vmatpush1.bf16.msra.mxu0 %v21128_v34  ;;  %v21193_v34 = vld [vmem:[#allocation11 + $0xaa4] ss:$16 sps:$4 sm:$0xff]  }
 0x9f9   :  { %14651 = vmatpush1.bf16.msra.mxu1 %v21125_v44  ;;  %14882 = vmatprep.subr.bf16.mxu0 %v21136_v60  ;;  %v21194_v44 = vld [vmem:[#allocation11 + $0x7a8] ss:$16 sps:$4 sm:$0xff]   ;;  %v21191_v60 = vld [vmem:[#allocation11 + $0xaa0] ss:$16 sps:$4 sm:$0xff]  }
 0x9fa   :  { %14652 = vmatprep.subr.bf16.mxu1 %v21133_v27  ;;  %v21202_v27 = vld [vmem:[#allocation11 + $0x7cc] ss:$16 sps:$4 sm:$0xff]  }
 0x9fc   :  { %14883 = vmatpush1.bf16.msra.mxu0 %v21134_v43  ;;  %v21199_v43 = vld [vmem:[#allocation11 + $0xac4] ss:$16 sps:$4 sm:$0xff]  }
 0x9fd   :  { %14653 = vmatpush1.bf16.msra.mxu1 %v21131_v45  ;;  %14884 = vmatprep.subr.bf16.mxu0 %v21142_v13  ;;  %v21200_v45 = vld [vmem:[#allocation11 + $0x7c8] ss:$16 sps:$4 sm:$0xff]   ;;  %v21197_v13 = vld [vmem:[#allocation11 + $0xac0] ss:$16 sps:$4 sm:$0xff]  }
 0x9fe   :  { %14654 = vmatprep.subr.bf16.mxu1 %v21139_v16  ;;  %v21208_v16 = vld [vmem:[#allocation11 + $0x7ec] ss:$16 sps:$4 sm:$0xff]  }
 0xa00   :  { %14885 = vmatpush1.bf16.msra.mxu0 %v21140_v5  ;;  %v21205_v5 = vld [vmem:[#allocation11 + $0xae4] ss:$16 sps:$4 sm:$0xff]  }
 0xa01   :  { %14655 = vmatpush1.bf16.msra.mxu1 %v21137_v19  ;;  %14886 = vmatprep.subr.bf16.mxu0 %v21148_v42  ;;  %v21206_v19 = vld [vmem:[#allocation11 + $0x7e8] ss:$16 sps:$4 sm:$0xff]   ;;  %v21203_v42 = vld [vmem:[#allocation11 + $0xae0] ss:$16 sps:$4 sm:$0xff]  }
 0xa02   :  { %v11929_v22 = vpop.f32.mrb[92].mxu0  ;;  %14656 = vmatprep.subr.bf16.mxu1 %v21145_v3  ;;  %v21214_v3 = vld [vmem:[#allocation11 + $0x80c] ss:$16 sps:$4 sm:$0xff]  }
 0xa03   :  { %v22664_v28 = vadd.f32 %v11929_v22, %v11890_v11  ;;  %v18459_v8 = vpop.f32.mrb[93].mxu0  ;;  %v21175_v11 = vld [vmem:[#allocation11 + $0xa44] ss:$16 sps:$4 sm:$0xff]   ;;  %v21220_v22 = vld [vmem:[#allocation11 + $0x82c] ss:$16 sps:$4 sm:$0xff]  }
 0xa04   :  { %v11932_v31 = vpop.f32.mrb[94].mxu0  ;;  %14887 = vmatpush1.bf16.msra.mxu0 %v21146_v7  ;;  %v21211_v7 = vld [vmem:[#allocation11 + $0xb04] ss:$16 sps:$4 sm:$0xff]   ;;  %v21218_v8 = vld [vmem:[#allocation11 + $0x828] ss:$16 sps:$4 sm:$0xff]  }
 0xa05   :  { %14657 = vmatpush1.bf16.msra.mxu1 %v21143_v10  ;;  %v18460_v63 = vpop.f32.mrb[95].mxu0  ;;  %14888 = vmatprep.subr.bf16.mxu0 %v21154_v25  ;;  %v21212_v10 = vld [vmem:[#allocation11 + $0x808] ss:$16 sps:$4 sm:$0xff]   ;;  %v21209_v25 = vld [vmem:[#allocation11 + $0xb00] ss:$16 sps:$4 sm:$0xff]  }
 0xa06   :  { %14658 = vmatprep.subr.bf16.mxu1 %v21151_v23  ;;  %v21217_v23 = vld [vmem:[#allocation11 + $0xb24] ss:$16 sps:$4 sm:$0xff]   ;;  %v21215_v31 = vld [vmem:[#allocation11 + $0xb20] ss:$16 sps:$4 sm:$0xff]  }
 0xa07   :  { %v21223_v63 = vld [vmem:[#allocation11 + $0xb44] ss:$16 sps:$4 sm:$0xff]  }
 0xa08   :  { %14889 = vmatpush1.bf16.msra.mxu0 %v21152_v33  ;;  %v21226_v33 = vld [vmem:[#allocation11 + $0x84c] ss:$16 sps:$4 sm:$0xff]  }
 0xa09   :  { %14659 = vmatpush1.bf16.msra.mxu1 %v21149_v35  ;;  %14890 = vmatprep.subr.bf16.mxu0 %v21160_v0  ;;  %v21224_v35 = vld [vmem:[#allocation11 + $0x848] ss:$16 sps:$4 sm:$0xff]   ;;  %v21221_v0 = vld [vmem:[#allocation11 + $0xb40] ss:$16 sps:$4 sm:$0xff]  }
 0xa0a   :  { %14660 = vmatprep.subr.bf16.mxu1 %v21157_v12  ;;  %v21229_v12 = vld [vmem:[#allocation11 + $0xb64] ss:$16 sps:$4 sm:$0xff]  }
 0xa0c   :  { %14891 = vmatpush1.bf16.msra.mxu0 %v21158_v54  ;;  %v21235_v54 = vld [vmem:[#allocation11 + $0xb84] ss:$16 sps:$4 sm:$0xff]  }
 0xa0d   :  { %14661 = vmatpush1.bf16.msra.mxu1 %v21155_v29  ;;  %14892 = vmatprep.subr.bf16.mxu0 %v21166_v36  ;;  %v21236_v29 = vld [vmem:[#allocation11 + $0x888] ss:$16 sps:$4 sm:$0xff]   ;;  %v21233_v36 = vld [vmem:[#allocation11 + $0xb80] ss:$16 sps:$4 sm:$0xff]  }
 0xa0e   :  { %14671 = vmatprep.subr.bf16.mxu1 %v21163_v20  ;;  %v21241_v20 = vld [vmem:[#allocation11 + $0xba4] ss:$16 sps:$4 sm:$0xff]  }
 0xa10   :  { %14663 = vmatmul.mubr.bf16.vlgmr.msra.gmra.mrb[60].mxu1 %v22672_v26  ;;  %14893 = vmatpush1.bf16.msra.mxu0 %v21164_v18  ;;  %v21239_v18 = vld [vmem:[#allocation11 + $0xba0] ss:$16 sps:$4 sm:$0xff]  }
 0xa11   :  { %14672 = vmatpush1.bf16.msra.mxu1 %v21161_v2  ;;  %14703 = vmatprep.mubr.bf16.mxu1 %v22674_v46  ;;  %v21250_v2 = vld [vmem:[#allocation11 + $0x8cc] ss:$16 sps:$4 sm:$0xff]  }
 0xa12   :  { %14673 = vmatprep.subr.bf16.mxu1 %v21169_v41  ;;  %14894 = vmatprep.subr.bf16.mxu0 %v21172_v48  ;;  %v21247_v41 = vld [vmem:[#allocation11 + $0xbc4] ss:$16 sps:$4 sm:$0xff]   ;;  %v21248_v48 = vld [vmem:[#allocation11 + $0x8c8] ss:$16 sps:$4 sm:$0xff]  }
 0xa14   :  { %14895 = vmatpush1.bf16.msra.mxu0 %v21170_v56  ;;  %v21245_v56 = vld [vmem:[#allocation11 + $0xbc0] ss:$16 sps:$4 sm:$0xff]  }
 0xa15   :  { %14674 = vmatpush1.bf16.msra.mxu1 %v21167_v58  ;;  %14896 = vmatprep.subr.bf16.mxu0 %v21178_v40  ;;  %v21256_v58 = vld [vmem:[#allocation11 + $0x8ec] ss:$16 sps:$4 sm:$0xff]   ;;  %v3047_v40 = vrot.slane %v22633_v59, %v22376_v14  ;;  %v21265_v59 = vld [vmem:[#allocation11 + $0xc24] ss:$16 sps:$4 sm:$0xff]  }
 0xa16   :  { %14675 = vmatprep.subr.bf16.mxu1 %v21175_v11  ;;  %v21253_v11 = vld [vmem:[#allocation11 + $0xbe4] ss:$16 sps:$4 sm:$0xff]  }
 0xa18   :  { %14897 = vmatpush1.bf16.msra.mxu0 %v21176_v24  ;;  %v21254_v24 = vld [vmem:[#allocation11 + $0x8e8] ss:$16 sps:$4 sm:$0xff]  }
 0xa19   :  { %14676 = vmatpush1.bf16.msra.mxu1 %v21173_v52  ;;  %14898 = vmatprep.subr.bf16.mxu0 %v21184_v62  ;;  %v21251_v52 = vld [vmem:[#allocation11 + $0xbe0] ss:$16 sps:$4 sm:$0xff]   ;;  %v21262_v62 = vld [vmem:[#allocation11 + $0x90c] ss:$16 sps:$4 sm:$0xff]  }
 0xa1a   :  { %14677 = vmatprep.subr.bf16.mxu1 %v21181_v37  ;;  %v18479_v37 = vadd.f32 %v22594_v57, %v3047_v40  ;;  %v21274_v57 = vld [vmem:[#allocation11 + $0x94c] ss:$16 sps:$4 sm:$0xff]  }
 0xa1b   :  { %v21322_v40 = vld [vmem:[#allocation11 + $0xaac] ss:$16 sps:$4 sm:$0xff]  }
 0xa1c   :  { %14899 = vmatpush1.bf16.msra.mxu0 %v21182_v39  ;;  %v21259_v39 = vld [vmem:[#allocation11 + $0xc04] ss:$16 sps:$4 sm:$0xff]  }
 0xa1d   :  { %14678 = vmatpush1.bf16.msra.mxu1 %v21179_v53  ;;  %14900 = vmatprep.subr.bf16.mxu0 %v21190_v55  ;;  %v21260_v53 = vld [vmem:[#allocation11 + $0x908] ss:$16 sps:$4 sm:$0xff]   ;;  %v21257_v55 = vld [vmem:[#allocation11 + $0xc00] ss:$16 sps:$4 sm:$0xff]  }
 0xa1e   :  { %14679 = vmatprep.subr.bf16.mxu1 %v21187_v30  ;;  %v21268_v30 = vld [vmem:[#allocation11 + $0x92c] ss:$16 sps:$4 sm:$0xff]  }
 0xa20   :  { %14901 = vmatpush1.bf16.msra.mxu0 %v21188_v17  ;;  %v22683_v17 = vpack.c.bf16 %v18479_v37, %v18479_v37  ;;  %v21395_v37 = vld [vmem:[#allocation14 + $0x60] ss:$16 sps:$4 sm:$0xff]  }
 0xa21   :  { %14680 = vmatpush1.bf16.msra.mxu1 %v21185_v32  ;;  %14902 = vmatprep.subr.bf16.mxu0 %v21196_v61  ;;  %v21266_v32 = vld [vmem:[#allocation11 + $0x928] ss:$16 sps:$4 sm:$0xff]   ;;  %v21263_v61 = vld [vmem:[#allocation11 + $0xc20] ss:$16 sps:$4 sm:$0xff]  }
 0xa22   :  { %14681 = vmatprep.subr.bf16.mxu1 %v21193_v34  ;;  %v21271_v34 = vld [vmem:[#allocation11 + $0xc44] ss:$16 sps:$4 sm:$0xff]  }
 0xa24   :  { %14903 = vmatpush1.bf16.msra.mxu0 %v21194_v44  ;;  %v21272_v44 = vld [vmem:[#allocation11 + $0x948] ss:$16 sps:$4 sm:$0xff]  }
 0xa25   :  { %14682 = vmatpush1.bf16.msra.mxu1 %v21191_v60  ;;  %14904 = vmatprep.subr.bf16.mxu0 %v21202_v27  ;;  %v21269_v60 = vld [vmem:[#allocation11 + $0xc40] ss:$16 sps:$4 sm:$0xff]   ;;  %v21280_v27 = vld [vmem:[#allocation11 + $0x96c] ss:$16 sps:$4 sm:$0xff]  }
 0xa26   :  { %14683 = vmatprep.subr.bf16.mxu1 %v21199_v43  ;;  %v21277_v43 = vld [vmem:[#allocation11 + $0xc64] ss:$16 sps:$4 sm:$0xff]  }
 0xa28   :  { %14905 = vmatpush1.bf16.msra.mxu0 %v21200_v45  ;;  %v21278_v45 = vld [vmem:[#allocation11 + $0x968] ss:$16 sps:$4 sm:$0xff]  }
 0xa29   :  { %14684 = vmatpush1.bf16.msra.mxu1 %v21197_v13  ;;  %14906 = vmatprep.subr.bf16.mxu0 %v21208_v16  ;;  %v21275_v13 = vld [vmem:[#allocation11 + $0xc60] ss:$16 sps:$4 sm:$0xff]   ;;  %v21286_v16 = vld [vmem:[#allocation11 + $0x98c] ss:$16 sps:$4 sm:$0xff]  }
 0xa2a   :  { %14685 = vmatprep.subr.bf16.mxu1 %v21205_v5  ;;  %v21283_v5 = vld [vmem:[#allocation11 + $0xc84] ss:$16 sps:$4 sm:$0xff]  }
 0xa2c   :  { %14907 = vmatpush1.bf16.msra.mxu0 %v21206_v19  ;;  %v21284_v19 = vld [vmem:[#allocation11 + $0x988] ss:$16 sps:$4 sm:$0xff]  }
 0xa2d   :  { %14686 = vmatpush1.bf16.msra.mxu1 %v21203_v42  ;;  %14917 = vmatprep.subr.bf16.mxu0 %v21214_v3  ;;  %v21281_v42 = vld [vmem:[#allocation11 + $0xc80] ss:$16 sps:$4 sm:$0xff]   ;;  %v21292_v3 = vld [vmem:[#allocation11 + $0x9ac] ss:$16 sps:$4 sm:$0xff]  }
 0xa2e   :  { %14687 = vmatprep.subr.bf16.mxu1 %v21211_v7  ;;  %v21289_v7 = vld [vmem:[#allocation11 + $0xca4] ss:$16 sps:$4 sm:$0xff]  }
 0xa2f   :  { %14909 = vmatmul.mubr.bf16.vlgmr.msra.gmra.mrb[96].mxu0 %v22654_v6  ;;  %v21230_v6 = vld [vmem:[#allocation11 + $0x868] ss:$16 sps:$4 sm:$0xff]  }
 0xa30   :  { %14918 = vmatpush1.bf16.msra.mxu0 %v21212_v10  ;;  %14949 = vmatprep.mubr.bf16.mxu0 %v22656_v9  ;;  %v21238_v9 = vld [vmem:[#allocation11 + $0x88c] ss:$16 sps:$4 sm:$0xff]   ;;  %v21290_v10 = vld [vmem:[#allocation11 + $0x9a8] ss:$16 sps:$4 sm:$0xff]  }
 0xa31   :  { %14688 = vmatpush1.bf16.msra.mxu1 %v21209_v25  ;;  %14919 = vmatprep.subr.bf16.mxu0 %v21220_v22  ;;  %v21287_v25 = vld [vmem:[#allocation11 + $0xca0] ss:$16 sps:$4 sm:$0xff]   ;;  %v21298_v22 = vld [vmem:[#allocation11 + $0x9cc] ss:$16 sps:$4 sm:$0xff]  }
 0xa32   :  { %14689 = vmatprep.subr.bf16.mxu1 %v21217_v23  ;;  %v21295_v23 = vld [vmem:[#allocation11 + $0xcc4] ss:$16 sps:$4 sm:$0xff]  }
 0xa34   :  { %14920 = vmatpush1.bf16.msra.mxu0 %v21218_v8  ;;  %v21296_v8 = vld [vmem:[#allocation11 + $0x9c8] ss:$16 sps:$4 sm:$0xff]  }
 0xa35   :  { %14690 = vmatpush1.bf16.msra.mxu1 %v21215_v31  ;;  %14921 = vmatprep.subr.bf16.mxu0 %v21226_v33  ;;  %v21293_v31 = vld [vmem:[#allocation11 + $0xcc0] ss:$16 sps:$4 sm:$0xff]   ;;  %v21304_v33 = vld [vmem:[#allocation11 + $0x9ec] ss:$16 sps:$4 sm:$0xff]  }
 0xa36   :  { %14691 = vmatprep.subr.bf16.mxu1 %v21223_v63  ;;  %v21301_v63 = vld [vmem:[#allocation11 + $0xce4] ss:$16 sps:$4 sm:$0xff]  }
 0xa38   :  { %14922 = vmatpush1.bf16.msra.mxu0 %v21224_v35  ;;  %v21302_v35 = vld [vmem:[#allocation11 + $0x9e8] ss:$16 sps:$4 sm:$0xff]  }
 0xa39   :  { %14692 = vmatpush1.bf16.msra.mxu1 %v21221_v0  ;;  %14923 = vmatprep.subr.bf16.mxu0 %v21232_v1  ;;  %v21299_v0 = vld [vmem:[#allocation11 + $0xce0] ss:$16 sps:$4 sm:$0xff]   ;;  %v21307_v1 = vld [vmem:[#allocation11 + $0xa0c] ss:$16 sps:$4 sm:$0xff]  }
 0xa3a   :  { %14693 = vmatprep.subr.bf16.mxu1 %v21229_v12  ;;  %v15041_v12 = vld [vmem:[%s22933_s1] sm:$0xff] }
 0xa3c   :  { %14924 = vmatpush1.bf16.msra.mxu0 %v21230_v6  ;;  %v15042_v6 = vld [vmem:[%s22933_s1 + $0x8] sm:$0xff] }
 0xa3d   :  { %14694 = vmatpush1.bf16.msra.mxu1 %v21227_v4  ;;  %14925 = vmatprep.subr.bf16.mxu0 %v21238_v9  ;;  %v21305_v4 = vld [vmem:[#allocation11 + $0xa08] ss:$16 sps:$4 sm:$0xff]   ;;  %v15044_v9 = vpack.c.bf16 %v15042_v6, %v15041_v12  ;;  %v21370_v6 = vld [vmem:[#allocation11 + $0xcac] ss:$16 sps:$4 sm:$0xff]  }
 0xa3e   :  { %14695 = vmatprep.subr.bf16.mxu1 %v21235_v54  ;;  %v22695_v54 = vpack.c.bf16 %v22664_v28, %v22664_v28  ;;  %v21311_v28 = vld [vmem:[#allocation11 + $0xa48] ss:$16 sps:$4 sm:$0xff]  }
 0xa3f   :  { %v21365_v12 = vld [vmem:[#allocation11 + $0xc88] ss:$16 sps:$4 sm:$0xff]  }
 0xa40   :  { %14926 = vmatpush1.bf16.msra.mxu0 %v21236_v29  ;;  %v21310_v29 = vld [vmem:[#allocation11 + $0xa2c] ss:$16 sps:$4 sm:$0xff]  }
 0xa41   :  { %14696 = vmatpush1.bf16.msra.mxu1 %v21233_v36  ;;  %14927 = vmatprep.subr.bf16.mxu0 %v21244_v21  ;;  %v21379_v36 = vld [vmem:[#allocation14 + $0x4] ss:$16 sps:$4 sm:$0xff]  }
 0xa42   :  { %14697 = vmatprep.subr.bf16.mxu1 %v21241_v20  ;;  %v21308_v21 = vld [vmem:[#allocation11 + $0xa28] ss:$16 sps:$4 sm:$0xff]   ;;  %v21313_v20 = vld [vmem:[#allocation11 + $0xa4c] ss:$16 sps:$4 sm:$0xff]  }
 0xa44   :  { %14928 = vmatpush1.bf16.msra.mxu0 %v21242_v38  ;;  %v15040_v38 = vld [vmem:[%s22935_s3] sm:$0x3] }
 0xa45   :  { %14698 = vmatpush1.bf16.msra.mxu1 %v21239_v18  ;;  %14929 = vmatprep.subr.bf16.mxu0 %v21250_v2  ;;  %v21316_v18 = vld [vmem:[#allocation11 + $0xa6c] ss:$16 sps:$4 sm:$0xff]   ;;  %v21377_v2 = vld [vmem:[#allocation14] ss:$16 sps:$4 sm:$0xff]  }
 0xa46   :  { %14699 = vmatprep.subr.bf16.mxu1 %v21247_v41  ;;  %v21385_v41 = vld [vmem:[#allocation14 + $0x24] ss:$16 sps:$4 sm:$0xff]  }
 0xa48   :  { %14930 = vmatpush1.bf16.msra.mxu0 %v21248_v48  ;;  %v21319_v48 = vld [vmem:[#allocation11 + $0xa8c] ss:$16 sps:$4 sm:$0xff]  }
 0xa49   :  { %14700 = vmatpush1.bf16.msra.mxu1 %v21245_v56  ;;  %14931 = vmatprep.subr.bf16.mxu0 %v21256_v58  ;;  %v21383_v56 = vld [vmem:[#allocation14 + $0x20] ss:$16 sps:$4 sm:$0xff]   ;;  %v21391_v58 = vld [vmem:[#allocation14 + $0x44] ss:$16 sps:$4 sm:$0xff]  }
 0xa4a   :  { %14701 = vmatprep.subr.bf16.mxu1 %v21253_v11  ;;  %v21389_v11 = vld [vmem:[#allocation14 + $0x40] ss:$16 sps:$4 sm:$0xff]  }
 0xa4c   :  { %14932 = vmatpush1.bf16.msra.mxu0 %v21254_v24  ;;  %v21397_v24 = vld [vmem:[#allocation14 + $0x64] ss:$16 sps:$4 sm:$0xff]  }
 0xa4d   :  { %14702 = vmatpush1.bf16.msra.mxu1 %v21251_v52  ;;  %14933 = vmatprep.subr.bf16.mxu0 %v21262_v62  ;;  %v21320_v52 = vld [vmem:[#allocation11 + $0xaa8] ss:$16 sps:$4 sm:$0xff]   ;;  %v21325_v62 = vld [vmem:[#allocation11 + $0xacc] ss:$16 sps:$4 sm:$0xff]  }
 0xa4e   :  { %14712 = vmatprep.subr.bf16.mxu1 %v21259_v39  ;;  %v21403_v39 = vld [vmem:[#allocation14 + $0x84] ss:$16 sps:$4 sm:$0xff]  }
 0xa50   :  { %14704 = vmatmul.mubr.bf16.vlgmr.msra.gmra.mrb[60].mxu1 %v22683_v17  ;;  %14934 = vmatpush1.bf16.msra.mxu0 %v21260_v53  ;;  %v21323_v53 = vld [vmem:[#allocation11 + $0xac8] ss:$16 sps:$4 sm:$0xff]  }
 0xa51   :  { %14713 = vmatpush1.bf16.msra.mxu1 %v21257_v55  ;;  %14935 = vmatprep.subr.bf16.mxu0 %v21268_v30  ;;  %v21328_v55 = vld [vmem:[#allocation11 + $0xaec] ss:$16 sps:$4 sm:$0xff]   ;;  %v21401_v30 = vld [vmem:[#allocation14 + $0x80] ss:$16 sps:$4 sm:$0xff]  }
 0xa52   :  { %14714 = vmatprep.subr.bf16.mxu1 %v21265_v59  ;;  %14744 = vmatprep.mubr.bf16.mxu1 %v21763_v51  ;;  %v21409_v59 = vld [vmem:[#allocation14 + $0xa4] ss:$16 sps:$4 sm:$0xff]  }
 0xa54   :  { %14936 = vmatpush1.bf16.msra.mxu0 %v21266_v32  ;;  %v21326_v32 = vld [vmem:[#allocation11 + $0xae8] ss:$16 sps:$4 sm:$0xff]  }
 0xa55   :  { %14715 = vmatpush1.bf16.msra.mxu1 %v21263_v61  ;;  %14937 = vmatprep.subr.bf16.mxu0 %v21274_v57  ;;  %v21331_v61 = vld [vmem:[#allocation11 + $0xb0c] ss:$16 sps:$4 sm:$0xff]   ;;  %v21407_v57 = vld [vmem:[#allocation14 + $0xa0] ss:$16 sps:$4 sm:$0xff]  }
 0xa56   :  { %14716 = vmatprep.subr.bf16.mxu1 %v21271_v34  ;;  %v21329_v34 = vld [vmem:[#allocation11 + $0xb08] ss:$16 sps:$4 sm:$0xff]  }
 0xa58   :  { %14938 = vmatpush1.bf16.msra.mxu0 %v21272_v44  ;;  %v21334_v44 = vld [vmem:[#allocation11 + $0xb2c] ss:$16 sps:$4 sm:$0xff]  }
 0xa59   :  { %14717 = vmatpush1.bf16.msra.mxu1 %v21269_v60  ;;  %14939 = vmatprep.subr.bf16.mxu0 %v21280_v27  ;;  %v21332_v60 = vld [vmem:[#allocation11 + $0xb28] ss:$16 sps:$4 sm:$0xff]   ;;  %v21337_v27 = vld [vmem:[#allocation11 + $0xb4c] ss:$16 sps:$4 sm:$0xff]  }
 0xa5a   :  { %14718 = vmatprep.subr.bf16.mxu1 %v21277_v43  ;;  %v21335_v43 = vld [vmem:[#allocation11 + $0xb48] ss:$16 sps:$4 sm:$0xff]  }
 0xa5c   :  { %14940 = vmatpush1.bf16.msra.mxu0 %v21278_v45  ;;  %v21340_v45 = vld [vmem:[#allocation11 + $0xb6c] ss:$16 sps:$4 sm:$0xff]  }
 0xa5d   :  { %14719 = vmatpush1.bf16.msra.mxu1 %v21275_v13  ;;  %14941 = vmatprep.subr.bf16.mxu0 %v21286_v16  ;;  %v21338_v13 = vld [vmem:[#allocation11 + $0xb68] ss:$16 sps:$4 sm:$0xff]   ;;  %v21343_v16 = vld [vmem:[#allocation11 + $0xb8c] ss:$16 sps:$4 sm:$0xff]  }
 0xa5e   :  { %14720 = vmatprep.subr.bf16.mxu1 %v21283_v5  ;;  %v21341_v5 = vld [vmem:[#allocation11 + $0xb88] ss:$16 sps:$4 sm:$0xff]  }
 0xa60   :  { %14942 = vmatpush1.bf16.msra.mxu0 %v21284_v19  ;;  %v21346_v19 = vld [vmem:[#allocation11 + $0xbac] ss:$16 sps:$4 sm:$0xff]  }
 0xa61   :  { %14721 = vmatpush1.bf16.msra.mxu1 %v21281_v42  ;;  %14943 = vmatprep.subr.bf16.mxu0 %v21292_v3  ;;  %v21344_v42 = vld [vmem:[#allocation11 + $0xba8] ss:$16 sps:$4 sm:$0xff]   ;;  %v21349_v3 = vld [vmem:[#allocation11 + $0xbcc] ss:$16 sps:$4 sm:$0xff]  }
 0xa62   :  { %14722 = vmatprep.subr.bf16.mxu1 %v21289_v7  ;;  %v21347_v7 = vld [vmem:[#allocation11 + $0xbc8] ss:$16 sps:$4 sm:$0xff]  }
 0xa64   :  { %14944 = vmatpush1.bf16.msra.mxu0 %v21290_v10  ;;  %v21352_v10 = vld [vmem:[#allocation11 + $0xbec] ss:$16 sps:$4 sm:$0xff]  }
 0xa65   :  { %14723 = vmatpush1.bf16.msra.mxu1 %v21287_v25  ;;  %14945 = vmatprep.subr.bf16.mxu0 %v21298_v22  ;;  %v21350_v25 = vld [vmem:[#allocation11 + $0xbe8] ss:$16 sps:$4 sm:$0xff]   ;;  %v21355_v22 = vld [vmem:[#allocation11 + $0xc0c] ss:$16 sps:$4 sm:$0xff]  }
 0xa66   :  { %14724 = vmatprep.subr.bf16.mxu1 %v21295_v23  ;;  %v21353_v23 = vld [vmem:[#allocation11 + $0xc08] ss:$16 sps:$4 sm:$0xff]  }
 0xa68   :  { %14946 = vmatpush1.bf16.msra.mxu0 %v21296_v8  ;;  %v21358_v8 = vld [vmem:[#allocation11 + $0xc2c] ss:$16 sps:$4 sm:$0xff]  }
 0xa69   :  { %14725 = vmatpush1.bf16.msra.mxu1 %v21293_v31  ;;  %14947 = vmatprep.subr.bf16.mxu0 %v21304_v33  ;;  %v21356_v31 = vld [vmem:[#allocation11 + $0xc28] ss:$16 sps:$4 sm:$0xff]   ;;  %v21361_v33 = vld [vmem:[#allocation11 + $0xc4c] ss:$16 sps:$4 sm:$0xff]  }
 0xa6a   :  { %14726 = vmatprep.subr.bf16.mxu1 %v21301_v63  ;;  %v21359_v63 = vld [vmem:[#allocation11 + $0xc48] ss:$16 sps:$4 sm:$0xff]  }
 0xa6c   :  { %14948 = vmatpush1.bf16.msra.mxu0 %v21302_v35  ;;  %v21364_v35 = vld [vmem:[#allocation11 + $0xc6c] ss:$16 sps:$4 sm:$0xff]  }
 0xa6d   :  { %14727 = vmatpush1.bf16.msra.mxu1 %v21299_v0  ;;  %14958 = vmatprep.subr.bf16.mxu0 %v21307_v1  ;;  %v21362_v0 = vld [vmem:[#allocation11 + $0xc68] ss:$16 sps:$4 sm:$0xff]   ;;  %v21367_v1 = vld [vmem:[#allocation11 + $0xc8c] ss:$16 sps:$4 sm:$0xff]  }
 0xa6e   :  { %18461 = vmatprep.subr.bf16.mxu1 %v21764_v50 }
 0xa6f   :  { %14950 = vmatmul.mubr.bf16.vlgmr.msra.gmra.mrb[96].mxu0 %v22672_v26  ;;  %v15043_v26 = vpack.c.bf16 %v15040_v38, %v15040_v38  ;;  %v21421_v38 = vld [vmem:[#allocation14 + $0xe4] ss:$16 sps:$4 sm:$0xff]  }
 0xa70   :  { %14745 = vmatmul.mubr.bf16.vlgmr.msra.gmra.mrb[60].mxu1 %v22695_v54  ;;  %14959 = vmatpush1.bf16.msra.mxu0 %v21305_v4  ;;  %v21373_v4 = vld [vmem:[#allocation11 + $0xccc] ss:$16 sps:$4 sm:$0xff]  }
 0xa71   :  { %14990 = vmatprep.mubr.bf16.mxu0 %v22674_v46  ;;  %18462 = vmatpush3.bf16.msra.mxu1 %v15044_v9  ;;  %v21314_v46 = vld [vmem:[#allocation11 + $0xa68] ss:$16 sps:$4 sm:$0xff]  }
 0xa72   :  { %14960 = vmatprep.subr.bf16.mxu0 %v21310_v29  ;;  %18463 = vmatprep.mubr.msk.bf16.mxu1 %vm21765_vm1, %v21764_v50  ;;  %v21317_v50 = vld [vmem:[#allocation11 + $0xa88] ss:$16 sps:$4 sm:$0xff]  }
 0xa73   :  { %15304 = vmatprep.subr.bf16.mxu1 %v21379_v36  ;;  %v21371_v9 = vld [vmem:[#allocation11 + $0xcc8] ss:$16 sps:$4 sm:$0xff]   ;;  %v21376_v36 = vld [vmem:[#allocation11 + $0xcec] ss:$16 sps:$4 sm:$0xff]  }
 0xa74   :  { %14961 = vmatpush1.bf16.msra.mxu0 %v21308_v21  ;;  %v21415_v29 = vld [vmem:[#allocation14 + $0xc4] ss:$16 sps:$4 sm:$0xff]   ;;  %v21413_v21 = vld [vmem:[#allocation14 + $0xc0] ss:$16 sps:$4 sm:$0xff]  }
 0xa75   :  { %14962 = vmatprep.subr.bf16.mxu0 %v21313_v20  ;;  %v21419_v20 = vld [vmem:[#allocation14 + $0xe0] ss:$16 sps:$4 sm:$0xff]  }
 0xa78   :  { %18464 = vmatmul.mubr.msk.bf16.vlgmr.msra.gmra.mrb[64].mxu1 %vm15045_vm2, %v15043_v26  ;;  %14963 = vmatpush1.bf16.msra.mxu0 %v21311_v28  ;;  %v21374_v28 = vld [vmem:[#allocation11 + $0xce8] ss:$16 sps:$4 sm:$0xff]   ;;  %v21382_v26 = vld [vmem:[#allocation14 + $0xc] ss:$16 sps:$4 sm:$0xff]  }
 0xa79   :  { %14964 = vmatprep.subr.bf16.mxu0 %v21316_v18  ;;  %15305 = vmatpush1.bf16.msra.mxu1 %v21377_v2  ;;  %v21380_v18 = vld [vmem:[#allocation14 + $0x8] ss:$16 sps:$4 sm:$0xff]   ;;  %v21425_v2 = vld [vmem:[%s22946_s14 + $0x40] sm:$0xff]  }
 0xa7a   :  { %15306 = vmatprep.subr.bf16.mxu1 %v21385_v41  ;;  %15336 = vmatprep.mubr.bf16.mxu1 %v21763_v51  ;;  %v21388_v41 = vld [vmem:[#allocation14 + $0x2c] ss:$16 sps:$4 sm:$0xff]  }
 0xa7c   :  { %14965 = vmatpush1.bf16.msra.mxu0 %v21314_v46  ;;  %v21386_v46 = vld [vmem:[#allocation14 + $0x28] ss:$16 sps:$4 sm:$0xff]  }
 0xa7d   :  { %14966 = vmatprep.subr.bf16.mxu0 %v21319_v48  ;;  %15307 = vmatpush1.bf16.msra.mxu1 %v21383_v56  ;;  %v21394_v48 = vld [vmem:[#allocation14 + $0x4c] ss:$16 sps:$4 sm:$0xff]   ;;  %v21392_v56 = vld [vmem:[#allocation14 + $0x48] ss:$16 sps:$4 sm:$0xff]  }
 0xa7e   :  { %15308 = vmatprep.subr.bf16.mxu1 %v21391_v58  ;;  %v21400_v58 = vld [vmem:[#allocation14 + $0x6c] ss:$16 sps:$4 sm:$0xff]  }
 0xa80   :  { %14967 = vmatpush1.bf16.msra.mxu0 %v21317_v50  ;;  %v21398_v50 = vld [vmem:[#allocation14 + $0x68] ss:$16 sps:$4 sm:$0xff]  }
 0xa81   :  { %14968 = vmatprep.subr.bf16.mxu0 %v21322_v40  ;;  %15309 = vmatpush1.bf16.msra.mxu1 %v21389_v11  ;;  %v21406_v40 = vld [vmem:[#allocation14 + $0x8c] ss:$16 sps:$4 sm:$0xff]   ;;  %v21404_v11 = vld [vmem:[#allocation14 + $0x88] ss:$16 sps:$4 sm:$0xff]  }
 0xa82   :  { %15310 = vmatprep.subr.bf16.mxu1 %v21397_v24  ;;  %v21412_v24 = vld [vmem:[#allocation14 + $0xac] ss:$16 sps:$4 sm:$0xff]  }
 0xa84   :  { %14969 = vmatpush1.bf16.msra.mxu0 %v21320_v52  ;;  %v21418_v52 = vld [vmem:[#allocation14 + $0xcc] ss:$16 sps:$4 sm:$0xff]  }
 0xa85   :  { %14970 = vmatprep.subr.bf16.mxu0 %v21325_v62  ;;  %15311 = vmatpush1.bf16.msra.mxu1 %v21395_v37  ;;  %v21424_v62 = vld [vmem:[#allocation14 + $0xec] ss:$16 sps:$4 sm:$0xff]   ;;  %v21422_v37 = vld [vmem:[#allocation14 + $0xe8] ss:$16 sps:$4 sm:$0xff]  }
 0xa86   :  { %15312 = vmatprep.subr.bf16.mxu1 %v21403_v39  ;;  %v21441_v39 = vld [vmem:[%s22946_s14 + $0xc0] sm:$0xff]  }
 0xa88   :  { %14971 = vmatpush1.bf16.msra.mxu0 %v21323_v53  ;;  %v22717_v53 = vld [vmem:[#allocation13] sm:$0xf] }
 0xa89   :  { %14972 = vmatprep.subr.bf16.mxu0 %v21328_v55  ;;  %15313 = vmatpush1.bf16.msra.mxu1 %v21401_v30 }
 0xa8a   :  { %15314 = vmatprep.subr.bf16.mxu1 %v21409_v59  ;;  %v12373_v59 = vrot.slane %v22717_v53, %v22342_v15 }
 0xa8c   :  { %14973 = vmatpush1.bf16.msra.mxu0 %v21326_v32 }
 0xa8d   :  { %14974 = vmatprep.subr.bf16.mxu0 %v21331_v61  ;;  %15315 = vmatpush1.bf16.msra.mxu1 %v21407_v57 }
 0xa8e   :  { %15316 = vmatprep.subr.bf16.mxu1 %v21415_v29  ;;  %v21453_v29 = vld [vmem:[%s22946_s14 + $0xf0] sm:$0xff]  }
 0xa90   :  { %14975 = vmatpush1.bf16.msra.mxu0 %v21329_v34 }
 0xa91   :  { %14976 = vmatprep.subr.bf16.mxu0 %v21334_v44  ;;  %15317 = vmatpush1.bf16.msra.mxu1 %v21413_v21  ;;  %v21426_v44 = vld [vmem:[%s22946_s14] sm:$0xff]   ;;  %v12369_v21 = vrot.slane %v22717_v53, %v22337_v49 }
 0xa92   :  { %15318 = vmatprep.subr.bf16.mxu1 %v21421_v38  ;;  %v21454_v38 = vld [vmem:[%s22946_s14 + $0xb0] sm:$0xff]  }
 0xa94   :  { %14977 = vmatpush1.bf16.msra.mxu0 %v21332_v60 }
 0xa95   :  { %14978 = vmatprep.subr.bf16.mxu0 %v21337_v27  ;;  %15319 = vmatpush1.bf16.msra.mxu1 %v21419_v20  ;;  %v21439_v20 = vld [vmem:[%s22946_s14 + $0x78] sm:$0xff]  }
 0xa96   :  { %18261 = vmatprep.subr.bf16.mxu1 %v21425_v2  ;;  %v21456_v2 = vld [vmem:[%s22946_s14 + $0xb8] sm:$0xff]  }
 0xa98   :  { %14979 = vmatpush1.bf16.msra.mxu0 %v21335_v43  ;;  %v21427_v43 = vld [vmem:[%s22946_s14 + $0x48] sm:$0xff]  }
 0xa99   :  { %14980 = vmatprep.subr.bf16.mxu0 %v21340_v45  ;;  %v21442_v45 = vld [vmem:[%s22946_s14 + $0x80] sm:$0xff]  }
 0xa9c   :  { %14981 = vmatpush1.bf16.msra.mxu0 %v21338_v13 }
 0xa9d   :  { %14982 = vmatprep.subr.bf16.mxu0 %v21343_v16 }
 0xaa0   :  { %14983 = vmatpush1.bf16.msra.mxu0 %v21341_v5  ;;  %v21443_v5 = vld [vmem:[%s22946_s14 + $0xc8] sm:$0xff]  }
 0xaa1   :  { %14984 = vmatprep.subr.bf16.mxu0 %v21346_v19 }
 0xaa4   :  { %14985 = vmatpush1.bf16.msra.mxu0 %v21344_v42  ;;  %v21428_v42 = vld [vmem:[%s22946_s14 + $0x8] sm:$0xff]  }
 0xaa5   :  { %14986 = vmatprep.subr.bf16.mxu0 %v21349_v3  ;;  %v21429_v3 = vld [vmem:[%s22946_s14 + $0x50] sm:$0xff]  }
 0xaa8   :  { %14987 = vmatpush1.bf16.msra.mxu0 %v21347_v7  ;;  %v21444_v7 = vld [vmem:[%s22946_s14 + $0x88] sm:$0xff]  }
 0xaa9   :  { %14988 = vmatprep.subr.bf16.mxu0 %v21352_v10  ;;  %v21445_v10 = vld [vmem:[%s22946_s14 + $0xd0] sm:$0xff]  }
 0xaac   :  { %14989 = vmatpush1.bf16.msra.mxu0 %v21350_v25  ;;  %v21430_v25 = vld [vmem:[%s22946_s14 + $0x10] sm:$0xff]  }
 0xaad   :  { %14999 = vmatprep.subr.bf16.mxu0 %v21355_v22  ;;  %v21431_v22 = vld [vmem:[%s22946_s14 + $0x58] sm:$0xff]  }
 0xaaf   :  { %14991 = vmatmul.mubr.bf16.vlgmr.msra.gmra.mrb[96].mxu0 %v22683_v17  ;;  %v21368_v17 = vld [vmem:[#allocation11 + $0xca8] ss:$16 sps:$4 sm:$0xff]  }
 0xab0   :  { %15000 = vmatpush1.bf16.msra.mxu0 %v21353_v23  ;;  %15031 = vmatprep.mubr.bf16.mxu0 %v21763_v51  ;;  %v21446_v23 = vld [vmem:[%s22946_s14 + $0x90] sm:$0xff]  }
 0xab1   :  { %15001 = vmatprep.subr.bf16.mxu0 %v21358_v8  ;;  %v21447_v8 = vld [vmem:[%s22946_s14 + $0xd8] sm:$0xff]  }
 0xab4   :  { %15002 = vmatpush1.bf16.msra.mxu0 %v21356_v31  ;;  %v21432_v31 = vld [vmem:[%s22946_s14 + $0x18] sm:$0xff]  }
 0xab5   :  { %15003 = vmatprep.subr.bf16.mxu0 %v21361_v33  ;;  %v21433_v33 = vld [vmem:[%s22946_s14 + $0x60] sm:$0xff]  }
 0xab8   :  { %15004 = vmatpush1.bf16.msra.mxu0 %v21359_v63  ;;  %v21448_v63 = vld [vmem:[%s22946_s14 + $0x98] sm:$0xff]  }
 0xab9   :  { %15005 = vmatprep.subr.bf16.mxu0 %v21364_v35  ;;  %v21449_v35 = vld [vmem:[%s22946_s14 + $0xe0] sm:$0xff]  }
 0xabc   :  { %15006 = vmatpush1.bf16.msra.mxu0 %v21362_v0  ;;  %v21434_v0 = vld [vmem:[%s22946_s14 + $0x20] sm:$0xff]  }
 0xabd   :  { %15007 = vmatprep.subr.bf16.mxu0 %v21367_v1  ;;  %v21435_v1 = vld [vmem:[%s22946_s14 + $0x68] sm:$0xff]  }
 0xac0   :  { %15008 = vmatpush1.bf16.msra.mxu0 %v21365_v12  ;;  %v21450_v12 = vld [vmem:[%s22946_s14 + $0xa0] sm:$0xff]  }
 0xac1   :  { %15009 = vmatprep.subr.bf16.mxu0 %v21370_v6  ;;  %v21451_v6 = vld [vmem:[%s22946_s14 + $0xe8] sm:$0xff]  }
 0xac4   :  { %15010 = vmatpush1.bf16.msra.mxu0 %v21368_v17  ;;  %v21436_v17 = vld [vmem:[%s22946_s14 + $0x28] sm:$0xff]  }
 0xac5   :  { %15011 = vmatprep.subr.bf16.mxu0 %v21373_v4  ;;  %v21437_v4 = vld [vmem:[%s22946_s14 + $0x70] sm:$0xff]  }
 0xac8   :  { %15012 = vmatpush1.bf16.msra.mxu0 %v21371_v9  ;;  %v21452_v9 = vld [vmem:[%s22946_s14 + $0xa8] sm:$0xff]  }
 0xac9   :  { %15013 = vmatprep.subr.bf16.mxu0 %v21376_v36  ;;  %v21438_v36 = vld [vmem:[%s22946_s14 + $0x30] sm:$0xff]  }
 0xacc   :  { %15014 = vmatpush1.bf16.msra.mxu0 %v21374_v28  ;;  %v21455_v28 = vld [vmem:[%s22946_s14 + $0xf8] sm:$0xff]  }
 0xacd   :  { %15345 = vmatprep.subr.bf16.mxu0 %v21382_v26  ;;  %v21440_v26 = vld [vmem:[%s22946_s14 + $0x38] sm:$0xff]  }
 0xacf   :  { %15032 = vmatmul.mubr.bf16.vlgmr.msra.gmra.mrb[96].mxu0 %v22695_v54  ;;  %v21410_v54 = vld [vmem:[#allocation14 + $0xa8] ss:$16 sps:$4 sm:$0xff]  }
 0xad0   :  { %15346 = vmatpush1.bf16.msra.mxu0 %v21380_v18  ;;  %15377 = vmatprep.mubr.bf16.mxu0 %v21763_v51  ;;  %v21416_v51 = vld [vmem:[#allocation14 + $0xc8] ss:$16 sps:$4 sm:$0xff]  }
 0xad1   :  { %15347 = vmatprep.subr.bf16.mxu0 %v21388_v41  ;;  %v21457_v41 = vld [vmem:[%s22946_s14 + $0x140] sm:$0xff]  }
 0xad4   :  { %15348 = vmatpush1.bf16.msra.mxu0 %v21386_v46  ;;  %v21458_v46 = vld [vmem:[%s22946_s14 + $0x1c0] sm:$0xff]  }
 0xad5   :  { %15349 = vmatprep.subr.bf16.mxu0 %v21394_v48  ;;  %v21459_v48 = vld [vmem:[%s22946_s14 + $0x100] sm:$0xff]  }
 0xad8   :  { %15350 = vmatpush1.bf16.msra.mxu0 %v21392_v56 }
 0xad9   :  { %15351 = vmatprep.subr.bf16.mxu0 %v21400_v58  ;;  %v21461_v58 = vld [vmem:[%s22946_s14 + $0x148] sm:$0xff]  }
 0xadc   :  { %15352 = vmatpush1.bf16.msra.mxu0 %v21398_v50  ;;  %v21463_v50 = vld [vmem:[%s22946_s14 + $0x108] sm:$0xff]  }
 0xadd   :  { %15353 = vmatprep.subr.bf16.mxu0 %v21406_v40  ;;  %v21465_v40 = vld [vmem:[%s22946_s14 + $0x150] sm:$0xff]  }
 0xae0   :  { %15354 = vmatpush1.bf16.msra.mxu0 %v21404_v11  ;;  %v21467_v11 = vld [vmem:[%s22946_s14 + $0x110] sm:$0xff]  }
 0xae1   :  { %15355 = vmatprep.subr.bf16.mxu0 %v21412_v24  ;;  %v21469_v24 = vld [vmem:[%s22946_s14 + $0x158] sm:$0xff]  }
 0xae4   :  { %15356 = vmatpush1.bf16.msra.mxu0 %v21410_v54  ;;  %v21471_v54 = vld [vmem:[%s22946_s14 + $0x118] sm:$0xff]  }
 0xae5   :  { %15357 = vmatprep.subr.bf16.mxu0 %v21418_v52  ;;  %v21473_v52 = vld [vmem:[%s22946_s14 + $0x160] sm:$0xff]  }
 0xae8   :  { %15358 = vmatpush1.bf16.msra.mxu0 %v21416_v51  ;;  %v21475_v51 = vld [vmem:[%s22946_s14 + $0x120] sm:$0xff]  }
 0xae9   :  { %15359 = vmatprep.subr.bf16.mxu0 %v21424_v62  ;;  %v21477_v62 = vld [vmem:[%s22946_s14 + $0x168] sm:$0xff]  }
 0xaec   :  { %15360 = vmatpush1.bf16.msra.mxu0 %v21422_v37  ;;  %v21479_v37 = vld [vmem:[%s22946_s14 + $0x128] sm:$0xff]  }
 0xaed   :  { %18283 = vmatprep.subr.bf16.mxu0 %v21441_v39  ;;  %v21481_v39 = vld [vmem:[%s22946_s14 + $0x170] sm:$0xff]  }
 0xb43   :  { %v22719_v55 = vpop.f32.mrb[60].mxu1 }
 0xb44   :  { %v14748_v30 = vpop.f32.mrb[61].mxu1  ;;  %v18481_v18 = vadd.f32 %v22719_v55, %v12369_v21  ;;  %v12377_v55 = vrot.slane %v22717_v53, %v22376_v14 }
 0xb45   :  { %v14750_v32 = vpop.f32.mrb[62].mxu1  ;;  %v18482_v57 = vadd.f32 %v14748_v30, %v12373_v59  ;;  %v12381_v30 = vrot.slane %v22717_v53, %v22357_v47  ;;  %v21483_v59 = vld [vmem:[%s22946_s14 + $0x130] sm:$0xff]  }
 0xb46   :  { %v14751_v61 = vpop.f32.mrb[63].mxu1  ;;  %v15514_v56 = vpack.c.bf16 %v18481_v18, %v18481_v18 }
 0xb47   :  { %v15515_v13 = vpack.c.bf16 %v18482_v57, %v18482_v57 }
 0xb4b   :  { %v15083_v34 = vpop.f32.mrb[64].mxu1 }
 0xb4c   :  { %v15121_v60 = vpack.c.bf16 %v15083_v34, %v15083_v34  ;;  %v18465_v27 = vpop.f32.mrb[65].mxu1  ;;  %v21485_v34 = vld [vmem:[%s22946_s14 + $0x178] sm:$0xff]  }
 0xb4d   :  { %v15086_v16 = vpop.f32.mrb[66].mxu1  ;;  %v21487_v27 = vld [vmem:[%s22946_s14 + $0x138] sm:$0xff]  }
 0xb4e   :  { %v18466_v19 = vpop.f32.mrb[67].mxu1  ;;  %15337 = vmatmul.mubr.bf16.vlgmr.msra.gmra.mrb[68].mxu1 %v15121_v60  ;;  %15378 = vmatmul.mubr.bf16.vlgmr.msra.gmra.mrb[100].mxu0 %v15121_v60  ;;  %v21462_v16 = vld [vmem:[%s22946_s14 + $0x1c8] sm:$0xff]  }
 0xb4f   :  { %18262 = vmatpush3.bf16.msra.mxu1 %v21426_v44  ;;  %15945 = vmatprep.mubr.bf16.mxu1 %v15515_v13  ;;  %v21466_v19 = vld [vmem:[%s22946_s14 + $0x1d0] sm:$0xff]  }
 0xb50   :  { %18263 = vmatprep.subr.bf16.mxu1 %v21427_v43  ;;  %18284 = vmatpush3.bf16.msra.mxu0 %v21442_v45  ;;  %v21460_v45 = vld [vmem:[%s22946_s14 + $0x180] sm:$0xff]  }
 0xb51   :  { %18285 = vmatprep.subr.bf16.mxu0 %v21443_v5  ;;  %v21464_v5 = vld [vmem:[%s22946_s14 + $0x188] sm:$0xff]  }
 0xb53   :  { %18264 = vmatpush3.bf16.msra.mxu1 %v21428_v42  ;;  %v21468_v42 = vld [vmem:[%s22946_s14 + $0x190] sm:$0xff]  }
 0xb54   :  { %18265 = vmatprep.subr.bf16.mxu1 %v21429_v3  ;;  %18286 = vmatpush3.bf16.msra.mxu0 %v21444_v7  ;;  %v21470_v3 = vld [vmem:[%s22946_s14 + $0x1d8] sm:$0xff]  }
 0xb55   :  { %18287 = vmatprep.subr.bf16.mxu0 %v21445_v10  ;;  %v21472_v7 = vld [vmem:[%s22946_s14 + $0x198] sm:$0xff]   ;;  %v21474_v10 = vld [vmem:[%s22946_s14 + $0x1e0] sm:$0xff]  }
 0xb57   :  { %18266 = vmatpush3.bf16.msra.mxu1 %v21430_v25  ;;  %v21476_v25 = vld [vmem:[%s22946_s14 + $0x1a0] sm:$0xff]  }
 0xb58   :  { %18267 = vmatprep.subr.bf16.mxu1 %v21431_v22  ;;  %18288 = vmatpush3.bf16.msra.mxu0 %v21446_v23  ;;  %v21478_v22 = vld [vmem:[%s22946_s14 + $0x1e8] sm:$0xff]  }
 0xb59   :  { %18289 = vmatprep.subr.bf16.mxu0 %v21447_v8  ;;  %v21480_v23 = vld [vmem:[%s22946_s14 + $0x1a8] sm:$0xff]   ;;  %v21482_v8 = vld [vmem:[%s22946_s14 + $0x1f0] sm:$0xff]  }
 0xb5b   :  { %18268 = vmatpush3.bf16.msra.mxu1 %v21432_v31  ;;  %v21484_v31 = vld [vmem:[%s22946_s14 + $0x1b0] sm:$0xff]  }
 0xb5c   :  { %18269 = vmatprep.subr.bf16.mxu1 %v21433_v33  ;;  %18290 = vmatpush3.bf16.msra.mxu0 %v21448_v63  ;;  %v21486_v33 = vld [vmem:[%s22946_s14 + $0x1f8] sm:$0xff]  }
 0xb5d   :  { %18291 = vmatprep.subr.bf16.mxu0 %v21449_v35  ;;  %v21488_v63 = vld [vmem:[%s22946_s14 + $0x1b8] sm:$0xff]   ;;  %v15122_v35 = vld [vmem:[#allocation16] sm:$0xf]  ;;  %s21766_s14 = smov [#allocation19]  }
 0xb5e   :  { %s16081_s19 = sshll.u32 %s21766_s14, 4  ;;  %s16082_s19 = int_to_ptr.vmem [resolvable:$true] %s16081_s19 }
 0xb5f   :  { %18270 = vmatpush3.bf16.msra.mxu1 %v21434_v0  ;;  %v15127_v0 = vrot.slane %v15122_v35, %v22337_v49  ;;  %s21712_s20 = scalar_lea.vmem %s16082_s19, 32  ;;  %p21717_p11 = scmp.lt.s32.totalorder %s16082_s19, %s16082_s19 }
 0xb60   :  { %18271 = vmatprep.subr.bf16.mxu1 %v21435_v1  ;;  %18292 = vmatpush3.bf16.msra.mxu0 %v21450_v12  ;;  %v15135_v1 = vrot.slane %v15122_v35, %v22376_v14  ;;  %v15131_v12 = vrot.slane %v15122_v35, %v22342_v15  ;;  %p21713_p10 = scmp.ne.s32.totalorder %s16082_s19, %s21712_s20  ;;  %p21718_p12 = scmp.lt.s32.totalorder %s21712_s20, %s21712_s20 }
 0xb61   :  { %18293 = vmatprep.subr.bf16.mxu0 %v21451_v6  ;;  %v15139_v6 = vrot.slane %v15122_v35, %v22357_v47 }
 0xb62   :  { %p21719_p13 = por %p21718_p12, %p21717_p11 }
 0xb63   :  { %18272 = vmatpush3.bf16.msra.mxu1 %v21436_v17 }
 0xb64   :  { %18273 = vmatprep.subr.bf16.mxu1 %v21437_v4  ;;  %18294 = vmatpush3.bf16.msra.mxu0 %v21452_v9  ;;  %p21720_p0 = pnand %p21719_p13, %p21713_p10 }
 0xb65   :  { %18295 = vmatprep.subr.bf16.mxu0 %v21453_v29 }
 0xb67   :  { %18274 = vmatpush3.bf16.msra.mxu1 %v21438_v36 }
 0xb68   :  { %18275 = vmatprep.subr.bf16.mxu1 %v21439_v20  ;;  %18296 = vmatpush3.bf16.msra.mxu0 %v21454_v38 }
 0xb69   :  { %18297 = vmatprep.subr.bf16.mxu0 %v21455_v28 }
 0xb6b   :  { %18276 = vmatpush3.bf16.msra.mxu1 %v21440_v26 }
 0xb6c   :  { %18298 = vmatpush3.bf16.msra.mxu0 %v21456_v2  ;;  %18305 = vmatprep.subr.bf16.mxu1 %v21457_v41 }
 0xb6d   :  { %18327 = vmatprep.subr.bf16.mxu0 %v21458_v46 }
 0xb6e   :  { %15946 = vmatmul.mubr.bf16.vlgmr.msra.gmra.mrb[72].mxu1 %v15514_v56 }
 0xb6f   :  { %18306 = vmatpush3.bf16.msra.mxu1 %v21459_v48 }
 0xb70   :  { %18307 = vmatprep.subr.bf16.mxu1 %v21461_v58 }
 0xb73   :  { %18308 = vmatpush3.bf16.msra.mxu1 %v21463_v50  ;;  %v17964_v50 = vld [vmem:[#allocation17] ss:$0 sm:$0xff] }
 0xb74   :  { %18309 = vmatprep.subr.bf16.mxu1 %v21465_v40 }
 0xb77   :  { %18310 = vmatpush3.bf16.msra.mxu1 %v21467_v11 }
 0xb78   :  { %18311 = vmatprep.subr.bf16.mxu1 %v21469_v24 }
 0xb7b   :  { %18312 = vmatpush3.bf16.msra.mxu1 %v21471_v54 }
 0xb7c   :  { %18313 = vmatprep.subr.bf16.mxu1 %v21473_v52 }
 0xb7f   :  { %18314 = vmatpush3.bf16.msra.mxu1 %v21475_v51 }
 0xb80   :  { %18315 = vmatprep.subr.bf16.mxu1 %v21477_v62 }
 0xb83   :  { %18316 = vmatpush3.bf16.msra.mxu1 %v21479_v37 }
 0xb84   :  { %18317 = vmatprep.subr.bf16.mxu1 %v21481_v39 }
 0xb87   :  { %18318 = vmatpush3.bf16.msra.mxu1 %v21483_v59 }
 0xb88   :  { %18319 = vmatprep.subr.bf16.mxu1 %v21485_v34 }
 0xb8b   :  { %18320 = vmatpush3.bf16.msra.mxu1 %v21487_v27 }
 0xba2   :  { %v15033_v32 = vpop.f32.mrb[96].mxu0 }
 0xba3   :  { %v18483_v61 = vadd.f32 %v15033_v32, %v12377_v55  ;;  %v15035_v57 = vpop.f32.mrb[97].mxu0 }
 0xba4   :  { %v18484_v44 = vadd.f32 %v15035_v57, %v12381_v30  ;;  %v15037_v60 = vpop.f32.mrb[98].mxu0 }
 0xba5   :  { %v15038_v43 = vpop.f32.mrb[99].mxu0  ;;  %v15516_v13 = vpack.c.bf16 %v18483_v61, %v18483_v61 }
 0xba6   :  { %v15517_v53 = vpack.c.bf16 %v18484_v44, %v18484_v44 }
 0xba8   :  { %15985 = vmatprep.mubr.bf16.mxu0 %v15517_v53 }
 0xba9   :  { %15986 = vmatmul.mubr.bf16.vlgmr.msra.gmra.mrb[104].mxu0 %v15516_v13 }
 0xbaa   :  { %18328 = vmatpush3.bf16.msra.mxu0 %v21460_v45 }
 0xbab   :  { %18329 = vmatprep.subr.bf16.mxu0 %v21462_v16 }
 0xbae   :  { %18330 = vmatpush3.bf16.msra.mxu0 %v21464_v5 }
 0xbaf   :  { %18331 = vmatprep.subr.bf16.mxu0 %v21466_v19 }
 0xbb2   :  { %18332 = vmatpush3.bf16.msra.mxu0 %v21468_v42 }
 0xbb3   :  { %18333 = vmatprep.subr.bf16.mxu0 %v21470_v3 }
 0xbb6   :  { %18334 = vmatpush3.bf16.msra.mxu0 %v21472_v7 }
 0xbb7   :  { %18335 = vmatprep.subr.bf16.mxu0 %v21474_v10 }
 0xbba   :  { %18336 = vmatpush3.bf16.msra.mxu0 %v21476_v25 }
 0xbbb   :  { %18337 = vmatprep.subr.bf16.mxu0 %v21478_v22 }
 0xbbe   :  { %18338 = vmatpush3.bf16.msra.mxu0 %v21480_v23 }
 0xbbf   :  { %18339 = vmatprep.subr.bf16.mxu0 %v21482_v8 }
 0xbc2   :  { %18340 = vmatpush3.bf16.msra.mxu0 %v21484_v31 }
 0xbc3   :  { %18341 = vmatprep.subr.bf16.mxu0 %v21486_v33 }
 0xbc6   :  { %18342 = vmatpush3.bf16.msra.mxu0 %v21488_v63 }
 0xc21   :  { %v15338_v17 = vpop.f32.mrb[68].mxu1  ;;  %v15379_v4 = vpop.f32.mrb[100].mxu0 }
 0xc22   :  { %v15339_v9 = vadd.f32 %v15338_v17, %v15127_v0  ;;  %v15380_v29 = vadd.f32 %v15379_v4, %v15135_v1  ;;  %v15340_v36 = vpop.f32.mrb[69].mxu1  ;;  %v15381_v21 = vpop.f32.mrb[101].mxu0 }
 0xc23   :  { %v15341_v20 = vadd.f32 %v15340_v36, %v15131_v12  ;;  %v15382_v38 = vadd.f32 %v15381_v21, %v15139_v6  ;;  %v15342_v28 = vpop.f32.mrb[70].mxu1  ;;  %v15383_v26 = vpop.f32.mrb[102].mxu0 }
 0xc24   :  { %v15343_v18 = vpop.f32.mrb[71].mxu1  ;;  %v15384_v2 = vpop.f32.mrb[103].mxu0  ;;  %v15518_v46 = vpack.c.bf16 %v15339_v9, %v15339_v9  ;;  %v15520_v14 = vpack.c.bf16 %v15380_v29, %v15380_v29 }
 0xc25   :  { %v15519_v41 = vpack.c.bf16 %v15341_v20, %v15341_v20  ;;  %v15521_v49 = vpack.c.bf16 %v15382_v38, %v15382_v38 }
 0xc27   :  { %16025 = vmatprep.mubr.bf16.mxu1 %v15519_v41  ;;  %16065 = vmatprep.mubr.bf16.mxu0 %v15521_v49 }
 0xc28   :  { %16026 = vmatmul.mubr.bf16.vlgmr.msra.gmra.mrb[76].mxu1 %v15518_v46  ;;  %16066 = vmatmul.mubr.bf16.vlgmr.msra.gmra.mrb[108].mxu0 %v15520_v14 }
 0xc41   :  { %v18277_v15 = vpop.f32.mrb[72].mxu1 }
 0xc42   :  { %v18278_v47 = vpop.f32.mrb[73].mxu1 }
 0xc43   :  { %v18279_v48 = vadd.f32 %v18278_v47, %v18277_v15  ;;  %v18280_v56 = vpop.f32.mrb[74].mxu1 }
 0xc44   :  { %v18281_v58 = vpop.f32.mrb[75].mxu1 }
 0xc45   :  { %v15948_v24 = vadd.f32 %v18279_v48, %v17964_v50 }
 0xc7c   :  { %v18299_v40 = vpop.f32.mrb[104].mxu0 }
 0xc7d   :  { %v18300_v11 = vpop.f32.mrb[105].mxu0 }
 0xc7e   :  { %v18301_v54 = vadd.f32 %v18300_v11, %v18299_v40  ;;  %v18302_v52 = vpop.f32.mrb[106].mxu0 }
 0xc7f   :  { %v18303_v51 = vpop.f32.mrb[107].mxu0 }
 0xc80   :  { %v15988_v62 = vadd.f32 %v18301_v54, %v15948_v24 }
 0xcfb   :  { %v18321_v37 = vpop.f32.mrb[76].mxu1  ;;  %v18343_v39 = vpop.f32.mrb[108].mxu0 }
 0xcfc   :  { %v18322_v55 = vpop.f32.mrb[77].mxu1  ;;  %v18344_v30 = vpop.f32.mrb[109].mxu0 }
 0xcfd   :  { %v18323_v59 = vadd.f32 %v18322_v55, %v18321_v37  ;;  %v18345_v32 = vadd.f32 %v18344_v30, %v18343_v39  ;;  %v18324_v61 = vpop.f32.mrb[78].mxu1  ;;  %v18346_v57 = vpop.f32.mrb[110].mxu0 }
 0xcfe   :  { %v18325_v34 = vpop.f32.mrb[79].mxu1  ;;  %v18347_v44 = vpop.f32.mrb[111].mxu0 }
 0xcff   :  { %v16028_v60 = vadd.f32 %v18323_v59, %v15988_v62 }
 0xd01   :  { %v16068_v27 = vadd.f32 %v18345_v32, %v16028_v60 }
 0xd03   :  { %16074 = vst.msk [vmem:[#allocation19] sm:$0x3] %vm16073_vm3, %v16068_v27 }
 0xd04   :  { %21723 = shalt.err (!%p21720_p0)
}
 0xd05   :  { %s22954_s15 = sld [smem:[#allocation28_spill]] }
 0xd0b   :  { %s21724_s12 = scalar_lea.hbm %s22954_s15, 32 }
 0xd0c   :  { %p21725_p1 = scmp.ne.s32.totalorder %s22954_s15, %s21724_s12  ;;  %p21728_p2 = scmp.lt.u32.totalorder %s21724_s12, %s22954_s15 }
 0xd0e   :  { %p21730_p3 = pnand %p21728_p2, %p21725_p1 }
 0xd10   :  { %21733 = shalt.err (!%p21730_p3)
}
 0xd11   :  { %16084 = dma.vmem_to_hbm [thread:$0]  %s16082_s19, 32, %s22954_s15, [#allocation4]  }
 0xd12   :  { %21746 = dma.done.wait [#allocation4], 32  }
 0xd13   :  { %21747 = vsyncadd [#allocation4], 4294967264 }
 0xd14   :  { %16088 = vsyncpa [#allocation3], 1 }
 0xd15   :  { %16089 = vsyncpa [#allocation6], 1 }
 0xd16   :  { %16090 = vsyncpa [#allocation9], 1 }
 0xd17   :  { %16091 = vsyncpa [#allocation12], 1 }
 0xd18   :  { %16092 = vsyncpa [#allocation15], 1 }
 0xd19   :  { %16093 = vsyncpa [#allocation18], 1 }
 0xd1a   :  { %16094 = vsyncpa [#allocation4], 1 }

</bundles_post_ra>
